<compile_context>
chip_gen: v5e
topology: v5e:2x2
jax: 0.10.0
libtpu: 0.0.40
codegen_flags: <defaults>
</compile_context>

<pallas_src>
import jax
import jax.numpy as jnp
from jax import lax
from jax.experimental import pallas as pl
from jax.experimental.pallas import tpu as pltpu


# Safe on v5e (raises its 16 MiB default), v6e and v7x (<= their 32 MiB
# scoped default / 64 MiB physical).  Raise for production N/T; on v7x keep
# headroom under 64 MiB and consider single-buffering the constant operands.
_VMEM_LIMIT = 32 * 1024 * 1024


def _pick_chunk(total, target):
    """Largest divisor of `total` that is <= target (>= 1)."""
    c = max(1, min(total, target))
    while total % c:
        c -= 1
    return c


# ----------------------------------------------------------------------------
# Kernel 1: time-parallel x-side projection (off the serial critical path).
#   xgu[t] = [ sum_k (G_k x_t) Wgx_k[:, :H] + bg[:H]   (z part, per batch)
#            | sum_k (G_k x_t) Wgx_k[:, H:] + bg[H:]   (r part, per batch)
#            | sum_k (G_k x_t) Wux_k        + bu     ] (update part)
# in a [N, 3*B*H] node-major layout (batch folded into lanes).
# ----------------------------------------------------------------------------
def _make_xproj_kernel(cheb_k, n_nodes, tc):
    K, N = cheb_k, n_nodes

    def kernel(x_ref, g_ref, wx_ref, b3_ref, out_ref):
        gb = g_ref[...]                                              # [K*N, N] bf16
        # Bias broadcast hoisted out of the time loop (no per-step broadcast).
        bias = jnp.broadcast_to(b3_ref[...], (N, b3_ref.shape[-1]))  # [N, 3BH]

        for t in range(tc):                 # static unroll; fully t-parallel work
            xt = x_ref[t].astype(jnp.bfloat16)                       # [N, B*Cin]
            # One matmul for all K Chebyshev orders.
            conv = jnp.dot(gb, xt, preferred_element_type=jnp.float32)
            convb = conv.astype(jnp.bfloat16)                        # [K*N, B*Cin]
            acc = bias
            for k in range(K):
                acc = acc + jnp.dot(convb[k * N:(k + 1) * N, :], wx_ref[k],
                                    preferred_element_type=jnp.float32)
            out_ref[t] = acc                                         # [N, 3*B*H]

    return kernel


def xproj_pallas(g_stack, x_nbc, wx3, b3, *, time_chunk=4):
    """g_stack: [K*N, N] bf16, x_nbc: [T, N, B*Cin] f32 -> xgu: [T, N, 3*B*H]."""
    T, N, BC = x_nbc.shape
    KN = g_stack.shape[0]
    K = KN // N
    out_dim = wx3.shape[-1]
    tc = _pick_chunk(T, time_chunk)

    return pl.pallas_call(
        _make_xproj_kernel(K, N, tc),
        out_shape=jax.ShapeDtypeStruct((T, N, out_dim), jnp.float32),
        grid_spec=pltpu.PrefetchScalarGridSpec(
            num_scalar_prefetch=0,
            grid=(T // tc,),
            in_specs=[
                pl.BlockSpec((tc, N, BC), lambda c: (c, 0, 0)),      # x chunk
                pl.BlockSpec((KN, N), lambda c: (0, 0)),             # Gstack
                pl.BlockSpec(wx3.shape, lambda c: (0, 0, 0)),        # x weights
                pl.BlockSpec(b3.shape, lambda c: (0, 0)),            # bias
            ],
            out_specs=pl.BlockSpec((tc, N, out_dim), lambda c: (c, 0, 0)),
        ),
        compiler_params=pltpu.CompilerParams(
            dimension_semantics=("parallel",),        # embarrassingly parallel in T
            vmem_limit_bytes=_VMEM_LIMIT),
    )(x_nbc, g_stack, wx3, b3)


# ----------------------------------------------------------------------------
# Kernel 2: serial GRU recurrence.  Only h-dependent work remains per step:
#   2 graph-conv matmuls (all K orders fused via Gstack) + 2*K small
#   projection matmuls + the gate elementwise math.
# ----------------------------------------------------------------------------
def _make_gru_kernel(cheb_k, n_nodes, tc, bh):
    K, N, BH = cheb_k, n_nodes, bh

    def kernel(xgu_ref, g_ref, whg_ref, whu_ref, h0_ref, hseq_ref, h_scr):
        @pl.when(pl.program_id(0) == 0)
        def _():
            h_scr[...] = h0_ref[...]

        gb = g_ref[...]                                              # [K*N, N] bf16

        def step(t, h):                                              # h: [N, B*H] f32
            xgu = xgu_ref[t]                                         # [N, 3*B*H]
            # ---- gates z, r (x-side contribution + bias precomputed) ----------
            conv = jnp.dot(gb, h.astype(jnp.bfloat16),
                           preferred_element_type=jnp.float32)       # [K*N, B*H]
            convb = conv.astype(jnp.bfloat16)
            zr = xgu[:, :2 * BH]
            for k in range(K):
                zr = zr + jnp.dot(convb[k * N:(k + 1) * N, :], whg_ref[k],
                                  preferred_element_type=jnp.float32)
            zr = jax.nn.sigmoid(zr)                                  # [N, 2*B*H]
            z = zr[:, :BH]
            r = zr[:, BH:]
            # ---- candidate ----------------------------------------------------
            conv2 = jnp.dot(gb, (r * h).astype(jnp.bfloat16),
                            preferred_element_type=jnp.float32)      # [K*N, B*H]
            conv2b = conv2.astype(jnp.bfloat16)
            cand = xgu[:, 2 * BH:]
            for k in range(K):
                cand = cand + jnp.dot(conv2b[k * N:(k + 1) * N, :], whu_ref[k],
                                      preferred_element_type=jnp.float32)
            n_gate = jnp.tanh(cand)
            h_new = z * n_gate + (1.0 - z) * h
            hseq_ref[t] = h_new
            return h_new

        h = h_scr[...]
        if tc <= 8:
            # Short fixed trip count: unroll statically (static ref indices).
            for t in range(tc):
                h = step(t, h)
        else:
            h = lax.fori_loop(0, tc, step, h)
        h_scr[...] = h

    return kernel


def gru_layer_pallas(g_stack, xgu, h0_nbh, whg, whu, *, time_chunk=32):
    """xgu: [T, N, 3*B*H] precomputed x projection; returns hseq [T, N, B*H]."""
    T, N, out3 = xgu.shape
    BH = out3 // 3
    KN = g_stack.shape[0]
    K = KN // N
    tc = _pick_chunk(T, time_chunk)

    return pl.pallas_call(
        _make_gru_kernel(K, N, tc, BH),
        out_shape=jax.ShapeDtypeStruct((T, N, BH), jnp.float32),
        grid_spec=pltpu.PrefetchScalarGridSpec(
            num_scalar_prefetch=0,
            grid=(T // tc,),
            in_specs=[
                pl.BlockSpec((tc, N, out3), lambda c: (c, 0, 0)),    # xgu chunk
                pl.BlockSpec((KN, N), lambda c: (0, 0)),             # Gstack
                pl.BlockSpec(whg.shape, lambda c: (0, 0, 0)),        # h gate W
                pl.BlockSpec(whu.shape, lambda c: (0, 0, 0)),        # h update W
                pl.BlockSpec((N, BH), lambda c: (0, 0)),             # h0
            ],
            out_specs=pl.BlockSpec((tc, N, BH), lambda c: (c, 0, 0)),
            scratch_shapes=[pltpu.VMEM((N, BH), jnp.float32)],       # carried h
        ),
        compiler_params=pltpu.CompilerParams(
            dimension_semantics=("arbitrary",),       # serial recurrence over time
            vmem_limit_bytes=_VMEM_LIMIT),
    )(xgu, g_stack, whg, whu, h0_nbh)


# ----------------------------------------------------------------------------
# Parameters: raw (torch-equivalent) + wrapper-side preprocessing into
# block-diagonal, gate-permuted, bf16 kernel weights.
# ----------------------------------------------------------------------------
def _xavier_normal(key, shape):
    fan_in, fan_out = shape
    std = (2.0 / (fan_in + fan_out)) ** 0.5
    return std * jax.random.normal(key, shape, dtype=jnp.float32)


def init_encoder_params(key, dim_in, dim_hidden, cheb_k, num_layers):
    """Raw params, exactly mirroring the PyTorch module's parameters."""
    layers = []
    for i in range(num_layers):
        cin = dim_in if i == 0 else dim_hidden
        p = cin + dim_hidden
        key, kg, ku = jax.random.split(key, 3)
        Wg = _xavier_normal(kg, (cheb_k * p, 2 * dim_hidden))
        bg = jnp.zeros((2 * dim_hidden,), jnp.float32)
        Wu = _xavier_normal(ku, (cheb_k * p, dim_hidden))
        bu = jnp.zeros((dim_hidden,), jnp.float32)
        layers.append((Wg, bg, Wu, bu))
    return layers


def _prep_layer_weights(Wg, bg, Wu, bu, cheb_k, cin, H, B):
    """Fold batch into block-diagonal, gate-permuted ([z|r]) bf16 weights."""
    BH = B * H
    Wg3 = Wg.reshape(cheb_k, cin + H, 2 * H)
    Wu3 = Wu.reshape(cheb_k, cin + H, H)
    Wgx, Wgh = Wg3[:, :cin, :], Wg3[:, cin:, :]
    Wux, Wuh = Wu3[:, :cin, :], Wu3[:, cin:, :]

    wx3 = jnp.zeros((cheb_k, B * cin, 3 * BH), jnp.float32)   # x-side [z | r | u]
    whg = jnp.zeros((cheb_k, BH, 2 * BH), jnp.float32)        # h-side gate [z | r]
    whu = jnp.zeros((cheb_k, BH, BH), jnp.float32)            # h-side update
    for b in range(B):
        rx = slice(b * cin, (b + 1) * cin)
        rh = slice(b * H, (b + 1) * H)
        cz = slice(0 * BH + b * H, 0 * BH + (b + 1) * H)
        cr = slice(1 * BH + b * H, 1 * BH + (b + 1) * H)
        cu = slice(2 * BH + b * H, 2 * BH + (b + 1) * H)
        wx3 = wx3.at[:, rx, cz].set(Wgx[:, :, :H])
        wx3 = wx3.at[:, rx, cr].set(Wgx[:, :, H:])
        wx3 = wx3.at[:, rx, cu].set(Wux)
        whg = whg.at[:, rh, cz].set(Wgh[:, :, :H])
        whg = whg.at[:, rh, cr].set(Wgh[:, :, H:])
        whu = whu.at[:, rh, rh].set(Wuh)
    b3 = jnp.concatenate([jnp.tile(bg[:H], B), jnp.tile(bg[H:], B),
                          jnp.tile(bu, B)]).reshape(1, 3 * BH)
    return (wx3.astype(jnp.bfloat16), whg.astype(jnp.bfloat16),
            whu.astype(jnp.bfloat16), b3.astype(jnp.float32))


def prepare_encoder_params(raw_layers, dim_in, dim_hidden, cheb_k, batch):
    prepped = []
    for i, (Wg, bg, Wu, bu) in enumerate(raw_layers):
        cin = dim_in if i == 0 else dim_hidden
        prepped.append(
            _prep_layer_weights(Wg, bg, Wu, bu, cheb_k, cin, dim_hidden, batch))
    return prepped


# ----------------------------------------------------------------------------
# Encoder forward (layer loop + layout plumbing is plain-JAX glue).
# ----------------------------------------------------------------------------
def encoder_forward_pallas(G, x_seq, init_h, prepped_params):
    """G: [K,N,N]; x_seq: [B,T,N,C]; init_h: list of [B,N,H].
    Returns list (per layer) of final hidden states [B,N,H], as in the module."""
    K, N, _ = G.shape
    B, T, _, C = x_seq.shape
    g_stack = G.reshape(K * N, N).astype(jnp.bfloat16)

    # Node-major layout with batch folded into lanes: [T, N, B*C].
    cur = jnp.transpose(x_seq, (1, 2, 0, 3)).reshape(T, N, B * C)
    output_h = []
    for i, (wx3, whg, whu, b3) in enumerate(prepped_params):
        H = whu.shape[-1] // B
        h0 = jnp.transpose(init_h[i], (1, 0, 2)).reshape(N, B * H)
        xgu = xproj_pallas(g_stack, cur, wx3, b3)            # [T, N, 3*B*H]
        hseq = gru_layer_pallas(g_stack, xgu, h0, whg, whu)  # [T, N, B*H]
        # Final hidden state = last time step (no separate per-step hfin store).
        output_h.append(hseq[T - 1].reshape(N, B, H).transpose(1, 0, 2))
        cur = hseq                                           # next layer's input
    return output_h


# ----------------------------------------------------------------------------
# Pure-JAX reference (mirrors the PyTorch module exactly) for verification.
# ----------------------------------------------------------------------------
def _gcn_ref(G, x, W, b):
    K = G.shape[0]
    sup = jnp.concatenate(
        [jnp.einsum('ij,bjp->bip', G[k], x) for k in range(K)], axis=-1)
    return jnp.einsum('bip,pq->biq', sup, W) + b


def _gru_cell_ref(G, x_t, h, Wg, bg, Wu, bu, H):
    combined = jnp.concatenate([x_t, h], axis=-1)
    z_r = jax.nn.sigmoid(_gcn_ref(G, combined, Wg, bg))
    z, r = z_r[..., :H], z_r[..., H:]
    cand = jnp.concatenate([x_t, r * h], axis=-1)
    n = jnp.tanh(_gcn_ref(G, cand, Wu, bu))
    return z * n + (1.0 - z) * h


def encoder_forward_ref(G, x_seq, init_h, raw_layers, H):
    cur = x_seq
    out = []
    for i, (Wg, bg, Wu, bu) in enumerate(raw_layers):
        h = init_h[i]
        hl = []
        for t in range(x_seq.shape[1]):
            h = _gru_cell_ref(G, cur[:, t], h, Wg, bg, Wu, bu, H)
            hl.append(h)
        out.append(h)
        cur = jnp.stack(hl, axis=1)
    return out


# ----------------------------------------------------------------------------
if __name__ == "__main__":
    B, T, N, C, H, K, L = 2, 8, 16, 4, 32, 3, 2

    key = jax.random.PRNGKey(0)
    key, kx, kg = jax.random.split(key, 3)
    x_seq = jax.random.normal(kx, (B, T, N, C), dtype=jnp.float32)
    G = jax.random.normal(kg, (K, N, N), dtype=jnp.float32) / jnp.sqrt(N)

    raw_params = init_encoder_params(key, C, H, K, L)
    prepped = prepare_encoder_params(raw_params, C, H, K, B)
    init_h = [jnp.zeros((B, N, H), jnp.float32) for _ in range(L)]

    fwd = jax.jit(encoder_forward_pallas)
    out = fwd(G, x_seq, init_h, prepped)
    out = [jax.block_until_ready(o) for o in out]

    ref = encoder_forward_ref(G, x_seq, init_h, raw_params, H)
    for o, r in zip(out, ref):
        assert o.shape == (B, N, H)
        err = float(jnp.max(jnp.abs(o - r)))
        # bf16 MXU operands with f32 accumulation -> loosened tolerance.
        assert err < 5e-2, f"mismatch: max abs err {err}"

    print("KERNEL_OK")
</pallas_src>

<mosaic_0001>
module attributes {stable_mosaic.version = 11 : i64} {
  func.func @kernel(%arg0: i32, %arg1: memref<4x16x8xf32, #tpu.memory_space<vmem>>, %arg2: memref<48x16xbf16, #tpu.memory_space<vmem>>, %arg3: memref<3x8x192xbf16, #tpu.memory_space<vmem>>, %arg4: memref<1x192xf32, #tpu.memory_space<vmem>>, %arg5: memref<4x16x192xf32, #tpu.memory_space<vmem>>) attributes {dimension_semantics = [#tpu.dimension_semantics<parallel>], iteration_bounds = array<i64: 2>, scalar_prefetch = 0 : i64, scratch_operands = 0 : i64, tpu.core_type = #tpu.core_type<tc>, window_params = [{transform_indices = @transform_0, window_bounds = array<i64: 4, 16, 8>}, {pipeline_mode = #tpu.pipeline_mode<synchronous>, transform_indices = @transform_1, window_bounds = array<i64: 48, 16>}, {pipeline_mode = #tpu.pipeline_mode<synchronous>, transform_indices = @transform_2, window_bounds = array<i64: 3, 8, 192>}, {pipeline_mode = #tpu.pipeline_mode<synchronous>, transform_indices = @transform_3, window_bounds = array<i64: 1, 192>}, {transform_indices = @transform_4, window_bounds = array<i64: 4, 16, 192>}]} {
    %c0 = arith.constant 0 : index
    %c0_0 = arith.constant 0 : index
    %0 = vector.load %arg2[%c0, %c0_0] : memref<48x16xbf16, #tpu.memory_space<vmem>>, vector<48x16xbf16>
    %c0_1 = arith.constant 0 : index
    %c0_2 = arith.constant 0 : index
    %1 = vector.load %arg4[%c0_1, %c0_2] : memref<1x192xf32, #tpu.memory_space<vmem>>, vector<1x192xf32>
    %2 = vector.shape_cast %1 : vector<1x192xf32> to vector<1x192xf32>
    %3 = vector.broadcast %2 : vector<1x192xf32> to vector<16x192xf32>
    %c0_3 = arith.constant 0 : index
    %c0_4 = arith.constant 0 : index
    %c0_5 = arith.constant 0 : index
    %4 = vector.load %arg1[%c0_3, %c0_4, %c0_5] : memref<4x16x8xf32, #tpu.memory_space<vmem>>, vector<1x16x8xf32>
    %5 = vector.shape_cast %4 : vector<1x16x8xf32> to vector<16x8xf32>
    %6 = arith.truncf %5 : vector<16x8xf32> to vector<16x8xbf16>
    %cst = arith.constant dense<0.000000e+00> : vector<48x8xf32>
    %7 = tpu.matmul %0, %6, %cst {dimension_numbers = #tpu.dot_dimension_numbers<[1], [0], [0], [1], [0, 0, 1, 1], [], []>} : vector<48x16xbf16>, vector<16x8xbf16>, vector<48x8xf32> -> vector<48x8xf32>
    %8 = arith.truncf %7 : vector<48x8xf32> to vector<48x8xbf16>
    %9 = vector.extract_strided_slice %8 {offsets = [0, 0], sizes = [16, 8], strides = [1, 1]} : vector<48x8xbf16> to vector<16x8xbf16>
    %c0_6 = arith.constant 0 : index
    %c0_7 = arith.constant 0 : index
    %c0_8 = arith.constant 0 : index
    %10 = vector.load %arg3[%c0_6, %c0_7, %c0_8] : memref<3x8x192xbf16, #tpu.memory_space<vmem>>, vector<1x8x192xbf16>
    %11 = vector.shape_cast %10 : vector<1x8x192xbf16> to vector<8x192xbf16>
    %cst_9 = arith.constant dense<0.000000e+00> : vector<16x192xf32>
    %12 = tpu.matmul %9, %11, %cst_9 {dimension_numbers = #tpu.dot_dimension_numbers<[1], [0], [0], [1], [0, 0, 1, 1], [], []>} : vector<16x8xbf16>, vector<8x192xbf16>, vector<16x192xf32> -> vector<16x192xf32>
    %13 = arith.addf %3, %12 : vector<16x192xf32>
    %14 = vector.extract_strided_slice %8 {offsets = [16, 0], sizes = [16, 8], strides = [1, 1]} : vector<48x8xbf16> to vector<16x8xbf16>
    %c1 = arith.constant 1 : index
    %c0_10 = arith.constant 0 : index
    %c0_11 = arith.constant 0 : index
    %15 = vector.load %arg3[%c1, %c0_10, %c0_11] : memref<3x8x192xbf16, #tpu.memory_space<vmem>>, vector<1x8x192xbf16>
    %16 = vector.shape_cast %15 : vector<1x8x192xbf16> to vector<8x192xbf16>
    %cst_12 = arith.constant dense<0.000000e+00> : vector<16x192xf32>
    %17 = tpu.matmul %14, %16, %cst_12 {dimension_numbers = #tpu.dot_dimension_numbers<[1], [0], [0], [1], [0, 0, 1, 1], [], []>} : vector<16x8xbf16>, vector<8x192xbf16>, vector<16x192xf32> -> vector<16x192xf32>
    %18 = arith.addf %13, %17 : vector<16x192xf32>
    %19 = vector.extract_strided_slice %8 {offsets = [32, 0], sizes = [16, 8], strides = [1, 1]} : vector<48x8xbf16> to vector<16x8xbf16>
    %c2 = arith.constant 2 : index
    %c0_13 = arith.constant 0 : index
    %c0_14 = arith.constant 0 : index
    %20 = vector.load %arg3[%c2, %c0_13, %c0_14] : memref<3x8x192xbf16, #tpu.memory_space<vmem>>, vector<1x8x192xbf16>
    %21 = vector.shape_cast %20 : vector<1x8x192xbf16> to vector<8x192xbf16>
    %cst_15 = arith.constant dense<0.000000e+00> : vector<16x192xf32>
    %22 = tpu.matmul %19, %21, %cst_15 {dimension_numbers = #tpu.dot_dimension_numbers<[1], [0], [0], [1], [0, 0, 1, 1], [], []>} : vector<16x8xbf16>, vector<8x192xbf16>, vector<16x192xf32> -> vector<16x192xf32>
    %23 = arith.addf %18, %22 : vector<16x192xf32>
    %c0_16 = arith.constant 0 : index
    %c0_17 = arith.constant 0 : index
    %c0_18 = arith.constant 0 : index
    %24 = vector.load %arg5[%c0_16, %c0_17, %c0_18] : memref<4x16x192xf32, #tpu.memory_space<vmem>>, vector<1x16x192xf32>
    %25 = vector.shape_cast %24 : vector<1x16x192xf32> to vector<16x192xf32>
    %26 = vector.shape_cast %23 : vector<16x192xf32> to vector<1x16x192xf32>
    tpu.vector_store %arg5[%c0_16, %c0_17, %c0_18], %26 {strides = array<i32>} : memref<4x16x192xf32, #tpu.memory_space<vmem>>, vector<1x16x192xf32>,
    %c1_19 = arith.constant 1 : index
    %c0_20 = arith.constant 0 : index
    %c0_21 = arith.constant 0 : index
    %27 = vector.load %arg1[%c1_19, %c0_20, %c0_21] : memref<4x16x8xf32, #tpu.memory_space<vmem>>, vector<1x16x8xf32>
    %28 = vector.shape_cast %27 : vector<1x16x8xf32> to vector<16x8xf32>
    %29 = arith.truncf %28 : vector<16x8xf32> to vector<16x8xbf16>
    %cst_22 = arith.constant dense<0.000000e+00> : vector<48x8xf32>
    %30 = tpu.matmul %0, %29, %cst_22 {dimension_numbers = #tpu.dot_dimension_numbers<[1], [0], [0], [1], [0, 0, 1, 1], [], []>} : vector<48x16xbf16>, vector<16x8xbf16>, vector<48x8xf32> -> vector<48x8xf32>
    %31 = arith.truncf %30 : vector<48x8xf32> to vector<48x8xbf16>
    %32 = vector.extract_strided_slice %31 {offsets = [0, 0], sizes = [16, 8], strides = [1, 1]} : vector<48x8xbf16> to vector<16x8xbf16>
    %c0_23 = arith.constant 0 : index
    %c0_24 = arith.constant 0 : index
    %c0_25 = arith.constant 0 : index
    %33 = vector.load %arg3[%c0_23, %c0_24, %c0_25] : memref<3x8x192xbf16, #tpu.memory_space<vmem>>, vector<1x8x192xbf16>
    %34 = vector.shape_cast %33 : vector<1x8x192xbf16> to vector<8x192xbf16>
    %cst_26 = arith.constant dense<0.000000e+00> : vector<16x192xf32>
    %35 = tpu.matmul %32, %34, %cst_26 {dimension_numbers = #tpu.dot_dimension_numbers<[1], [0], [0], [1], [0, 0, 1, 1], [], []>} : vector<16x8xbf16>, vector<8x192xbf16>, vector<16x192xf32> -> vector<16x192xf32>
    %36 = arith.addf %3, %35 : vector<16x192xf32>
    %37 = vector.extract_strided_slice %31 {offsets = [16, 0], sizes = [16, 8], strides = [1, 1]} : vector<48x8xbf16> to vector<16x8xbf16>
    %c1_27 = arith.constant 1 : index
    %c0_28 = arith.constant 0 : index
    %c0_29 = arith.constant 0 : index
    %38 = vector.load %arg3[%c1_27, %c0_28, %c0_29] : memref<3x8x192xbf16, #tpu.memory_space<vmem>>, vector<1x8x192xbf16>
    %39 = vector.shape_cast %38 : vector<1x8x192xbf16> to vector<8x192xbf16>
    %cst_30 = arith.constant dense<0.000000e+00> : vector<16x192xf32>
    %40 = tpu.matmul %37, %39, %cst_30 {dimension_numbers = #tpu.dot_dimension_numbers<[1], [0], [0], [1], [0, 0, 1, 1], [], []>} : vector<16x8xbf16>, vector<8x192xbf16>, vector<16x192xf32> -> vector<16x192xf32>
    %41 = arith.addf %36, %40 : vector<16x192xf32>
    %42 = vector.extract_strided_slice %31 {offsets = [32, 0], sizes = [16, 8], strides = [1, 1]} : vector<48x8xbf16> to vector<16x8xbf16>
    %c2_31 = arith.constant 2 : index
    %c0_32 = arith.constant 0 : index
    %c0_33 = arith.constant 0 : index
    %43 = vector.load %arg3[%c2_31, %c0_32, %c0_33] : memref<3x8x192xbf16, #tpu.memory_space<vmem>>, vector<1x8x192xbf16>
    %44 = vector.shape_cast %43 : vector<1x8x192xbf16> to vector<8x192xbf16>
    %cst_34 = arith.constant dense<0.000000e+00> : vector<16x192xf32>
    %45 = tpu.matmul %42, %44, %cst_34 {dimension_numbers = #tpu.dot_dimension_numbers<[1], [0], [0], [1], [0, 0, 1, 1], [], []>} : vector<16x8xbf16>, vector<8x192xbf16>, vector<16x192xf32> -> vector<16x192xf32>
    %46 = arith.addf %41, %45 : vector<16x192xf32>
    %c1_35 = arith.constant 1 : index
    %c0_36 = arith.constant 0 : index
    %c0_37 = arith.constant 0 : index
    %47 = vector.load %arg5[%c1_35, %c0_36, %c0_37] : memref<4x16x192xf32, #tpu.memory_space<vmem>>, vector<1x16x192xf32>
    %48 = vector.shape_cast %47 : vector<1x16x192xf32> to vector<16x192xf32>
    %49 = vector.shape_cast %46 : vector<16x192xf32> to vector<1x16x192xf32>
    tpu.vector_store %arg5[%c1_35, %c0_36, %c0_37], %49 {strides = array<i32>} : memref<4x16x192xf32, #tpu.memory_space<vmem>>, vector<1x16x192xf32>,
    %c2_38 = arith.constant 2 : index
    %c0_39 = arith.constant 0 : index
    %c0_40 = arith.constant 0 : index
    %50 = vector.load %arg1[%c2_38, %c0_39, %c0_40] : memref<4x16x8xf32, #tpu.memory_space<vmem>>, vector<1x16x8xf32>
    %51 = vector.shape_cast %50 : vector<1x16x8xf32> to vector<16x8xf32>
    %52 = arith.truncf %51 : vector<16x8xf32> to vector<16x8xbf16>
    %cst_41 = arith.constant dense<0.000000e+00> : vector<48x8xf32>
    %53 = tpu.matmul %0, %52, %cst_41 {dimension_numbers = #tpu.dot_dimension_numbers<[1], [0], [0], [1], [0, 0, 1, 1], [], []>} : vector<48x16xbf16>, vector<16x8xbf16>, vector<48x8xf32> -> vector<48x8xf32>
    %54 = arith.truncf %53 : vector<48x8xf32> to vector<48x8xbf16>
    %55 = vector.extract_strided_slice %54 {offsets = [0, 0], sizes = [16, 8], strides = [1, 1]} : vector<48x8xbf16> to vector<16x8xbf16>
    %c0_42 = arith.constant 0 : index
    %c0_43 = arith.constant 0 : index
    %c0_44 = arith.constant 0 : index
    %56 = vector.load %arg3[%c0_42, %c0_43, %c0_44] : memref<3x8x192xbf16, #tpu.memory_space<vmem>>, vector<1x8x192xbf16>
    %57 = vector.shape_cast %56 : vector<1x8x192xbf16> to vector<8x192xbf16>
    %cst_45 = arith.constant dense<0.000000e+00> : vector<16x192xf32>
    %58 = tpu.matmul %55, %57, %cst_45 {dimension_numbers = #tpu.dot_dimension_numbers<[1], [0], [0], [1], [0, 0, 1, 1], [], []>} : vector<16x8xbf16>, vector<8x192xbf16>, vector<16x192xf32> -> vector<16x192xf32>
    %59 = arith.addf %3, %58 : vector<16x192xf32>
    %60 = vector.extract_strided_slice %54 {offsets = [16, 0], sizes = [16, 8], strides = [1, 1]} : vector<48x8xbf16> to vector<16x8xbf16>
    %c1_46 = arith.constant 1 : index
    %c0_47 = arith.constant 0 : index
    %c0_48 = arith.constant 0 : index
    %61 = vector.load %arg3[%c1_46, %c0_47, %c0_48] : memref<3x8x192xbf16, #tpu.memory_space<vmem>>, vector<1x8x192xbf16>
    %62 = vector.shape_cast %61 : vector<1x8x192xbf16> to vector<8x192xbf16>
    %cst_49 = arith.constant dense<0.000000e+00> : vector<16x192xf32>
    %63 = tpu.matmul %60, %62, %cst_49 {dimension_numbers = #tpu.dot_dimension_numbers<[1], [0], [0], [1], [0, 0, 1, 1], [], []>} : vector<16x8xbf16>, vector<8x192xbf16>, vector<16x192xf32> -> vector<16x192xf32>
    %64 = arith.addf %59, %63 : vector<16x192xf32>
    %65 = vector.extract_strided_slice %54 {offsets = [32, 0], sizes = [16, 8], strides = [1, 1]} : vector<48x8xbf16> to vector<16x8xbf16>
    %c2_50 = arith.constant 2 : index
    %c0_51 = arith.constant 0 : index
    %c0_52 = arith.constant 0 : index
    %66 = vector.load %arg3[%c2_50, %c0_51, %c0_52] : memref<3x8x192xbf16, #tpu.memory_space<vmem>>, vector<1x8x192xbf16>
    %67 = vector.shape_cast %66 : vector<1x8x192xbf16> to vector<8x192xbf16>
    %cst_53 = arith.constant dense<0.000000e+00> : vector<16x192xf32>
    %68 = tpu.matmul %65, %67, %cst_53 {dimension_numbers = #tpu.dot_dimension_numbers<[1], [0], [0], [1], [0, 0, 1, 1], [], []>} : vector<16x8xbf16>, vector<8x192xbf16>, vector<16x192xf32> -> vector<16x192xf32>
    %69 = arith.addf %64, %68 : vector<16x192xf32>
    %c2_54 = arith.constant 2 : index
    %c0_55 = arith.constant 0 : index
    %c0_56 = arith.constant 0 : index
    %70 = vector.load %arg5[%c2_54, %c0_55, %c0_56] : memref<4x16x192xf32, #tpu.memory_space<vmem>>, vector<1x16x192xf32>
    %71 = vector.shape_cast %70 : vector<1x16x192xf32> to vector<16x192xf32>
    %72 = vector.shape_cast %69 : vector<16x192xf32> to vector<1x16x192xf32>
    tpu.vector_store %arg5[%c2_54, %c0_55, %c0_56], %72 {strides = array<i32>} : memref<4x16x192xf32, #tpu.memory_space<vmem>>, vector<1x16x192xf32>,
    %c3 = arith.constant 3 : index
    %c0_57 = arith.constant 0 : index
    %c0_58 = arith.constant 0 : index
    %73 = vector.load %arg1[%c3, %c0_57, %c0_58] : memref<4x16x8xf32, #tpu.memory_space<vmem>>, vector<1x16x8xf32>
    %74 = vector.shape_cast %73 : vector<1x16x8xf32> to vector<16x8xf32>
    %75 = arith.truncf %74 : vector<16x8xf32> to vector<16x8xbf16>
    %cst_59 = arith.constant dense<0.000000e+00> : vector<48x8xf32>
    %76 = tpu.matmul %0, %75, %cst_59 {dimension_numbers = #tpu.dot_dimension_numbers<[1], [0], [0], [1], [0, 0, 1, 1], [], []>} : vector<48x16xbf16>, vector<16x8xbf16>, vector<48x8xf32> -> vector<48x8xf32>
    %77 = arith.truncf %76 : vector<48x8xf32> to vector<48x8xbf16>
    %78 = vector.extract_strided_slice %77 {offsets = [0, 0], sizes = [16, 8], strides = [1, 1]} : vector<48x8xbf16> to vector<16x8xbf16>
    %c0_60 = arith.constant 0 : index
    %c0_61 = arith.constant 0 : index
    %c0_62 = arith.constant 0 : index
    %79 = vector.load %arg3[%c0_60, %c0_61, %c0_62] : memref<3x8x192xbf16, #tpu.memory_space<vmem>>, vector<1x8x192xbf16>
    %80 = vector.shape_cast %79 : vector<1x8x192xbf16> to vector<8x192xbf16>
    %cst_63 = arith.constant dense<0.000000e+00> : vector<16x192xf32>
    %81 = tpu.matmul %78, %80, %cst_63 {dimension_numbers = #tpu.dot_dimension_numbers<[1], [0], [0], [1], [0, 0, 1, 1], [], []>} : vector<16x8xbf16>, vector<8x192xbf16>, vector<16x192xf32> -> vector<16x192xf32>
    %82 = arith.addf %3, %81 : vector<16x192xf32>
    %83 = vector.extract_strided_slice %77 {offsets = [16, 0], sizes = [16, 8], strides = [1, 1]} : vector<48x8xbf16> to vector<16x8xbf16>
    %c1_64 = arith.constant 1 : index
    %c0_65 = arith.constant 0 : index
    %c0_66 = arith.constant 0 : index
    %84 = vector.load %arg3[%c1_64, %c0_65, %c0_66] : memref<3x8x192xbf16, #tpu.memory_space<vmem>>, vector<1x8x192xbf16>
    %85 = vector.shape_cast %84 : vector<1x8x192xbf16> to vector<8x192xbf16>
    %cst_67 = arith.constant dense<0.000000e+00> : vector<16x192xf32>
    %86 = tpu.matmul %83, %85, %cst_67 {dimension_numbers = #tpu.dot_dimension_numbers<[1], [0], [0], [1], [0, 0, 1, 1], [], []>} : vector<16x8xbf16>, vector<8x192xbf16>, vector<16x192xf32> -> vector<16x192xf32>
    %87 = arith.addf %82, %86 : vector<16x192xf32>
    %88 = vector.extract_strided_slice %77 {offsets = [32, 0], sizes = [16, 8], strides = [1, 1]} : vector<48x8xbf16> to vector<16x8xbf16>
    %c2_68 = arith.constant 2 : index
    %c0_69 = arith.constant 0 : index
    %c0_70 = arith.constant 0 : index
    %89 = vector.load %arg3[%c2_68, %c0_69, %c0_70] : memref<3x8x192xbf16, #tpu.memory_space<vmem>>, vector<1x8x192xbf16>
    %90 = vector.shape_cast %89 : vector<1x8x192xbf16> to vector<8x192xbf16>
    %cst_71 = arith.constant dense<0.000000e+00> : vector<16x192xf32>
    %91 = tpu.matmul %88, %90, %cst_71 {dimension_numbers = #tpu.dot_dimension_numbers<[1], [0], [0], [1], [0, 0, 1, 1], [], []>} : vector<16x8xbf16>, vector<8x192xbf16>, vector<16x192xf32> -> vector<16x192xf32>
    %92 = arith.addf %87, %91 : vector<16x192xf32>
    %c3_72 = arith.constant 3 : index
    %c0_73 = arith.constant 0 : index
    %c0_74 = arith.constant 0 : index
    %93 = vector.load %arg5[%c3_72, %c0_73, %c0_74] : memref<4x16x192xf32, #tpu.memory_space<vmem>>, vector<1x16x192xf32>
    %94 = vector.shape_cast %93 : vector<1x16x192xf32> to vector<16x192xf32>
    %95 = vector.shape_cast %92 : vector<16x192xf32> to vector<1x16x192xf32>
    tpu.vector_store %arg5[%c3_72, %c0_73, %c0_74], %95 {strides = array<i32>} : memref<4x16x192xf32, #tpu.memory_space<vmem>>, vector<1x16x192xf32>,
    return
  }
  func.func @transform_0(%arg0: i32) -> (i32, i32, i32) {
    %c0_i32 = arith.constant 0 : i32
    %c0_i32_0 = arith.constant 0 : i32
    %c0_i32_1 = arith.constant 0 : i32
    return %arg0, %c0_i32, %c0_i32_0 : i32, i32, i32
  }
  func.func @transform_1(%arg0: i32) -> (i32, i32) {
    %c0_i32 = arith.constant 0 : i32
    %c0_i32_0 = arith.constant 0 : i32
    %c0_i32_1 = arith.constant 0 : i32
    return %c0_i32, %c0_i32_0 : i32, i32
  }
  func.func @transform_2(%arg0: i32) -> (i32, i32, i32) {
    %c0_i32 = arith.constant 0 : i32
    %c0_i32_0 = arith.constant 0 : i32
    %c0_i32_1 = arith.constant 0 : i32
    %c0_i32_2 = arith.constant 0 : i32
    return %c0_i32, %c0_i32_0, %c0_i32_1 : i32, i32, i32
  }
  func.func @transform_3(%arg0: i32) -> (i32, i32) {
    %c0_i32 = arith.constant 0 : i32
    %c0_i32_0 = arith.constant 0 : i32
    %c0_i32_1 = arith.constant 0 : i32
    return %c0_i32, %c0_i32_0 : i32, i32
  }
  func.func @transform_4(%arg0: i32) -> (i32, i32, i32) {
    %c0_i32 = arith.constant 0 : i32
    %c0_i32_0 = arith.constant 0 : i32
    %c0_i32_1 = arith.constant 0 : i32
    return %arg0, %c0_i32, %c0_i32_0 : i32, i32, i32
  }
}

module attributes {stable_mosaic.version = 11 : i64} {
  func.func @kernel(%arg0: i32, %arg1: memref<8x16x192xf32, #tpu.memory_space<vmem>>, %arg2: memref<48x16xbf16, #tpu.memory_space<vmem>>, %arg3: memref<3x64x128xbf16, #tpu.memory_space<vmem>>, %arg4: memref<3x64x64xbf16, #tpu.memory_space<vmem>>, %arg5: memref<16x64xf32, #tpu.memory_space<vmem>>, %arg6: memref<8x16x64xf32, #tpu.memory_space<vmem>>, %arg7: memref<16x64xf32, #tpu.memory_space<vmem>>) attributes {dimension_semantics = [#tpu.dimension_semantics<arbitrary>], iteration_bounds = array<i64: 1>, scalar_prefetch = 0 : i64, scratch_operands = 1 : i64, tpu.core_type = #tpu.core_type<tc>, window_params = [{transform_indices = @transform_0, window_bounds = array<i64: 8, 16, 192>}, {pipeline_mode = #tpu.pipeline_mode<synchronous>, transform_indices = @transform_1, window_bounds = array<i64: 48, 16>}, {pipeline_mode = #tpu.pipeline_mode<synchronous>, transform_indices = @transform_2, window_bounds = array<i64: 3, 64, 128>}, {pipeline_mode = #tpu.pipeline_mode<synchronous>, transform_indices = @transform_3, window_bounds = array<i64: 3, 64, 64>}, {pipeline_mode = #tpu.pipeline_mode<synchronous>, transform_indices = @transform_4, window_bounds = array<i64: 16, 64>}, {transform_indices = @transform_5, window_bounds = array<i64: 8, 16, 64>}]} {
    %c0_i32 = arith.constant 0 : i32
    %0 = arith.cmpi eq, %arg0, %c0_i32 : i32
    %1 = arith.extui %0 : i1 to i32
    %c0_i32_0 = arith.constant 0 : i32
    %2 = arith.cmpi ne, %1, %c0_i32_0 : i32
    scf.if %2 {
      %c0_270 = arith.constant 0 : index
      %c0_271 = arith.constant 0 : index
      %462 = vector.load %arg5[%c0_270, %c0_271] : memref<16x64xf32, #tpu.memory_space<vmem>>, vector<16x64xf32>
      %c0_272 = arith.constant 0 : index
      %c0_273 = arith.constant 0 : index
      %463 = vector.load %arg7[%c0_272, %c0_273] : memref<16x64xf32, #tpu.memory_space<vmem>>, vector<16x64xf32>
      tpu.vector_store %arg7[%c0_272, %c0_273], %462 {strides = array<i32>} : memref<16x64xf32, #tpu.memory_space<vmem>>, vector<16x64xf32>,
    } else {
    }
    %c0 = arith.constant 0 : index
    %c0_1 = arith.constant 0 : index
    %3 = vector.load %arg2[%c0, %c0_1] : memref<48x16xbf16, #tpu.memory_space<vmem>>, vector<48x16xbf16>
    %c0_2 = arith.constant 0 : index
    %c0_3 = arith.constant 0 : index
    %4 = vector.load %arg7[%c0_2, %c0_3] : memref<16x64xf32, #tpu.memory_space<vmem>>, vector<16x64xf32>
    %c0_4 = arith.constant 0 : index
    %c0_5 = arith.constant 0 : index
    %c0_6 = arith.constant 0 : index
    %5 = vector.load %arg1[%c0_4, %c0_5, %c0_6] : memref<8x16x192xf32, #tpu.memory_space<vmem>>, vector<1x16x192xf32>
    %6 = vector.shape_cast %5 : vector<1x16x192xf32> to vector<16x192xf32>
    %7 = arith.truncf %4 : vector<16x64xf32> to vector<16x64xbf16>
    %cst = arith.constant dense<0.000000e+00> : vector<48x64xf32>
    %8 = tpu.matmul %3, %7, %cst {dimension_numbers = #tpu.dot_dimension_numbers<[1], [0], [0], [1], [0, 0, 1, 1], [], []>} : vector<48x16xbf16>, vector<16x64xbf16>, vector<48x64xf32> -> vector<48x64xf32>
    %9 = arith.truncf %8 : vector<48x64xf32> to vector<48x64xbf16>
    %10 = vector.extract_strided_slice %6 {offsets = [0, 0], sizes = [16, 128], strides = [1, 1]} : vector<16x192xf32> to vector<16x128xf32>
    %11 = vector.extract_strided_slice %9 {offsets = [0, 0], sizes = [16, 64], strides = [1, 1]} : vector<48x64xbf16> to vector<16x64xbf16>
    %c0_7 = arith.constant 0 : index
    %c0_8 = arith.constant 0 : index
    %c0_9 = arith.constant 0 : index
    %12 = vector.load %arg3[%c0_7, %c0_8, %c0_9] : memref<3x64x128xbf16, #tpu.memory_space<vmem>>, vector<1x64x128xbf16>
    %13 = vector.shape_cast %12 : vector<1x64x128xbf16> to vector<64x128xbf16>
    %cst_10 = arith.constant dense<0.000000e+00> : vector<16x128xf32>
    %14 = tpu.matmul %11, %13, %cst_10 {dimension_numbers = #tpu.dot_dimension_numbers<[1], [0], [0], [1], [0, 0, 1, 1], [], []>} : vector<16x64xbf16>, vector<64x128xbf16>, vector<16x128xf32> -> vector<16x128xf32>
    %15 = arith.addf %10, %14 : vector<16x128xf32>
    %16 = vector.extract_strided_slice %9 {offsets = [16, 0], sizes = [16, 64], strides = [1, 1]} : vector<48x64xbf16> to vector<16x64xbf16>
    %c1 = arith.constant 1 : index
    %c0_11 = arith.constant 0 : index
    %c0_12 = arith.constant 0 : index
    %17 = vector.load %arg3[%c1, %c0_11, %c0_12] : memref<3x64x128xbf16, #tpu.memory_space<vmem>>, vector<1x64x128xbf16>
    %18 = vector.shape_cast %17 : vector<1x64x128xbf16> to vector<64x128xbf16>
    %cst_13 = arith.constant dense<0.000000e+00> : vector<16x128xf32>
    %19 = tpu.matmul %16, %18, %cst_13 {dimension_numbers = #tpu.dot_dimension_numbers<[1], [0], [0], [1], [0, 0, 1, 1], [], []>} : vector<16x64xbf16>, vector<64x128xbf16>, vector<16x128xf32> -> vector<16x128xf32>
    %20 = arith.addf %15, %19 : vector<16x128xf32>
    %21 = vector.extract_strided_slice %9 {offsets = [32, 0], sizes = [16, 64], strides = [1, 1]} : vector<48x64xbf16> to vector<16x64xbf16>
    %c2 = arith.constant 2 : index
    %c0_14 = arith.constant 0 : index
    %c0_15 = arith.constant 0 : index
    %22 = vector.load %arg3[%c2, %c0_14, %c0_15] : memref<3x64x128xbf16, #tpu.memory_space<vmem>>, vector<1x64x128xbf16>
    %23 = vector.shape_cast %22 : vector<1x64x128xbf16> to vector<64x128xbf16>
    %cst_16 = arith.constant dense<0.000000e+00> : vector<16x128xf32>
    %24 = tpu.matmul %21, %23, %cst_16 {dimension_numbers = #tpu.dot_dimension_numbers<[1], [0], [0], [1], [0, 0, 1, 1], [], []>} : vector<16x64xbf16>, vector<64x128xbf16>, vector<16x128xf32> -> vector<16x128xf32>
    %25 = arith.addf %20, %24 : vector<16x128xf32>
    %26 = arith.negf %25 : vector<16x128xf32>
    %27 = math.exp %26 : vector<16x128xf32>
    %cst_17 = arith.constant 1.000000e+00 : f32
    %28 = vector.broadcast %cst_17 : f32 to vector<16x128xf32>
    %29 = arith.addf %28, %27 : vector<16x128xf32>
    %30 = arith.divf %28, %29 : vector<16x128xf32>
    %31 = vector.extract_strided_slice %30 {offsets = [0, 0], sizes = [16, 64], strides = [1, 1]} : vector<16x128xf32> to vector<16x64xf32>
    %32 = vector.extract_strided_slice %30 {offsets = [0, 64], sizes = [16, 64], strides = [1, 1]} : vector<16x128xf32> to vector<16x64xf32>
    %33 = arith.mulf %32, %4 : vector<16x64xf32>
    %34 = arith.truncf %33 : vector<16x64xf32> to vector<16x64xbf16>
    %cst_18 = arith.constant dense<0.000000e+00> : vector<48x64xf32>
    %35 = tpu.matmul %3, %34, %cst_18 {dimension_numbers = #tpu.dot_dimension_numbers<[1], [0], [0], [1], [0, 0, 1, 1], [], []>} : vector<48x16xbf16>, vector<16x64xbf16>, vector<48x64xf32> -> vector<48x64xf32>
    %36 = arith.truncf %35 : vector<48x64xf32> to vector<48x64xbf16>
    %37 = vector.extract_strided_slice %6 {offsets = [0, 128], sizes = [16, 64], strides = [1, 1]} : vector<16x192xf32> to vector<16x64xf32>
    %38 = vector.extract_strided_slice %36 {offsets = [0, 0], sizes = [16, 64], strides = [1, 1]} : vector<48x64xbf16> to vector<16x64xbf16>
    %c0_19 = arith.constant 0 : index
    %c0_20 = arith.constant 0 : index
    %c0_21 = arith.constant 0 : index
    %39 = vector.load %arg4[%c0_19, %c0_20, %c0_21] : memref<3x64x64xbf16, #tpu.memory_space<vmem>>, vector<1x64x64xbf16>
    %40 = vector.shape_cast %39 : vector<1x64x64xbf16> to vector<64x64xbf16>
    %cst_22 = arith.constant dense<0.000000e+00> : vector<16x64xf32>
    %41 = tpu.matmul %38, %40, %cst_22 {dimension_numbers = #tpu.dot_dimension_numbers<[1], [0], [0], [1], [0, 0, 1, 1], [], []>} : vector<16x64xbf16>, vector<64x64xbf16>, vector<16x64xf32> -> vector<16x64xf32>
    %42 = arith.addf %37, %41 : vector<16x64xf32>
    %43 = vector.extract_strided_slice %36 {offsets = [16, 0], sizes = [16, 64], strides = [1, 1]} : vector<48x64xbf16> to vector<16x64xbf16>
    %c1_23 = arith.constant 1 : index
    %c0_24 = arith.constant 0 : index
    %c0_25 = arith.constant 0 : index
    %44 = vector.load %arg4[%c1_23, %c0_24, %c0_25] : memref<3x64x64xbf16, #tpu.memory_space<vmem>>, vector<1x64x64xbf16>
    %45 = vector.shape_cast %44 : vector<1x64x64xbf16> to vector<64x64xbf16>
    %cst_26 = arith.constant dense<0.000000e+00> : vector<16x64xf32>
    %46 = tpu.matmul %43, %45, %cst_26 {dimension_numbers = #tpu.dot_dimension_numbers<[1], [0], [0], [1], [0, 0, 1, 1], [], []>} : vector<16x64xbf16>, vector<64x64xbf16>, vector<16x64xf32> -> vector<16x64xf32>
    %47 = arith.addf %42, %46 : vector<16x64xf32>
    %48 = vector.extract_strided_slice %36 {offsets = [32, 0], sizes = [16, 64], strides = [1, 1]} : vector<48x64xbf16> to vector<16x64xbf16>
    %c2_27 = arith.constant 2 : index
    %c0_28 = arith.constant 0 : index
    %c0_29 = arith.constant 0 : index
    %49 = vector.load %arg4[%c2_27, %c0_28, %c0_29] : memref<3x64x64xbf16, #tpu.memory_space<vmem>>, vector<1x64x64xbf16>
    %50 = vector.shape_cast %49 : vector<1x64x64xbf16> to vector<64x64xbf16>
    %cst_30 = arith.constant dense<0.000000e+00> : vector<16x64xf32>
    %51 = tpu.matmul %48, %50, %cst_30 {dimension_numbers = #tpu.dot_dimension_numbers<[1], [0], [0], [1], [0, 0, 1, 1], [], []>} : vector<16x64xbf16>, vector<64x64xbf16>, vector<16x64xf32> -> vector<16x64xf32>
    %52 = arith.addf %47, %51 : vector<16x64xf32>
    %53 = math.tanh %52 : vector<16x64xf32>
    %54 = arith.mulf %31, %53 : vector<16x64xf32>
    %cst_31 = arith.constant 1.000000e+00 : f32
    %55 = vector.broadcast %cst_31 : f32 to vector<16x64xf32>
    %56 = arith.subf %55, %31 : vector<16x64xf32>
    %57 = arith.mulf %56, %4 : vector<16x64xf32>
    %58 = arith.addf %54, %57 : vector<16x64xf32>
    %c0_32 = arith.constant 0 : index
    %c0_33 = arith.constant 0 : index
    %c0_34 = arith.constant 0 : index
    %59 = vector.load %arg6[%c0_32, %c0_33, %c0_34] : memref<8x16x64xf32, #tpu.memory_space<vmem>>, vector<1x16x64xf32>
    %60 = vector.shape_cast %59 : vector<1x16x64xf32> to vector<16x64xf32>
    %61 = vector.shape_cast %58 : vector<16x64xf32> to vector<1x16x64xf32>
    tpu.vector_store %arg6[%c0_32, %c0_33, %c0_34], %61 {strides = array<i32>} : memref<8x16x64xf32, #tpu.memory_space<vmem>>, vector<1x16x64xf32>,
    %c1_35 = arith.constant 1 : index
    %c0_36 = arith.constant 0 : index
    %c0_37 = arith.constant 0 : index
    %62 = vector.load %arg1[%c1_35, %c0_36, %c0_37] : memref<8x16x192xf32, #tpu.memory_space<vmem>>, vector<1x16x192xf32>
    %63 = vector.shape_cast %62 : vector<1x16x192xf32> to vector<16x192xf32>
    %64 = arith.truncf %58 : vector<16x64xf32> to vector<16x64xbf16>
    %cst_38 = arith.constant dense<0.000000e+00> : vector<48x64xf32>
    %65 = tpu.matmul %3, %64, %cst_38 {dimension_numbers = #tpu.dot_dimension_numbers<[1], [0], [0], [1], [0, 0, 1, 1], [], []>} : vector<48x16xbf16>, vector<16x64xbf16>, vector<48x64xf32> -> vector<48x64xf32>
    %66 = arith.truncf %65 : vector<48x64xf32> to vector<48x64xbf16>
    %67 = vector.extract_strided_slice %63 {offsets = [0, 0], sizes = [16, 128], strides = [1, 1]} : vector<16x192xf32> to vector<16x128xf32>
    %68 = vector.extract_strided_slice %66 {offsets = [0, 0], sizes = [16, 64], strides = [1, 1]} : vector<48x64xbf16> to vector<16x64xbf16>
    %c0_39 = arith.constant 0 : index
    %c0_40 = arith.constant 0 : index
    %c0_41 = arith.constant 0 : index
    %69 = vector.load %arg3[%c0_39, %c0_40, %c0_41] : memref<3x64x128xbf16, #tpu.memory_space<vmem>>, vector<1x64x128xbf16>
    %70 = vector.shape_cast %69 : vector<1x64x128xbf16> to vector<64x128xbf16>
    %cst_42 = arith.constant dense<0.000000e+00> : vector<16x128xf32>
    %71 = tpu.matmul %68, %70, %cst_42 {dimension_numbers = #tpu.dot_dimension_numbers<[1], [0], [0], [1], [0, 0, 1, 1], [], []>} : vector<16x64xbf16>, vector<64x128xbf16>, vector<16x128xf32> -> vector<16x128xf32>
    %72 = arith.addf %67, %71 : vector<16x128xf32>
    %73 = vector.extract_strided_slice %66 {offsets = [16, 0], sizes = [16, 64], strides = [1, 1]} : vector<48x64xbf16> to vector<16x64xbf16>
    %c1_43 = arith.constant 1 : index
    %c0_44 = arith.constant 0 : index
    %c0_45 = arith.constant 0 : index
    %74 = vector.load %arg3[%c1_43, %c0_44, %c0_45] : memref<3x64x128xbf16, #tpu.memory_space<vmem>>, vector<1x64x128xbf16>
    %75 = vector.shape_cast %74 : vector<1x64x128xbf16> to vector<64x128xbf16>
    %cst_46 = arith.constant dense<0.000000e+00> : vector<16x128xf32>
    %76 = tpu.matmul %73, %75, %cst_46 {dimension_numbers = #tpu.dot_dimension_numbers<[1], [0], [0], [1], [0, 0, 1, 1], [], []>} : vector<16x64xbf16>, vector<64x128xbf16>, vector<16x128xf32> -> vector<16x128xf32>
    %77 = arith.addf %72, %76 : vector<16x128xf32>
    %78 = vector.extract_strided_slice %66 {offsets = [32, 0], sizes = [16, 64], strides = [1, 1]} : vector<48x64xbf16> to vector<16x64xbf16>
    %c2_47 = arith.constant 2 : index
    %c0_48 = arith.constant 0 : index
    %c0_49 = arith.constant 0 : index
    %79 = vector.load %arg3[%c2_47, %c0_48, %c0_49] : memref<3x64x128xbf16, #tpu.memory_space<vmem>>, vector<1x64x128xbf16>
    %80 = vector.shape_cast %79 : vector<1x64x128xbf16> to vector<64x128xbf16>
    %cst_50 = arith.constant dense<0.000000e+00> : vector<16x128xf32>
    %81 = tpu.matmul %78, %80, %cst_50 {dimension_numbers = #tpu.dot_dimension_numbers<[1], [0], [0], [1], [0, 0, 1, 1], [], []>} : vector<16x64xbf16>, vector<64x128xbf16>, vector<16x128xf32> -> vector<16x128xf32>
    %82 = arith.addf %77, %81 : vector<16x128xf32>
    %83 = arith.negf %82 : vector<16x128xf32>
    %84 = math.exp %83 : vector<16x128xf32>
    %cst_51 = arith.constant 1.000000e+00 : f32
    %85 = vector.broadcast %cst_51 : f32 to vector<16x128xf32>
    %86 = arith.addf %85, %84 : vector<16x128xf32>
    %87 = arith.divf %85, %86 : vector<16x128xf32>
    %88 = vector.extract_strided_slice %87 {offsets = [0, 0], sizes = [16, 64], strides = [1, 1]} : vector<16x128xf32> to vector<16x64xf32>
    %89 = vector.extract_strided_slice %87 {offsets = [0, 64], sizes = [16, 64], strides = [1, 1]} : vector<16x128xf32> to vector<16x64xf32>
    %90 = arith.mulf %89, %58 : vector<16x64xf32>
    %91 = arith.truncf %90 : vector<16x64xf32> to vector<16x64xbf16>
    %cst_52 = arith.constant dense<0.000000e+00> : vector<48x64xf32>
    %92 = tpu.matmul %3, %91, %cst_52 {dimension_numbers = #tpu.dot_dimension_numbers<[1], [0], [0], [1], [0, 0, 1, 1], [], []>} : vector<48x16xbf16>, vector<16x64xbf16>, vector<48x64xf32> -> vector<48x64xf32>
    %93 = arith.truncf %92 : vector<48x64xf32> to vector<48x64xbf16>
    %94 = vector.extract_strided_slice %63 {offsets = [0, 128], sizes = [16, 64], strides = [1, 1]} : vector<16x192xf32> to vector<16x64xf32>
    %95 = vector.extract_strided_slice %93 {offsets = [0, 0], sizes = [16, 64], strides = [1, 1]} : vector<48x64xbf16> to vector<16x64xbf16>
    %c0_53 = arith.constant 0 : index
    %c0_54 = arith.constant 0 : index
    %c0_55 = arith.constant 0 : index
    %96 = vector.load %arg4[%c0_53, %c0_54, %c0_55] : memref<3x64x64xbf16, #tpu.memory_space<vmem>>, vector<1x64x64xbf16>
    %97 = vector.shape_cast %96 : vector<1x64x64xbf16> to vector<64x64xbf16>
    %cst_56 = arith.constant dense<0.000000e+00> : vector<16x64xf32>
    %98 = tpu.matmul %95, %97, %cst_56 {dimension_numbers = #tpu.dot_dimension_numbers<[1], [0], [0], [1], [0, 0, 1, 1], [], []>} : vector<16x64xbf16>, vector<64x64xbf16>, vector<16x64xf32> -> vector<16x64xf32>
    %99 = arith.addf %94, %98 : vector<16x64xf32>
    %100 = vector.extract_strided_slice %93 {offsets = [16, 0], sizes = [16, 64], strides = [1, 1]} : vector<48x64xbf16> to vector<16x64xbf16>
    %c1_57 = arith.constant 1 : index
    %c0_58 = arith.constant 0 : index
    %c0_59 = arith.constant 0 : index
    %101 = vector.load %arg4[%c1_57, %c0_58, %c0_59] : memref<3x64x64xbf16, #tpu.memory_space<vmem>>, vector<1x64x64xbf16>
    %102 = vector.shape_cast %101 : vector<1x64x64xbf16> to vector<64x64xbf16>
    %cst_60 = arith.constant dense<0.000000e+00> : vector<16x64xf32>
    %103 = tpu.matmul %100, %102, %cst_60 {dimension_numbers = #tpu.dot_dimension_numbers<[1], [0], [0], [1], [0, 0, 1, 1], [], []>} : vector<16x64xbf16>, vector<64x64xbf16>, vector<16x64xf32> -> vector<16x64xf32>
    %104 = arith.addf %99, %103 : vector<16x64xf32>
    %105 = vector.extract_strided_slice %93 {offsets = [32, 0], sizes = [16, 64], strides = [1, 1]} : vector<48x64xbf16> to vector<16x64xbf16>
    %c2_61 = arith.constant 2 : index
    %c0_62 = arith.constant 0 : index
    %c0_63 = arith.constant 0 : index
    %106 = vector.load %arg4[%c2_61, %c0_62, %c0_63] : memref<3x64x64xbf16, #tpu.memory_space<vmem>>, vector<1x64x64xbf16>
    %107 = vector.shape_cast %106 : vector<1x64x64xbf16> to vector<64x64xbf16>
    %cst_64 = arith.constant dense<0.000000e+00> : vector<16x64xf32>
    %108 = tpu.matmul %105, %107, %cst_64 {dimension_numbers = #tpu.dot_dimension_numbers<[1], [0], [0], [1], [0, 0, 1, 1], [], []>} : vector<16x64xbf16>, vector<64x64xbf16>, vector<16x64xf32> -> vector<16x64xf32>
    %109 = arith.addf %104, %108 : vector<16x64xf32>
    %110 = math.tanh %109 : vector<16x64xf32>
    %111 = arith.mulf %88, %110 : vector<16x64xf32>
    %cst_65 = arith.constant 1.000000e+00 : f32
    %112 = vector.broadcast %cst_65 : f32 to vector<16x64xf32>
    %113 = arith.subf %112, %88 : vector<16x64xf32>
    %114 = arith.mulf %113, %58 : vector<16x64xf32>
    %115 = arith.addf %111, %114 : vector<16x64xf32>
    %c1_66 = arith.constant 1 : index
    %c0_67 = arith.constant 0 : index
    %c0_68 = arith.constant 0 : index
    %116 = vector.load %arg6[%c1_66, %c0_67, %c0_68] : memref<8x16x64xf32, #tpu.memory_space<vmem>>, vector<1x16x64xf32>
    %117 = vector.shape_cast %116 : vector<1x16x64xf32> to vector<16x64xf32>
    %118 = vector.shape_cast %115 : vector<16x64xf32> to vector<1x16x64xf32>
    tpu.vector_store %arg6[%c1_66, %c0_67, %c0_68], %118 {strides = array<i32>} : memref<8x16x64xf32, #tpu.memory_space<vmem>>, vector<1x16x64xf32>,
    %c2_69 = arith.constant 2 : index
    %c0_70 = arith.constant 0 : index
    %c0_71 = arith.constant 0 : index
    %119 = vector.load %arg1[%c2_69, %c0_70, %c0_71] : memref<8x16x192xf32, #tpu.memory_space<vmem>>, vector<1x16x192xf32>
    %120 = vector.shape_cast %119 : vector<1x16x192xf32> to vector<16x192xf32>
    %121 = arith.truncf %115 : vector<16x64xf32> to vector<16x64xbf16>
    %cst_72 = arith.constant dense<0.000000e+00> : vector<48x64xf32>
    %122 = tpu.matmul %3, %121, %cst_72 {dimension_numbers = #tpu.dot_dimension_numbers<[1], [0], [0], [1], [0, 0, 1, 1], [], []>} : vector<48x16xbf16>, vector<16x64xbf16>, vector<48x64xf32> -> vector<48x64xf32>
    %123 = arith.truncf %122 : vector<48x64xf32> to vector<48x64xbf16>
    %124 = vector.extract_strided_slice %120 {offsets = [0, 0], sizes = [16, 128], strides = [1, 1]} : vector<16x192xf32> to vector<16x128xf32>
    %125 = vector.extract_strided_slice %123 {offsets = [0, 0], sizes = [16, 64], strides = [1, 1]} : vector<48x64xbf16> to vector<16x64xbf16>
    %c0_73 = arith.constant 0 : index
    %c0_74 = arith.constant 0 : index
    %c0_75 = arith.constant 0 : index
    %126 = vector.load %arg3[%c0_73, %c0_74, %c0_75] : memref<3x64x128xbf16, #tpu.memory_space<vmem>>, vector<1x64x128xbf16>
    %127 = vector.shape_cast %126 : vector<1x64x128xbf16> to vector<64x128xbf16>
    %cst_76 = arith.constant dense<0.000000e+00> : vector<16x128xf32>
    %128 = tpu.matmul %125, %127, %cst_76 {dimension_numbers = #tpu.dot_dimension_numbers<[1], [0], [0], [1], [0, 0, 1, 1], [], []>} : vector<16x64xbf16>, vector<64x128xbf16>, vector<16x128xf32> -> vector<16x128xf32>
    %129 = arith.addf %124, %128 : vector<16x128xf32>
    %130 = vector.extract_strided_slice %123 {offsets = [16, 0], sizes = [16, 64], strides = [1, 1]} : vector<48x64xbf16> to vector<16x64xbf16>
    %c1_77 = arith.constant 1 : index
    %c0_78 = arith.constant 0 : index
    %c0_79 = arith.constant 0 : index
    %131 = vector.load %arg3[%c1_77, %c0_78, %c0_79] : memref<3x64x128xbf16, #tpu.memory_space<vmem>>, vector<1x64x128xbf16>
    %132 = vector.shape_cast %131 : vector<1x64x128xbf16> to vector<64x128xbf16>
    %cst_80 = arith.constant dense<0.000000e+00> : vector<16x128xf32>
    %133 = tpu.matmul %130, %132, %cst_80 {dimension_numbers = #tpu.dot_dimension_numbers<[1], [0], [0], [1], [0, 0, 1, 1], [], []>} : vector<16x64xbf16>, vector<64x128xbf16>, vector<16x128xf32> -> vector<16x128xf32>
    %134 = arith.addf %129, %133 : vector<16x128xf32>
    %135 = vector.extract_strided_slice %123 {offsets = [32, 0], sizes = [16, 64], strides = [1, 1]} : vector<48x64xbf16> to vector<16x64xbf16>
    %c2_81 = arith.constant 2 : index
    %c0_82 = arith.constant 0 : index
    %c0_83 = arith.constant 0 : index
    %136 = vector.load %arg3[%c2_81, %c0_82, %c0_83] : memref<3x64x128xbf16, #tpu.memory_space<vmem>>, vector<1x64x128xbf16>
    %137 = vector.shape_cast %136 : vector<1x64x128xbf16> to vector<64x128xbf16>
    %cst_84 = arith.constant dense<0.000000e+00> : vector<16x128xf32>
    %138 = tpu.matmul %135, %137, %cst_84 {dimension_numbers = #tpu.dot_dimension_numbers<[1], [0], [0], [1], [0, 0, 1, 1], [], []>} : vector<16x64xbf16>, vector<64x128xbf16>, vector<16x128xf32> -> vector<16x128xf32>
    %139 = arith.addf %134, %138 : vector<16x128xf32>
    %140 = arith.negf %139 : vector<16x128xf32>
    %141 = math.exp %140 : vector<16x128xf32>
    %cst_85 = arith.constant 1.000000e+00 : f32
    %142 = vector.broadcast %cst_85 : f32 to vector<16x128xf32>
    %143 = arith.addf %142, %141 : vector<16x128xf32>
    %144 = arith.divf %142, %143 : vector<16x128xf32>
    %145 = vector.extract_strided_slice %144 {offsets = [0, 0], sizes = [16, 64], strides = [1, 1]} : vector<16x128xf32> to vector<16x64xf32>
    %146 = vector.extract_strided_slice %144 {offsets = [0, 64], sizes = [16, 64], strides = [1, 1]} : vector<16x128xf32> to vector<16x64xf32>
    %147 = arith.mulf %146, %115 : vector<16x64xf32>
    %148 = arith.truncf %147 : vector<16x64xf32> to vector<16x64xbf16>
    %cst_86 = arith.constant dense<0.000000e+00> : vector<48x64xf32>
    %149 = tpu.matmul %3, %148, %cst_86 {dimension_numbers = #tpu.dot_dimension_numbers<[1], [0], [0], [1], [0, 0, 1, 1], [], []>} : vector<48x16xbf16>, vector<16x64xbf16>, vector<48x64xf32> -> vector<48x64xf32>
    %150 = arith.truncf %149 : vector<48x64xf32> to vector<48x64xbf16>
    %151 = vector.extract_strided_slice %120 {offsets = [0, 128], sizes = [16, 64], strides = [1, 1]} : vector<16x192xf32> to vector<16x64xf32>
    %152 = vector.extract_strided_slice %150 {offsets = [0, 0], sizes = [16, 64], strides = [1, 1]} : vector<48x64xbf16> to vector<16x64xbf16>
    %c0_87 = arith.constant 0 : index
    %c0_88 = arith.constant 0 : index
    %c0_89 = arith.constant 0 : index
    %153 = vector.load %arg4[%c0_87, %c0_88, %c0_89] : memref<3x64x64xbf16, #tpu.memory_space<vmem>>, vector<1x64x64xbf16>
    %154 = vector.shape_cast %153 : vector<1x64x64xbf16> to vector<64x64xbf16>
    %cst_90 = arith.constant dense<0.000000e+00> : vector<16x64xf32>
    %155 = tpu.matmul %152, %154, %cst_90 {dimension_numbers = #tpu.dot_dimension_numbers<[1], [0], [0], [1], [0, 0, 1, 1], [], []>} : vector<16x64xbf16>, vector<64x64xbf16>, vector<16x64xf32> -> vector<16x64xf32>
    %156 = arith.addf %151, %155 : vector<16x64xf32>
    %157 = vector.extract_strided_slice %150 {offsets = [16, 0], sizes = [16, 64], strides = [1, 1]} : vector<48x64xbf16> to vector<16x64xbf16>
    %c1_91 = arith.constant 1 : index
    %c0_92 = arith.constant 0 : index
    %c0_93 = arith.constant 0 : index
    %158 = vector.load %arg4[%c1_91, %c0_92, %c0_93] : memref<3x64x64xbf16, #tpu.memory_space<vmem>>, vector<1x64x64xbf16>
    %159 = vector.shape_cast %158 : vector<1x64x64xbf16> to vector<64x64xbf16>
    %cst_94 = arith.constant dense<0.000000e+00> : vector<16x64xf32>
    %160 = tpu.matmul %157, %159, %cst_94 {dimension_numbers = #tpu.dot_dimension_numbers<[1], [0], [0], [1], [0, 0, 1, 1], [], []>} : vector<16x64xbf16>, vector<64x64xbf16>, vector<16x64xf32> -> vector<16x64xf32>
    %161 = arith.addf %156, %160 : vector<16x64xf32>
    %162 = vector.extract_strided_slice %150 {offsets = [32, 0], sizes = [16, 64], strides = [1, 1]} : vector<48x64xbf16> to vector<16x64xbf16>
    %c2_95 = arith.constant 2 : index
    %c0_96 = arith.constant 0 : index
    %c0_97 = arith.constant 0 : index
    %163 = vector.load %arg4[%c2_95, %c0_96, %c0_97] : memref<3x64x64xbf16, #tpu.memory_space<vmem>>, vector<1x64x64xbf16>
    %164 = vector.shape_cast %163 : vector<1x64x64xbf16> to vector<64x64xbf16>
    %cst_98 = arith.constant dense<0.000000e+00> : vector<16x64xf32>
    %165 = tpu.matmul %162, %164, %cst_98 {dimension_numbers = #tpu.dot_dimension_numbers<[1], [0], [0], [1], [0, 0, 1, 1], [], []>} : vector<16x64xbf16>, vector<64x64xbf16>, vector<16x64xf32> -> vector<16x64xf32>
    %166 = arith.addf %161, %165 : vector<16x64xf32>
    %167 = math.tanh %166 : vector<16x64xf32>
    %168 = arith.mulf %145, %167 : vector<16x64xf32>
    %cst_99 = arith.constant 1.000000e+00 : f32
    %169 = vector.broadcast %cst_99 : f32 to vector<16x64xf32>
    %170 = arith.subf %169, %145 : vector<16x64xf32>
    %171 = arith.mulf %170, %115 : vector<16x64xf32>
    %172 = arith.addf %168, %171 : vector<16x64xf32>
    %c2_100 = arith.constant 2 : index
    %c0_101 = arith.constant 0 : index
    %c0_102 = arith.constant 0 : index
    %173 = vector.load %arg6[%c2_100, %c0_101, %c0_102] : memref<8x16x64xf32, #tpu.memory_space<vmem>>, vector<1x16x64xf32>
    %174 = vector.shape_cast %173 : vector<1x16x64xf32> to vector<16x64xf32>
    %175 = vector.shape_cast %172 : vector<16x64xf32> to vector<1x16x64xf32>
    tpu.vector_store %arg6[%c2_100, %c0_101, %c0_102], %175 {strides = array<i32>} : memref<8x16x64xf32, #tpu.memory_space<vmem>>, vector<1x16x64xf32>,
    %c3 = arith.constant 3 : index
    %c0_103 = arith.constant 0 : index
    %c0_104 = arith.constant 0 : index
    %176 = vector.load %arg1[%c3, %c0_103, %c0_104] : memref<8x16x192xf32, #tpu.memory_space<vmem>>, vector<1x16x192xf32>
    %177 = vector.shape_cast %176 : vector<1x16x192xf32> to vector<16x192xf32>
    %178 = arith.truncf %172 : vector<16x64xf32> to vector<16x64xbf16>
    %cst_105 = arith.constant dense<0.000000e+00> : vector<48x64xf32>
    %179 = tpu.matmul %3, %178, %cst_105 {dimension_numbers = #tpu.dot_dimension_numbers<[1], [0], [0], [1], [0, 0, 1, 1], [], []>} : vector<48x16xbf16>, vector<16x64xbf16>, vector<48x64xf32> -> vector<48x64xf32>
    %180 = arith.truncf %179 : vector<48x64xf32> to vector<48x64xbf16>
    %181 = vector.extract_strided_slice %177 {offsets = [0, 0], sizes = [16, 128], strides = [1, 1]} : vector<16x192xf32> to vector<16x128xf32>
    %182 = vector.extract_strided_slice %180 {offsets = [0, 0], sizes = [16, 64], strides = [1, 1]} : vector<48x64xbf16> to vector<16x64xbf16>
    %c0_106 = arith.constant 0 : index
    %c0_107 = arith.constant 0 : index
    %c0_108 = arith.constant 0 : index
    %183 = vector.load %arg3[%c0_106, %c0_107, %c0_108] : memref<3x64x128xbf16, #tpu.memory_space<vmem>>, vector<1x64x128xbf16>
    %184 = vector.shape_cast %183 : vector<1x64x128xbf16> to vector<64x128xbf16>
    %cst_109 = arith.constant dense<0.000000e+00> : vector<16x128xf32>
    %185 = tpu.matmul %182, %184, %cst_109 {dimension_numbers = #tpu.dot_dimension_numbers<[1], [0], [0], [1], [0, 0, 1, 1], [], []>} : vector<16x64xbf16>, vector<64x128xbf16>, vector<16x128xf32> -> vector<16x128xf32>
    %186 = arith.addf %181, %185 : vector<16x128xf32>
    %187 = vector.extract_strided_slice %180 {offsets = [16, 0], sizes = [16, 64], strides = [1, 1]} : vector<48x64xbf16> to vector<16x64xbf16>
    %c1_110 = arith.constant 1 : index
    %c0_111 = arith.constant 0 : index
    %c0_112 = arith.constant 0 : index
    %188 = vector.load %arg3[%c1_110, %c0_111, %c0_112] : memref<3x64x128xbf16, #tpu.memory_space<vmem>>, vector<1x64x128xbf16>
    %189 = vector.shape_cast %188 : vector<1x64x128xbf16> to vector<64x128xbf16>
    %cst_113 = arith.constant dense<0.000000e+00> : vector<16x128xf32>
    %190 = tpu.matmul %187, %189, %cst_113 {dimension_numbers = #tpu.dot_dimension_numbers<[1], [0], [0], [1], [0, 0, 1, 1], [], []>} : vector<16x64xbf16>, vector<64x128xbf16>, vector<16x128xf32> -> vector<16x128xf32>
    %191 = arith.addf %186, %190 : vector<16x128xf32>
    %192 = vector.extract_strided_slice %180 {offsets = [32, 0], sizes = [16, 64], strides = [1, 1]} : vector<48x64xbf16> to vector<16x64xbf16>
    %c2_114 = arith.constant 2 : index
    %c0_115 = arith.constant 0 : index
    %c0_116 = arith.constant 0 : index
    %193 = vector.load %arg3[%c2_114, %c0_115, %c0_116] : memref<3x64x128xbf16, #tpu.memory_space<vmem>>, vector<1x64x128xbf16>
    %194 = vector.shape_cast %193 : vector<1x64x128xbf16> to vector<64x128xbf16>
    %cst_117 = arith.constant dense<0.000000e+00> : vector<16x128xf32>
    %195 = tpu.matmul %192, %194, %cst_117 {dimension_numbers = #tpu.dot_dimension_numbers<[1], [0], [0], [1], [0, 0, 1, 1], [], []>} : vector<16x64xbf16>, vector<64x128xbf16>, vector<16x128xf32> -> vector<16x128xf32>
    %196 = arith.addf %191, %195 : vector<16x128xf32>
    %197 = arith.negf %196 : vector<16x128xf32>
    %198 = math.exp %197 : vector<16x128xf32>
    %cst_118 = arith.constant 1.000000e+00 : f32
    %199 = vector.broadcast %cst_118 : f32 to vector<16x128xf32>
    %200 = arith.addf %199, %198 : vector<16x128xf32>
    %201 = arith.divf %199, %200 : vector<16x128xf32>
    %202 = vector.extract_strided_slice %201 {offsets = [0, 0], sizes = [16, 64], strides = [1, 1]} : vector<16x128xf32> to vector<16x64xf32>
    %203 = vector.extract_strided_slice %201 {offsets = [0, 64], sizes = [16, 64], strides = [1, 1]} : vector<16x128xf32> to vector<16x64xf32>
    %204 = arith.mulf %203, %172 : vector<16x64xf32>
    %205 = arith.truncf %204 : vector<16x64xf32> to vector<16x64xbf16>
    %cst_119 = arith.constant dense<0.000000e+00> : vector<48x64xf32>
    %206 = tpu.matmul %3, %205, %cst_119 {dimension_numbers = #tpu.dot_dimension_numbers<[1], [0], [0], [1], [0, 0, 1, 1], [], []>} : vector<48x16xbf16>, vector<16x64xbf16>, vector<48x64xf32> -> vector<48x64xf32>
    %207 = arith.truncf %206 : vector<48x64xf32> to vector<48x64xbf16>
    %208 = vector.extract_strided_slice %177 {offsets = [0, 128], sizes = [16, 64], strides = [1, 1]} : vector<16x192xf32> to vector<16x64xf32>
    %209 = vector.extract_strided_slice %207 {offsets = [0, 0], sizes = [16, 64], strides = [1, 1]} : vector<48x64xbf16> to vector<16x64xbf16>
    %c0_120 = arith.constant 0 : index
    %c0_121 = arith.constant 0 : index
    %c0_122 = arith.constant 0 : index
    %210 = vector.load %arg4[%c0_120, %c0_121, %c0_122] : memref<3x64x64xbf16, #tpu.memory_space<vmem>>, vector<1x64x64xbf16>
    %211 = vector.shape_cast %210 : vector<1x64x64xbf16> to vector<64x64xbf16>
    %cst_123 = arith.constant dense<0.000000e+00> : vector<16x64xf32>
    %212 = tpu.matmul %209, %211, %cst_123 {dimension_numbers = #tpu.dot_dimension_numbers<[1], [0], [0], [1], [0, 0, 1, 1], [], []>} : vector<16x64xbf16>, vector<64x64xbf16>, vector<16x64xf32> -> vector<16x64xf32>
    %213 = arith.addf %208, %212 : vector<16x64xf32>
    %214 = vector.extract_strided_slice %207 {offsets = [16, 0], sizes = [16, 64], strides = [1, 1]} : vector<48x64xbf16> to vector<16x64xbf16>
    %c1_124 = arith.constant 1 : index
    %c0_125 = arith.constant 0 : index
    %c0_126 = arith.constant 0 : index
    %215 = vector.load %arg4[%c1_124, %c0_125, %c0_126] : memref<3x64x64xbf16, #tpu.memory_space<vmem>>, vector<1x64x64xbf16>
    %216 = vector.shape_cast %215 : vector<1x64x64xbf16> to vector<64x64xbf16>
    %cst_127 = arith.constant dense<0.000000e+00> : vector<16x64xf32>
    %217 = tpu.matmul %214, %216, %cst_127 {dimension_numbers = #tpu.dot_dimension_numbers<[1], [0], [0], [1], [0, 0, 1, 1], [], []>} : vector<16x64xbf16>, vector<64x64xbf16>, vector<16x64xf32> -> vector<16x64xf32>
    %218 = arith.addf %213, %217 : vector<16x64xf32>
    %219 = vector.extract_strided_slice %207 {offsets = [32, 0], sizes = [16, 64], strides = [1, 1]} : vector<48x64xbf16> to vector<16x64xbf16>
    %c2_128 = arith.constant 2 : index
    %c0_129 = arith.constant 0 : index
    %c0_130 = arith.constant 0 : index
    %220 = vector.load %arg4[%c2_128, %c0_129, %c0_130] : memref<3x64x64xbf16, #tpu.memory_space<vmem>>, vector<1x64x64xbf16>
    %221 = vector.shape_cast %220 : vector<1x64x64xbf16> to vector<64x64xbf16>
    %cst_131 = arith.constant dense<0.000000e+00> : vector<16x64xf32>
    %222 = tpu.matmul %219, %221, %cst_131 {dimension_numbers = #tpu.dot_dimension_numbers<[1], [0], [0], [1], [0, 0, 1, 1], [], []>} : vector<16x64xbf16>, vector<64x64xbf16>, vector<16x64xf32> -> vector<16x64xf32>
    %223 = arith.addf %218, %222 : vector<16x64xf32>
    %224 = math.tanh %223 : vector<16x64xf32>
    %225 = arith.mulf %202, %224 : vector<16x64xf32>
    %cst_132 = arith.constant 1.000000e+00 : f32
    %226 = vector.broadcast %cst_132 : f32 to vector<16x64xf32>
    %227 = arith.subf %226, %202 : vector<16x64xf32>
    %228 = arith.mulf %227, %172 : vector<16x64xf32>
    %229 = arith.addf %225, %228 : vector<16x64xf32>
    %c3_133 = arith.constant 3 : index
    %c0_134 = arith.constant 0 : index
    %c0_135 = arith.constant 0 : index
    %230 = vector.load %arg6[%c3_133, %c0_134, %c0_135] : memref<8x16x64xf32, #tpu.memory_space<vmem>>, vector<1x16x64xf32>
    %231 = vector.shape_cast %230 : vector<1x16x64xf32> to vector<16x64xf32>
    %232 = vector.shape_cast %229 : vector<16x64xf32> to vector<1x16x64xf32>
    tpu.vector_store %arg6[%c3_133, %c0_134, %c0_135], %232 {strides = array<i32>} : memref<8x16x64xf32, #tpu.memory_space<vmem>>, vector<1x16x64xf32>,
    %c4 = arith.constant 4 : index
    %c0_136 = arith.constant 0 : index
    %c0_137 = arith.constant 0 : index
    %233 = vector.load %arg1[%c4, %c0_136, %c0_137] : memref<8x16x192xf32, #tpu.memory_space<vmem>>, vector<1x16x192xf32>
    %234 = vector.shape_cast %233 : vector<1x16x192xf32> to vector<16x192xf32>
    %235 = arith.truncf %229 : vector<16x64xf32> to vector<16x64xbf16>
    %cst_138 = arith.constant dense<0.000000e+00> : vector<48x64xf32>
    %236 = tpu.matmul %3, %235, %cst_138 {dimension_numbers = #tpu.dot_dimension_numbers<[1], [0], [0], [1], [0, 0, 1, 1], [], []>} : vector<48x16xbf16>, vector<16x64xbf16>, vector<48x64xf32> -> vector<48x64xf32>
    %237 = arith.truncf %236 : vector<48x64xf32> to vector<48x64xbf16>
    %238 = vector.extract_strided_slice %234 {offsets = [0, 0], sizes = [16, 128], strides = [1, 1]} : vector<16x192xf32> to vector<16x128xf32>
    %239 = vector.extract_strided_slice %237 {offsets = [0, 0], sizes = [16, 64], strides = [1, 1]} : vector<48x64xbf16> to vector<16x64xbf16>
    %c0_139 = arith.constant 0 : index
    %c0_140 = arith.constant 0 : index
    %c0_141 = arith.constant 0 : index
    %240 = vector.load %arg3[%c0_139, %c0_140, %c0_141] : memref<3x64x128xbf16, #tpu.memory_space<vmem>>, vector<1x64x128xbf16>
    %241 = vector.shape_cast %240 : vector<1x64x128xbf16> to vector<64x128xbf16>
    %cst_142 = arith.constant dense<0.000000e+00> : vector<16x128xf32>
    %242 = tpu.matmul %239, %241, %cst_142 {dimension_numbers = #tpu.dot_dimension_numbers<[1], [0], [0], [1], [0, 0, 1, 1], [], []>} : vector<16x64xbf16>, vector<64x128xbf16>, vector<16x128xf32> -> vector<16x128xf32>
    %243 = arith.addf %238, %242 : vector<16x128xf32>
    %244 = vector.extract_strided_slice %237 {offsets = [16, 0], sizes = [16, 64], strides = [1, 1]} : vector<48x64xbf16> to vector<16x64xbf16>
    %c1_143 = arith.constant 1 : index
    %c0_144 = arith.constant 0 : index
    %c0_145 = arith.constant 0 : index
    %245 = vector.load %arg3[%c1_143, %c0_144, %c0_145] : memref<3x64x128xbf16, #tpu.memory_space<vmem>>, vector<1x64x128xbf16>
    %246 = vector.shape_cast %245 : vector<1x64x128xbf16> to vector<64x128xbf16>
    %cst_146 = arith.constant dense<0.000000e+00> : vector<16x128xf32>
    %247 = tpu.matmul %244, %246, %cst_146 {dimension_numbers = #tpu.dot_dimension_numbers<[1], [0], [0], [1], [0, 0, 1, 1], [], []>} : vector<16x64xbf16>, vector<64x128xbf16>, vector<16x128xf32> -> vector<16x128xf32>
    %248 = arith.addf %243, %247 : vector<16x128xf32>
    %249 = vector.extract_strided_slice %237 {offsets = [32, 0], sizes = [16, 64], strides = [1, 1]} : vector<48x64xbf16> to vector<16x64xbf16>
    %c2_147 = arith.constant 2 : index
    %c0_148 = arith.constant 0 : index
    %c0_149 = arith.constant 0 : index
    %250 = vector.load %arg3[%c2_147, %c0_148, %c0_149] : memref<3x64x128xbf16, #tpu.memory_space<vmem>>, vector<1x64x128xbf16>
    %251 = vector.shape_cast %250 : vector<1x64x128xbf16> to vector<64x128xbf16>
    %cst_150 = arith.constant dense<0.000000e+00> : vector<16x128xf32>
    %252 = tpu.matmul %249, %251, %cst_150 {dimension_numbers = #tpu.dot_dimension_numbers<[1], [0], [0], [1], [0, 0, 1, 1], [], []>} : vector<16x64xbf16>, vector<64x128xbf16>, vector<16x128xf32> -> vector<16x128xf32>
    %253 = arith.addf %248, %252 : vector<16x128xf32>
    %254 = arith.negf %253 : vector<16x128xf32>
    %255 = math.exp %254 : vector<16x128xf32>
    %cst_151 = arith.constant 1.000000e+00 : f32
    %256 = vector.broadcast %cst_151 : f32 to vector<16x128xf32>
    %257 = arith.addf %256, %255 : vector<16x128xf32>
    %258 = arith.divf %256, %257 : vector<16x128xf32>
    %259 = vector.extract_strided_slice %258 {offsets = [0, 0], sizes = [16, 64], strides = [1, 1]} : vector<16x128xf32> to vector<16x64xf32>
    %260 = vector.extract_strided_slice %258 {offsets = [0, 64], sizes = [16, 64], strides = [1, 1]} : vector<16x128xf32> to vector<16x64xf32>
    %261 = arith.mulf %260, %229 : vector<16x64xf32>
    %262 = arith.truncf %261 : vector<16x64xf32> to vector<16x64xbf16>
    %cst_152 = arith.constant dense<0.000000e+00> : vector<48x64xf32>
    %263 = tpu.matmul %3, %262, %cst_152 {dimension_numbers = #tpu.dot_dimension_numbers<[1], [0], [0], [1], [0, 0, 1, 1], [], []>} : vector<48x16xbf16>, vector<16x64xbf16>, vector<48x64xf32> -> vector<48x64xf32>
    %264 = arith.truncf %263 : vector<48x64xf32> to vector<48x64xbf16>
    %265 = vector.extract_strided_slice %234 {offsets = [0, 128], sizes = [16, 64], strides = [1, 1]} : vector<16x192xf32> to vector<16x64xf32>
    %266 = vector.extract_strided_slice %264 {offsets = [0, 0], sizes = [16, 64], strides = [1, 1]} : vector<48x64xbf16> to vector<16x64xbf16>
    %c0_153 = arith.constant 0 : index
    %c0_154 = arith.constant 0 : index
    %c0_155 = arith.constant 0 : index
    %267 = vector.load %arg4[%c0_153, %c0_154, %c0_155] : memref<3x64x64xbf16, #tpu.memory_space<vmem>>, vector<1x64x64xbf16>
    %268 = vector.shape_cast %267 : vector<1x64x64xbf16> to vector<64x64xbf16>
    %cst_156 = arith.constant dense<0.000000e+00> : vector<16x64xf32>
    %269 = tpu.matmul %266, %268, %cst_156 {dimension_numbers = #tpu.dot_dimension_numbers<[1], [0], [0], [1], [0, 0, 1, 1], [], []>} : vector<16x64xbf16>, vector<64x64xbf16>, vector<16x64xf32> -> vector<16x64xf32>
    %270 = arith.addf %265, %269 : vector<16x64xf32>
    %271 = vector.extract_strided_slice %264 {offsets = [16, 0], sizes = [16, 64], strides = [1, 1]} : vector<48x64xbf16> to vector<16x64xbf16>
    %c1_157 = arith.constant 1 : index
    %c0_158 = arith.constant 0 : index
    %c0_159 = arith.constant 0 : index
    %272 = vector.load %arg4[%c1_157, %c0_158, %c0_159] : memref<3x64x64xbf16, #tpu.memory_space<vmem>>, vector<1x64x64xbf16>
    %273 = vector.shape_cast %272 : vector<1x64x64xbf16> to vector<64x64xbf16>
    %cst_160 = arith.constant dense<0.000000e+00> : vector<16x64xf32>
    %274 = tpu.matmul %271, %273, %cst_160 {dimension_numbers = #tpu.dot_dimension_numbers<[1], [0], [0], [1], [0, 0, 1, 1], [], []>} : vector<16x64xbf16>, vector<64x64xbf16>, vector<16x64xf32> -> vector<16x64xf32>
    %275 = arith.addf %270, %274 : vector<16x64xf32>
    %276 = vector.extract_strided_slice %264 {offsets = [32, 0], sizes = [16, 64], strides = [1, 1]} : vector<48x64xbf16> to vector<16x64xbf16>
    %c2_161 = arith.constant 2 : index
    %c0_162 = arith.constant 0 : index
    %c0_163 = arith.constant 0 : index
    %277 = vector.load %arg4[%c2_161, %c0_162, %c0_163] : memref<3x64x64xbf16, #tpu.memory_space<vmem>>, vector<1x64x64xbf16>
    %278 = vector.shape_cast %277 : vector<1x64x64xbf16> to vector<64x64xbf16>
    %cst_164 = arith.constant dense<0.000000e+00> : vector<16x64xf32>
    %279 = tpu.matmul %276, %278, %cst_164 {dimension_numbers = #tpu.dot_dimension_numbers<[1], [0], [0], [1], [0, 0, 1, 1], [], []>} : vector<16x64xbf16>, vector<64x64xbf16>, vector<16x64xf32> -> vector<16x64xf32>
    %280 = arith.addf %275, %279 : vector<16x64xf32>
    %281 = math.tanh %280 : vector<16x64xf32>
    %282 = arith.mulf %259, %281 : vector<16x64xf32>
    %cst_165 = arith.constant 1.000000e+00 : f32
    %283 = vector.broadcast %cst_165 : f32 to vector<16x64xf32>
    %284 = arith.subf %283, %259 : vector<16x64xf32>
    %285 = arith.mulf %284, %229 : vector<16x64xf32>
    %286 = arith.addf %282, %285 : vector<16x64xf32>
    %c4_166 = arith.constant 4 : index
    %c0_167 = arith.constant 0 : index
    %c0_168 = arith.constant 0 : index
    %287 = vector.load %arg6[%c4_166, %c0_167, %c0_168] : memref<8x16x64xf32, #tpu.memory_space<vmem>>, vector<1x16x64xf32>
    %288 = vector.shape_cast %287 : vector<1x16x64xf32> to vector<16x64xf32>
    %289 = vector.shape_cast %286 : vector<16x64xf32> to vector<1x16x64xf32>
    tpu.vector_store %arg6[%c4_166, %c0_167, %c0_168], %289 {strides = array<i32>} : memref<8x16x64xf32, #tpu.memory_space<vmem>>, vector<1x16x64xf32>,
    %c5 = arith.constant 5 : index
    %c0_169 = arith.constant 0 : index
    %c0_170 = arith.constant 0 : index
    %290 = vector.load %arg1[%c5, %c0_169, %c0_170] : memref<8x16x192xf32, #tpu.memory_space<vmem>>, vector<1x16x192xf32>
    %291 = vector.shape_cast %290 : vector<1x16x192xf32> to vector<16x192xf32>
    %292 = arith.truncf %286 : vector<16x64xf32> to vector<16x64xbf16>
    %cst_171 = arith.constant dense<0.000000e+00> : vector<48x64xf32>
    %293 = tpu.matmul %3, %292, %cst_171 {dimension_numbers = #tpu.dot_dimension_numbers<[1], [0], [0], [1], [0, 0, 1, 1], [], []>} : vector<48x16xbf16>, vector<16x64xbf16>, vector<48x64xf32> -> vector<48x64xf32>
    %294 = arith.truncf %293 : vector<48x64xf32> to vector<48x64xbf16>
    %295 = vector.extract_strided_slice %291 {offsets = [0, 0], sizes = [16, 128], strides = [1, 1]} : vector<16x192xf32> to vector<16x128xf32>
    %296 = vector.extract_strided_slice %294 {offsets = [0, 0], sizes = [16, 64], strides = [1, 1]} : vector<48x64xbf16> to vector<16x64xbf16>
    %c0_172 = arith.constant 0 : index
    %c0_173 = arith.constant 0 : index
    %c0_174 = arith.constant 0 : index
    %297 = vector.load %arg3[%c0_172, %c0_173, %c0_174] : memref<3x64x128xbf16, #tpu.memory_space<vmem>>, vector<1x64x128xbf16>
    %298 = vector.shape_cast %297 : vector<1x64x128xbf16> to vector<64x128xbf16>
    %cst_175 = arith.constant dense<0.000000e+00> : vector<16x128xf32>
    %299 = tpu.matmul %296, %298, %cst_175 {dimension_numbers = #tpu.dot_dimension_numbers<[1], [0], [0], [1], [0, 0, 1, 1], [], []>} : vector<16x64xbf16>, vector<64x128xbf16>, vector<16x128xf32> -> vector<16x128xf32>
    %300 = arith.addf %295, %299 : vector<16x128xf32>
    %301 = vector.extract_strided_slice %294 {offsets = [16, 0], sizes = [16, 64], strides = [1, 1]} : vector<48x64xbf16> to vector<16x64xbf16>
    %c1_176 = arith.constant 1 : index
    %c0_177 = arith.constant 0 : index
    %c0_178 = arith.constant 0 : index
    %302 = vector.load %arg3[%c1_176, %c0_177, %c0_178] : memref<3x64x128xbf16, #tpu.memory_space<vmem>>, vector<1x64x128xbf16>
    %303 = vector.shape_cast %302 : vector<1x64x128xbf16> to vector<64x128xbf16>
    %cst_179 = arith.constant dense<0.000000e+00> : vector<16x128xf32>
    %304 = tpu.matmul %301, %303, %cst_179 {dimension_numbers = #tpu.dot_dimension_numbers<[1], [0], [0], [1], [0, 0, 1, 1], [], []>} : vector<16x64xbf16>, vector<64x128xbf16>, vector<16x128xf32> -> vector<16x128xf32>
    %305 = arith.addf %300, %304 : vector<16x128xf32>
    %306 = vector.extract_strided_slice %294 {offsets = [32, 0], sizes = [16, 64], strides = [1, 1]} : vector<48x64xbf16> to vector<16x64xbf16>
    %c2_180 = arith.constant 2 : index
    %c0_181 = arith.constant 0 : index
    %c0_182 = arith.constant 0 : index
    %307 = vector.load %arg3[%c2_180, %c0_181, %c0_182] : memref<3x64x128xbf16, #tpu.memory_space<vmem>>, vector<1x64x128xbf16>
    %308 = vector.shape_cast %307 : vector<1x64x128xbf16> to vector<64x128xbf16>
    %cst_183 = arith.constant dense<0.000000e+00> : vector<16x128xf32>
    %309 = tpu.matmul %306, %308, %cst_183 {dimension_numbers = #tpu.dot_dimension_numbers<[1], [0], [0], [1], [0, 0, 1, 1], [], []>} : vector<16x64xbf16>, vector<64x128xbf16>, vector<16x128xf32> -> vector<16x128xf32>
    %310 = arith.addf %305, %309 : vector<16x128xf32>
    %311 = arith.negf %310 : vector<16x128xf32>
    %312 = math.exp %311 : vector<16x128xf32>
    %cst_184 = arith.constant 1.000000e+00 : f32
    %313 = vector.broadcast %cst_184 : f32 to vector<16x128xf32>
    %314 = arith.addf %313, %312 : vector<16x128xf32>
    %315 = arith.divf %313, %314 : vector<16x128xf32>
    %316 = vector.extract_strided_slice %315 {offsets = [0, 0], sizes = [16, 64], strides = [1, 1]} : vector<16x128xf32> to vector<16x64xf32>
    %317 = vector.extract_strided_slice %315 {offsets = [0, 64], sizes = [16, 64], strides = [1, 1]} : vector<16x128xf32> to vector<16x64xf32>
    %318 = arith.mulf %317, %286 : vector<16x64xf32>
    %319 = arith.truncf %318 : vector<16x64xf32> to vector<16x64xbf16>
    %cst_185 = arith.constant dense<0.000000e+00> : vector<48x64xf32>
    %320 = tpu.matmul %3, %319, %cst_185 {dimension_numbers = #tpu.dot_dimension_numbers<[1], [0], [0], [1], [0, 0, 1, 1], [], []>} : vector<48x16xbf16>, vector<16x64xbf16>, vector<48x64xf32> -> vector<48x64xf32>
    %321 = arith.truncf %320 : vector<48x64xf32> to vector<48x64xbf16>
    %322 = vector.extract_strided_slice %291 {offsets = [0, 128], sizes = [16, 64], strides = [1, 1]} : vector<16x192xf32> to vector<16x64xf32>
    %323 = vector.extract_strided_slice %321 {offsets = [0, 0], sizes = [16, 64], strides = [1, 1]} : vector<48x64xbf16> to vector<16x64xbf16>
    %c0_186 = arith.constant 0 : index
    %c0_187 = arith.constant 0 : index
    %c0_188 = arith.constant 0 : index
    %324 = vector.load %arg4[%c0_186, %c0_187, %c0_188] : memref<3x64x64xbf16, #tpu.memory_space<vmem>>, vector<1x64x64xbf16>
    %325 = vector.shape_cast %324 : vector<1x64x64xbf16> to vector<64x64xbf16>
    %cst_189 = arith.constant dense<0.000000e+00> : vector<16x64xf32>
    %326 = tpu.matmul %323, %325, %cst_189 {dimension_numbers = #tpu.dot_dimension_numbers<[1], [0], [0], [1], [0, 0, 1, 1], [], []>} : vector<16x64xbf16>, vector<64x64xbf16>, vector<16x64xf32> -> vector<16x64xf32>
    %327 = arith.addf %322, %326 : vector<16x64xf32>
    %328 = vector.extract_strided_slice %321 {offsets = [16, 0], sizes = [16, 64], strides = [1, 1]} : vector<48x64xbf16> to vector<16x64xbf16>
    %c1_190 = arith.constant 1 : index
    %c0_191 = arith.constant 0 : index
    %c0_192 = arith.constant 0 : index
    %329 = vector.load %arg4[%c1_190, %c0_191, %c0_192] : memref<3x64x64xbf16, #tpu.memory_space<vmem>>, vector<1x64x64xbf16>
    %330 = vector.shape_cast %329 : vector<1x64x64xbf16> to vector<64x64xbf16>
    %cst_193 = arith.constant dense<0.000000e+00> : vector<16x64xf32>
    %331 = tpu.matmul %328, %330, %cst_193 {dimension_numbers = #tpu.dot_dimension_numbers<[1], [0], [0], [1], [0, 0, 1, 1], [], []>} : vector<16x64xbf16>, vector<64x64xbf16>, vector<16x64xf32> -> vector<16x64xf32>
    %332 = arith.addf %327, %331 : vector<16x64xf32>
    %333 = vector.extract_strided_slice %321 {offsets = [32, 0], sizes = [16, 64], strides = [1, 1]} : vector<48x64xbf16> to vector<16x64xbf16>
    %c2_194 = arith.constant 2 : index
    %c0_195 = arith.constant 0 : index
    %c0_196 = arith.constant 0 : index
    %334 = vector.load %arg4[%c2_194, %c0_195, %c0_196] : memref<3x64x64xbf16, #tpu.memory_space<vmem>>, vector<1x64x64xbf16>
    %335 = vector.shape_cast %334 : vector<1x64x64xbf16> to vector<64x64xbf16>
    %cst_197 = arith.constant dense<0.000000e+00> : vector<16x64xf32>
    %336 = tpu.matmul %333, %335, %cst_197 {dimension_numbers = #tpu.dot_dimension_numbers<[1], [0], [0], [1], [0, 0, 1, 1], [], []>} : vector<16x64xbf16>, vector<64x64xbf16>, vector<16x64xf32> -> vector<16x64xf32>
    %337 = arith.addf %332, %336 : vector<16x64xf32>
    %338 = math.tanh %337 : vector<16x64xf32>
    %339 = arith.mulf %316, %338 : vector<16x64xf32>
    %cst_198 = arith.constant 1.000000e+00 : f32
    %340 = vector.broadcast %cst_198 : f32 to vector<16x64xf32>
    %341 = arith.subf %340, %316 : vector<16x64xf32>
    %342 = arith.mulf %341, %286 : vector<16x64xf32>
    %343 = arith.addf %339, %342 : vector<16x64xf32>
    %c5_199 = arith.constant 5 : index
    %c0_200 = arith.constant 0 : index
    %c0_201 = arith.constant 0 : index
    %344 = vector.load %arg6[%c5_199, %c0_200, %c0_201] : memref<8x16x64xf32, #tpu.memory_space<vmem>>, vector<1x16x64xf32>
    %345 = vector.shape_cast %344 : vector<1x16x64xf32> to vector<16x64xf32>
    %346 = vector.shape_cast %343 : vector<16x64xf32> to vector<1x16x64xf32>
    tpu.vector_store %arg6[%c5_199, %c0_200, %c0_201], %346 {strides = array<i32>} : memref<8x16x64xf32, #tpu.memory_space<vmem>>, vector<1x16x64xf32>,
    %c6 = arith.constant 6 : index
    %c0_202 = arith.constant 0 : index
    %c0_203 = arith.constant 0 : index
    %347 = vector.load %arg1[%c6, %c0_202, %c0_203] : memref<8x16x192xf32, #tpu.memory_space<vmem>>, vector<1x16x192xf32>
    %348 = vector.shape_cast %347 : vector<1x16x192xf32> to vector<16x192xf32>
    %349 = arith.truncf %343 : vector<16x64xf32> to vector<16x64xbf16>
    %cst_204 = arith.constant dense<0.000000e+00> : vector<48x64xf32>
    %350 = tpu.matmul %3, %349, %cst_204 {dimension_numbers = #tpu.dot_dimension_numbers<[1], [0], [0], [1], [0, 0, 1, 1], [], []>} : vector<48x16xbf16>, vector<16x64xbf16>, vector<48x64xf32> -> vector<48x64xf32>
    %351 = arith.truncf %350 : vector<48x64xf32> to vector<48x64xbf16>
    %352 = vector.extract_strided_slice %348 {offsets = [0, 0], sizes = [16, 128], strides = [1, 1]} : vector<16x192xf32> to vector<16x128xf32>
    %353 = vector.extract_strided_slice %351 {offsets = [0, 0], sizes = [16, 64], strides = [1, 1]} : vector<48x64xbf16> to vector<16x64xbf16>
    %c0_205 = arith.constant 0 : index
    %c0_206 = arith.constant 0 : index
    %c0_207 = arith.constant 0 : index
    %354 = vector.load %arg3[%c0_205, %c0_206, %c0_207] : memref<3x64x128xbf16, #tpu.memory_space<vmem>>, vector<1x64x128xbf16>
    %355 = vector.shape_cast %354 : vector<1x64x128xbf16> to vector<64x128xbf16>
    %cst_208 = arith.constant dense<0.000000e+00> : vector<16x128xf32>
    %356 = tpu.matmul %353, %355, %cst_208 {dimension_numbers = #tpu.dot_dimension_numbers<[1], [0], [0], [1], [0, 0, 1, 1], [], []>} : vector<16x64xbf16>, vector<64x128xbf16>, vector<16x128xf32> -> vector<16x128xf32>
    %357 = arith.addf %352, %356 : vector<16x128xf32>
    %358 = vector.extract_strided_slice %351 {offsets = [16, 0], sizes = [16, 64], strides = [1, 1]} : vector<48x64xbf16> to vector<16x64xbf16>
    %c1_209 = arith.constant 1 : index
    %c0_210 = arith.constant 0 : index
    %c0_211 = arith.constant 0 : index
    %359 = vector.load %arg3[%c1_209, %c0_210, %c0_211] : memref<3x64x128xbf16, #tpu.memory_space<vmem>>, vector<1x64x128xbf16>
    %360 = vector.shape_cast %359 : vector<1x64x128xbf16> to vector<64x128xbf16>
    %cst_212 = arith.constant dense<0.000000e+00> : vector<16x128xf32>
    %361 = tpu.matmul %358, %360, %cst_212 {dimension_numbers = #tpu.dot_dimension_numbers<[1], [0], [0], [1], [0, 0, 1, 1], [], []>} : vector<16x64xbf16>, vector<64x128xbf16>, vector<16x128xf32> -> vector<16x128xf32>
    %362 = arith.addf %357, %361 : vector<16x128xf32>
    %363 = vector.extract_strided_slice %351 {offsets = [32, 0], sizes = [16, 64], strides = [1, 1]} : vector<48x64xbf16> to vector<16x64xbf16>
    %c2_213 = arith.constant 2 : index
    %c0_214 = arith.constant 0 : index
    %c0_215 = arith.constant 0 : index
    %364 = vector.load %arg3[%c2_213, %c0_214, %c0_215] : memref<3x64x128xbf16, #tpu.memory_space<vmem>>, vector<1x64x128xbf16>
    %365 = vector.shape_cast %364 : vector<1x64x128xbf16> to vector<64x128xbf16>
    %cst_216 = arith.constant dense<0.000000e+00> : vector<16x128xf32>
    %366 = tpu.matmul %363, %365, %cst_216 {dimension_numbers = #tpu.dot_dimension_numbers<[1], [0], [0], [1], [0, 0, 1, 1], [], []>} : vector<16x64xbf16>, vector<64x128xbf16>, vector<16x128xf32> -> vector<16x128xf32>
    %367 = arith.addf %362, %366 : vector<16x128xf32>
    %368 = arith.negf %367 : vector<16x128xf32>
    %369 = math.exp %368 : vector<16x128xf32>
    %cst_217 = arith.constant 1.000000e+00 : f32
    %370 = vector.broadcast %cst_217 : f32 to vector<16x128xf32>
    %371 = arith.addf %370, %369 : vector<16x128xf32>
    %372 = arith.divf %370, %371 : vector<16x128xf32>
    %373 = vector.extract_strided_slice %372 {offsets = [0, 0], sizes = [16, 64], strides = [1, 1]} : vector<16x128xf32> to vector<16x64xf32>
    %374 = vector.extract_strided_slice %372 {offsets = [0, 64], sizes = [16, 64], strides = [1, 1]} : vector<16x128xf32> to vector<16x64xf32>
    %375 = arith.mulf %374, %343 : vector<16x64xf32>
    %376 = arith.truncf %375 : vector<16x64xf32> to vector<16x64xbf16>
    %cst_218 = arith.constant dense<0.000000e+00> : vector<48x64xf32>
    %377 = tpu.matmul %3, %376, %cst_218 {dimension_numbers = #tpu.dot_dimension_numbers<[1], [0], [0], [1], [0, 0, 1, 1], [], []>} : vector<48x16xbf16>, vector<16x64xbf16>, vector<48x64xf32> -> vector<48x64xf32>
    %378 = arith.truncf %377 : vector<48x64xf32> to vector<48x64xbf16>
    %379 = vector.extract_strided_slice %348 {offsets = [0, 128], sizes = [16, 64], strides = [1, 1]} : vector<16x192xf32> to vector<16x64xf32>
    %380 = vector.extract_strided_slice %378 {offsets = [0, 0], sizes = [16, 64], strides = [1, 1]} : vector<48x64xbf16> to vector<16x64xbf16>
    %c0_219 = arith.constant 0 : index
    %c0_220 = arith.constant 0 : index
    %c0_221 = arith.constant 0 : index
    %381 = vector.load %arg4[%c0_219, %c0_220, %c0_221] : memref<3x64x64xbf16, #tpu.memory_space<vmem>>, vector<1x64x64xbf16>
    %382 = vector.shape_cast %381 : vector<1x64x64xbf16> to vector<64x64xbf16>
    %cst_222 = arith.constant dense<0.000000e+00> : vector<16x64xf32>
    %383 = tpu.matmul %380, %382, %cst_222 {dimension_numbers = #tpu.dot_dimension_numbers<[1], [0], [0], [1], [0, 0, 1, 1], [], []>} : vector<16x64xbf16>, vector<64x64xbf16>, vector<16x64xf32> -> vector<16x64xf32>
    %384 = arith.addf %379, %383 : vector<16x64xf32>
    %385 = vector.extract_strided_slice %378 {offsets = [16, 0], sizes = [16, 64], strides = [1, 1]} : vector<48x64xbf16> to vector<16x64xbf16>
    %c1_223 = arith.constant 1 : index
    %c0_224 = arith.constant 0 : index
    %c0_225 = arith.constant 0 : index
    %386 = vector.load %arg4[%c1_223, %c0_224, %c0_225] : memref<3x64x64xbf16, #tpu.memory_space<vmem>>, vector<1x64x64xbf16>
    %387 = vector.shape_cast %386 : vector<1x64x64xbf16> to vector<64x64xbf16>
    %cst_226 = arith.constant dense<0.000000e+00> : vector<16x64xf32>
    %388 = tpu.matmul %385, %387, %cst_226 {dimension_numbers = #tpu.dot_dimension_numbers<[1], [0], [0], [1], [0, 0, 1, 1], [], []>} : vector<16x64xbf16>, vector<64x64xbf16>, vector<16x64xf32> -> vector<16x64xf32>
    %389 = arith.addf %384, %388 : vector<16x64xf32>
    %390 = vector.extract_strided_slice %378 {offsets = [32, 0], sizes = [16, 64], strides = [1, 1]} : vector<48x64xbf16> to vector<16x64xbf16>
    %c2_227 = arith.constant 2 : index
    %c0_228 = arith.constant 0 : index
    %c0_229 = arith.constant 0 : index
    %391 = vector.load %arg4[%c2_227, %c0_228, %c0_229] : memref<3x64x64xbf16, #tpu.memory_space<vmem>>, vector<1x64x64xbf16>
    %392 = vector.shape_cast %391 : vector<1x64x64xbf16> to vector<64x64xbf16>
    %cst_230 = arith.constant dense<0.000000e+00> : vector<16x64xf32>
    %393 = tpu.matmul %390, %392, %cst_230 {dimension_numbers = #tpu.dot_dimension_numbers<[1], [0], [0], [1], [0, 0, 1, 1], [], []>} : vector<16x64xbf16>, vector<64x64xbf16>, vector<16x64xf32> -> vector<16x64xf32>
    %394 = arith.addf %389, %393 : vector<16x64xf32>
    %395 = math.tanh %394 : vector<16x64xf32>
    %396 = arith.mulf %373, %395 : vector<16x64xf32>
    %cst_231 = arith.constant 1.000000e+00 : f32
    %397 = vector.broadcast %cst_231 : f32 to vector<16x64xf32>
    %398 = arith.subf %397, %373 : vector<16x64xf32>
    %399 = arith.mulf %398, %343 : vector<16x64xf32>
    %400 = arith.addf %396, %399 : vector<16x64xf32>
    %c6_232 = arith.constant 6 : index
    %c0_233 = arith.constant 0 : index
    %c0_234 = arith.constant 0 : index
    %401 = vector.load %arg6[%c6_232, %c0_233, %c0_234] : memref<8x16x64xf32, #tpu.memory_space<vmem>>, vector<1x16x64xf32>
    %402 = vector.shape_cast %401 : vector<1x16x64xf32> to vector<16x64xf32>
    %403 = vector.shape_cast %400 : vector<16x64xf32> to vector<1x16x64xf32>
    tpu.vector_store %arg6[%c6_232, %c0_233, %c0_234], %403 {strides = array<i32>} : memref<8x16x64xf32, #tpu.memory_space<vmem>>, vector<1x16x64xf32>,
    %c7 = arith.constant 7 : index
    %c0_235 = arith.constant 0 : index
    %c0_236 = arith.constant 0 : index
    %404 = vector.load %arg1[%c7, %c0_235, %c0_236] : memref<8x16x192xf32, #tpu.memory_space<vmem>>, vector<1x16x192xf32>
    %405 = vector.shape_cast %404 : vector<1x16x192xf32> to vector<16x192xf32>
    %406 = arith.truncf %400 : vector<16x64xf32> to vector<16x64xbf16>
    %cst_237 = arith.constant dense<0.000000e+00> : vector<48x64xf32>
    %407 = tpu.matmul %3, %406, %cst_237 {dimension_numbers = #tpu.dot_dimension_numbers<[1], [0], [0], [1], [0, 0, 1, 1], [], []>} : vector<48x16xbf16>, vector<16x64xbf16>, vector<48x64xf32> -> vector<48x64xf32>
    %408 = arith.truncf %407 : vector<48x64xf32> to vector<48x64xbf16>
    %409 = vector.extract_strided_slice %405 {offsets = [0, 0], sizes = [16, 128], strides = [1, 1]} : vector<16x192xf32> to vector<16x128xf32>
    %410 = vector.extract_strided_slice %408 {offsets = [0, 0], sizes = [16, 64], strides = [1, 1]} : vector<48x64xbf16> to vector<16x64xbf16>
    %c0_238 = arith.constant 0 : index
    %c0_239 = arith.constant 0 : index
    %c0_240 = arith.constant 0 : index
    %411 = vector.load %arg3[%c0_238, %c0_239, %c0_240] : memref<3x64x128xbf16, #tpu.memory_space<vmem>>, vector<1x64x128xbf16>
    %412 = vector.shape_cast %411 : vector<1x64x128xbf16> to vector<64x128xbf16>
    %cst_241 = arith.constant dense<0.000000e+00> : vector<16x128xf32>
    %413 = tpu.matmul %410, %412, %cst_241 {dimension_numbers = #tpu.dot_dimension_numbers<[1], [0], [0], [1], [0, 0, 1, 1], [], []>} : vector<16x64xbf16>, vector<64x128xbf16>, vector<16x128xf32> -> vector<16x128xf32>
    %414 = arith.addf %409, %413 : vector<16x128xf32>
    %415 = vector.extract_strided_slice %408 {offsets = [16, 0], sizes = [16, 64], strides = [1, 1]} : vector<48x64xbf16> to vector<16x64xbf16>
    %c1_242 = arith.constant 1 : index
    %c0_243 = arith.constant 0 : index
    %c0_244 = arith.constant 0 : index
    %416 = vector.load %arg3[%c1_242, %c0_243, %c0_244] : memref<3x64x128xbf16, #tpu.memory_space<vmem>>, vector<1x64x128xbf16>
    %417 = vector.shape_cast %416 : vector<1x64x128xbf16> to vector<64x128xbf16>
    %cst_245 = arith.constant dense<0.000000e+00> : vector<16x128xf32>
    %418 = tpu.matmul %415, %417, %cst_245 {dimension_numbers = #tpu.dot_dimension_numbers<[1], [0], [0], [1], [0, 0, 1, 1], [], []>} : vector<16x64xbf16>, vector<64x128xbf16>, vector<16x128xf32> -> vector<16x128xf32>
    %419 = arith.addf %414, %418 : vector<16x128xf32>
    %420 = vector.extract_strided_slice %408 {offsets = [32, 0], sizes = [16, 64], strides = [1, 1]} : vector<48x64xbf16> to vector<16x64xbf16>
    %c2_246 = arith.constant 2 : index
    %c0_247 = arith.constant 0 : index
    %c0_248 = arith.constant 0 : index
    %421 = vector.load %arg3[%c2_246, %c0_247, %c0_248] : memref<3x64x128xbf16, #tpu.memory_space<vmem>>, vector<1x64x128xbf16>
    %422 = vector.shape_cast %421 : vector<1x64x128xbf16> to vector<64x128xbf16>
    %cst_249 = arith.constant dense<0.000000e+00> : vector<16x128xf32>
    %423 = tpu.matmul %420, %422, %cst_249 {dimension_numbers = #tpu.dot_dimension_numbers<[1], [0], [0], [1], [0, 0, 1, 1], [], []>} : vector<16x64xbf16>, vector<64x128xbf16>, vector<16x128xf32> -> vector<16x128xf32>
    %424 = arith.addf %419, %423 : vector<16x128xf32>
    %425 = arith.negf %424 : vector<16x128xf32>
    %426 = math.exp %425 : vector<16x128xf32>
    %cst_250 = arith.constant 1.000000e+00 : f32
    %427 = vector.broadcast %cst_250 : f32 to vector<16x128xf32>
    %428 = arith.addf %427, %426 : vector<16x128xf32>
    %429 = arith.divf %427, %428 : vector<16x128xf32>
    %430 = vector.extract_strided_slice %429 {offsets = [0, 0], sizes = [16, 64], strides = [1, 1]} : vector<16x128xf32> to vector<16x64xf32>
    %431 = vector.extract_strided_slice %429 {offsets = [0, 64], sizes = [16, 64], strides = [1, 1]} : vector<16x128xf32> to vector<16x64xf32>
    %432 = arith.mulf %431, %400 : vector<16x64xf32>
    %433 = arith.truncf %432 : vector<16x64xf32> to vector<16x64xbf16>
    %cst_251 = arith.constant dense<0.000000e+00> : vector<48x64xf32>
    %434 = tpu.matmul %3, %433, %cst_251 {dimension_numbers = #tpu.dot_dimension_numbers<[1], [0], [0], [1], [0, 0, 1, 1], [], []>} : vector<48x16xbf16>, vector<16x64xbf16>, vector<48x64xf32> -> vector<48x64xf32>
    %435 = arith.truncf %434 : vector<48x64xf32> to vector<48x64xbf16>
    %436 = vector.extract_strided_slice %405 {offsets = [0, 128], sizes = [16, 64], strides = [1, 1]} : vector<16x192xf32> to vector<16x64xf32>
    %437 = vector.extract_strided_slice %435 {offsets = [0, 0], sizes = [16, 64], strides = [1, 1]} : vector<48x64xbf16> to vector<16x64xbf16>
    %c0_252 = arith.constant 0 : index
    %c0_253 = arith.constant 0 : index
    %c0_254 = arith.constant 0 : index
    %438 = vector.load %arg4[%c0_252, %c0_253, %c0_254] : memref<3x64x64xbf16, #tpu.memory_space<vmem>>, vector<1x64x64xbf16>
    %439 = vector.shape_cast %438 : vector<1x64x64xbf16> to vector<64x64xbf16>
    %cst_255 = arith.constant dense<0.000000e+00> : vector<16x64xf32>
    %440 = tpu.matmul %437, %439, %cst_255 {dimension_numbers = #tpu.dot_dimension_numbers<[1], [0], [0], [1], [0, 0, 1, 1], [], []>} : vector<16x64xbf16>, vector<64x64xbf16>, vector<16x64xf32> -> vector<16x64xf32>
    %441 = arith.addf %436, %440 : vector<16x64xf32>
    %442 = vector.extract_strided_slice %435 {offsets = [16, 0], sizes = [16, 64], strides = [1, 1]} : vector<48x64xbf16> to vector<16x64xbf16>
    %c1_256 = arith.constant 1 : index
    %c0_257 = arith.constant 0 : index
    %c0_258 = arith.constant 0 : index
    %443 = vector.load %arg4[%c1_256, %c0_257, %c0_258] : memref<3x64x64xbf16, #tpu.memory_space<vmem>>, vector<1x64x64xbf16>
    %444 = vector.shape_cast %443 : vector<1x64x64xbf16> to vector<64x64xbf16>
    %cst_259 = arith.constant dense<0.000000e+00> : vector<16x64xf32>
    %445 = tpu.matmul %442, %444, %cst_259 {dimension_numbers = #tpu.dot_dimension_numbers<[1], [0], [0], [1], [0, 0, 1, 1], [], []>} : vector<16x64xbf16>, vector<64x64xbf16>, vector<16x64xf32> -> vector<16x64xf32>
    %446 = arith.addf %441, %445 : vector<16x64xf32>
    %447 = vector.extract_strided_slice %435 {offsets = [32, 0], sizes = [16, 64], strides = [1, 1]} : vector<48x64xbf16> to vector<16x64xbf16>
    %c2_260 = arith.constant 2 : index
    %c0_261 = arith.constant 0 : index
    %c0_262 = arith.constant 0 : index
    %448 = vector.load %arg4[%c2_260, %c0_261, %c0_262] : memref<3x64x64xbf16, #tpu.memory_space<vmem>>, vector<1x64x64xbf16>
    %449 = vector.shape_cast %448 : vector<1x64x64xbf16> to vector<64x64xbf16>
    %cst_263 = arith.constant dense<0.000000e+00> : vector<16x64xf32>
    %450 = tpu.matmul %447, %449, %cst_263 {dimension_numbers = #tpu.dot_dimension_numbers<[1], [0], [0], [1], [0, 0, 1, 1], [], []>} : vector<16x64xbf16>, vector<64x64xbf16>, vector<16x64xf32> -> vector<16x64xf32>
    %451 = arith.addf %446, %450 : vector<16x64xf32>
    %452 = math.tanh %451 : vector<16x64xf32>
    %453 = arith.mulf %430, %452 : vector<16x64xf32>
    %cst_264 = arith.constant 1.000000e+00 : f32
    %454 = vector.broadcast %cst_264 : f32 to vector<16x64xf32>
    %455 = arith.subf %454, %430 : vector<16x64xf32>
    %456 = arith.mulf %455, %400 : vector<16x64xf32>
    %457 = arith.addf %453, %456 : vector<16x64xf32>
    %c7_265 = arith.constant 7 : index
    %c0_266 = arith.constant 0 : index
    %c0_267 = arith.constant 0 : index
    %458 = vector.load %arg6[%c7_265, %c0_266, %c0_267] : memref<8x16x64xf32, #tpu.memory_space<vmem>>, vector<1x16x64xf32>
    %459 = vector.shape_cast %458 : vector<1x16x64xf32> to vector<16x64xf32>
    %460 = vector.shape_cast %457 : vector<16x64xf32> to vector<1x16x64xf32>
    tpu.vector_store %arg6[%c7_265, %c0_266, %c0_267], %460 {strides = array<i32>} : memref<8x16x64xf32, #tpu.memory_space<vmem>>, vector<1x16x64xf32>,
    %c0_268 = arith.constant 0 : index
    %c0_269 = arith.constant 0 : index
    %461 = vector.load %arg7[%c0_268, %c0_269] : memref<16x64xf32, #tpu.memory_space<vmem>>, vector<16x64xf32>
    tpu.vector_store %arg7[%c0_268, %c0_269], %457 {strides = array<i32>} : memref<16x64xf32, #tpu.memory_space<vmem>>, vector<16x64xf32>,
    return
  }
  func.func @transform_0(%arg0: i32) -> (i32, i32, i32) {
    %c0_i32 = arith.constant 0 : i32
    %c0_i32_0 = arith.constant 0 : i32
    %c0_i32_1 = arith.constant 0 : i32
    return %arg0, %c0_i32, %c0_i32_0 : i32, i32, i32
  }
  func.func @transform_1(%arg0: i32) -> (i32, i32) {
    %c0_i32 = arith.constant 0 : i32
    %c0_i32_0 = arith.constant 0 : i32
    %c0_i32_1 = arith.constant 0 : i32
    return %c0_i32, %c0_i32_0 : i32, i32
  }
  func.func @transform_2(%arg0: i32) -> (i32, i32, i32) {
    %c0_i32 = arith.constant 0 : i32
    %c0_i32_0 = arith.constant 0 : i32
    %c0_i32_1 = arith.constant 0 : i32
    %c0_i32_2 = arith.constant 0 : i32
    return %c0_i32, %c0_i32_0, %c0_i32_1 : i32, i32, i32
  }
  func.func @transform_3(%arg0: i32) -> (i32, i32, i32) {
    %c0_i32 = arith.constant 0 : i32
    %c0_i32_0 = arith.constant 0 : i32
    %c0_i32_1 = arith.constant 0 : i32
    %c0_i32_2 = arith.constant 0 : i32
    return %c0_i32, %c0_i32_0, %c0_i32_1 : i32, i32, i32
  }
  func.func @transform_4(%arg0: i32) -> (i32, i32) {
    %c0_i32 = arith.constant 0 : i32
    %c0_i32_0 = arith.constant 0 : i32
    %c0_i32_1 = arith.constant 0 : i32
    return %c0_i32, %c0_i32_0 : i32, i32
  }
  func.func @transform_5(%arg0: i32) -> (i32, i32, i32) {
    %c0_i32 = arith.constant 0 : i32
    %c0_i32_0 = arith.constant 0 : i32
    %c0_i32_1 = arith.constant 0 : i32
    return %arg0, %c0_i32, %c0_i32_0 : i32, i32, i32
  }
}

module attributes {stable_mosaic.version = 11 : i64} {
  func.func @kernel(%arg0: i32, %arg1: memref<4x16x64xf32, #tpu.memory_space<vmem>>, %arg2: memref<48x16xbf16, #tpu.memory_space<vmem>>, %arg3: memref<3x64x192xbf16, #tpu.memory_space<vmem>>, %arg4: memref<1x192xf32, #tpu.memory_space<vmem>>, %arg5: memref<4x16x192xf32, #tpu.memory_space<vmem>>) attributes {dimension_semantics = [#tpu.dimension_semantics<parallel>], iteration_bounds = array<i64: 2>, scalar_prefetch = 0 : i64, scratch_operands = 0 : i64, tpu.core_type = #tpu.core_type<tc>, window_params = [{transform_indices = @transform_0, window_bounds = array<i64: 4, 16, 64>}, {pipeline_mode = #tpu.pipeline_mode<synchronous>, transform_indices = @transform_1, window_bounds = array<i64: 48, 16>}, {pipeline_mode = #tpu.pipeline_mode<synchronous>, transform_indices = @transform_2, window_bounds = array<i64: 3, 64, 192>}, {pipeline_mode = #tpu.pipeline_mode<synchronous>, transform_indices = @transform_3, window_bounds = array<i64: 1, 192>}, {transform_indices = @transform_4, window_bounds = array<i64: 4, 16, 192>}]} {
    %c0 = arith.constant 0 : index
    %c0_0 = arith.constant 0 : index
    %0 = vector.load %arg2[%c0, %c0_0] : memref<48x16xbf16, #tpu.memory_space<vmem>>, vector<48x16xbf16>
    %c0_1 = arith.constant 0 : index
    %c0_2 = arith.constant 0 : index
    %1 = vector.load %arg4[%c0_1, %c0_2] : memref<1x192xf32, #tpu.memory_space<vmem>>, vector<1x192xf32>
    %2 = vector.shape_cast %1 : vector<1x192xf32> to vector<1x192xf32>
    %3 = vector.broadcast %2 : vector<1x192xf32> to vector<16x192xf32>
    %c0_3 = arith.constant 0 : index
    %c0_4 = arith.constant 0 : index
    %c0_5 = arith.constant 0 : index
    %4 = vector.load %arg1[%c0_3, %c0_4, %c0_5] : memref<4x16x64xf32, #tpu.memory_space<vmem>>, vector<1x16x64xf32>
    %5 = vector.shape_cast %4 : vector<1x16x64xf32> to vector<16x64xf32>
    %6 = arith.truncf %5 : vector<16x64xf32> to vector<16x64xbf16>
    %cst = arith.constant dense<0.000000e+00> : vector<48x64xf32>
    %7 = tpu.matmul %0, %6, %cst {dimension_numbers = #tpu.dot_dimension_numbers<[1], [0], [0], [1], [0, 0, 1, 1], [], []>} : vector<48x16xbf16>, vector<16x64xbf16>, vector<48x64xf32> -> vector<48x64xf32>
    %8 = arith.truncf %7 : vector<48x64xf32> to vector<48x64xbf16>
    %9 = vector.extract_strided_slice %8 {offsets = [0, 0], sizes = [16, 64], strides = [1, 1]} : vector<48x64xbf16> to vector<16x64xbf16>
    %c0_6 = arith.constant 0 : index
    %c0_7 = arith.constant 0 : index
    %c0_8 = arith.constant 0 : index
    %10 = vector.load %arg3[%c0_6, %c0_7, %c0_8] : memref<3x64x192xbf16, #tpu.memory_space<vmem>>, vector<1x64x192xbf16>
    %11 = vector.shape_cast %10 : vector<1x64x192xbf16> to vector<64x192xbf16>
    %cst_9 = arith.constant dense<0.000000e+00> : vector<16x192xf32>
    %12 = tpu.matmul %9, %11, %cst_9 {dimension_numbers = #tpu.dot_dimension_numbers<[1], [0], [0], [1], [0, 0, 1, 1], [], []>} : vector<16x64xbf16>, vector<64x192xbf16>, vector<16x192xf32> -> vector<16x192xf32>
    %13 = arith.addf %3, %12 : vector<16x192xf32>
    %14 = vector.extract_strided_slice %8 {offsets = [16, 0], sizes = [16, 64], strides = [1, 1]} : vector<48x64xbf16> to vector<16x64xbf16>
    %c1 = arith.constant 1 : index
    %c0_10 = arith.constant 0 : index
    %c0_11 = arith.constant 0 : index
    %15 = vector.load %arg3[%c1, %c0_10, %c0_11] : memref<3x64x192xbf16, #tpu.memory_space<vmem>>, vector<1x64x192xbf16>
    %16 = vector.shape_cast %15 : vector<1x64x192xbf16> to vector<64x192xbf16>
    %cst_12 = arith.constant dense<0.000000e+00> : vector<16x192xf32>
    %17 = tpu.matmul %14, %16, %cst_12 {dimension_numbers = #tpu.dot_dimension_numbers<[1], [0], [0], [1], [0, 0, 1, 1], [], []>} : vector<16x64xbf16>, vector<64x192xbf16>, vector<16x192xf32> -> vector<16x192xf32>
    %18 = arith.addf %13, %17 : vector<16x192xf32>
    %19 = vector.extract_strided_slice %8 {offsets = [32, 0], sizes = [16, 64], strides = [1, 1]} : vector<48x64xbf16> to vector<16x64xbf16>
    %c2 = arith.constant 2 : index
    %c0_13 = arith.constant 0 : index
    %c0_14 = arith.constant 0 : index
    %20 = vector.load %arg3[%c2, %c0_13, %c0_14] : memref<3x64x192xbf16, #tpu.memory_space<vmem>>, vector<1x64x192xbf16>
    %21 = vector.shape_cast %20 : vector<1x64x192xbf16> to vector<64x192xbf16>
    %cst_15 = arith.constant dense<0.000000e+00> : vector<16x192xf32>
    %22 = tpu.matmul %19, %21, %cst_15 {dimension_numbers = #tpu.dot_dimension_numbers<[1], [0], [0], [1], [0, 0, 1, 1], [], []>} : vector<16x64xbf16>, vector<64x192xbf16>, vector<16x192xf32> -> vector<16x192xf32>
    %23 = arith.addf %18, %22 : vector<16x192xf32>
    %c0_16 = arith.constant 0 : index
    %c0_17 = arith.constant 0 : index
    %c0_18 = arith.constant 0 : index
    %24 = vector.load %arg5[%c0_16, %c0_17, %c0_18] : memref<4x16x192xf32, #tpu.memory_space<vmem>>, vector<1x16x192xf32>
    %25 = vector.shape_cast %24 : vector<1x16x192xf32> to vector<16x192xf32>
    %26 = vector.shape_cast %23 : vector<16x192xf32> to vector<1x16x192xf32>
    tpu.vector_store %arg5[%c0_16, %c0_17, %c0_18], %26 {strides = array<i32>} : memref<4x16x192xf32, #tpu.memory_space<vmem>>, vector<1x16x192xf32>,
    %c1_19 = arith.constant 1 : index
    %c0_20 = arith.constant 0 : index
    %c0_21 = arith.constant 0 : index
    %27 = vector.load %arg1[%c1_19, %c0_20, %c0_21] : memref<4x16x64xf32, #tpu.memory_space<vmem>>, vector<1x16x64xf32>
    %28 = vector.shape_cast %27 : vector<1x16x64xf32> to vector<16x64xf32>
    %29 = arith.truncf %28 : vector<16x64xf32> to vector<16x64xbf16>
    %cst_22 = arith.constant dense<0.000000e+00> : vector<48x64xf32>
    %30 = tpu.matmul %0, %29, %cst_22 {dimension_numbers = #tpu.dot_dimension_numbers<[1], [0], [0], [1], [0, 0, 1, 1], [], []>} : vector<48x16xbf16>, vector<16x64xbf16>, vector<48x64xf32> -> vector<48x64xf32>
    %31 = arith.truncf %30 : vector<48x64xf32> to vector<48x64xbf16>
    %32 = vector.extract_strided_slice %31 {offsets = [0, 0], sizes = [16, 64], strides = [1, 1]} : vector<48x64xbf16> to vector<16x64xbf16>
    %c0_23 = arith.constant 0 : index
    %c0_24 = arith.constant 0 : index
    %c0_25 = arith.constant 0 : index
    %33 = vector.load %arg3[%c0_23, %c0_24, %c0_25] : memref<3x64x192xbf16, #tpu.memory_space<vmem>>, vector<1x64x192xbf16>
    %34 = vector.shape_cast %33 : vector<1x64x192xbf16> to vector<64x192xbf16>
    %cst_26 = arith.constant dense<0.000000e+00> : vector<16x192xf32>
    %35 = tpu.matmul %32, %34, %cst_26 {dimension_numbers = #tpu.dot_dimension_numbers<[1], [0], [0], [1], [0, 0, 1, 1], [], []>} : vector<16x64xbf16>, vector<64x192xbf16>, vector<16x192xf32> -> vector<16x192xf32>
    %36 = arith.addf %3, %35 : vector<16x192xf32>
    %37 = vector.extract_strided_slice %31 {offsets = [16, 0], sizes = [16, 64], strides = [1, 1]} : vector<48x64xbf16> to vector<16x64xbf16>
    %c1_27 = arith.constant 1 : index
    %c0_28 = arith.constant 0 : index
    %c0_29 = arith.constant 0 : index
    %38 = vector.load %arg3[%c1_27, %c0_28, %c0_29] : memref<3x64x192xbf16, #tpu.memory_space<vmem>>, vector<1x64x192xbf16>
    %39 = vector.shape_cast %38 : vector<1x64x192xbf16> to vector<64x192xbf16>
    %cst_30 = arith.constant dense<0.000000e+00> : vector<16x192xf32>
    %40 = tpu.matmul %37, %39, %cst_30 {dimension_numbers = #tpu.dot_dimension_numbers<[1], [0], [0], [1], [0, 0, 1, 1], [], []>} : vector<16x64xbf16>, vector<64x192xbf16>, vector<16x192xf32> -> vector<16x192xf32>
    %41 = arith.addf %36, %40 : vector<16x192xf32>
    %42 = vector.extract_strided_slice %31 {offsets = [32, 0], sizes = [16, 64], strides = [1, 1]} : vector<48x64xbf16> to vector<16x64xbf16>
    %c2_31 = arith.constant 2 : index
    %c0_32 = arith.constant 0 : index
    %c0_33 = arith.constant 0 : index
    %43 = vector.load %arg3[%c2_31, %c0_32, %c0_33] : memref<3x64x192xbf16, #tpu.memory_space<vmem>>, vector<1x64x192xbf16>
    %44 = vector.shape_cast %43 : vector<1x64x192xbf16> to vector<64x192xbf16>
    %cst_34 = arith.constant dense<0.000000e+00> : vector<16x192xf32>
    %45 = tpu.matmul %42, %44, %cst_34 {dimension_numbers = #tpu.dot_dimension_numbers<[1], [0], [0], [1], [0, 0, 1, 1], [], []>} : vector<16x64xbf16>, vector<64x192xbf16>, vector<16x192xf32> -> vector<16x192xf32>
    %46 = arith.addf %41, %45 : vector<16x192xf32>
    %c1_35 = arith.constant 1 : index
    %c0_36 = arith.constant 0 : index
    %c0_37 = arith.constant 0 : index
    %47 = vector.load %arg5[%c1_35, %c0_36, %c0_37] : memref<4x16x192xf32, #tpu.memory_space<vmem>>, vector<1x16x192xf32>
    %48 = vector.shape_cast %47 : vector<1x16x192xf32> to vector<16x192xf32>
    %49 = vector.shape_cast %46 : vector<16x192xf32> to vector<1x16x192xf32>
    tpu.vector_store %arg5[%c1_35, %c0_36, %c0_37], %49 {strides = array<i32>} : memref<4x16x192xf32, #tpu.memory_space<vmem>>, vector<1x16x192xf32>,
    %c2_38 = arith.constant 2 : index
    %c0_39 = arith.constant 0 : index
    %c0_40 = arith.constant 0 : index
    %50 = vector.load %arg1[%c2_38, %c0_39, %c0_40] : memref<4x16x64xf32, #tpu.memory_space<vmem>>, vector<1x16x64xf32>
    %51 = vector.shape_cast %50 : vector<1x16x64xf32> to vector<16x64xf32>
    %52 = arith.truncf %51 : vector<16x64xf32> to vector<16x64xbf16>
    %cst_41 = arith.constant dense<0.000000e+00> : vector<48x64xf32>
    %53 = tpu.matmul %0, %52, %cst_41 {dimension_numbers = #tpu.dot_dimension_numbers<[1], [0], [0], [1], [0, 0, 1, 1], [], []>} : vector<48x16xbf16>, vector<16x64xbf16>, vector<48x64xf32> -> vector<48x64xf32>
    %54 = arith.truncf %53 : vector<48x64xf32> to vector<48x64xbf16>
    %55 = vector.extract_strided_slice %54 {offsets = [0, 0], sizes = [16, 64], strides = [1, 1]} : vector<48x64xbf16> to vector<16x64xbf16>
    %c0_42 = arith.constant 0 : index
    %c0_43 = arith.constant 0 : index
    %c0_44 = arith.constant 0 : index
    %56 = vector.load %arg3[%c0_42, %c0_43, %c0_44] : memref<3x64x192xbf16, #tpu.memory_space<vmem>>, vector<1x64x192xbf16>
    %57 = vector.shape_cast %56 : vector<1x64x192xbf16> to vector<64x192xbf16>
    %cst_45 = arith.constant dense<0.000000e+00> : vector<16x192xf32>
    %58 = tpu.matmul %55, %57, %cst_45 {dimension_numbers = #tpu.dot_dimension_numbers<[1], [0], [0], [1], [0, 0, 1, 1], [], []>} : vector<16x64xbf16>, vector<64x192xbf16>, vector<16x192xf32> -> vector<16x192xf32>
    %59 = arith.addf %3, %58 : vector<16x192xf32>
    %60 = vector.extract_strided_slice %54 {offsets = [16, 0], sizes = [16, 64], strides = [1, 1]} : vector<48x64xbf16> to vector<16x64xbf16>
    %c1_46 = arith.constant 1 : index
    %c0_47 = arith.constant 0 : index
    %c0_48 = arith.constant 0 : index
    %61 = vector.load %arg3[%c1_46, %c0_47, %c0_48] : memref<3x64x192xbf16, #tpu.memory_space<vmem>>, vector<1x64x192xbf16>
    %62 = vector.shape_cast %61 : vector<1x64x192xbf16> to vector<64x192xbf16>
    %cst_49 = arith.constant dense<0.000000e+00> : vector<16x192xf32>
    %63 = tpu.matmul %60, %62, %cst_49 {dimension_numbers = #tpu.dot_dimension_numbers<[1], [0], [0], [1], [0, 0, 1, 1], [], []>} : vector<16x64xbf16>, vector<64x192xbf16>, vector<16x192xf32> -> vector<16x192xf32>
    %64 = arith.addf %59, %63 : vector<16x192xf32>
    %65 = vector.extract_strided_slice %54 {offsets = [32, 0], sizes = [16, 64], strides = [1, 1]} : vector<48x64xbf16> to vector<16x64xbf16>
    %c2_50 = arith.constant 2 : index
    %c0_51 = arith.constant 0 : index
    %c0_52 = arith.constant 0 : index
    %66 = vector.load %arg3[%c2_50, %c0_51, %c0_52] : memref<3x64x192xbf16, #tpu.memory_space<vmem>>, vector<1x64x192xbf16>
    %67 = vector.shape_cast %66 : vector<1x64x192xbf16> to vector<64x192xbf16>
    %cst_53 = arith.constant dense<0.000000e+00> : vector<16x192xf32>
    %68 = tpu.matmul %65, %67, %cst_53 {dimension_numbers = #tpu.dot_dimension_numbers<[1], [0], [0], [1], [0, 0, 1, 1], [], []>} : vector<16x64xbf16>, vector<64x192xbf16>, vector<16x192xf32> -> vector<16x192xf32>
    %69 = arith.addf %64, %68 : vector<16x192xf32>
    %c2_54 = arith.constant 2 : index
    %c0_55 = arith.constant 0 : index
    %c0_56 = arith.constant 0 : index
    %70 = vector.load %arg5[%c2_54, %c0_55, %c0_56] : memref<4x16x192xf32, #tpu.memory_space<vmem>>, vector<1x16x192xf32>
    %71 = vector.shape_cast %70 : vector<1x16x192xf32> to vector<16x192xf32>
    %72 = vector.shape_cast %69 : vector<16x192xf32> to vector<1x16x192xf32>
    tpu.vector_store %arg5[%c2_54, %c0_55, %c0_56], %72 {strides = array<i32>} : memref<4x16x192xf32, #tpu.memory_space<vmem>>, vector<1x16x192xf32>,
    %c3 = arith.constant 3 : index
    %c0_57 = arith.constant 0 : index
    %c0_58 = arith.constant 0 : index
    %73 = vector.load %arg1[%c3, %c0_57, %c0_58] : memref<4x16x64xf32, #tpu.memory_space<vmem>>, vector<1x16x64xf32>
    %74 = vector.shape_cast %73 : vector<1x16x64xf32> to vector<16x64xf32>
    %75 = arith.truncf %74 : vector<16x64xf32> to vector<16x64xbf16>
    %cst_59 = arith.constant dense<0.000000e+00> : vector<48x64xf32>
    %76 = tpu.matmul %0, %75, %cst_59 {dimension_numbers = #tpu.dot_dimension_numbers<[1], [0], [0], [1], [0, 0, 1, 1], [], []>} : vector<48x16xbf16>, vector<16x64xbf16>, vector<48x64xf32> -> vector<48x64xf32>
    %77 = arith.truncf %76 : vector<48x64xf32> to vector<48x64xbf16>
    %78 = vector.extract_strided_slice %77 {offsets = [0, 0], sizes = [16, 64], strides = [1, 1]} : vector<48x64xbf16> to vector<16x64xbf16>
    %c0_60 = arith.constant 0 : index
    %c0_61 = arith.constant 0 : index
    %c0_62 = arith.constant 0 : index
    %79 = vector.load %arg3[%c0_60, %c0_61, %c0_62] : memref<3x64x192xbf16, #tpu.memory_space<vmem>>, vector<1x64x192xbf16>
    %80 = vector.shape_cast %79 : vector<1x64x192xbf16> to vector<64x192xbf16>
    %cst_63 = arith.constant dense<0.000000e+00> : vector<16x192xf32>
    %81 = tpu.matmul %78, %80, %cst_63 {dimension_numbers = #tpu.dot_dimension_numbers<[1], [0], [0], [1], [0, 0, 1, 1], [], []>} : vector<16x64xbf16>, vector<64x192xbf16>, vector<16x192xf32> -> vector<16x192xf32>
    %82 = arith.addf %3, %81 : vector<16x192xf32>
    %83 = vector.extract_strided_slice %77 {offsets = [16, 0], sizes = [16, 64], strides = [1, 1]} : vector<48x64xbf16> to vector<16x64xbf16>
    %c1_64 = arith.constant 1 : index
    %c0_65 = arith.constant 0 : index
    %c0_66 = arith.constant 0 : index
    %84 = vector.load %arg3[%c1_64, %c0_65, %c0_66] : memref<3x64x192xbf16, #tpu.memory_space<vmem>>, vector<1x64x192xbf16>
    %85 = vector.shape_cast %84 : vector<1x64x192xbf16> to vector<64x192xbf16>
    %cst_67 = arith.constant dense<0.000000e+00> : vector<16x192xf32>
    %86 = tpu.matmul %83, %85, %cst_67 {dimension_numbers = #tpu.dot_dimension_numbers<[1], [0], [0], [1], [0, 0, 1, 1], [], []>} : vector<16x64xbf16>, vector<64x192xbf16>, vector<16x192xf32> -> vector<16x192xf32>
    %87 = arith.addf %82, %86 : vector<16x192xf32>
    %88 = vector.extract_strided_slice %77 {offsets = [32, 0], sizes = [16, 64], strides = [1, 1]} : vector<48x64xbf16> to vector<16x64xbf16>
    %c2_68 = arith.constant 2 : index
    %c0_69 = arith.constant 0 : index
    %c0_70 = arith.constant 0 : index
    %89 = vector.load %arg3[%c2_68, %c0_69, %c0_70] : memref<3x64x192xbf16, #tpu.memory_space<vmem>>, vector<1x64x192xbf16>
    %90 = vector.shape_cast %89 : vector<1x64x192xbf16> to vector<64x192xbf16>
    %cst_71 = arith.constant dense<0.000000e+00> : vector<16x192xf32>
    %91 = tpu.matmul %88, %90, %cst_71 {dimension_numbers = #tpu.dot_dimension_numbers<[1], [0], [0], [1], [0, 0, 1, 1], [], []>} : vector<16x64xbf16>, vector<64x192xbf16>, vector<16x192xf32> -> vector<16x192xf32>
    %92 = arith.addf %87, %91 : vector<16x192xf32>
    %c3_72 = arith.constant 3 : index
    %c0_73 = arith.constant 0 : index
    %c0_74 = arith.constant 0 : index
    %93 = vector.load %arg5[%c3_72, %c0_73, %c0_74] : memref<4x16x192xf32, #tpu.memory_space<vmem>>, vector<1x16x192xf32>
    %94 = vector.shape_cast %93 : vector<1x16x192xf32> to vector<16x192xf32>
    %95 = vector.shape_cast %92 : vector<16x192xf32> to vector<1x16x192xf32>
    tpu.vector_store %arg5[%c3_72, %c0_73, %c0_74], %95 {strides = array<i32>} : memref<4x16x192xf32, #tpu.memory_space<vmem>>, vector<1x16x192xf32>,
    return
  }
  func.func @transform_0(%arg0: i32) -> (i32, i32, i32) {
    %c0_i32 = arith.constant 0 : i32
    %c0_i32_0 = arith.constant 0 : i32
    %c0_i32_1 = arith.constant 0 : i32
    return %arg0, %c0_i32, %c0_i32_0 : i32, i32, i32
  }
  func.func @transform_1(%arg0: i32) -> (i32, i32) {
    %c0_i32 = arith.constant 0 : i32
    %c0_i32_0 = arith.constant 0 : i32
    %c0_i32_1 = arith.constant 0 : i32
    return %c0_i32, %c0_i32_0 : i32, i32
  }
  func.func @transform_2(%arg0: i32) -> (i32, i32, i32) {
    %c0_i32 = arith.constant 0 : i32
    %c0_i32_0 = arith.constant 0 : i32
    %c0_i32_1 = arith.constant 0 : i32
    %c0_i32_2 = arith.constant 0 : i32
    return %c0_i32, %c0_i32_0, %c0_i32_1 : i32, i32, i32
  }
  func.func @transform_3(%arg0: i32) -> (i32, i32) {
    %c0_i32 = arith.constant 0 : i32
    %c0_i32_0 = arith.constant 0 : i32
    %c0_i32_1 = arith.constant 0 : i32
    return %c0_i32, %c0_i32_0 : i32, i32
  }
  func.func @transform_4(%arg0: i32) -> (i32, i32, i32) {
    %c0_i32 = arith.constant 0 : i32
    %c0_i32_0 = arith.constant 0 : i32
    %c0_i32_1 = arith.constant 0 : i32
    return %arg0, %c0_i32, %c0_i32_0 : i32, i32, i32
  }
}

</mosaic_0001>

<bundles_post_ra>
// kernel: squeeze.2
= control target key start
LH: loop header
LB: loop body
LE: loop exit
PB: predicated region body
PF: predicated region fallthrough
CT: control target
= control target key end

     0   :  { %s144_s8 = smov 96   ;;  %vm3_vm0 = vcmask 261120   ;;  %s217_s0 = inlined_call_operand.vmem [shape: f32[1,16,64], index: 0, kind: input, shape index: {}]   ;;  %s218_s1 = inlined_call_operand.vmem [shape: f32[16,2,32], index: 1, kind: output, shape index: {}]  }
   0x1   :  { %v13_v0 = vld [vmem:[%s217_s0] sm:$0xff]   ;;  %v127_v1 = vld [vmem:[%s217_s0 + $0x8] sm:$0xff]  }
   0x2   :  { %14 = vrot.lane.b32.xlu0 %v13_v0, %s144_s8  ;;  %4 = vst.msk [vmem:[#allocation0] ss:$8 sm:$0xf] %vm3_vm0, %v13_v0  }
   0x3   :  { %5 = vst.msk [vmem:[#allocation0] ss:$8 sm:$0xf0] %vm3_vm0, %v13_v0  }
   0x4   :  { %10 = vst.msk [vmem:[#allocation0 + $0x40] ss:$8 sm:$0xf] %vm3_vm0, %v127_v1  }
   0x5   :  { %12 = vst.msk [vmem:[#allocation0 + $0x40] ss:$8 sm:$0xf0] %vm3_vm0, %v127_v1  }
   0xa   :  { %23 = vrot.lane.b32.xlu0 %v127_v1, %s144_s8 }
  0x74   :  { %v15_v2 = vpop.permute.xlu0 %14  }
  0x75   :  { %18 = vst.msk [vmem:[#allocation0 + $0x1] ss:$8 sm:$0xf] %vm3_vm0, %v15_v2  }
  0x76   :  { %20 = vst.msk [vmem:[#allocation0 + $0x1] ss:$8 sm:$0xf0] %vm3_vm0, %v15_v2  }
  0x7c   :  { %v32_v3 = vld [vmem:[#allocation0] sm:$0x3]  ;;  %v37_v4 = vld [vmem:[#allocation0 + $0x8] sm:$0x3]  ;;  %v43_v5 = vld [vmem:[#allocation0 + $0x10] sm:$0x3]  ;;  %v24_v6 = vpop.permute.xlu0 %23  }
  0x7d   :  { %35 = vst [vmem:[%s218_s1] sm:$0x3] %v32_v3  ;;  %v49_v7 = vld [vmem:[#allocation0 + $0x18] sm:$0x3]  ;;  %v55_v8 = vld [vmem:[#allocation0 + $0x20] sm:$0x3] }
  0x7e   :  { %128 = vst [vmem:[%s218_s1 + $0x2] sm:$0x3] %v37_v4  ;;  %v61_v9 = vld [vmem:[#allocation0 + $0x28] sm:$0x3]  ;;  %v67_v10 = vld [vmem:[#allocation0 + $0x30] sm:$0x3] }
  0x7f   :  { %129 = vst [vmem:[%s218_s1 + $0x4] sm:$0x3] %v43_v5  ;;  %v73_v11 = vld [vmem:[#allocation0 + $0x38] sm:$0x3] }
  0x80   :  { %130 = vst [vmem:[%s218_s1 + $0x6] sm:$0x3] %v49_v7 }
  0x81   :  { %131 = vst [vmem:[%s218_s1 + $0x8] sm:$0x3] %v55_v8 }
  0x82   :  { %132 = vst [vmem:[%s218_s1 + $0xa] sm:$0x3] %v61_v9 }
  0x83   :  { %133 = vst [vmem:[%s218_s1 + $0xc] sm:$0x3] %v67_v10 }
  0x84   :  { %134 = vst [vmem:[%s218_s1 + $0xe] sm:$0x3] %v73_v11 }
  0x85   :  { %27 = vst.msk [vmem:[#allocation0 + $0x41] ss:$8 sm:$0xf] %vm3_vm0, %v24_v6  }
  0x86   :  { %29 = vst.msk [vmem:[#allocation0 + $0x41] ss:$8 sm:$0xf0] %vm3_vm0, %v24_v6  }
  0x8c   :  { %v79_v12 = vld [vmem:[#allocation0 + $0x40] sm:$0x3]  ;;  %v85_v13 = vld [vmem:[#allocation0 + $0x48] sm:$0x3]  ;;  %v91_v14 = vld [vmem:[#allocation0 + $0x50] sm:$0x3] }
  0x8d   :  { %135 = vst [vmem:[%s218_s1 + $0x10] sm:$0x3] %v79_v12  ;;  %v97_v15 = vld [vmem:[#allocation0 + $0x58] sm:$0x3]  ;;  %v103_v16 = vld [vmem:[#allocation0 + $0x60] sm:$0x3] }
  0x8e   :  { %136 = vst [vmem:[%s218_s1 + $0x12] sm:$0x3] %v85_v13  ;;  %v109_v17 = vld [vmem:[#allocation0 + $0x68] sm:$0x3]  ;;  %v115_v18 = vld [vmem:[#allocation0 + $0x70] sm:$0x3] }
  0x8f   :  { %137 = vst [vmem:[%s218_s1 + $0x14] sm:$0x3] %v91_v14  ;;  %v121_v19 = vld [vmem:[#allocation0 + $0x78] sm:$0x3] }
  0x90   :  { %138 = vst [vmem:[%s218_s1 + $0x16] sm:$0x3] %v97_v15 }
  0x91   :  { %139 = vst [vmem:[%s218_s1 + $0x18] sm:$0x3] %v103_v16 }
  0x92   :  { %140 = vst [vmem:[%s218_s1 + $0x1a] sm:$0x3] %v109_v17 }
  0x93   :  { %141 = vst [vmem:[%s218_s1 + $0x1c] sm:$0x3] %v115_v18 }
  0x94   :  { %142 = vst [vmem:[%s218_s1 + $0x1e] sm:$0x3] %v121_v19 }

// kernel: encoder_forward_pallas.4
= control target key start
LH: loop header
LB: loop body
LE: loop exit
PB: predicated region body
PF: predicated region fallthrough
CT: control target
= control target key end

     0   :  { %s1218_s15 = smov 0   ;;  %s1412_s0 = inlined_call_operand.vmem [shape: f32[8,16,8], index: 0, kind: input, shape index: {}]   ;;  %s1413_s1 = inlined_call_operand.vmem [shape: bf16[48,16], index: 1, kind: input, shape index: {}]   ;;  %s1414_s2 = inlined_call_operand.vmem [shape: bf16[3,8,192], index: 2, kind: input, shape index: {}]   ;;  %s1415_s3 = inlined_call_operand.vmem [shape: f32[1,192], index: 3, kind: input, shape index: {}]   ;;  %s1416_s4 = inlined_call_operand.vmem [shape: f32[8,16,192], index: 4, kind: output, shape index: {}]  }
   0x1 LB: > { %s1085_s16 = sadd.s32 4294967295, %s1191_s15   ;;  %p1089_p0 = scmp.ge.s32.totalorder %s1191_s15, 1  ;;  %s1191_s15 = sphi %s1218_s15, %s14_s15  }
   0x2   : > { %p164_p1 = scmp.lt.s32.totalorder %s1191_s15, 3 }
   0x4   : > { %p165_p2 = pnand %p1089_p0, %p164_p1 }
   0x5   : > { %s1090_s17 = sshll.u32 (!%p165_p2), %s1085_s16, 2 }
   0x6   : > { %168 = sbr.rel (%p165_p2) target bundleno = 866 (0x362), region = 36  ;;  %p193_p3 = scmp.lt.s32.totalorder (!%p165_p2), %s1090_s17, 7 }
   0xb   : > { %s1418_s17 = smov (!%p193_p3, %s1090_s17), 7  ;;  %v1239_v3 = vld [vmem:[%s1413_s1] sm:$0xff]  ;;  %vm237_vm0 = vcmask 130048   ;;  %v1246_v4 = vld [vmem:[%s1413_s1 + $0x8] sm:$0xff]  ;;  %v1253_v5 = vld [vmem:[%s1413_s1 + $0x10] sm:$0xff]  ;;  %vm292_vm1 = vcmask 1043456  }
   0xc   : > { %s1172_s18 = sshll.u32 %s1418_s17, 4  ;;  %v277_v6 = vld [vmem:[%s1414_s2] sm:$0xff]  ;;  %v1113_v13 = vld [vmem:[%s1414_s2 + $0x8] sm:$0xff]  ;;  %v1116_v21 = vld [vmem:[%s1414_s2 + $0x10] sm:$0xff]  ;;  %vm288_vm2 = vcmask 64512   ;;  %s1173_s10 = sshll.u32 %s1418_s17, 5 }
   0xd   : > { %s1232_s21 = scalar_lea.vmem %s1412_s0, %s1172_s18  ;;  %v284_v7 = vunpack.c.l.b16 %v277_v6  ;;  %v285_v8 = vunpack.c.h.b16 %v277_v6  ;;  %v340_v14 = vunpack.c.h.b16 %v1113_v13  ;;  %v339_v17 = vunpack.c.l.b16 %v1113_v13  ;;  %v213_v57 = vld [vmem:[%s1415_s3] sm:$0x3]  ;;  %s1325_s13 = scalar_lea.vmem %s1416_s4, %s1173_s10 }
   0xe   : > { %v219_v0 = vld [vmem:[%s1232_s21] sm:$0xff]  ;;  %v220_v1 = vld [vmem:[%s1232_s21 + $0x8] sm:$0xff]  ;;  %v392_v23 = vunpack.c.l.b16 %v1116_v21  ;;  %v393_v24 = vunpack.c.h.b16 %v1116_v21  ;;  %v1119_v27 = vld [vmem:[%s1232_s21 + $0x10] sm:$0xff]  ;;  %v1315_v60 = vperm.slane %v213_v57, 0  ;;  %v1317_v61 = vperm.slane %v213_v57, 1 }
   0xf   : > { %v221_v2 = vpack.c.bf16 %v220_v1, %v219_v0  ;;  %v286_v9 = vpack.c.b16 %v284_v7, %v284_v7  ;;  %v287_v10 = vpack.c.b16 %v285_v8, %v285_v8  ;;  %v342_v15 = vpack.c.b16 %v340_v14, %v340_v14  ;;  %v1120_v28 = vld [vmem:[%s1232_s21 + $0x18] sm:$0xff] }
  0x10   : > { %v341_v18 = vpack.c.b16 %v339_v17, %v339_v17  ;;  %v394_v29 = vpack.c.b16 %v392_v23, %v392_v23  ;;  %v395_v30 = vpack.c.b16 %v393_v24, %v393_v24  ;;  %v445_v35 = vpack.c.bf16 %v1120_v28, %v1119_v27  ;;  %v1137_v17 = vld [vmem:[%s1232_s21 + $0x28] sm:$0xff] }
  0x11   : > { %254 = vmatpush.bf16.msra.mxu0 %v221_v2  ;;  %v1261_v11 = vsel %vm292_vm1, %v286_v9, 0  ;;  %v1264_v12 = vsel %vm292_vm1, %v287_v10, 0  ;;  %v1272_v16 = vsel %vm292_vm1, %v342_v15, 0  ;;  %vm438_vm3 = vcmask 523264   ;;  %v1136_v15 = vld [vmem:[%s1232_s21 + $0x20] sm:$0xff] }
  0x12   : > { %306 = vmatpush.bf16.msra.mxu1 %v1261_v11  ;;  %320 = vmatpush.bf16.msra.mxu2 %v1264_v12  ;;  %v1276_v19 = vsel %vm292_vm1, %v341_v18, 0  ;;  %v1286_v33 = vsel %vm292_vm1, %v394_v29, 0  ;;  %v1289_v34 = vsel %vm292_vm1, %v395_v30, 0 }
  0x13   : > { %359 = vmatpush.bf16.msra.mxu3 %v1276_v19 }
  0x14   : > { %1108 = vmatmul.msk.bf16.vlgmr.msra.gmra.mxu0 %vm237_vm0, %v1239_v3 }
  0x15   : > { %555 = vmatpush.bf16.msrb.mxu0 %v1276_v19 }
  0x16   : > { %373 = vmatpush.bf16.msrb.mxu1 %v1272_v16  ;;  %412 = vmatpush.bf16.msrb.mxu2 %v1286_v33 }
  0x17   : > { %426 = vmatpush.bf16.msrb.mxu3 %v1289_v34 }
  0x19   : > { %621 = vmatpush.bf16.msra.mxu0 %v1289_v34 }
  0x24   : > { %1109 = vmatmul.msk.bf16.gmra.mxu0 %vm237_vm0, %v1246_v4 }
  0x34   : > { %1110 = vmatmul.msk.bf16.gmra.mxu0 %vm237_vm0, %v1253_v5 }
  0x91   : > { %v256_v20 = vpop.f32.mrf.mxu0 }
  0x92   : > { %v271_v22 = vpack.c.bf16 %v256_v20, %v256_v20 }
  0x94   : > { %v280_v31 = vunpack.c.l.b16 %v271_v22 }
  0x99   : > { %v258_v25 = vpop.f32.mrf.mxu0 }
  0x9a   : > { %v272_v26 = vpack.c.bf16 %v258_v25, %v258_v25  ;;  %v640_v25 = vpack.c.bf16 %v1137_v17, %v1136_v15  ;;  %v1153_v17 = vld [vmem:[%s1232_s21 + $0x30] sm:$0xff] }
  0x9c   : > { %v281_v32 = vunpack.c.l.b16 %v272_v26 }
  0x9e   : > { %v282_v36 = vpack.c.b16 %v281_v32, %v280_v31 }
  0xa0   : > { %1111 = vmatmul.msk.bf16.vlgmr.msra.gmra.mxu1 %vm288_vm2, %v282_v36  ;;  %1112 = vmatmul.msk.bf16.vlgmr.msra.gmra.mxu2 %vm288_vm2, %v282_v36 }
  0xa1   : > { %v261_v37 = vpop.f32.mrf.mxu0  ;;  %453 = vmatpush.bf16.msra.mxu1 %v445_v35  ;;  %503 = vmatpush.bf16.msra.mxu2 %v1261_v11 }
  0xa2   : > { %v273_v38 = vpack.c.bf16 %v261_v37, %v261_v37 }
  0xa4   : > { %v335_v41 = vunpack.c.l.b16 %v273_v38 }
  0xa9   : > { %v263_v39 = vpop.f32.mrf.mxu0 }
  0xaa   : > { %v274_v40 = vpack.c.bf16 %v263_v39, %v263_v39 }
  0xac   : > { %v336_v42 = vunpack.c.l.b16 %v274_v40 }
  0xae   : > { %v337_v43 = vpack.c.b16 %v336_v42, %v335_v41 }
  0xb0   : > { %1114 = vmatmul.msk.bf16.vlgmr.msra.gmra.mxu3 %vm288_vm2, %v337_v43  ;;  %1115 = vmatmul.msk.bf16.vlgmr.msrb.gmra.mxu1 %vm288_vm2, %v337_v43 }
  0xb1   : > { %v266_v44 = vpop.f32.mrf.mxu0  ;;  %517 = vmatpush.bf16.msra.mxu3 %v1264_v12  ;;  %750 = vmatpush.bf16.msrb.mxu1 %v1276_v19 }
  0xb2   : > { %v275_v45 = vpack.c.bf16 %v266_v44, %v266_v44 }
  0xb4   : > { %v388_v47 = vunpack.c.l.b16 %v275_v45 }
  0xb9   : > { %v268_v46 = vpop.f32.mrf.mxu0 }
  0xba   : > { %v276_v48 = vpack.c.bf16 %v268_v46, %v268_v46 }
  0xbc   : > { %v389_v49 = vunpack.c.l.b16 %v276_v48 }
  0xbe   : > { %v390_v50 = vpack.c.b16 %v389_v49, %v388_v47 }
  0xc0   : > { %1117 = vmatmul.msk.bf16.vlgmr.msrb.gmra.mxu2 %vm288_vm2, %v390_v50  ;;  %1118 = vmatmul.msk.bf16.vlgmr.msrb.gmra.mxu3 %vm288_vm2, %v390_v50 }
  0xc1   : > { %1121 = vmatmul.msk.bf16.vlgmr.msra.gmra.mxu1 %vm237_vm0, %v1239_v3  ;;  %569 = vmatpush.bf16.msrb.mxu2 %v1272_v16 }
  0xc2   : > { %607 = vmatpush.bf16.msrb.mxu3 %v1286_v33  ;;  %816 = vmatpush.bf16.msra.mxu1 %v1289_v34 }
  0xd1   : > { %1122 = vmatmul.msk.bf16.gmra.mxu1 %vm237_vm0, %v1246_v4 }
  0xe1   : > { %1123 = vmatmul.msk.bf16.gmra.mxu1 %vm237_vm0, %v1253_v5 }
 0x11d   : > { %v308_v51 = vpop.f32.mrf.mxu1 }
 0x11e   : > { %v327_v63 = vadd.f32 %v308_v51, %v1315_v60 }
 0x123   : > { %v322_v54 = vpop.f32.mrf.mxu2 }
 0x124   : > { %v328_v0 = vadd.f32 %v322_v54, %v1317_v61 }
 0x125   : > { %v310_v52 = vpop.f32.mrf.mxu1 }
 0x126   : > { %v329_v18 = vadd.f32 %v310_v52, %v1315_v60 }
 0x12b   : > { %v324_v58 = vpop.f32.mrf.mxu2 }
 0x12c   : > { %v330_v20 = vadd.f32 %v324_v58, %v1317_v61 }
 0x12d   : > { %v375_v53 = vpop.f32.mrf.mxu1 }
 0x12e   : > { %v381_v1 = vadd.f32 %v375_v53, %v328_v0 }
 0x133   : > { %v361_v55 = vpop.f32.mrf.mxu3 }
 0x134   : > { %v380_v2 = vadd.f32 %v361_v55, %v327_v63 }
 0x135   : > { %v377_v56 = vpop.f32.mrf.mxu1 }
 0x136   : > { %v383_v23 = vadd.f32 %v377_v56, %v330_v20 }
 0x13b   : > { %v363_v59 = vpop.f32.mrf.mxu3 }
 0x13c   : > { %v382_v24 = vadd.f32 %v363_v59, %v329_v18  ;;  %v1154_v18 = vld [vmem:[%s1232_s21 + $0x38] sm:$0xff] }
 0x13e   : > { %v455_v62 = vpop.f32.mrf.mxu1 }
 0x13f   : > { %v470_v10 = vpack.c.bf16 %v455_v62, %v455_v62 }
 0x141   : > { %v479_v21 = vunpack.c.l.b16 %v470_v10 }
 0x143   : > { %v414_v6 = vpop.f32.mrf.mxu2  ;;  %v428_v7 = vpop.f32.mrf.mxu3 }
 0x144   : > { %v433_v8 = vadd.f32 %v414_v6, %v380_v2  ;;  %v434_v9 = vadd.f32 %v428_v7, %v381_v1 }
 0x146   : > { %437 = vst [vmem:[%s1325_s13] sm:$0xff] %v433_v8  ;;  %v457_v13 = vpop.f32.mrf.mxu1 }
 0x147   : > { %439 = vst.msk [vmem:[%s1325_s13 + $0x8] sm:$0xff] %vm438_vm3, %v434_v9  ;;  %v471_v14 = vpack.c.bf16 %v457_v13, %v457_v13 }
 0x149   : > { %v480_v22 = vunpack.c.l.b16 %v471_v14 }
 0x14b   : > { %v481_v26 = vpack.c.b16 %v480_v22, %v479_v21  ;;  %v416_v27 = vpop.f32.mrf.mxu2  ;;  %v430_v28 = vpop.f32.mrf.mxu3  ;;  %v835_v22 = vpack.c.bf16 %v1154_v18, %v1153_v17 }
 0x14c   : > { %v435_v29 = vadd.f32 %v416_v27, %v382_v24  ;;  %v436_v30 = vadd.f32 %v430_v28, %v383_v23 }
 0x14d   : > { %1124 = vmatmul.msk.bf16.vlgmr.msra.gmra.mxu2 %vm288_vm2, %v481_v26  ;;  %1125 = vmatmul.msk.bf16.vlgmr.msra.gmra.mxu3 %vm288_vm2, %v481_v26 }
 0x14e   : > { %440 = vst [vmem:[%s1325_s13 + $0x10] sm:$0xff] %v435_v29  ;;  %v460_v31 = vpop.f32.mrf.mxu1  ;;  %648 = vmatpush.bf16.msra.mxu2 %v640_v25  ;;  %698 = vmatpush.bf16.msra.mxu3 %v1261_v11 }
 0x14f   : > { %441 = vst.msk [vmem:[%s1325_s13 + $0x18] sm:$0xff] %vm438_vm3, %v436_v30  ;;  %v472_v32 = vpack.c.bf16 %v460_v31, %v460_v31 }
 0x151   : > { %v531_v37 = vunpack.c.l.b16 %v472_v32 }
 0x156   : > { %v462_v35 = vpop.f32.mrf.mxu1 }
 0x157   : > { %v473_v36 = vpack.c.bf16 %v462_v35, %v462_v35 }
 0x159   : > { %v532_v38 = vunpack.c.l.b16 %v473_v36 }
 0x15b   : > { %v533_v39 = vpack.c.b16 %v532_v38, %v531_v37 }
 0x15d   : > { %1127 = vmatmul.msk.bf16.vlgmr.msrb.gmra.mxu0 %vm288_vm2, %v533_v39  ;;  %1128 = vmatmul.msk.bf16.vlgmr.msrb.gmra.mxu2 %vm288_vm2, %v533_v39 }
 0x15e   : > { %v465_v40 = vpop.f32.mrf.mxu1  ;;  %712 = vmatpush.bf16.msrb.mxu0 %v1264_v12  ;;  %945 = vmatpush.bf16.msrb.mxu2 %v1276_v19 }
 0x15f   : > { %v474_v41 = vpack.c.bf16 %v465_v40, %v465_v40 }
 0x161   : > { %v583_v43 = vunpack.c.l.b16 %v474_v41 }
 0x166   : > { %v467_v42 = vpop.f32.mrf.mxu1 }
 0x167   : > { %v475_v44 = vpack.c.bf16 %v467_v42, %v467_v42 }
 0x169   : > { %v584_v45 = vunpack.c.l.b16 %v475_v44 }
 0x16b   : > { %v585_v46 = vpack.c.b16 %v584_v45, %v583_v43 }
 0x16d   : > { %1130 = vmatmul.msk.bf16.vlgmr.msrb.gmra.mxu3 %vm288_vm2, %v585_v46  ;;  %1131 = vmatmul.msk.bf16.vlgmr.msra.gmra.mxu0 %vm288_vm2, %v585_v46 }
 0x16e   : > { %1138 = vmatmul.msk.bf16.vlgmr.msra.gmra.mxu2 %vm237_vm0, %v1239_v3  ;;  %764 = vmatpush.bf16.msrb.mxu3 %v1272_v16 }
 0x16f   : > { %802 = vmatpush.bf16.msra.mxu0 %v1286_v33  ;;  %1011 = vmatpush.bf16.msra.mxu2 %v1289_v34 }
 0x17e   : > { %1139 = vmatmul.msk.bf16.gmra.mxu2 %vm237_vm0, %v1246_v4 }
 0x18e   : > { %1140 = vmatmul.msk.bf16.gmra.mxu2 %vm237_vm0, %v1253_v5 }
 0x1d0   : > { %v505_v19 = vpop.f32.mrf.mxu2  ;;  %v519_v49 = vpop.f32.mrf.mxu3 }
 0x1d1   : > { %v525_v52 = vadd.f32 %v519_v49, %v1317_v61  ;;  %v524_v57 = vadd.f32 %v505_v19, %v1315_v60 }
 0x1d8   : > { %v507_v47 = vpop.f32.mrf.mxu2  ;;  %v521_v53 = vpop.f32.mrf.mxu3 }
 0x1d9   : > { %v527_v58 = vadd.f32 %v521_v53, %v1317_v61  ;;  %v526_v7 = vadd.f32 %v507_v47, %v1315_v60 }
 0x1da   : > { %v557_v48 = vpop.f32.mrf.mxu0 }
 0x1db   : > { %v576_v59 = vadd.f32 %v557_v48, %v524_v57 }
 0x1e0   : > { %v571_v50 = vpop.f32.mrf.mxu2 }
 0x1e1   : > { %v577_v34 = vadd.f32 %v571_v50, %v525_v52 }
 0x1e2   : > { %v559_v51 = vpop.f32.mrf.mxu0 }
 0x1e3   : > { %v578_v8 = vadd.f32 %v559_v51, %v526_v7 }
 0x1e8   : > { %v573_v54 = vpop.f32.mrf.mxu2 }
 0x1e9   : > { %v579_v63 = vadd.f32 %v573_v54, %v527_v58 }
 0x1ea   : > { %v623_v55 = vpop.f32.mrf.mxu0 }
 0x1eb   : > { %v629_v56 = vadd.f32 %v623_v55, %v577_v34 }
 0x1ed   : > { %1133 = vst.msk [vmem:[%s1325_s13 + $0x28] sm:$0xff] %vm438_vm3, %v629_v56 }
 0x1f0   : > { %v609_v62 = vpop.f32.mrf.mxu3 }
 0x1f1   : > { %v628_v0 = vadd.f32 %v609_v62, %v576_v59  ;;  %v650_v1 = vpop.f32.mrf.mxu2 }
 0x1f2   : > { %v625_v2 = vpop.f32.mrf.mxu0  ;;  %v665_v9 = vpack.c.bf16 %v650_v1, %v650_v1 }
 0x1f3   : > { %1132 = vst [vmem:[%s1325_s13 + $0x20] sm:$0xff] %v628_v0  ;;  %v631_v6 = vadd.f32 %v625_v2, %v579_v63 }
 0x1f4   : > { %v674_v20 = vunpack.c.l.b16 %v665_v9 }
 0x1f5   : > { %1135 = vst.msk [vmem:[%s1325_s13 + $0x38] sm:$0xff] %vm438_vm3, %v631_v6 }
 0x1f8   : > { %v611_v10 = vpop.f32.mrf.mxu3 }
 0x1f9   : > { %v630_v13 = vadd.f32 %v611_v10, %v578_v8  ;;  %v652_v14 = vpop.f32.mrf.mxu2 }
 0x1fa   : > { %v666_v15 = vpack.c.bf16 %v652_v14, %v652_v14 }
 0x1fb   : > { %1134 = vst [vmem:[%s1325_s13 + $0x30] sm:$0xff] %v630_v13 }
 0x1fc   : > { %v675_v21 = vunpack.c.l.b16 %v666_v15 }
 0x1fe   : > { %v676_v23 = vpack.c.b16 %v675_v21, %v674_v20 }
 0x200   : > { %1141 = vmatmul.msk.bf16.vlgmr.msra.gmra.mxu3 %vm288_vm2, %v676_v23  ;;  %1142 = vmatmul.msk.bf16.vlgmr.msrb.gmra.mxu0 %vm288_vm2, %v676_v23 }
 0x201   : > { %v655_v24 = vpop.f32.mrf.mxu2  ;;  %843 = vmatpush.bf16.msra.mxu3 %v835_v22  ;;  %893 = vmatpush.bf16.msrb.mxu0 %v1261_v11 }
 0x202   : > { %v667_v25 = vpack.c.bf16 %v655_v24, %v655_v24 }
 0x204   : > { %v726_v28 = vunpack.c.l.b16 %v667_v25 }
 0x209   : > { %v657_v26 = vpop.f32.mrf.mxu2 }
 0x20a   : > { %v668_v27 = vpack.c.bf16 %v657_v26, %v657_v26 }
 0x20c   : > { %v727_v29 = vunpack.c.l.b16 %v668_v27 }
 0x20e   : > { %v728_v30 = vpack.c.b16 %v727_v29, %v726_v28 }
 0x210   : > { %1144 = vmatmul.msk.bf16.vlgmr.msrb.gmra.mxu1 %vm288_vm2, %v728_v30  ;;  %1145 = vmatmul.msk.bf16.vlgmr.msrb.gmra.mxu3 %vm288_vm2, %v728_v30 }
 0x211   : > { %v660_v31 = vpop.f32.mrf.mxu2  ;;  %907 = vmatpush.bf16.msrb.mxu1 %v1264_v12 }
 0x212   : > { %v669_v32 = vpack.c.bf16 %v660_v31, %v660_v31 }
 0x214   : > { %v778_v36 = vunpack.c.l.b16 %v669_v32 }
 0x219   : > { %v662_v35 = vpop.f32.mrf.mxu2 }
 0x21a   : > { %v670_v37 = vpack.c.bf16 %v662_v35, %v662_v35 }
 0x21c   : > { %v779_v38 = vunpack.c.l.b16 %v670_v37 }
 0x21e   : > { %v780_v39 = vpack.c.b16 %v779_v38, %v778_v36 }
 0x220   : > { %1147 = vmatmul.msk.bf16.vlgmr.msra.gmra.mxu0 %vm288_vm2, %v780_v39  ;;  %1148 = vmatmul.msk.bf16.vlgmr.msra.gmra.mxu1 %vm288_vm2, %v780_v39 }
 0x221   : > { %1155 = vmatmul.msk.bf16.vlgmr.msra.gmra.mxu3 %vm237_vm0, %v1239_v3  ;;  %959 = vmatpush.bf16.msra.mxu0 %v1272_v16 }
 0x222   : > { %997 = vmatpush.bf16.msra.mxu1 %v1286_v33 }
 0x231   : > { %1156 = vmatmul.msk.bf16.gmra.mxu3 %vm237_vm0, %v1246_v4 }
 0x241   : > { %1157 = vmatmul.msk.bf16.gmra.mxu3 %vm237_vm0, %v1253_v5 }
 0x27d   : > { %v714_v12 = vpop.f32.mrf.mxu0 }
 0x27e   : > { %v720_v3 = vadd.f32 %v714_v12, %v1317_v61 }
 0x283   : > { %v700_v11 = vpop.f32.mrf.mxu3 }
 0x284   : > { %v719_v16 = vadd.f32 %v700_v11, %v1315_v60 }
 0x285   : > { %v716_v43 = vpop.f32.mrf.mxu0 }
 0x286   : > { %v722_v48 = vadd.f32 %v716_v43, %v1317_v61 }
 0x28b   : > { %v702_v40 = vpop.f32.mrf.mxu3 }
 0x28c   : > { %v721_v49 = vadd.f32 %v702_v40, %v1315_v60 }
 0x28d   : > { %v752_v41 = vpop.f32.mrf.mxu1 }
 0x28e   : > { %v771_v45 = vadd.f32 %v752_v41, %v719_v16 }
 0x293   : > { %v766_v42 = vpop.f32.mrf.mxu3 }
 0x294   : > { %v772_v46 = vadd.f32 %v766_v42, %v720_v3 }
 0x295   : > { %v754_v44 = vpop.f32.mrf.mxu1 }
 0x296   : > { %v773_v50 = vadd.f32 %v754_v44, %v721_v49 }
 0x29b   : > { %v768_v33 = vpop.f32.mrf.mxu3 }
 0x29c   : > { %v774_v51 = vadd.f32 %v768_v33, %v722_v48 }
 0x29d   : > { %v804_v4 = vpop.f32.mrf.mxu0  ;;  %v818_v5 = vpop.f32.mrf.mxu1 }
 0x29e   : > { %v823_v19 = vadd.f32 %v804_v4, %v771_v45  ;;  %v824_v47 = vadd.f32 %v818_v5, %v772_v46 }
 0x2a0   : > { %1149 = vst [vmem:[%s1325_s13 + $0x40] sm:$0xff] %v823_v19 }
 0x2a1   : > { %1150 = vst.msk [vmem:[%s1325_s13 + $0x48] sm:$0xff] %vm438_vm3, %v824_v47 }
 0x2a4   : > { %v845_v52 = vpop.f32.mrf.mxu3 }
 0x2a5   : > { %v806_v53 = vpop.f32.mrf.mxu0  ;;  %v820_v54 = vpop.f32.mrf.mxu1  ;;  %v860_v56 = vpack.c.bf16 %v845_v52, %v845_v52 }
 0x2a6   : > { %v825_v34 = vadd.f32 %v806_v53, %v773_v50  ;;  %v826_v55 = vadd.f32 %v820_v54, %v774_v51 }
 0x2a7   : > { %v869_v59 = vunpack.c.l.b16 %v860_v56 }
 0x2a8   : > { %1151 = vst [vmem:[%s1325_s13 + $0x50] sm:$0xff] %v825_v34 }
 0x2a9   : > { %1152 = vst.msk [vmem:[%s1325_s13 + $0x58] sm:$0xff] %vm438_vm3, %v826_v55 }
 0x2ac   : > { %v847_v57 = vpop.f32.mrf.mxu3 }
 0x2ad   : > { %v861_v58 = vpack.c.bf16 %v847_v57, %v847_v57 }
 0x2af   : > { %v870_v62 = vunpack.c.l.b16 %v861_v58 }
 0x2b1   : > { %v871_v63 = vpack.c.b16 %v870_v62, %v869_v59 }
 0x2b3   : > { %1158 = vmatmul.msk.bf16.vlgmr.msrb.gmra.mxu0 %vm288_vm2, %v871_v63  ;;  %1159 = vmatmul.msk.bf16.vlgmr.msrb.gmra.mxu1 %vm288_vm2, %v871_v63 }
 0x2b4   : > { %v850_v0 = vpop.f32.mrf.mxu3 }
 0x2b5   : > { %v862_v1 = vpack.c.bf16 %v850_v0, %v850_v0 }
 0x2b7   : > { %v921_v7 = vunpack.c.l.b16 %v862_v1 }
 0x2bc   : > { %v852_v2 = vpop.f32.mrf.mxu3 }
 0x2bd   : > { %v863_v6 = vpack.c.bf16 %v852_v2, %v852_v2 }
 0x2bf   : > { %v922_v8 = vunpack.c.l.b16 %v863_v6 }
 0x2c1   : > { %v923_v9 = vpack.c.b16 %v922_v8, %v921_v7 }
 0x2c3   : > { %1161 = vmatmul.msk.bf16.vlgmr.msrb.gmra.mxu2 %vm288_vm2, %v923_v9  ;;  %1162 = vmatmul.msk.bf16.vlgmr.msra.gmra.mxu0 %vm288_vm2, %v923_v9 }
 0x2c4   : > { %v855_v10 = vpop.f32.mrf.mxu3 }
 0x2c5   : > { %v864_v13 = vpack.c.bf16 %v855_v10, %v855_v10 }
 0x2c7   : > { %v973_v17 = vunpack.c.l.b16 %v864_v13 }
 0x2cc   : > { %v857_v14 = vpop.f32.mrf.mxu3 }
 0x2cd   : > { %v865_v15 = vpack.c.bf16 %v857_v14, %v857_v14 }
 0x2cf   : > { %v974_v18 = vunpack.c.l.b16 %v865_v15 }
 0x2d1   : > { %v975_v20 = vpack.c.b16 %v974_v18, %v973_v17 }
 0x2d3   : > { %1164 = vmatmul.msk.bf16.vlgmr.msra.gmra.mxu1 %vm288_vm2, %v975_v20  ;;  %1165 = vmatmul.msk.bf16.vlgmr.msra.gmra.mxu2 %vm288_vm2, %v975_v20 }
 0x330   : > { %v895_v21 = vpop.f32.mrf.mxu0  ;;  %v909_v22 = vpop.f32.mrf.mxu1 }
 0x331   : > { %v914_v26 = vadd.f32 %v895_v21, %v1315_v60  ;;  %v915_v32 = vadd.f32 %v909_v22, %v1317_v61 }
 0x338   : > { %v897_v23 = vpop.f32.mrf.mxu0  ;;  %v911_v25 = vpop.f32.mrf.mxu1 }
 0x339   : > { %v916_v35 = vadd.f32 %v897_v23, %v1315_v60  ;;  %v917_v41 = vadd.f32 %v911_v25, %v1317_v61 }
 0x340   : > { %v961_v29 = vpop.f32.mrf.mxu0 }
 0x341   : > { %v967_v36 = vadd.f32 %v961_v29, %v915_v32 }
 0x346   : > { %v947_v24 = vpop.f32.mrf.mxu2 }
 0x347   : > { %v966_v28 = vadd.f32 %v947_v24, %v914_v26 }
 0x348   : > { %v963_v40 = vpop.f32.mrf.mxu0 }
 0x349   : > { %v969_v42 = vadd.f32 %v963_v40, %v917_v41 }
 0x34e   : > { %v949_v27 = vpop.f32.mrf.mxu2 }
 0x34f   : > { %v968_v38 = vadd.f32 %v949_v27, %v916_v35 }
 0x350   : > { %v999_v30 = vpop.f32.mrf.mxu1 }
 0x351   : > { %v1018_v31 = vadd.f32 %v999_v30, %v966_v28 }
 0x353   : > { %1166 = vst [vmem:[%s1325_s13 + $0x60] sm:$0xff] %v1018_v31 }
 0x356   : > { %v1013_v37 = vpop.f32.mrf.mxu2 }
 0x357   : > { %v1019_v39 = vadd.f32 %v1013_v37, %v967_v36 }
 0x358   : > { %v1001_v11 = vpop.f32.mrf.mxu1 }
 0x359   : > { %1167 = vst.msk [vmem:[%s1325_s13 + $0x68] sm:$0xff] %vm438_vm3, %v1019_v39  ;;  %v1020_v12 = vadd.f32 %v1001_v11, %v968_v38 }
 0x35b   : > { %1168 = vst [vmem:[%s1325_s13 + $0x70] sm:$0xff] %v1020_v12 }
 0x35e   : > { %v1015_v43 = vpop.f32.mrf.mxu2 }
 0x35f   : > { %v1021_v44 = vadd.f32 %v1015_v43, %v969_v42 }
 0x361   : > { %1169 = vst.msk [vmem:[%s1325_s13 + $0x78] sm:$0xff] %vm438_vm3, %v1021_v44 }
 0x362 PF: > { %s14_s15 = sadd.s32 1, %s1191_s15  }
 0x363   : > { %p11_p4 = scmp.ge.s32.totalorder %s14_s15, 4  }
 0x365   :  { %13 = sbr.rel (!%p11_p4) target bundleno = 1 (0x1), region = 74 }

// kernel: encoder_forward_pallas.6
= control target key start
LH: loop header
LB: loop body
LE: loop exit
PB: predicated region body
PF: predicated region fallthrough
CT: control target
= control target key end

     0   :  { %s2184_s15 = smov 0   ;;  %s2921_s0 = inlined_call_operand.vmem [shape: f32[8,16,64], index: 0, kind: input, shape index: {}]   ;;  %s2922_s1 = inlined_call_operand.vmem [shape: bf16[48,16], index: 1, kind: input, shape index: {}]   ;;  %s2923_s2 = inlined_call_operand.vmem [shape: bf16[3,64,192], index: 2, kind: input, shape index: {}]   ;;  %s2924_s3 = inlined_call_operand.vmem [shape: f32[1,192], index: 3, kind: input, shape index: {}]   ;;  %s2925_s4 = inlined_call_operand.vmem [shape: f32[8,16,192], index: 4, kind: output, shape index: {}]  }
   0x1 LB: > { %s1515_s16 = sadd.s32 4294967295, %s2157_s15   ;;  %p1519_p0 = scmp.ge.s32.totalorder %s2157_s15, 1  ;;  %s2157_s15 = sphi %s2184_s15, %s14_s15  }
   0x2   : > { %p164_p1 = scmp.lt.s32.totalorder %s2157_s15, 3 }
   0x4   : > { %p165_p2 = pnand %p1519_p0, %p164_p1 }
   0x5   : > { %s1520_s17 = sshll.u32 (!%p165_p2), %s1515_s16, 2 }
   0x6   : > { %168 = sbr.rel (%p165_p2) target bundleno = 866 (0x362), region = 36  ;;  %p193_p3 = scmp.lt.s32.totalorder (!%p165_p2), %s1520_s17, 7 }
   0xb   : > { %s2927_s17 = smov (!%p193_p3, %s1520_s17), 7  ;;  %v2205_v3 = vld [vmem:[%s2922_s1] sm:$0xff]  ;;  %vm237_vm0 = vcmask 130048   ;;  %v2212_v4 = vld [vmem:[%s2922_s1 + $0x8] sm:$0xff]  ;;  %v2219_v5 = vld [vmem:[%s2922_s1 + $0x10] sm:$0xff]  ;;  %vm330_vm1 = vcmask 523264  }
   0xc   : > { %s2042_s18 = sshll.u32 %s2927_s17, 4  ;;  %v1567_v6 = vld [vmem:[%s2923_s2 + $0x30] sm:$0xf]  ;;  %v2054_v7 = vld [vmem:[%s2923_s2 + $0x34] sm:$0xf0]  ;;  %s2043_s19 = sshll.u32 %s2927_s17, 5 }
   0xd   : > { %s2198_s21 = scalar_lea.vmem %s2921_s0, %s2042_s18  ;;  %v2053_v8 = vld [vmem:[%s2923_s2 + $0x34] sm:$0xf]  ;;  %v1568_v9 = vor.u32 %v2054_v7, %v1567_v6  ;;  %v1569_v10 = vld [vmem:[%s2923_s2 + $0x38] sm:$0xf0]  ;;  %v1559_v12 = vld [vmem:[%s2923_s2 + $0x20] sm:$0xf]  ;;  %s2521_s25 = scalar_lea.vmem %s2925_s4, %s2043_s19 }
   0xe   : > { %v219_v0 = vld [vmem:[%s2198_s21] sm:$0xff]  ;;  %v220_v1 = vld [vmem:[%s2198_s21 + $0x8] sm:$0xff]  ;;  %v1572_v11 = vor.u32 %v2053_v8, %v1569_v10  ;;  %v1551_v18 = vld [vmem:[%s2923_s2 + $0x10] sm:$0xf] }
   0xf   : > { %v221_v2 = vpack.c.bf16 %v220_v1, %v219_v0  ;;  %338 = vmatpush.bf16.msra.mxu1 %v1568_v9  ;;  %v2052_v13 = vld [vmem:[%s2923_s2 + $0x24] sm:$0xf0]  ;;  %v2051_v14 = vld [vmem:[%s2923_s2 + $0x24] sm:$0xf]  ;;  %v1561_v16 = vld [vmem:[%s2923_s2 + $0x28] sm:$0xf0] }
  0x10   : > { %352 = vmatpush.bf16.msra.mxu2 %v1572_v11  ;;  %v1560_v15 = vor.u32 %v2052_v13, %v1559_v12  ;;  %v1564_v17 = vor.u32 %v2051_v14, %v1561_v16  ;;  %v2050_v19 = vld [vmem:[%s2923_s2 + $0x14] sm:$0xf0]  ;;  %v2049_v20 = vld [vmem:[%s2923_s2 + $0x14] sm:$0xf]  ;;  %v1553_v22 = vld [vmem:[%s2923_s2 + $0x18] sm:$0xf0] }
  0x11   : > { %254 = vmatpush.bf16.msra.mxu0 %v221_v2  ;;  %v1552_v21 = vor.u32 %v2050_v19, %v1551_v18  ;;  %v1556_v23 = vor.u32 %v2049_v20, %v1553_v22  ;;  %v1543_v24 = vld [vmem:[%s2923_s2] sm:$0xf]  ;;  %v2048_v25 = vld [vmem:[%s2923_s2 + $0x4] sm:$0xf0]  ;;  %v2047_v26 = vld [vmem:[%s2923_s2 + $0x4] sm:$0xf] }
  0x12   : > { %v1544_v27 = vor.u32 %v2048_v25, %v1543_v24  ;;  %v1545_v28 = vld [vmem:[%s2923_s2 + $0x8] sm:$0xf0]  ;;  %v2061_v30 = vld [vmem:[%s2923_s2 + $0x74] sm:$0xf]  ;;  %v1611_v31 = vld [vmem:[%s2923_s2 + $0x78] sm:$0xf0] }
  0x13   : > { %339 = vmatpush.bf16.msra.mxu1 %v1560_v15  ;;  %v1548_v29 = vor.u32 %v2047_v26, %v1545_v28  ;;  %v1614_v32 = vor.u32 %v2061_v30, %v1611_v31  ;;  %v1609_v33 = vld [vmem:[%s2923_s2 + $0x70] sm:$0xf]  ;;  %v2062_v34 = vld [vmem:[%s2923_s2 + $0x74] sm:$0xf0]  ;;  %v2059_v36 = vld [vmem:[%s2923_s2 + $0x64] sm:$0xf] }
  0x14   : > { %1538 = vmatmul.msk.bf16.vlgmr.msra.gmra.mxu0 %vm237_vm0, %v2205_v3  ;;  %353 = vmatpush.bf16.msra.mxu2 %v1564_v17  ;;  %v1610_v35 = vor.u32 %v2062_v34, %v1609_v33  ;;  %v1603_v37 = vld [vmem:[%s2923_s2 + $0x68] sm:$0xf0]  ;;  %v1601_v38 = vld [vmem:[%s2923_s2 + $0x60] sm:$0xf]  ;;  %v2060_v40 = vld [vmem:[%s2923_s2 + $0x64] sm:$0xf0] }
  0x15   : > { %v1606_v39 = vor.u32 %v2059_v36, %v1603_v37  ;;  %v1602_v41 = vor.u32 %v2060_v40, %v1601_v38  ;;  %v2057_v42 = vld [vmem:[%s2923_s2 + $0x54] sm:$0xf]  ;;  %v1595_v43 = vld [vmem:[%s2923_s2 + $0x58] sm:$0xf0]  ;;  %v1593_v45 = vld [vmem:[%s2923_s2 + $0x50] sm:$0xf] }
  0x16   : > { %427 = vmatpush.bf16.msra.mxu3 %v1610_v35  ;;  %v1598_v44 = vor.u32 %v2057_v42, %v1595_v43  ;;  %v2058_v46 = vld [vmem:[%s2923_s2 + $0x54] sm:$0xf0]  ;;  %v2055_v48 = vld [vmem:[%s2923_s2 + $0x44] sm:$0xf]  ;;  %v1587_v49 = vld [vmem:[%s2923_s2 + $0x48] sm:$0xf0] }
  0x17   : > { %340 = vmatpush.bf16.msra.mxu1 %v1552_v21  ;;  %v1594_v47 = vor.u32 %v2058_v46, %v1593_v45  ;;  %v1585_v50 = vld [vmem:[%s2923_s2 + $0x40] sm:$0xf]  ;;  %v1590_v51 = vor.u32 %v2055_v48, %v1587_v49  ;;  %v2056_v52 = vld [vmem:[%s2923_s2 + $0x44] sm:$0xf0]  ;;  %v1651_v54 = vld [vmem:[%s2923_s2 + $0xb0] sm:$0xf] }
  0x18   : > { %354 = vmatpush.bf16.msra.mxu2 %v1556_v23  ;;  %v1586_v53 = vor.u32 %v2056_v52, %v1585_v50  ;;  %v2070_v55 = vld [vmem:[%s2923_s2 + $0xb4] sm:$0xf0]  ;;  %v2069_v56 = vld [vmem:[%s2923_s2 + $0xb4] sm:$0xf]  ;;  %v1653_v58 = vld [vmem:[%s2923_s2 + $0xb8] sm:$0xf0] }
  0x19   : > { %v1652_v57 = vor.u32 %v2070_v55, %v1651_v54  ;;  %v1656_v59 = vor.u32 %v2069_v56, %v1653_v58  ;;  %v1643_v61 = vld [vmem:[%s2923_s2 + $0xa0] sm:$0xf]  ;;  %v2068_v62 = vld [vmem:[%s2923_s2 + $0xa4] sm:$0xf0]  ;;  %v2067_v63 = vld [vmem:[%s2923_s2 + $0xa4] sm:$0xf] }
  0x1a   : > { %428 = vmatpush.bf16.msra.mxu3 %v1602_v41  ;;  %v1644_v0 = vor.u32 %v2068_v62, %v1643_v61  ;;  %v1645_v1 = vld [vmem:[%s2923_s2 + $0xa8] sm:$0xf0]  ;;  %v1635_v6 = vld [vmem:[%s2923_s2 + $0x90] sm:$0xf]  ;;  %v2066_v7 = vld [vmem:[%s2923_s2 + $0x94] sm:$0xf0] }
  0x1b   : > { %341 = vmatpush.bf16.msra.mxu1 %v1544_v27  ;;  %v1648_v2 = vor.u32 %v2067_v63, %v1645_v1  ;;  %v2065_v8 = vld [vmem:[%s2923_s2 + $0x94] sm:$0xf]  ;;  %v1636_v9 = vor.u32 %v2066_v7, %v1635_v6  ;;  %v1637_v10 = vld [vmem:[%s2923_s2 + $0x98] sm:$0xf0]  ;;  %v1627_v17 = vld [vmem:[%s2923_s2 + $0x80] sm:$0xf] }
  0x1c   : > { %355 = vmatpush.bf16.msra.mxu2 %v1548_v29  ;;  %v1640_v12 = vor.u32 %v2065_v8, %v1637_v10  ;;  %v1659_v14 = vld [vmem:[%s2198_s21 + $0x10] sm:$0xff]  ;;  %v1660_v15 = vld [vmem:[%s2198_s21 + $0x18] sm:$0xff]  ;;  %v2064_v18 = vld [vmem:[%s2923_s2 + $0x84] sm:$0xf0] }
  0x1d   : > { %v2063_v19 = vld [vmem:[%s2923_s2 + $0x84] sm:$0xf]  ;;  %v1628_v20 = vor.u32 %v2064_v18, %v1627_v17  ;;  %v1629_v21 = vld [vmem:[%s2923_s2 + $0x88] sm:$0xf0]  ;;  %v551_v25 = vpack.c.bf16 %v1660_v15, %v1659_v14  ;;  %v1690_v41 = vld [vmem:[%s2923_s2 + $0x30] sm:$0xf] }
  0x1e   : > { %429 = vmatpush.bf16.msra.mxu3 %v1594_v47  ;;  %v1632_v24 = vor.u32 %v2063_v19, %v1629_v21  ;;  %v2078_v42 = vld [vmem:[%s2923_s2 + $0x34] sm:$0xf0]  ;;  %v2077_v43 = vld [vmem:[%s2923_s2 + $0x34] sm:$0xf]  ;;  %v1692_v45 = vld [vmem:[%s2923_s2 + $0x38] sm:$0xf0] }
  0x1f   : > { %441 = vmatpush.bf16.msrb.mxu1 %v1614_v32  ;;  %v1695_v47 = vor.u32 %v2077_v43, %v1692_v45  ;;  %v1682_v48 = vld [vmem:[%s2923_s2 + $0x20] sm:$0xf]  ;;  %v2076_v49 = vld [vmem:[%s2923_s2 + $0x24] sm:$0xf0]  ;;  %v2075_v50 = vld [vmem:[%s2923_s2 + $0x24] sm:$0xf] }
  0x20   : > { %516 = vmatpush.bf16.msrb.mxu2 %v1652_v57  ;;  %v1684_v52 = vld [vmem:[%s2923_s2 + $0x28] sm:$0xf0]  ;;  %v1674_v54 = vld [vmem:[%s2923_s2 + $0x10] sm:$0xf]  ;;  %v2074_v55 = vld [vmem:[%s2923_s2 + $0x14] sm:$0xf0] }
  0x21   : > { %v2073_v56 = vld [vmem:[%s2923_s2 + $0x14] sm:$0xf]  ;;  %v1675_v57 = vor.u32 %v2074_v55, %v1674_v54  ;;  %v1676_v58 = vld [vmem:[%s2923_s2 + $0x18] sm:$0xf0]  ;;  %v1666_v61 = vld [vmem:[%s2923_s2] sm:$0xf] }
  0x22   : > { %430 = vmatpush.bf16.msra.mxu3 %v1586_v53  ;;  %v1687_v53 = vor.u32 %v2075_v50, %v1684_v52  ;;  %v2072_v62 = vld [vmem:[%s2923_s2 + $0x4] sm:$0xf0]  ;;  %v2071_v63 = vld [vmem:[%s2923_s2 + $0x4] sm:$0xf]  ;;  %v1668_v1 = vld [vmem:[%s2923_s2 + $0x8] sm:$0xf0] }
  0x23   : > { %442 = vmatpush.bf16.msrb.mxu1 %v1606_v39  ;;  %v2085_v6 = vld [vmem:[%s2923_s2 + $0x74] sm:$0xf]  ;;  %v1734_v7 = vld [vmem:[%s2923_s2 + $0x78] sm:$0xf0]  ;;  %v1732_v8 = vld [vmem:[%s2923_s2 + $0x70] sm:$0xf] }
  0x24   : > { %1539 = vmatmul.msk.bf16.gmra.mxu0 %vm237_vm0, %v2212_v4  ;;  %517 = vmatpush.bf16.msrb.mxu2 %v1644_v0  ;;  %v1667_v0 = vor.u32 %v2072_v62, %v1666_v61  ;;  %v2086_v10 = vld [vmem:[%s2923_s2 + $0x74] sm:$0xf0]  ;;  %v1726_v14 = vld [vmem:[%s2923_s2 + $0x68] sm:$0xf0]  ;;  %v1724_v15 = vld [vmem:[%s2923_s2 + $0x60] sm:$0xf] }
  0x25   : > { %v2084_v17 = vld [vmem:[%s2923_s2 + $0x64] sm:$0xf0]  ;;  %v1718_v21 = vld [vmem:[%s2923_s2 + $0x58] sm:$0xf0]  ;;  %v2089_v61 = vld [vmem:[%s2923_s2 + $0x94] sm:$0xf] }
  0x26   : > { %530 = vmatpush.bf16.msrb.mxu3 %v1656_v59  ;;  %v1725_v19 = vor.u32 %v2084_v17, %v1724_v15  ;;  %v1776_v43 = vld [vmem:[%s2923_s2 + $0xb8] sm:$0xf0]  ;;  %v1752_v17 = vld [vmem:[%s2923_s2 + $0x88] sm:$0xf0] }
  0x27   : > { %443 = vmatpush.bf16.msrb.mxu1 %v1598_v44  ;;  %v1691_v44 = vor.u32 %v2078_v42, %v1690_v41 }
  0x28   : > { %518 = vmatpush.bf16.msrb.mxu2 %v1636_v9  ;;  %v1737_v9 = vor.u32 %v2085_v6, %v1734_v7 }
  0x2a   : > { %531 = vmatpush.bf16.msrb.mxu3 %v1648_v2  ;;  %v1671_v2 = vor.u32 %v2071_v63, %v1668_v1  ;;  %v1760_v1 = vld [vmem:[%s2923_s2 + $0x98] sm:$0xf0] }
  0x2b   : > { %444 = vmatpush.bf16.msrb.mxu1 %v1590_v51  ;;  %v1683_v51 = vor.u32 %v2076_v49, %v1682_v48  ;;  %v2092_v48 = vld [vmem:[%s2923_s2 + $0xa4] sm:$0xf0]  ;;  %v2091_v49 = vld [vmem:[%s2923_s2 + $0xa4] sm:$0xf]  ;;  %v1763_v6 = vor.u32 %v2089_v61, %v1760_v1  ;;  %v2097_v61 = vld [vmem:[%s2923_s2 + $0x14] sm:$0xf] }
  0x2c   : > { %519 = vmatpush.bf16.msrb.mxu2 %v1628_v20  ;;  %v2081_v20 = vld [vmem:[%s2923_s2 + $0x54] sm:$0xf] }
  0x2e   : > { %532 = vmatpush.bf16.msrb.mxu3 %v1640_v12  ;;  %v1733_v12 = vor.u32 %v2086_v10, %v1732_v8  ;;  %v1786_v8 = vld [vmem:[%s2198_s21 + $0x20] sm:$0xff]  ;;  %v1787_v10 = vld [vmem:[%s2198_s21 + $0x28] sm:$0xff] }
  0x30   : > { %730 = vmatpush.bf16.msrb.mxu0 %v1733_v12  ;;  %v2088_v12 = vld [vmem:[%s2923_s2 + $0x84] sm:$0xf0] }
  0x32   : > { %533 = vmatpush.bf16.msrb.mxu3 %v1632_v24  ;;  %v1716_v24 = vld [vmem:[%s2923_s2 + $0x50] sm:$0xf] }
  0x34   : > { %1540 = vmatmul.msk.bf16.gmra.mxu0 %vm237_vm0, %v2219_v5 }
  0x35   : > { %731 = vmatpush.bf16.msrb.mxu0 %v1725_v19 }
  0x91   : > { %v256_v60 = vpop.f32.mrf.mxu0 }
  0x92   : > { %v271_v11 = vpack.c.bf16 %v256_v60, %v256_v60  ;;  %v1679_v60 = vor.u32 %v2073_v56, %v1676_v58  ;;  %v1758_v58 = vld [vmem:[%s2923_s2 + $0x90] sm:$0xf] }
  0x94   : > { %v287_v22 = vunpack.c.l.b16 %v271_v11 }
  0x99   : > { %v258_v13 = vpop.f32.mrf.mxu0 }
  0x9a   : > { %v272_v16 = vpack.c.bf16 %v258_v13, %v258_v13  ;;  %v2083_v13 = vld [vmem:[%s2923_s2 + $0x64] sm:$0xf] }
  0x9c   : > { %v288_v23 = vunpack.c.l.b16 %v272_v16  ;;  %v1729_v16 = vor.u32 %v2083_v13, %v1726_v14 }
  0x9e   : > { %v289_v26 = vpack.c.b16 %v288_v23, %v287_v22  ;;  %v1721_v22 = vor.u32 %v2081_v20, %v1718_v21 }
  0xa0   : > { %1573 = vmatmul.msk.bf16.vlgmr.msra.gmra.mxu1 %vm330_vm1, %v289_v26  ;;  %1574 = vmatmul.msk.bf16.vlgmr.msra.gmra.mxu2 %vm330_vm1, %v289_v26 }
  0xa1   : > { %v261_v27 = vpop.f32.mrf.mxu0  ;;  %559 = vmatpush.bf16.msra.mxu1 %v551_v25  ;;  %642 = vmatpush.bf16.msra.mxu2 %v1691_v44  ;;  %v2082_v25 = vld [vmem:[%s2923_s2 + $0x54] sm:$0xf0] }
  0xa2   : > { %v273_v28 = vpack.c.bf16 %v261_v27, %v261_v27  ;;  %v1717_v26 = vor.u32 %v2082_v25, %v1716_v24 }
  0xa4   : > { %v377_v31 = vunpack.c.l.b16 %v273_v28  ;;  %732 = vmatpush.bf16.msrb.mxu0 %v1717_v26  ;;  %v2079_v28 = vld [vmem:[%s2923_s2 + $0x44] sm:$0xf] }
  0xa5   : > { %643 = vmatpush.bf16.msra.mxu2 %v1683_v51 }
  0xa9   : > { %v263_v29 = vpop.f32.mrf.mxu0  ;;  %644 = vmatpush.bf16.msra.mxu2 %v1675_v57 }
  0xaa   : > { %v274_v30 = vpack.c.bf16 %v263_v29, %v263_v29  ;;  %v1710_v29 = vld [vmem:[%s2923_s2 + $0x48] sm:$0xf0] }
  0xac   : > { %v378_v32 = vunpack.c.l.b16 %v274_v30  ;;  %v1708_v30 = vld [vmem:[%s2923_s2 + $0x40] sm:$0xf] }
  0xad   : > { %645 = vmatpush.bf16.msra.mxu2 %v1667_v0 }
  0xae   : > { %v379_v33 = vpack.c.b16 %v378_v32, %v377_v31  ;;  %v1713_v31 = vor.u32 %v2079_v28, %v1710_v29  ;;  %v2080_v32 = vld [vmem:[%s2923_s2 + $0x44] sm:$0xf0] }
  0xb0   : > { %1615 = vmatmul.msk.bf16.vlgmr.msra.gmra.mxu3 %vm330_vm1, %v379_v33  ;;  %1616 = vmatmul.msk.bf16.vlgmr.msrb.gmra.mxu1 %vm330_vm1, %v379_v33  ;;  %v213_v33 = vld [vmem:[%s2924_s3] sm:$0x3] }
  0xb1   : > { %v266_v34 = vpop.f32.mrf.mxu0  ;;  %656 = vmatpush.bf16.msra.mxu3 %v1695_v47  ;;  %v2497_v41 = vperm.slane %v213_v33, 1  ;;  %v1766_v47 = vld [vmem:[%s2923_s2 + $0xa0] sm:$0xf] }
  0xb2   : > { %v275_v35 = vpack.c.bf16 %v266_v34, %v266_v34  ;;  %v1709_v34 = vor.u32 %v2080_v32, %v1708_v30  ;;  %v1767_v52 = vor.u32 %v2092_v48, %v1766_v47  ;;  %v2101_v48 = vld [vmem:[%s2923_s2 + $0x34] sm:$0xf] }
  0xb4   : > { %v466_v37 = vunpack.c.l.b16 %v275_v35  ;;  %733 = vmatpush.bf16.msrb.mxu0 %v1709_v34 }
  0xb5   : > { %657 = vmatpush.bf16.msra.mxu3 %v1687_v53  ;;  %v1768_v53 = vld [vmem:[%s2923_s2 + $0xa8] sm:$0xf0] }
  0xb6   : > { %v1771_v54 = vor.u32 %v2091_v49, %v1768_v53  ;;  %v1819_v49 = vld [vmem:[%s2923_s2 + $0x38] sm:$0xf0]  ;;  %v2100_v53 = vld [vmem:[%s2923_s2 + $0x24] sm:$0xf0] }
  0xb9   : > { %v268_v36 = vpop.f32.mrf.mxu0  ;;  %658 = vmatpush.bf16.msra.mxu3 %v1679_v60  ;;  %v2090_v60 = vld [vmem:[%s2923_s2 + $0x94] sm:$0xf0] }
  0xba   : > { %v276_v38 = vpack.c.bf16 %v268_v36, %v268_v36  ;;  %v1759_v0 = vor.u32 %v2090_v60, %v1758_v58  ;;  %v2098_v58 = vld [vmem:[%s2923_s2 + $0x14] sm:$0xf0] }
  0xbc   : > { %v467_v39 = vunpack.c.l.b16 %v276_v38  ;;  %v2094_v38 = vld [vmem:[%s2923_s2 + $0xb4] sm:$0xf0] }
  0xbd   : > { %659 = vmatpush.bf16.msra.mxu3 %v1671_v2 }
  0xbe   : > { %v468_v40 = vpack.c.b16 %v467_v39, %v466_v37  ;;  %v1774_v37 = vld [vmem:[%s2923_s2 + $0xb0] sm:$0xf]  ;;  %v2093_v39 = vld [vmem:[%s2923_s2 + $0xb4] sm:$0xf] }
  0xbf   : > { %v1775_v42 = vor.u32 %v2094_v38, %v1774_v37  ;;  %v1779_v44 = vor.u32 %v2093_v39, %v1776_v43 }
  0xc0   : > { %1657 = vmatmul.msk.bf16.vlgmr.msrb.gmra.mxu2 %vm330_vm1, %v468_v40  ;;  %1658 = vmatmul.msk.bf16.vlgmr.msrb.gmra.mxu3 %vm330_vm1, %v468_v40  ;;  %v2495_v40 = vperm.slane %v213_v33, 0 }
  0xc1   : > { %1661 = vmatmul.msk.bf16.vlgmr.msra.gmra.mxu1 %vm237_vm0, %v2205_v3  ;;  %744 = vmatpush.bf16.msrb.mxu2 %v1737_v9 }
  0xc2   : > { %818 = vmatpush.bf16.msrb.mxu3 %v1775_v42  ;;  %832 = vmatpush.bf16.msra.mxu0 %v1779_v44  ;;  %v1817_v44 = vld [vmem:[%s2923_s2 + $0x30] sm:$0xf] }
  0xc5   : > { %745 = vmatpush.bf16.msrb.mxu2 %v1729_v16  ;;  %v2087_v16 = vld [vmem:[%s2923_s2 + $0x84] sm:$0xf] }
  0xc6   : > { %819 = vmatpush.bf16.msrb.mxu3 %v1767_v52  ;;  %833 = vmatpush.bf16.msra.mxu0 %v1771_v54  ;;  %v1755_v20 = vor.u32 %v2087_v16, %v1752_v17  ;;  %v1809_v52 = vld [vmem:[%s2923_s2 + $0x20] sm:$0xf]  ;;  %v2099_v54 = vld [vmem:[%s2923_s2 + $0x24] sm:$0xf]  ;;  %v2110_v16 = vld [vmem:[%s2923_s2 + $0x74] sm:$0xf0] }
  0xc9   : > { %746 = vmatpush.bf16.msrb.mxu2 %v1721_v22 }
  0xca   : > { %820 = vmatpush.bf16.msrb.mxu3 %v1759_v0  ;;  %834 = vmatpush.bf16.msra.mxu0 %v1763_v6  ;;  %v2096_v6 = vld [vmem:[%s2923_s2 + $0x4] sm:$0xf0] }
  0xcd   : > { %747 = vmatpush.bf16.msrb.mxu2 %v1713_v31 }
  0xce   : > { %835 = vmatpush.bf16.msra.mxu0 %v1755_v20  ;;  %v2107_v20 = vld [vmem:[%s2923_s2 + $0x64] sm:$0xf] }
  0xd1   : > { %1662 = vmatmul.msk.bf16.gmra.mxu1 %vm237_vm0, %v2212_v4 }
  0xe1   : > { %1663 = vmatmul.msk.bf16.gmra.mxu1 %vm237_vm0, %v2219_v5 }
 0x11d   : > { %v2393_v46 = vpop.f32.mrf.mxu1 }
 0x11e   : > { %v362_v50 = vadd.f32 %v2393_v46, %v2495_v40 }
 0x123   : > { %v357_v18 = vpop.f32.mrf.mxu2 }
 0x124   : > { %v363_v51 = vadd.f32 %v357_v18, %v2497_v41 }
 0x125   : > { %v2419_v59 = vpop.f32.mrf.mxu1 }
 0x126   : > { %v364_v13 = vadd.f32 %v2419_v59, %v2495_v40  ;;  %v854_v59 = vpack.c.bf16 %v1787_v10, %v1786_v8 }
 0x12b   : > { %v359_v35 = vpop.f32.mrf.mxu2 }
 0x12c   : > { %v365_v14 = vadd.f32 %v359_v35, %v2497_v41 }
 0x12d   : > { %v446_v11 = vpop.f32.mrf.mxu1 }
 0x12e   : > { %v452_v55 = vadd.f32 %v446_v11, %v363_v51  ;;  %v1750_v11 = vld [vmem:[%s2923_s2 + $0x80] sm:$0xf] }
 0x12f   : > { %v1751_v15 = vor.u32 %v2088_v12, %v1750_v11  ;;  %v2109_v12 = vld [vmem:[%s2923_s2 + $0x74] sm:$0xf] }
 0x131   : > { %821 = vmatpush.bf16.msrb.mxu3 %v1751_v15 }
 0x133   : > { %v432_v23 = vpop.f32.mrf.mxu3 }
 0x134   : > { %v451_v56 = vadd.f32 %v432_v23, %v362_v50  ;;  %v1822_v50 = vor.u32 %v2101_v48, %v1819_v49  ;;  %v2118_v48 = vld [vmem:[%s2923_s2 + $0xb4] sm:$0xf0]  ;;  %v2117_v49 = vld [vmem:[%s2923_s2 + $0xb4] sm:$0xf] }
 0x135   : > { %v2469_v27 = vpop.f32.mrf.mxu1 }
 0x136   : > { %v454_v21 = vadd.f32 %v2469_v27, %v365_v14  ;;  %v1859_v14 = vld [vmem:[%s2923_s2 + $0x70] sm:$0xf] }
 0x13b   : > { %v434_v36 = vpop.f32.mrf.mxu3 }
 0x13c   : > { %v453_v22 = vadd.f32 %v434_v36, %v364_v13  ;;  %v1861_v13 = vld [vmem:[%s2923_s2 + $0x78] sm:$0xf0] }
 0x13d   : > { %v1864_v15 = vor.u32 %v2109_v12, %v1861_v13  ;;  %v1887_v12 = vld [vmem:[%s2923_s2 + $0x98] sm:$0xf0] }
 0x13e   : > { %v561_v45 = vpop.f32.mrf.mxu1 }
 0x13f   : > { %v576_v2 = vpack.c.bf16 %v561_v45, %v561_v45  ;;  %v2102_v45 = vld [vmem:[%s2923_s2 + $0x34] sm:$0xf0] }
 0x140   : > { %v1818_v47 = vor.u32 %v2102_v45, %v1817_v44 }
 0x141   : > { %v592_v18 = vunpack.c.l.b16 %v576_v2  ;;  %v1793_v2 = vld [vmem:[%s2923_s2] sm:$0xf] }
 0x142   : > { %v1794_v8 = vor.u32 %v2096_v6, %v1793_v2  ;;  %v1895_v2 = vld [vmem:[%s2923_s2 + $0xa8] sm:$0xf0] }
 0x143   : > { %v521_v57 = vpop.f32.mrf.mxu2  ;;  %v535_v46 = vpop.f32.mrf.mxu3 }
 0x144   : > { %v540_v62 = vadd.f32 %v521_v57, %v451_v56  ;;  %v541_v63 = vadd.f32 %v535_v46, %v452_v55  ;;  %v1810_v55 = vor.u32 %v2100_v53, %v1809_v52  ;;  %v1811_v56 = vld [vmem:[%s2923_s2 + $0x28] sm:$0xf0]  ;;  %v1801_v46 = vld [vmem:[%s2923_s2 + $0x10] sm:$0xf]  ;;  %v1903_v53 = vld [vmem:[%s2923_s2 + $0xb8] sm:$0xf0] }
 0x145   : > { %v1814_v57 = vor.u32 %v2099_v54, %v1811_v56  ;;  %v1802_v60 = vor.u32 %v2098_v58, %v1801_v46 }
 0x146   : > { %544 = vst [vmem:[%s2521_s25] sm:$0xff] %v540_v62  ;;  %v563_v7 = vpop.f32.mrf.mxu1  ;;  %v1803_v62 = vld [vmem:[%s2923_s2 + $0x18] sm:$0xf0] }
 0x147   : > { %545 = vst.msk [vmem:[%s2521_s25 + $0x8] sm:$0xff] %vm330_vm1, %v541_v63  ;;  %v577_v9 = vpack.c.bf16 %v563_v7, %v563_v7  ;;  %v1806_v63 = vor.u32 %v2097_v61, %v1803_v62  ;;  %v2095_v7 = vld [vmem:[%s2923_s2 + $0x4] sm:$0xf]  ;;  %v2116_v61 = vld [vmem:[%s2923_s2 + $0xa4] sm:$0xf0] }
 0x148   : > { %v2115_v62 = vld [vmem:[%s2923_s2 + $0xa4] sm:$0xf] }
 0x149   : > { %v593_v19 = vunpack.c.l.b16 %v577_v9  ;;  %v1795_v9 = vld [vmem:[%s2923_s2 + $0x8] sm:$0xf0]  ;;  %v1898_v6 = vor.u32 %v2115_v62, %v1895_v2  ;;  %v1928_v2 = vld [vmem:[%s2923_s2 + $0x10] sm:$0xf] }
 0x14a   : > { %v1798_v10 = vor.u32 %v2095_v7, %v1795_v9  ;;  %v2114_v9 = vld [vmem:[%s2923_s2 + $0x94] sm:$0xf0] }
 0x14b   : > { %v594_v23 = vpack.c.b16 %v593_v19, %v592_v18  ;;  %v523_v24 = vpop.f32.mrf.mxu2  ;;  %v537_v25 = vpop.f32.mrf.mxu3  ;;  %v1860_v18 = vor.u32 %v2110_v16, %v1859_v14 }
 0x14c   : > { %v542_v26 = vadd.f32 %v523_v24, %v453_v22  ;;  %v543_v28 = vadd.f32 %v537_v25, %v454_v21  ;;  %v1853_v21 = vld [vmem:[%s2923_s2 + $0x68] sm:$0xf0]  ;;  %v1851_v22 = vld [vmem:[%s2923_s2 + $0x60] sm:$0xf]  ;;  %v2105_v25 = vld [vmem:[%s2923_s2 + $0x54] sm:$0xf] }
 0x14d   : > { %1696 = vmatmul.msk.bf16.vlgmr.msra.gmra.mxu2 %vm330_vm1, %v594_v23  ;;  %1697 = vmatmul.msk.bf16.vlgmr.msra.gmra.mxu3 %vm330_vm1, %v594_v23  ;;  %v2108_v23 = vld [vmem:[%s2923_s2 + $0x64] sm:$0xf0] }
 0x14e   : > { %546 = vst [vmem:[%s2521_s25 + $0x10] sm:$0xff] %v542_v26  ;;  %v566_v29 = vpop.f32.mrf.mxu1  ;;  %862 = vmatpush.bf16.msra.mxu2 %v854_v59  ;;  %945 = vmatpush.bf16.msra.mxu3 %v1818_v47  ;;  %v1856_v59 = vor.u32 %v2107_v20, %v1853_v21  ;;  %v1852_v24 = vor.u32 %v2108_v23, %v1851_v22  ;;  %v1845_v26 = vld [vmem:[%s2923_s2 + $0x58] sm:$0xf0]  ;;  %v1901_v47 = vld [vmem:[%s2923_s2 + $0xb0] sm:$0xf] }
 0x14f   : > { %547 = vst.msk [vmem:[%s2521_s25 + $0x18] sm:$0xff] %vm330_vm1, %v543_v28  ;;  %v578_v30 = vpack.c.bf16 %v566_v29, %v566_v29  ;;  %1033 = vmatpush.bf16.msrb.mxu1 %v1860_v18  ;;  %v1848_v28 = vor.u32 %v2105_v25, %v1845_v26  ;;  %v1843_v29 = vld [vmem:[%s2923_s2 + $0x50] sm:$0xf]  ;;  %v1902_v52 = vor.u32 %v2118_v48, %v1901_v47  ;;  %v1914_v20 = vld [vmem:[%s2198_s21 + $0x38] sm:$0xff]  ;;  %v2112_v22 = vld [vmem:[%s2923_s2 + $0x84] sm:$0xf0] }
 0x150   : > { %v1913_v18 = vld [vmem:[%s2198_s21 + $0x30] sm:$0xff]  ;;  %v2134_v48 = vld [vmem:[%s2923_s2 + $0x74] sm:$0xf0] }
 0x151   : > { %v680_v32 = vunpack.c.l.b16 %v578_v30  ;;  %v2106_v30 = vld [vmem:[%s2923_s2 + $0x54] sm:$0xf0]  ;;  %v1986_v47 = vld [vmem:[%s2923_s2 + $0x70] sm:$0xf] }
 0x152   : > { %946 = vmatpush.bf16.msra.mxu3 %v1810_v55  ;;  %v1906_v55 = vor.u32 %v2117_v49, %v1903_v53  ;;  %v1987_v49 = vor.u32 %v2134_v48, %v1986_v47  ;;  %v1946_v53 = vld [vmem:[%s2923_s2 + $0x38] sm:$0xf0] }
 0x153   : > { %1034 = vmatpush.bf16.msrb.mxu1 %v1852_v24  ;;  %v1879_v24 = vld [vmem:[%s2923_s2 + $0x88] sm:$0xf0] }
 0x156   : > { %v568_v27 = vpop.f32.mrf.mxu1  ;;  %947 = vmatpush.bf16.msra.mxu3 %v1802_v60  ;;  %v1893_v60 = vld [vmem:[%s2923_s2 + $0xa0] sm:$0xf] }
 0x157   : > { %v579_v31 = vpack.c.bf16 %v568_v27, %v568_v27 }
 0x159   : > { %v681_v33 = vunpack.c.l.b16 %v579_v31  ;;  %v1844_v31 = vor.u32 %v2106_v30, %v1843_v29  ;;  %v1157_v29 = vpack.c.bf16 %v1914_v20, %v1913_v18  ;;  %v1922_v18 = vld [vmem:[%s2923_s2 + $0x8] sm:$0xf0] }
 0x15a   : > { %948 = vmatpush.bf16.msra.mxu3 %v1794_v8  ;;  %v1885_v8 = vld [vmem:[%s2923_s2 + $0x90] sm:$0xf] }
 0x15b   : > { %v682_v34 = vpack.c.b16 %v681_v33, %v680_v32  ;;  %1035 = vmatpush.bf16.msrb.mxu1 %v1844_v31 }
 0x15d   : > { %1738 = vmatmul.msk.bf16.vlgmr.msrb.gmra.mxu0 %vm330_vm1, %v682_v34  ;;  %1739 = vmatmul.msk.bf16.vlgmr.msrb.gmra.mxu2 %vm330_vm1, %v682_v34 }
 0x15e   : > { %v571_v35 = vpop.f32.mrf.mxu1  ;;  %959 = vmatpush.bf16.msrb.mxu0 %v1822_v50  ;;  %1336 = vmatpush.bf16.msrb.mxu2 %v1987_v49  ;;  %v2141_v49 = vld [vmem:[%s2923_s2 + $0xb4] sm:$0xf] }
 0x15f   : > { %v580_v36 = vpack.c.bf16 %v571_v35, %v571_v35 }
 0x161   : > { %v768_v38 = vunpack.c.l.b16 %v580_v36  ;;  %v2103_v36 = vld [vmem:[%s2923_s2 + $0x44] sm:$0xf] }
 0x162   : > { %960 = vmatpush.bf16.msrb.mxu0 %v1814_v57 }
 0x166   : > { %v573_v37 = vpop.f32.mrf.mxu1  ;;  %961 = vmatpush.bf16.msrb.mxu0 %v1806_v63 }
 0x167   : > { %v581_v39 = vpack.c.bf16 %v573_v37, %v573_v37  ;;  %v1837_v37 = vld [vmem:[%s2923_s2 + $0x48] sm:$0xf0] }
 0x169   : > { %v769_v42 = vunpack.c.l.b16 %v581_v39 }
 0x16a   : > { %962 = vmatpush.bf16.msrb.mxu0 %v1798_v10  ;;  %v2113_v10 = vld [vmem:[%s2923_s2 + $0x94] sm:$0xf] }
 0x16b   : > { %v770_v43 = vpack.c.b16 %v769_v42, %v768_v38  ;;  %v1835_v38 = vld [vmem:[%s2923_s2 + $0x40] sm:$0xf]  ;;  %v1840_v42 = vor.u32 %v2103_v36, %v1837_v37 }
 0x16d   : > { %1780 = vmatmul.msk.bf16.vlgmr.msrb.gmra.mxu3 %vm330_vm1, %v770_v43  ;;  %1781 = vmatmul.msk.bf16.vlgmr.msra.gmra.mxu0 %vm330_vm1, %v770_v43  ;;  %v2104_v43 = vld [vmem:[%s2923_s2 + $0x44] sm:$0xf0] }
 0x16e   : > { %1788 = vmatmul.msk.bf16.vlgmr.msra.gmra.mxu2 %vm237_vm0, %v2205_v3  ;;  %1047 = vmatpush.bf16.msrb.mxu3 %v1864_v15  ;;  %v1836_v44 = vor.u32 %v2104_v43, %v1835_v38  ;;  %v1890_v15 = vor.u32 %v2113_v10, %v1887_v12 }
 0x16f   : > { %1121 = vmatpush.bf16.msra.mxu0 %v1902_v52  ;;  %v2125_v52 = vld [vmem:[%s2923_s2 + $0x34] sm:$0xf] }
 0x170   : > { %1036 = vmatpush.bf16.msrb.mxu1 %v1836_v44 }
 0x172   : > { %1048 = vmatpush.bf16.msrb.mxu3 %v1856_v59  ;;  %v2111_v59 = vld [vmem:[%s2923_s2 + $0x84] sm:$0xf] }
 0x174   : > { %1135 = vmatpush.bf16.msra.mxu1 %v1906_v55 }
 0x176   : > { %1049 = vmatpush.bf16.msrb.mxu3 %v1848_v28  ;;  %v1882_v28 = vor.u32 %v2111_v59, %v1879_v24 }
 0x178   : > { %1136 = vmatpush.bf16.msra.mxu1 %v1898_v6 }
 0x17a   : > { %1050 = vmatpush.bf16.msrb.mxu3 %v1840_v42 }
 0x17c   : > { %1137 = vmatpush.bf16.msra.mxu1 %v1890_v15  ;;  %v2120_v15 = vld [vmem:[%s2923_s2 + $0x4] sm:$0xf0] }
 0x17e   : > { %1789 = vmatmul.msk.bf16.gmra.mxu2 %vm237_vm0, %v2212_v4 }
 0x180   : > { %1138 = vmatpush.bf16.msra.mxu1 %v1882_v28 }
 0x18e   : > { %1790 = vmatmul.msk.bf16.gmra.mxu2 %vm237_vm0, %v2219_v5 }
 0x1d0   : > { %v2583_v51 = vpop.f32.mrf.mxu2  ;;  %v661_v11 = vpop.f32.mrf.mxu3 }
 0x1d1   : > { %v667_v27 = vadd.f32 %v661_v11, %v2497_v41  ;;  %v666_v45 = vadd.f32 %v2583_v51, %v2495_v40 }
 0x1d8   : > { %v2609_v0 = vpop.f32.mrf.mxu2  ;;  %v663_v32 = vpop.f32.mrf.mxu3 }
 0x1d9   : > { %v669_v50 = vadd.f32 %v663_v32, %v2497_v41  ;;  %v668_v7 = vadd.f32 %v2609_v0, %v2495_v40  ;;  %v1886_v0 = vor.u32 %v2114_v9, %v1885_v8  ;;  %v2121_v8 = vld [vmem:[%s2923_s2 + $0x14] sm:$0xf]  ;;  %v1930_v9 = vld [vmem:[%s2923_s2 + $0x18] sm:$0xf0] }
 0x1da   : > { %v735_v1 = vpop.f32.mrf.mxu0  ;;  %v1933_v12 = vor.u32 %v2121_v8, %v1930_v9  ;;  %v2014_v8 = vld [vmem:[%s2923_s2 + $0x98] sm:$0xf0] }
 0x1db   : > { %v754_v51 = vadd.f32 %v735_v1, %v666_v45  ;;  %v1894_v1 = vor.u32 %v2116_v61, %v1893_v60  ;;  %v1938_v61 = vld [vmem:[%s2923_s2 + $0x28] sm:$0xf0] }
 0x1dd   : > { %1122 = vmatpush.bf16.msra.mxu0 %v1894_v1  ;;  %v2130_v1 = vld [vmem:[%s2923_s2 + $0x54] sm:$0xf0] }
 0x1e0   : > { %v749_v17 = vpop.f32.mrf.mxu2 }
 0x1e1   : > { %v755_v34 = vadd.f32 %v749_v17, %v667_v27  ;;  %1123 = vmatpush.bf16.msra.mxu0 %v1886_v0 }
 0x1e2   : > { %v2635_v19 = vpop.f32.mrf.mxu0 }
 0x1e3   : > { %v756_v11 = vadd.f32 %v2635_v19, %v668_v7  ;;  %v1877_v19 = vld [vmem:[%s2923_s2 + $0x80] sm:$0xf]  ;;  %v2122_v7 = vld [vmem:[%s2923_s2 + $0x14] sm:$0xf0] }
 0x1e4   : > { %v1878_v23 = vor.u32 %v2112_v22, %v1877_v19  ;;  %v1929_v0 = vor.u32 %v2122_v7, %v1928_v2  ;;  %v1988_v19 = vld [vmem:[%s2923_s2 + $0x78] sm:$0xf0]  ;;  %v2140_v2 = vld [vmem:[%s2923_s2 + $0xa4] sm:$0xf0]  ;;  %v2137_v7 = vld [vmem:[%s2923_s2 + $0x94] sm:$0xf] }
 0x1e5   : > { %v2017_v9 = vor.u32 %v2137_v7, %v2014_v8 }
 0x1e6   : > { %1124 = vmatpush.bf16.msra.mxu0 %v1878_v23 }
 0x1e8   : > { %v751_v33 = vpop.f32.mrf.mxu2 }
 0x1e9   : > { %v757_v56 = vadd.f32 %v751_v33, %v669_v50 }
 0x1ea   : > { %v837_v35 = vpop.f32.mrf.mxu0 }
 0x1eb   : > { %v843_v39 = vadd.f32 %v837_v35, %v755_v34 }
 0x1ed   : > { %1783 = vst.msk [vmem:[%s2521_s25 + $0x28] sm:$0xff] %vm330_vm1, %v843_v39 }
 0x1f0   : > { %v823_v54 = vpop.f32.mrf.mxu3 }
 0x1f1   : > { %v842_v57 = vadd.f32 %v823_v54, %v754_v51  ;;  %v864_v46 = vpop.f32.mrf.mxu2  ;;  %v2126_v51 = vld [vmem:[%s2923_s2 + $0x34] sm:$0xf0] }
 0x1f2   : > { %v839_v58 = vpop.f32.mrf.mxu0  ;;  %v879_v13 = vpack.c.bf16 %v864_v46, %v864_v46  ;;  %v2124_v46 = vld [vmem:[%s2923_s2 + $0x24] sm:$0xf0] }
 0x1f3   : > { %1782 = vst [vmem:[%s2521_s25 + $0x20] sm:$0xff] %v842_v57  ;;  %v845_v63 = vadd.f32 %v839_v58, %v757_v56  ;;  %v1949_v56 = vor.u32 %v2125_v52, %v1946_v53  ;;  %v1936_v57 = vld [vmem:[%s2923_s2 + $0x20] sm:$0xf]  ;;  %v2123_v58 = vld [vmem:[%s2923_s2 + $0x24] sm:$0xf] }
 0x1f4   : > { %v895_v25 = vunpack.c.l.b16 %v879_v13  ;;  %v1937_v60 = vor.u32 %v2124_v46, %v1936_v57  ;;  %v1941_v62 = vor.u32 %v2123_v58, %v1938_v61  ;;  %v2142_v52 = vld [vmem:[%s2923_s2 + $0xb4] sm:$0xf0]  ;;  %v2139_v58 = vld [vmem:[%s2923_s2 + $0xa4] sm:$0xf]  ;;  %v2020_v61 = vld [vmem:[%s2923_s2 + $0xa0] sm:$0xf] }
 0x1f5   : > { %1785 = vst.msk [vmem:[%s2521_s25 + $0x38] sm:$0xff] %vm330_vm1, %v845_v63  ;;  %v1970_v63 = vld [vmem:[%s2923_s2 + $0x50] sm:$0xf] }
 0x1f6   : > { %v1971_v6 = vor.u32 %v2130_v1, %v1970_v63 }
 0x1f8   : > { %v825_v14 = vpop.f32.mrf.mxu3 }
 0x1f9   : > { %v844_v16 = vadd.f32 %v825_v14, %v756_v11  ;;  %v866_v17 = vpop.f32.mrf.mxu2  ;;  %v1920_v14 = vld [vmem:[%s2923_s2] sm:$0xf] }
 0x1fa   : > { %v880_v21 = vpack.c.bf16 %v866_v17, %v866_v17  ;;  %v1921_v17 = vor.u32 %v2120_v15, %v1920_v14  ;;  %v2135_v15 = vld [vmem:[%s2923_s2 + $0x84] sm:$0xf] }
 0x1fb   : > { %1784 = vst [vmem:[%s2521_s25 + $0x30] sm:$0xff] %v844_v16  ;;  %v2119_v16 = vld [vmem:[%s2923_s2 + $0x4] sm:$0xf] }
 0x1fc   : > { %v896_v26 = vunpack.c.l.b16 %v880_v21  ;;  %v1925_v20 = vor.u32 %v2119_v16, %v1922_v18  ;;  %v2133_v21 = vld [vmem:[%s2923_s2 + $0x74] sm:$0xf]  ;;  %v2006_v16 = vld [vmem:[%s2923_s2 + $0x88] sm:$0xf0] }
 0x1fd   : > { %v1991_v22 = vor.u32 %v2133_v21, %v1988_v19  ;;  %v2009_v18 = vor.u32 %v2135_v15, %v2006_v16 }
 0x1fe   : > { %v897_v30 = vpack.c.b16 %v896_v26, %v895_v25  ;;  %v2131_v25 = vld [vmem:[%s2923_s2 + $0x64] sm:$0xf]  ;;  %v1980_v26 = vld [vmem:[%s2923_s2 + $0x68] sm:$0xf0] }
 0x1ff   : > { %v1983_v28 = vor.u32 %v2131_v25, %v1980_v26 }
 0x200   : > { %1823 = vmatmul.msk.bf16.vlgmr.msra.gmra.mxu3 %vm330_vm1, %v897_v30  ;;  %1824 = vmatmul.msk.bf16.vlgmr.msrb.gmra.mxu0 %vm330_vm1, %v897_v30  ;;  %v2128_v30 = vld [vmem:[%s2923_s2 + $0x44] sm:$0xf0] }
 0x201   : > { %v869_v27 = vpop.f32.mrf.mxu2  ;;  %1165 = vmatpush.bf16.msra.mxu3 %v1157_v29  ;;  %v1962_v29 = vld [vmem:[%s2923_s2 + $0x40] sm:$0xf] }
 0x202   : > { %v881_v31 = vpack.c.bf16 %v869_v27, %v869_v27  ;;  %v1963_v27 = vor.u32 %v2128_v30, %v1962_v29 }
 0x204   : > { %v983_v34 = vunpack.c.l.b16 %v881_v31  ;;  %v2129_v31 = vld [vmem:[%s2923_s2 + $0x54] sm:$0xf] }
 0x209   : > { %v871_v32 = vpop.f32.mrf.mxu2 }
 0x20a   : > { %v882_v33 = vpack.c.bf16 %v871_v32, %v871_v32  ;;  %v1972_v32 = vld [vmem:[%s2923_s2 + $0x58] sm:$0xf0] }
 0x20c   : > { %v984_v35 = vunpack.c.l.b16 %v882_v33 }
 0x20e   : > { %v985_v36 = vpack.c.b16 %v984_v35, %v983_v34  ;;  %v1975_v35 = vor.u32 %v2129_v31, %v1972_v32 }
 0x210   : > { %1865 = vmatmul.msk.bf16.vlgmr.msrb.gmra.mxu1 %vm330_vm1, %v985_v36  ;;  %1866 = vmatmul.msk.bf16.vlgmr.msrb.gmra.mxu3 %vm330_vm1, %v985_v36 }
 0x211   : > { %v874_v37 = vpop.f32.mrf.mxu2  ;;  %1262 = vmatpush.bf16.msrb.mxu1 %v1949_v56 }
 0x212   : > { %v883_v38 = vpack.c.bf16 %v874_v37, %v874_v37 }
 0x214   : > { %v1071_v42 = vunpack.c.l.b16 %v883_v38 }
 0x215   : > { %1263 = vmatpush.bf16.msrb.mxu1 %v1941_v62 }
 0x219   : > { %v876_v39 = vpop.f32.mrf.mxu2  ;;  %1264 = vmatpush.bf16.msrb.mxu1 %v1933_v12 }
 0x21a   : > { %v884_v43 = vpack.c.bf16 %v876_v39, %v876_v39 }
 0x21c   : > { %v1072_v44 = vunpack.c.l.b16 %v884_v43  ;;  %v2127_v43 = vld [vmem:[%s2923_s2 + $0x44] sm:$0xf] }
 0x21d   : > { %1265 = vmatpush.bf16.msrb.mxu1 %v1925_v20  ;;  %v2136_v20 = vld [vmem:[%s2923_s2 + $0x84] sm:$0xf0] }
 0x21e   : > { %v1073_v45 = vpack.c.b16 %v1072_v44, %v1071_v42  ;;  %v1964_v44 = vld [vmem:[%s2923_s2 + $0x48] sm:$0xf0] }
 0x21f   : > { %v1967_v48 = vor.u32 %v2127_v43, %v1964_v44 }
 0x220   : > { %1907 = vmatmul.msk.bf16.vlgmr.msra.gmra.mxu0 %vm330_vm1, %v1073_v45  ;;  %1908 = vmatmul.msk.bf16.vlgmr.msra.gmra.mxu1 %vm330_vm1, %v1073_v45 }
 0x221   : > { %1915 = vmatmul.msk.bf16.vlgmr.msra.gmra.mxu3 %vm237_vm0, %v2205_v3  ;;  %v1978_v3 = vld [vmem:[%s2923_s2 + $0x60] sm:$0xf] }
 0x231   : > { %1916 = vmatmul.msk.bf16.gmra.mxu3 %vm237_vm0, %v2212_v4  ;;  %v2132_v4 = vld [vmem:[%s2923_s2 + $0x64] sm:$0xf0] }
 0x232   : > { %v1979_v50 = vor.u32 %v2132_v4, %v1978_v3  ;;  %v2030_v3 = vld [vmem:[%s2923_s2 + $0xb8] sm:$0xf0] }
 0x234   : > { %1337 = vmatpush.bf16.msrb.mxu2 %v1979_v50  ;;  %v2033_v50 = vor.u32 %v2141_v49, %v2030_v3 }
 0x238   : > { %1338 = vmatpush.bf16.msrb.mxu2 %v1971_v6  ;;  %v2021_v6 = vor.u32 %v2140_v2, %v2020_v61 }
 0x23c   : > { %1339 = vmatpush.bf16.msrb.mxu2 %v1963_v27 }
 0x240   : > { %1438 = vmatpush.bf16.msra.mxu2 %v2033_v50 }
 0x241   : > { %1917 = vmatmul.msk.bf16.gmra.mxu3 %vm237_vm0, %v2219_v5  ;;  %v1944_v5 = vld [vmem:[%s2923_s2 + $0x30] sm:$0xf] }
 0x242   : > { %v1945_v55 = vor.u32 %v2126_v51, %v1944_v5  ;;  %v2028_v51 = vld [vmem:[%s2923_s2 + $0xb0] sm:$0xf] }
 0x243   : > { %v2029_v53 = vor.u32 %v2142_v52, %v2028_v51 }
 0x244   : > { %1248 = vmatpush.bf16.msrb.mxu0 %v1945_v55 }
 0x245   : > { %1424 = vmatpush.bf16.msra.mxu1 %v2029_v53 }
 0x248   : > { %1249 = vmatpush.bf16.msrb.mxu0 %v1937_v60  ;;  %v2022_v60 = vld [vmem:[%s2923_s2 + $0xa8] sm:$0xf0] }
 0x249   : > { %v2025_v1 = vor.u32 %v2139_v58, %v2022_v60  ;;  %1425 = vmatpush.bf16.msra.mxu1 %v2021_v6 }
 0x24b   : > { %1439 = vmatpush.bf16.msra.mxu2 %v2025_v1 }
 0x24c   : > { %1250 = vmatpush.bf16.msrb.mxu0 %v1929_v0 }
 0x24f   : > { %1440 = vmatpush.bf16.msra.mxu2 %v2017_v9 }
 0x250   : > { %1251 = vmatpush.bf16.msrb.mxu0 %v1921_v17  ;;  %v2004_v17 = vld [vmem:[%s2923_s2 + $0x80] sm:$0xf] }
 0x253   : > { %1441 = vmatpush.bf16.msra.mxu2 %v2009_v18 }
 0x254   : > { %1350 = vmatpush.bf16.msra.mxu0 %v1991_v22  ;;  %v2005_v22 = vor.u32 %v2136_v20, %v2004_v17 }
 0x258   : > { %1351 = vmatpush.bf16.msra.mxu0 %v1983_v28 }
 0x25c   : > { %1352 = vmatpush.bf16.msra.mxu0 %v1975_v35 }
 0x260   : > { %1353 = vmatpush.bf16.msra.mxu0 %v1967_v48 }
 0x27d   : > { %v964_v10 = vpop.f32.mrf.mxu0 }
 0x27e   : > { %v970_v33 = vadd.f32 %v964_v10, %v2497_v41  ;;  %v2012_v10 = vld [vmem:[%s2923_s2 + $0x90] sm:$0xf] }
 0x283   : > { %v950_v54 = vpop.f32.mrf.mxu3 }
 0x284   : > { %v969_v34 = vadd.f32 %v950_v54, %v2495_v40 }
 0x285   : > { %v966_v23 = vpop.f32.mrf.mxu0 }
 0x286   : > { %v972_v4 = vadd.f32 %v966_v23, %v2497_v41 }
 0x28b   : > { %v952_v11 = vpop.f32.mrf.mxu3 }
 0x28c   : > { %v971_v5 = vadd.f32 %v952_v11, %v2495_v40  ;;  %v2138_v11 = vld [vmem:[%s2923_s2 + $0x94] sm:$0xf0] }
 0x28d   : > { %v1038_v13 = vpop.f32.mrf.mxu1  ;;  %v2013_v0 = vor.u32 %v2138_v11, %v2012_v10 }
 0x28e   : > { %v1057_v37 = vadd.f32 %v1038_v13, %v969_v34 }
 0x28f   : > { %1426 = vmatpush.bf16.msra.mxu1 %v2013_v0 }
 0x293   : > { %v1052_v59 = vpop.f32.mrf.mxu3  ;;  %1427 = vmatpush.bf16.msra.mxu1 %v2005_v22 }
 0x294   : > { %v1058_v38 = vadd.f32 %v1052_v59, %v970_v33 }
 0x295   : > { %v1040_v24 = vpop.f32.mrf.mxu1 }
 0x296   : > { %v1059_v54 = vadd.f32 %v1040_v24, %v971_v5 }
 0x29b   : > { %v1054_v36 = vpop.f32.mrf.mxu3 }
 0x29c   : > { %v1060_v55 = vadd.f32 %v1054_v36, %v972_v4 }
 0x29d   : > { %v1126_v39 = vpop.f32.mrf.mxu0  ;;  %v1140_v42 = vpop.f32.mrf.mxu1 }
 0x29e   : > { %v1145_v45 = vadd.f32 %v1126_v39, %v1057_v37  ;;  %v1146_v47 = vadd.f32 %v1140_v42, %v1058_v38 }
 0x2a0   : > { %1909 = vst [vmem:[%s2521_s25 + $0x40] sm:$0xff] %v1145_v45 }
 0x2a1   : > { %1910 = vst.msk [vmem:[%s2521_s25 + $0x48] sm:$0xff] %vm330_vm1, %v1146_v47 }
 0x2a4   : > { %v1167_v56 = vpop.f32.mrf.mxu3 }
 0x2a5   : > { %v1128_v57 = vpop.f32.mrf.mxu0  ;;  %v1142_v46 = vpop.f32.mrf.mxu1  ;;  %v1182_v12 = vpack.c.bf16 %v1167_v56, %v1167_v56 }
 0x2a6   : > { %v1147_v62 = vadd.f32 %v1128_v57, %v1059_v54  ;;  %v1148_v63 = vadd.f32 %v1142_v46, %v1060_v55 }
 0x2a7   : > { %v1198_v21 = vunpack.c.l.b16 %v1182_v12 }
 0x2a8   : > { %1911 = vst [vmem:[%s2521_s25 + $0x50] sm:$0xff] %v1147_v62 }
 0x2a9   : > { %1912 = vst.msk [vmem:[%s2521_s25 + $0x58] sm:$0xff] %vm330_vm1, %v1148_v63 }
 0x2ac   : > { %v1169_v13 = vpop.f32.mrf.mxu3 }
 0x2ad   : > { %v1183_v14 = vpack.c.bf16 %v1169_v13, %v1169_v13 }
 0x2af   : > { %v1199_v19 = vunpack.c.l.b16 %v1183_v14 }
 0x2b1   : > { %v1200_v59 = vpack.c.b16 %v1199_v19, %v1198_v21 }
 0x2b3   : > { %1950 = vmatmul.msk.bf16.vlgmr.msrb.gmra.mxu0 %vm330_vm1, %v1200_v59  ;;  %1951 = vmatmul.msk.bf16.vlgmr.msrb.gmra.mxu1 %vm330_vm1, %v1200_v59 }
 0x2b4   : > { %v1172_v23 = vpop.f32.mrf.mxu3 }
 0x2b5   : > { %v1184_v24 = vpack.c.bf16 %v1172_v23, %v1172_v23 }
 0x2b7   : > { %v1286_v28 = vunpack.c.l.b16 %v1184_v24 }
 0x2bc   : > { %v1174_v25 = vpop.f32.mrf.mxu3 }
 0x2bd   : > { %v1185_v26 = vpack.c.bf16 %v1174_v25, %v1174_v25 }
 0x2bf   : > { %v1287_v29 = vunpack.c.l.b16 %v1185_v26 }
 0x2c1   : > { %v1288_v30 = vpack.c.b16 %v1287_v29, %v1286_v28 }
 0x2c3   : > { %1992 = vmatmul.msk.bf16.vlgmr.msrb.gmra.mxu2 %vm330_vm1, %v1288_v30  ;;  %1993 = vmatmul.msk.bf16.vlgmr.msra.gmra.mxu0 %vm330_vm1, %v1288_v30 }
 0x2c4   : > { %v1177_v27 = vpop.f32.mrf.mxu3 }
 0x2c5   : > { %v1186_v31 = vpack.c.bf16 %v1177_v27, %v1177_v27 }
 0x2c7   : > { %v1374_v34 = vunpack.c.l.b16 %v1186_v31 }
 0x2cc   : > { %v1179_v32 = vpop.f32.mrf.mxu3 }
 0x2cd   : > { %v1187_v33 = vpack.c.bf16 %v1179_v32, %v1179_v32 }
 0x2cf   : > { %v1375_v35 = vunpack.c.l.b16 %v1187_v33 }
 0x2d1   : > { %v1376_v36 = vpack.c.b16 %v1375_v35, %v1374_v34 }
 0x2d3   : > { %2034 = vmatmul.msk.bf16.vlgmr.msra.gmra.mxu1 %vm330_vm1, %v1376_v36  ;;  %2035 = vmatmul.msk.bf16.vlgmr.msra.gmra.mxu2 %vm330_vm1, %v1376_v36 }
 0x330   : > { %v1253_v37 = vpop.f32.mrf.mxu0  ;;  %v1267_v38 = vpop.f32.mrf.mxu1 }
 0x331   : > { %v1272_v44 = vadd.f32 %v1253_v37, %v2495_v40  ;;  %v1273_v4 = vadd.f32 %v1267_v38, %v2497_v41 }
 0x338   : > { %v1255_v39 = vpop.f32.mrf.mxu0  ;;  %v1269_v43 = vpop.f32.mrf.mxu1 }
 0x339   : > { %v1274_v5 = vadd.f32 %v1255_v39, %v2495_v40  ;;  %v1275_v57 = vadd.f32 %v1269_v43, %v2497_v41 }
 0x340   : > { %v1355_v48 = vpop.f32.mrf.mxu0 }
 0x341   : > { %v1361_v50 = vadd.f32 %v1355_v48, %v1273_v4 }
 0x346   : > { %v1341_v42 = vpop.f32.mrf.mxu2 }
 0x347   : > { %v1360_v47 = vadd.f32 %v1341_v42, %v1272_v44 }
 0x348   : > { %v1357_v56 = vpop.f32.mrf.mxu0 }
 0x349   : > { %v1363_v46 = vadd.f32 %v1357_v56, %v1275_v57 }
 0x34e   : > { %v1343_v45 = vpop.f32.mrf.mxu2 }
 0x34f   : > { %v1362_v52 = vadd.f32 %v1343_v45, %v1274_v5 }
 0x350   : > { %v1429_v49 = vpop.f32.mrf.mxu1 }
 0x351   : > { %v1448_v3 = vadd.f32 %v1429_v49, %v1360_v47 }
 0x353   : > { %2036 = vst [vmem:[%s2521_s25 + $0x60] sm:$0xff] %v1448_v3 }
 0x356   : > { %v1443_v51 = vpop.f32.mrf.mxu2 }
 0x357   : > { %v1449_v53 = vadd.f32 %v1443_v51, %v1361_v50 }
 0x358   : > { %v1431_v54 = vpop.f32.mrf.mxu1 }
 0x359   : > { %2037 = vst.msk [vmem:[%s2521_s25 + $0x68] sm:$0xff] %vm330_vm1, %v1449_v53  ;;  %v1450_v55 = vadd.f32 %v1431_v54, %v1362_v52 }
 0x35b   : > { %2038 = vst [vmem:[%s2521_s25 + $0x70] sm:$0xff] %v1450_v55 }
 0x35e   : > { %v1445_v58 = vpop.f32.mrf.mxu2 }
 0x35f   : > { %v1451_v60 = vadd.f32 %v1445_v58, %v1363_v46 }
 0x361   : > { %2039 = vst.msk [vmem:[%s2521_s25 + $0x78] sm:$0xff] %vm330_vm1, %v1451_v60 }
 0x362 PF: > { %s14_s15 = sadd.s32 1, %s2157_s15  }
 0x363   : > { %p11_p4 = scmp.ge.s32.totalorder %s14_s15, 4  }
 0x365   :  { %13 = sbr.rel (!%p11_p4) target bundleno = 1 (0x1), region = 74 }

// kernel: encoder_forward_pallas.5
= control target key start
LH: loop header
LB: loop body
LE: loop exit
PB: predicated region body
PF: predicated region fallthrough
CT: control target
= control target key end

     0   :  { %vm27_vm0 = vcmask 523264   ;;  %vm58_vm1 = vcmask 130048   ;;  %s5304_s27 = smov 64   ;;  %s6468_s4 = inlined_call_operand.vmem [shape: f32[16,64], index: 4, kind: input, shape index: {}]   ;;  %s6469_s1 = inlined_call_operand.vmem [shape: bf16[48,16], index: 1, kind: input, shape index: {}]   ;;  %s6470_s2 = inlined_call_operand.vmem [shape: bf16[3,64,128], index: 2, kind: input, shape index: {}]   ;;  %s6471_s0 = inlined_call_operand.vmem [shape: f32[8,16,192], index: 0, kind: input, shape index: {}]   ;;  %s6472_s3 = inlined_call_operand.vmem [shape: bf16[3,64,64], index: 3, kind: input, shape index: {}]   ;;  %s6473_s5 = inlined_call_operand.vmem [shape: f32[8,16,64], index: 5, kind: output, shape index: {}]  }
   0x1   :  { %v25_v0 = vld [vmem:[%s6468_s4] sm:$0xff]  ;;  %v26_v1 = vld [vmem:[%s6468_s4 + $0x8] sm:$0xff]  ;;  %v5366_v7 = vld [vmem:[%s6469_s1 + $0x10] sm:$0xff] }
   0x2   :  { %28 = vst.msk [vmem:[#allocation2] sm:$0xff] %vm27_vm0, %v25_v0  ;;  %v5352_v5 = vld [vmem:[%s6469_s1] sm:$0xff]  ;;  %v5359_v6 = vld [vmem:[%s6469_s1 + $0x8] sm:$0xff]  ;;  %v5012_v8 = vld [vmem:[%s6470_s2 + $0x18] sm:$0xff] }
   0x3   :  { %29 = vst.msk [vmem:[#allocation2 + $0x8] sm:$0xff] %vm27_vm0, %v26_v1  ;;  %143 = vmatpush.bf16.msra.mxu3 %v5012_v8  ;;  %v5011_v9 = vld [vmem:[%s6470_s2 + $0x10] sm:$0xff]  ;;  %v5010_v10 = vld [vmem:[%s6470_s2 + $0x8] sm:$0xff]  ;;  %v5009_v11 = vld [vmem:[%s6470_s2] sm:$0xff] }
   0x4   :  { %v5016_v12 = vld [vmem:[%s6470_s2 + $0x38] sm:$0xff]  ;;  %v5015_v13 = vld [vmem:[%s6470_s2 + $0x30] sm:$0xff]  ;;  %v5014_v14 = vld [vmem:[%s6470_s2 + $0x28] sm:$0xff] }
   0x5   :  { %200 = vmatpush.bf16.msra.mxu2 %v5016_v12  ;;  %v5013_v15 = vld [vmem:[%s6470_s2 + $0x20] sm:$0xff]  ;;  %v5020_v16 = vld [vmem:[%s6470_s2 + $0x58] sm:$0xff]  ;;  %v5019_v18 = vld [vmem:[%s6470_s2 + $0x50] sm:$0xff] }
   0x6   :  { %v5018_v19 = vld [vmem:[%s6470_s2 + $0x48] sm:$0xff]  ;;  %v5017_v23 = vld [vmem:[%s6470_s2 + $0x40] sm:$0xff]  ;;  %v40_v49 = vld [vmem:[%s6471_s0 + $0x10] sm:$0xff] }
   0x7   :  { %144 = vmatpush.bf16.msra.mxu3 %v5011_v9  ;;  %v38_v43 = vld [vmem:[%s6471_s0] sm:$0xff] }
   0x9   :  { %v5343_v2 = vld [vmem:[#allocation2] sm:$0xff]  ;;  %201 = vmatpush.bf16.msra.mxu2 %v5015_v13 }
   0xa   :  { %v5345_v3 = vld [vmem:[#allocation2 + $0x8] sm:$0xff]  ;;  %309 = vrot.lane.b32.xlu0 %v5343_v2, %s5304_s27 }
   0xb   :  { %v42_v4 = vpack.c.bf16 %v5345_v3, %v5343_v2  ;;  %145 = vmatpush.bf16.msra.mxu3 %v5010_v10 }
   0xd   :  { %75 = vmatpush.bf16.msra.mxu0 %v42_v4  ;;  %202 = vmatpush.bf16.msra.mxu2 %v5014_v14 }
   0xf   :  { %146 = vmatpush.bf16.msra.mxu3 %v5009_v11 }
  0x10   :  { %3828 = vmatmul.msk.bf16.vlgmr.msra.gmra.mxu0 %vm58_vm1, %v5352_v5 }
  0x11   :  { %203 = vmatpush.bf16.msra.mxu2 %v5013_v15 }
  0x12   :  { %311 = vrot.lane.b32.xlu0 %v5345_v3, %s5304_s27 }
  0x13   :  { %257 = vmatpush.bf16.msrb.mxu3 %v5020_v16 }
  0x17   :  { %258 = vmatpush.bf16.msrb.mxu3 %v5019_v18 }
  0x1b   :  { %259 = vmatpush.bf16.msrb.mxu3 %v5018_v19 }
  0x1f   :  { %260 = vmatpush.bf16.msrb.mxu3 %v5017_v23 }
  0x20   :  { %3829 = vmatmul.msk.bf16.gmra.mxu0 %vm58_vm1, %v5359_v6 }
  0x30   :  { %3830 = vmatmul.msk.bf16.gmra.mxu0 %vm58_vm1, %v5366_v7 }
  0x7c   :  { %v310_v1 = vpop.permute.xlu0 %309 }
  0x8d   :  { %v77_v17 = vpop.f32.mrf.mxu0 }
  0x8e   :  { %v92_v20 = vpack.c.bf16 %v77_v17, %v77_v17 }
  0x90   :  { %v108_v24 = vunpack.c.l.b16 %v92_v20  ;;  %v312_v20 = vpop.permute.xlu0 %311 }
  0x95   :  { %v79_v21 = vpop.f32.mrf.mxu0 }
  0x96   :  { %v93_v22 = vpack.c.bf16 %v79_v21, %v79_v21 }
  0x98   :  { %v109_v25 = vunpack.c.l.b16 %v93_v22 }
  0x9a   :  { %v110_v26 = vpack.c.b16 %v109_v25, %v108_v24 }
  0x9c   :  { %3847 = vmatmul.msk.bf16.vlgmr.msra.gmra.mxu3 %vm27_vm0, %v110_v26 }
  0x9d   :  { %v82_v27 = vpop.f32.mrf.mxu0 }
  0x9e   :  { %v94_v28 = vpack.c.bf16 %v82_v27, %v82_v27 }
  0xa0   :  { %v166_v31 = vunpack.c.l.b16 %v94_v28  ;;  %v5024_v28 = vld [vmem:[%s6472_s3 + $0x18] sm:$0xff] }
  0xa1   :  { %396 = vmatpush.bf16.msrb.mxu2 %v5024_v28  ;;  %v5033_v28 = vld [vmem:[%s6470_s2] sm:$0xff] }
  0xa5   :  { %v84_v29 = vpop.f32.mrf.mxu0 }
  0xa6   :  { %v95_v30 = vpack.c.bf16 %v84_v29, %v84_v29  ;;  %v5023_v29 = vld [vmem:[%s6472_s3 + $0x10] sm:$0xff] }
  0xa7   :  { %397 = vmatpush.bf16.msrb.mxu2 %v5023_v29  ;;  %v5040_v29 = vld [vmem:[%s6470_s2 + $0x38] sm:$0xff] }
  0xa8   :  { %v167_v32 = vunpack.c.l.b16 %v95_v30  ;;  %v5022_v30 = vld [vmem:[%s6472_s3 + $0x8] sm:$0xff] }
  0xaa   :  { %v168_v33 = vpack.c.b16 %v167_v32, %v166_v31  ;;  %v5021_v31 = vld [vmem:[%s6472_s3] sm:$0xff]  ;;  %v5028_v32 = vld [vmem:[%s6472_s3 + $0x38] sm:$0xff] }
  0xab   :  { %398 = vmatpush.bf16.msrb.mxu2 %v5022_v30  ;;  %453 = vmatpush.bf16.msra.mxu3 %v5028_v32  ;;  %v5039_v30 = vld [vmem:[%s6470_s2 + $0x30] sm:$0xff]  ;;  %v5037_v32 = vld [vmem:[%s6470_s2 + $0x20] sm:$0xff] }
  0xac   :  { %3872 = vmatmul.msk.bf16.vlgmr.msra.gmra.mxu2 %vm27_vm0, %v168_v33  ;;  %v5027_v33 = vld [vmem:[%s6472_s3 + $0x30] sm:$0xff] }
  0xad   :  { %v87_v34 = vpop.f32.mrf.mxu0 }
  0xae   :  { %v96_v35 = vpack.c.bf16 %v87_v34, %v87_v34  ;;  %v5026_v34 = vld [vmem:[%s6472_s3 + $0x28] sm:$0xff] }
  0xaf   :  { %399 = vmatpush.bf16.msrb.mxu2 %v5021_v31  ;;  %454 = vmatpush.bf16.msra.mxu3 %v5027_v33  ;;  %v5038_v31 = vld [vmem:[%s6470_s2 + $0x28] sm:$0xff]  ;;  %v5044_v33 = vld [vmem:[%s6470_s2 + $0x58] sm:$0xff] }
  0xb0   :  { %v223_v38 = vunpack.c.l.b16 %v96_v35  ;;  %v5025_v35 = vld [vmem:[%s6472_s3 + $0x20] sm:$0xff] }
  0xb3   :  { %455 = vmatpush.bf16.msra.mxu3 %v5026_v34 }
  0xb5   :  { %v89_v36 = vpop.f32.mrf.mxu0 }
  0xb6   :  { %v97_v37 = vpack.c.bf16 %v89_v36, %v89_v36  ;;  %v5032_v36 = vld [vmem:[%s6472_s3 + $0x58] sm:$0xff] }
  0xb7   :  { %456 = vmatpush.bf16.msra.mxu3 %v5025_v35  ;;  %510 = vmatpush.bf16.msra.mxu2 %v5032_v36  ;;  %v5043_v35 = vld [vmem:[%s6470_s2 + $0x50] sm:$0xff]  ;;  %v5042_v36 = vld [vmem:[%s6470_s2 + $0x48] sm:$0xff] }
  0xb8   :  { %v224_v39 = vunpack.c.l.b16 %v97_v37 }
  0xba   :  { %v225_v40 = vpack.c.b16 %v224_v39, %v223_v38  ;;  %v5031_v38 = vld [vmem:[%s6472_s3 + $0x50] sm:$0xff]  ;;  %v5030_v39 = vld [vmem:[%s6472_s3 + $0x48] sm:$0xff] }
  0xbb   :  { %511 = vmatpush.bf16.msra.mxu2 %v5031_v38 }
  0xbc   :  { %3897 = vmatmul.msk.bf16.vlgmr.msrb.gmra.mxu3 %vm27_vm0, %v225_v40 }
  0xbf   :  { %512 = vmatpush.bf16.msra.mxu2 %v5030_v39 }
 0x11f   :  { %v148_v41 = vpop.f32.mrf.mxu3 }
 0x120   :  { %v153_v45 = vadd.f32 %v148_v41, %v38_v43  ;;  %v5029_v43 = vld [vmem:[%s6472_s3 + $0x40] sm:$0xff] }
 0x121   :  { %513 = vmatpush.bf16.msra.mxu2 %v5029_v43 }
 0x127   :  { %v150_v42 = vpop.f32.mrf.mxu3 }
 0x128   :  { %v154_v52 = vadd.f32 %v150_v42, %v40_v49 }
 0x12f   :  { %v205_v44 = vpop.f32.mrf.mxu2 }
 0x130   :  { %v210_v46 = vadd.f32 %v205_v44, %v153_v45 }
 0x137   :  { %v207_v51 = vpop.f32.mrf.mxu2 }
 0x138   :  { %v211_v53 = vadd.f32 %v207_v51, %v154_v52 }
 0x13f   :  { %v262_v47 = vpop.f32.mrf.mxu3 }
 0x140   :  { %v267_v48 = vadd.f32 %v262_v47, %v210_v46 }
 0x142   :  { %v3898_v50 = vmul.f32 -1.442695, %v267_v48 }
 0x144   :  { %5202 = vpow2.f32 %v3898_v50 }
 0x147   :  { %v264_v54 = vpop.f32.mrf.mxu3 }
 0x148   :  { %v268_v55 = vadd.f32 %v264_v54, %v211_v53 }
 0x14a   :  { %v5203_v56 = vpop.eup %5202  ;;  %v3899_v57 = vmul.f32 -1.442695, %v268_v55 }
 0x14b   :  { %v275_v58 = vadd.f32 1.0, %v5203_v56 }
 0x14c   :  { %5204 = vpow2.f32 %v3899_v57 }
 0x14d   :  { %5206 = vrcp.f32 %v275_v58  ;;  %v288_v10 = vand.u32 2147483648, %v275_v58  ;;  %vm282_vm3 = vweird.f32 %v275_v58  ;;  %v286_v11 = vand.u32 2147483647, %v275_v58 }
 0x14f   :  { %v289_v17 = vor.u32 1.1754944e-38, %v288_v10  ;;  %vm287_vm6 = vcmp.eq.f32.partialorder %v286_v11, 8.507059e+37  ;;  %v41_v10 = vld [vmem:[%s6471_s0 + $0x18] sm:$0xff] }
 0x152   :  { %v5205_v59 = vpop.eup %5204 }
 0x153   :  { %v5207_v60 = vpop.eup %5206  ;;  %v276_v61 = vadd.f32 1.0, %v5205_v59 }
 0x154   :  { %v278_v62 = vmul.f32 %v5207_v60, %v275_v58  ;;  %vm283_vm2 = vweird.f32 %v5207_v60 }
 0x155   :  { %5208 = vrcp.f32 %v276_v61  ;;  %vm284_vm4 = vmor %vm282_vm3, %vm283_vm2  ;;  %v303_v13 = vand.u32 2147483648, %v276_v61  ;;  %v301_v16 = vand.u32 2147483647, %v276_v61  ;;  %vm297_vm7 = vweird.f32 %v276_v61 }
 0x156   :  { %v279_v63 = vsub.f32 1.0, %v278_v62 }
 0x157   :  { %v304_v21 = vor.u32 1.1754944e-38, %v303_v13  ;;  %vm302_vm9 = vcmp.eq.f32.partialorder %v301_v16, 8.507059e+37 }
 0x158   :  { %v280_v0 = vmul.f32 %v5207_v60, %v279_v63  ;;  %v39_v63 = vld [vmem:[%s6471_s0 + $0x8] sm:$0xff] }
 0x15a   :  { %v281_v8 = vadd.f32 %v5207_v60, %v280_v0 }
 0x15b   :  { %v5209_v4 = vpop.eup %5208 }
 0x15c   :  { %v293_v9 = vmul.f32 %v5209_v4, %v276_v61  ;;  %v285_v14 = vsel %vm284_vm4, %v5207_v60, %v281_v8  ;;  %vm298_vm5 = vweird.f32 %v5209_v4 }
 0x15d   :  { %v5419_v19 = vsel %vm287_vm6, %v289_v17, %v285_v14  ;;  %vm299_vm8 = vmor %vm297_vm7, %vm298_vm5 }
 0x15e   :  { %v294_v12 = vsub.f32 1.0, %v293_v9  ;;  %v315_v24 = vmul.f32 %v310_v1, %v5419_v19  ;;  %v526_v13 = vsub.f32 1.0, %v5419_v19 }
 0x160   :  { %v295_v15 = vmul.f32 %v5209_v4, %v294_v12 }
 0x162   :  { %v296_v18 = vadd.f32 %v5209_v4, %v295_v15 }
 0x164   :  { %v300_v22 = vsel %vm299_vm8, %v5209_v4, %v296_v18  ;;  %v528_v18 = vmul.f32 %v526_v13, %v5343_v2 }
 0x165   :  { %v5421_v23 = vsel %vm302_vm9, %v304_v21, %v300_v22 }
 0x166   :  { %v316_v25 = vmul.f32 %v312_v20, %v5421_v23  ;;  %v527_v22 = vsub.f32 1.0, %v5421_v23 }
 0x168   :  { %v317_v26 = vpack.c.bf16 %v316_v25, %v315_v24  ;;  %v529_v25 = vmul.f32 %v527_v22, %v5345_v3  ;;  %v5036_v3 = vld [vmem:[%s6470_s2 + $0x18] sm:$0xff] }
 0x169   :  { %614 = vmatpush.bf16.msrb.mxu0 %v5036_v3 }
 0x16a   :  { %319 = vrot.lane.b32.xlu1 %v317_v26, %s5304_s27 }
 0x1dc   :  { %v320_v27 = vpop.permute.xlu1 %319 }
 0x1dd   :  { %329 = vmatpush.bf16.msra.mxu1 %v320_v27  ;;  %v5034_v27 = vld [vmem:[%s6470_s2 + $0x8] sm:$0xff] }
 0x1e0   :  { %3900 = vmatmul.msk.bf16.vlgmr.msra.gmra.mxu1 %vm58_vm1, %v5352_v5 }
 0x1f0   :  { %3901 = vmatmul.msk.bf16.gmra.mxu1 %vm58_vm1, %v5359_v6 }
 0x200   :  { %3902 = vmatmul.msk.bf16.gmra.mxu1 %vm58_vm1, %v5366_v7 }
 0x25d   :  { %v331_v37 = vpop.f32.mrf.mxu1 }
 0x25e   :  { %v346_v40 = vpack.c.bf16 %v331_v37, %v331_v37 }
 0x260   :  { %v362_v44 = vunpack.c.l.b16 %v346_v40  ;;  %v5041_v40 = vld [vmem:[%s6470_s2 + $0x40] sm:$0xff] }
 0x265   :  { %v333_v41 = vpop.f32.mrf.mxu1 }
 0x266   :  { %v347_v42 = vpack.c.bf16 %v333_v41, %v333_v41 }
 0x268   :  { %v363_v45 = vunpack.c.l.b16 %v347_v42 }
 0x26a   :  { %v364_v46 = vpack.c.b16 %v363_v45, %v362_v44 }
 0x26c   :  { %3919 = vmatmul.msk.bf16.vlgmr.msrb.gmra.mxu2 %vm27_vm0, %v364_v46 }
 0x26d   :  { %v336_v47 = vpop.f32.mrf.mxu1  ;;  %670 = vmatpush.bf16.msrb.mxu2 %v5040_v29 }
 0x26e   :  { %v348_v48 = vpack.c.bf16 %v336_v47, %v336_v47 }
 0x270   :  { %v419_v51 = vunpack.c.l.b16 %v348_v48 }
 0x271   :  { %671 = vmatpush.bf16.msrb.mxu2 %v5039_v30 }
 0x275   :  { %v338_v49 = vpop.f32.mrf.mxu1  ;;  %672 = vmatpush.bf16.msrb.mxu2 %v5038_v31 }
 0x276   :  { %v349_v50 = vpack.c.bf16 %v338_v49, %v338_v49 }
 0x278   :  { %v420_v52 = vunpack.c.l.b16 %v349_v50 }
 0x279   :  { %673 = vmatpush.bf16.msrb.mxu2 %v5037_v32 }
 0x27a   :  { %v421_v53 = vpack.c.b16 %v420_v52, %v419_v51 }
 0x27c   :  { %3944 = vmatmul.msk.bf16.vlgmr.msra.gmra.mxu3 %vm27_vm0, %v421_v53 }
 0x27d   :  { %v341_v54 = vpop.f32.mrf.mxu1 }
 0x27e   :  { %v350_v55 = vpack.c.bf16 %v341_v54, %v341_v54 }
 0x280   :  { %v476_v58 = vunpack.c.l.b16 %v350_v55 }
 0x285   :  { %v343_v56 = vpop.f32.mrf.mxu1 }
 0x286   :  { %v351_v57 = vpack.c.bf16 %v343_v56, %v343_v56 }
 0x288   :  { %v477_v59 = vunpack.c.l.b16 %v351_v57 }
 0x28a   :  { %v478_v60 = vpack.c.b16 %v477_v59, %v476_v58 }
 0x28c   :  { %3969 = vmatmul.msk.bf16.vlgmr.msra.gmra.mxu2 %vm27_vm0, %v478_v60  ;;  %v3970_v60 = vld [vmem:[%s6471_s0 + $0x20] sm:$0xff] }
 0x2ef   :  { %v401_v61 = vpop.f32.mrf.mxu2 }
 0x2f0   :  { %v406_v1 = vadd.f32 %v401_v61, %v39_v63 }
 0x2f7   :  { %v403_v62 = vpop.f32.mrf.mxu2 }
 0x2f8   :  { %v407_v12 = vadd.f32 %v403_v62, %v41_v10 }
 0x2ff   :  { %v458_v0 = vpop.f32.mrf.mxu3 }
 0x300   :  { %v463_v4 = vadd.f32 %v458_v0, %v406_v1 }
 0x307   :  { %v460_v11 = vpop.f32.mrf.mxu3 }
 0x308   :  { %v464_v14 = vadd.f32 %v460_v11, %v407_v12 }
 0x30f   :  { %v515_v8 = vpop.f32.mrf.mxu2 }
 0x310   :  { %v520_v9 = vadd.f32 %v515_v8, %v463_v4  ;;  %v3972_v4 = vld [vmem:[%s6471_s0 + $0x30] sm:$0xff] }
 0x312   :  { %5210 = vtanh.f32 %v520_v9 }
 0x317   :  { %v517_v15 = vpop.f32.mrf.mxu2 }
 0x318   :  { %v5211_v16 = vpop.eup %5210  ;;  %v521_v17 = vadd.f32 %v517_v15, %v464_v14 }
 0x319   :  { %v524_v20 = vmul.f32 %v5211_v16, %v5419_v19 }
 0x31a   :  { %5212 = vtanh.f32 %v521_v17 }
 0x31b   :  { %v5480_v21 = vadd.f32 %v528_v18, %v524_v20 }
 0x31d   :  { %778 = vrot.lane.b32.xlu1 %v5480_v21, %s5304_s27  ;;  %532 = vst.msk [vmem:[%s6473_s5] sm:$0xff] %vm27_vm0, %v5480_v21 }
 0x320   :  { %v5213_v24 = vpop.eup %5212 }
 0x321   :  { %v525_v2 = vmul.f32 %v5213_v24, %v5421_v23  ;;  %v5035_v23 = vld [vmem:[%s6470_s2 + $0x10] sm:$0xff] }
 0x322   :  { %615 = vmatpush.bf16.msrb.mxu0 %v5035_v23 }
 0x323   :  { %v5492_v19 = vadd.f32 %v529_v25, %v525_v2 }
 0x325   :  { %780 = vrot.lane.b32.xlu2 %v5492_v19, %s5304_s27  ;;  %533 = vst.msk [vmem:[%s6473_s5 + $0x8] sm:$0xff] %vm27_vm0, %v5492_v19  ;;  %v539_v26 = vpack.c.bf16 %v5492_v19, %v5480_v21 }
 0x326   :  { %616 = vmatpush.bf16.msrb.mxu0 %v5034_v27 }
 0x327   :  { %547 = vmatpush.bf16.msrb.mxu3 %v539_v26 }
 0x32a   :  { %3974 = vmatmul.msk.bf16.vlgmr.msrb.gmra.mxu3 %vm58_vm1, %v5352_v5  ;;  %617 = vmatpush.bf16.msrb.mxu0 %v5033_v28 }
 0x32e   :  { %726 = vmatpush.bf16.msra.mxu0 %v5044_v33 }
 0x332   :  { %727 = vmatpush.bf16.msra.mxu0 %v5043_v35 }
 0x336   :  { %728 = vmatpush.bf16.msra.mxu0 %v5042_v36 }
 0x33a   :  { %3975 = vmatmul.msk.bf16.gmra.mxu3 %vm58_vm1, %v5359_v6  ;;  %729 = vmatpush.bf16.msra.mxu0 %v5041_v40 }
 0x34a   :  { %3976 = vmatmul.msk.bf16.gmra.mxu3 %vm58_vm1, %v5366_v7 }
 0x3ad   :  { %v549_v34 = vpop.f32.mrf.mxu3 }
 0x3ae   :  { %v564_v37 = vpack.c.bf16 %v549_v34, %v549_v34 }
 0x3b0   :  { %v580_v41 = vunpack.c.l.b16 %v564_v37 }
 0x3b5   :  { %v551_v38 = vpop.f32.mrf.mxu3 }
 0x3b6   :  { %v565_v39 = vpack.c.bf16 %v551_v38, %v551_v38  ;;  %v781_v38 = vpop.permute.xlu2 %780 }
 0x3b8   :  { %v581_v42 = vunpack.c.l.b16 %v565_v39  ;;  %v779_v39 = vpop.permute.xlu1 %778 }
 0x3ba   :  { %v582_v43 = vpack.c.b16 %v581_v42, %v580_v41 }
 0x3bc   :  { %3993 = vmatmul.msk.bf16.vlgmr.msrb.gmra.mxu0 %vm27_vm0, %v582_v43 }
 0x3bd   :  { %v554_v44 = vpop.f32.mrf.mxu3 }
 0x3be   :  { %v566_v45 = vpack.c.bf16 %v554_v44, %v554_v44 }
 0x3c0   :  { %v636_v48 = vunpack.c.l.b16 %v566_v45  ;;  %v5048_v45 = vld [vmem:[%s6472_s3 + $0x18] sm:$0xff] }
 0x3c1   :  { %865 = vmatpush.bf16.msra.mxu2 %v5048_v45  ;;  %v5057_v45 = vld [vmem:[%s6470_s2] sm:$0xff] }
 0x3c5   :  { %v556_v46 = vpop.f32.mrf.mxu3 }
 0x3c6   :  { %v567_v47 = vpack.c.bf16 %v556_v46, %v556_v46  ;;  %v5047_v46 = vld [vmem:[%s6472_s3 + $0x10] sm:$0xff] }
 0x3c7   :  { %866 = vmatpush.bf16.msra.mxu2 %v5047_v46  ;;  %v5064_v46 = vld [vmem:[%s6470_s2 + $0x38] sm:$0xff] }
 0x3c8   :  { %v637_v49 = vunpack.c.l.b16 %v567_v47  ;;  %v5046_v47 = vld [vmem:[%s6472_s3 + $0x8] sm:$0xff] }
 0x3ca   :  { %v638_v50 = vpack.c.b16 %v637_v49, %v636_v48  ;;  %v5045_v48 = vld [vmem:[%s6472_s3] sm:$0xff]  ;;  %v5052_v49 = vld [vmem:[%s6472_s3 + $0x38] sm:$0xff] }
 0x3cb   :  { %867 = vmatpush.bf16.msra.mxu2 %v5046_v47  ;;  %921 = vmatpush.bf16.msrb.mxu0 %v5052_v49  ;;  %v5063_v47 = vld [vmem:[%s6470_s2 + $0x30] sm:$0xff]  ;;  %v5061_v49 = vld [vmem:[%s6470_s2 + $0x20] sm:$0xff] }
 0x3cc   :  { %4018 = vmatmul.msk.bf16.vlgmr.msrb.gmra.mxu2 %vm27_vm0, %v638_v50  ;;  %v5051_v50 = vld [vmem:[%s6472_s3 + $0x30] sm:$0xff] }
 0x3cd   :  { %v559_v51 = vpop.f32.mrf.mxu3 }
 0x3ce   :  { %v568_v52 = vpack.c.bf16 %v559_v51, %v559_v51  ;;  %v5050_v51 = vld [vmem:[%s6472_s3 + $0x28] sm:$0xff] }
 0x3cf   :  { %868 = vmatpush.bf16.msra.mxu2 %v5045_v48  ;;  %922 = vmatpush.bf16.msrb.mxu0 %v5051_v50  ;;  %v5062_v48 = vld [vmem:[%s6470_s2 + $0x28] sm:$0xff]  ;;  %v5068_v50 = vld [vmem:[%s6470_s2 + $0x58] sm:$0xff] }
 0x3d0   :  { %v692_v55 = vunpack.c.l.b16 %v568_v52  ;;  %v5049_v52 = vld [vmem:[%s6472_s3 + $0x20] sm:$0xff] }
 0x3d3   :  { %923 = vmatpush.bf16.msrb.mxu0 %v5050_v51 }
 0x3d5   :  { %v561_v53 = vpop.f32.mrf.mxu3 }
 0x3d6   :  { %v569_v54 = vpack.c.bf16 %v561_v53, %v561_v53  ;;  %v5056_v53 = vld [vmem:[%s6472_s3 + $0x58] sm:$0xff] }
 0x3d7   :  { %924 = vmatpush.bf16.msrb.mxu0 %v5049_v52  ;;  %977 = vmatpush.bf16.msrb.mxu2 %v5056_v53  ;;  %v5067_v52 = vld [vmem:[%s6470_s2 + $0x50] sm:$0xff]  ;;  %v5066_v53 = vld [vmem:[%s6470_s2 + $0x48] sm:$0xff] }
 0x3d8   :  { %v693_v56 = vunpack.c.l.b16 %v569_v54 }
 0x3da   :  { %v694_v57 = vpack.c.b16 %v693_v56, %v692_v55  ;;  %v5055_v55 = vld [vmem:[%s6472_s3 + $0x50] sm:$0xff]  ;;  %v5054_v56 = vld [vmem:[%s6472_s3 + $0x48] sm:$0xff] }
 0x3db   :  { %978 = vmatpush.bf16.msrb.mxu2 %v5055_v55 }
 0x3dc   :  { %4043 = vmatmul.msk.bf16.vlgmr.msra.gmra.mxu0 %vm27_vm0, %v694_v57 }
 0x3df   :  { %979 = vmatpush.bf16.msrb.mxu2 %v5054_v56 }
 0x439   :  { %v619_v58 = vpop.f32.mrf.mxu0 }
 0x43a   :  { %v624_v62 = vadd.f32 %v3970_v60, %v619_v58  ;;  %v5053_v60 = vld [vmem:[%s6472_s3 + $0x40] sm:$0xff] }
 0x43b   :  { %980 = vmatpush.bf16.msrb.mxu2 %v5053_v60 }
 0x441   :  { %v621_v59 = vpop.f32.mrf.mxu0 }
 0x442   :  { %v625_v10 = vadd.f32 %v3972_v4, %v621_v59 }
 0x44f   :  { %v675_v61 = vpop.f32.mrf.mxu2 }
 0x450   :  { %v680_v63 = vadd.f32 %v675_v61, %v624_v62 }
 0x457   :  { %v677_v9 = vpop.f32.mrf.mxu2 }
 0x458   :  { %v681_v11 = vadd.f32 %v677_v9, %v625_v10 }
 0x459   :  { %v731_v0 = vpop.f32.mrf.mxu0 }
 0x45a   :  { %v736_v1 = vadd.f32 %v731_v0, %v680_v63 }
 0x45c   :  { %v4044_v8 = vmul.f32 -1.442695, %v736_v1 }
 0x45e   :  { %5214 = vpow2.f32 %v4044_v8 }
 0x461   :  { %v733_v12 = vpop.f32.mrf.mxu0 }
 0x462   :  { %v737_v13 = vadd.f32 %v733_v12, %v681_v11 }
 0x464   :  { %v5215_v14 = vpop.eup %5214  ;;  %v4045_v15 = vmul.f32 -1.442695, %v737_v13 }
 0x465   :  { %v744_v16 = vadd.f32 1.0, %v5215_v14 }
 0x466   :  { %5216 = vpow2.f32 %v4045_v15 }
 0x467   :  { %5218 = vrcp.f32 %v744_v16  ;;  %v757_v23 = vand.u32 2147483648, %v744_v16  ;;  %vm751_vm11 = vweird.f32 %v744_v16  ;;  %v755_v28 = vand.u32 2147483647, %v744_v16 }
 0x469   :  { %v758_v33 = vor.u32 1.1754944e-38, %v757_v23  ;;  %vm756_vm14 = vcmp.eq.f32.partialorder %v755_v28, 8.507059e+37 }
 0x46c   :  { %v5217_v17 = vpop.eup %5216 }
 0x46d   :  { %v5219_v18 = vpop.eup %5218  ;;  %v745_v20 = vadd.f32 1.0, %v5217_v17 }
 0x46e   :  { %v747_v22 = vmul.f32 %v5219_v18, %v744_v16  ;;  %vm752_vm10 = vweird.f32 %v5219_v18 }
 0x46f   :  { %5220 = vrcp.f32 %v745_v20  ;;  %vm753_vm12 = vmor %vm751_vm11, %vm752_vm10  ;;  %v772_v29 = vand.u32 2147483648, %v745_v20  ;;  %v770_v32 = vand.u32 2147483647, %v745_v20  ;;  %vm766_vm15 = vweird.f32 %v745_v20 }
 0x470   :  { %v748_v24 = vsub.f32 1.0, %v747_v22 }
 0x471   :  { %v773_v36 = vor.u32 1.1754944e-38, %v772_v29  ;;  %vm771_vm3 = vcmp.eq.f32.partialorder %v770_v32, 8.507059e+37 }
 0x472   :  { %v749_v25 = vmul.f32 %v5219_v18, %v748_v24  ;;  %v3971_v24 = vld [vmem:[%s6471_s0 + $0x28] sm:$0xff] }
 0x474   :  { %v750_v3 = vadd.f32 %v5219_v18, %v749_v25 }
 0x475   :  { %v5221_v2 = vpop.eup %5220 }
 0x476   :  { %v762_v26 = vmul.f32 %v5221_v2, %v745_v20  ;;  %v754_v30 = vsel %vm753_vm12, %v5219_v18, %v750_v3  ;;  %vm767_vm13 = vweird.f32 %v5221_v2 }
 0x477   :  { %v5554_v35 = vsel %vm756_vm14, %v758_v33, %v754_v30  ;;  %vm768_vm2 = vmor %vm766_vm15, %vm767_vm13 }
 0x478   :  { %v763_v27 = vsub.f32 1.0, %v762_v26  ;;  %v784_v41 = vmul.f32 %v779_v39, %v5554_v35  ;;  %v993_v30 = vsub.f32 1.0, %v5554_v35 }
 0x47a   :  { %v764_v31 = vmul.f32 %v5221_v2, %v763_v27  ;;  %v3973_v27 = vld [vmem:[%s6471_s0 + $0x38] sm:$0xff] }
 0x47c   :  { %v765_v34 = vadd.f32 %v5221_v2, %v764_v31 }
 0x47e   :  { %v769_v37 = vsel %vm768_vm2, %v5221_v2, %v765_v34 }
 0x47f   :  { %v5556_v40 = vsel %vm771_vm3, %v773_v36, %v769_v37  ;;  %v995_v37 = vmul.f32 %v993_v30, %v5480_v21 }
 0x480   :  { %v785_v42 = vmul.f32 %v781_v38, %v5556_v40  ;;  %v994_v39 = vsub.f32 1.0, %v5556_v40 }
 0x482   :  { %v786_v43 = vpack.c.bf16 %v785_v42, %v784_v41 }
 0x484   :  { %788 = vrot.lane.b32.xlu2 %v786_v43, %s5304_s27 }
 0x4de   :  { %v789_v44 = vpop.permute.xlu2 %788 }
 0x4df   :  { %798 = vmatpush.bf16.msrb.mxu1 %v789_v44  ;;  %v5058_v44 = vld [vmem:[%s6470_s2 + $0x8] sm:$0xff] }
 0x4e2   :  { %4046 = vmatmul.msk.bf16.vlgmr.msrb.gmra.mxu1 %vm58_vm1, %v5352_v5 }
 0x4f2   :  { %4047 = vmatmul.msk.bf16.gmra.mxu1 %vm58_vm1, %v5359_v6 }
 0x502   :  { %4048 = vmatmul.msk.bf16.gmra.mxu1 %vm58_vm1, %v5366_v7 }
 0x55f   :  { %v800_v54 = vpop.f32.mrf.mxu1 }
 0x560   :  { %v815_v57 = vpack.c.bf16 %v800_v54, %v800_v54 }
 0x562   :  { %v831_v61 = vunpack.c.l.b16 %v815_v57  ;;  %v5065_v57 = vld [vmem:[%s6470_s2 + $0x40] sm:$0xff] }
 0x567   :  { %v802_v58 = vpop.f32.mrf.mxu1 }
 0x568   :  { %v816_v59 = vpack.c.bf16 %v802_v58, %v802_v58 }
 0x56a   :  { %v832_v62 = vunpack.c.l.b16 %v816_v59 }
 0x56c   :  { %v833_v63 = vpack.c.b16 %v832_v62, %v831_v61 }
 0x56e   :  { %4065 = vmatmul.msk.bf16.vlgmr.msra.gmra.mxu2 %vm27_vm0, %v833_v63 }
 0x56f   :  { %v805_v0 = vpop.f32.mrf.mxu1  ;;  %1138 = vmatpush.bf16.msra.mxu2 %v5064_v46 }
 0x570   :  { %v817_v1 = vpack.c.bf16 %v805_v0, %v805_v0 }
 0x572   :  { %v887_v9 = vunpack.c.l.b16 %v817_v1 }
 0x573   :  { %1139 = vmatpush.bf16.msra.mxu2 %v5063_v47 }
 0x577   :  { %v807_v4 = vpop.f32.mrf.mxu1  ;;  %1140 = vmatpush.bf16.msra.mxu2 %v5062_v48 }
 0x578   :  { %v818_v8 = vpack.c.bf16 %v807_v4, %v807_v4 }
 0x57a   :  { %v888_v10 = vunpack.c.l.b16 %v818_v8 }
 0x57b   :  { %1141 = vmatpush.bf16.msra.mxu2 %v5061_v49 }
 0x57c   :  { %v889_v11 = vpack.c.b16 %v888_v10, %v887_v9 }
 0x57e   :  { %4090 = vmatmul.msk.bf16.vlgmr.msrb.gmra.mxu0 %vm27_vm0, %v889_v11 }
 0x57f   :  { %v810_v12 = vpop.f32.mrf.mxu1 }
 0x580   :  { %v819_v13 = vpack.c.bf16 %v810_v12, %v810_v12 }
 0x582   :  { %v943_v16 = vunpack.c.l.b16 %v819_v13 }
 0x587   :  { %v812_v14 = vpop.f32.mrf.mxu1 }
 0x588   :  { %v820_v15 = vpack.c.bf16 %v812_v14, %v812_v14 }
 0x58a   :  { %v944_v17 = vunpack.c.l.b16 %v820_v15 }
 0x58c   :  { %v945_v18 = vpack.c.b16 %v944_v17, %v943_v16 }
 0x58e   :  { %4115 = vmatmul.msk.bf16.vlgmr.msrb.gmra.mxu2 %vm27_vm0, %v945_v18  ;;  %v4118_v18 = vld [vmem:[%s6471_s0 + $0x40] sm:$0xff] }
 0x5f1   :  { %v870_v20 = vpop.f32.mrf.mxu2 }
 0x5f2   :  { %v875_v2 = vadd.f32 %v3971_v24, %v870_v20 }
 0x5f9   :  { %v872_v22 = vpop.f32.mrf.mxu2 }
 0x5fa   :  { %v876_v29 = vadd.f32 %v3973_v27, %v872_v22 }
 0x5fb   :  { %v926_v25 = vpop.f32.mrf.mxu0 }
 0x5fc   :  { %v931_v26 = vadd.f32 %v926_v25, %v875_v2 }
 0x603   :  { %v928_v28 = vpop.f32.mrf.mxu0 }
 0x604   :  { %v932_v31 = vadd.f32 %v928_v28, %v876_v29 }
 0x611   :  { %v982_v3 = vpop.f32.mrf.mxu2 }
 0x612   :  { %v987_v23 = vadd.f32 %v982_v3, %v931_v26  ;;  %v4120_v26 = vld [vmem:[%s6471_s0 + $0x50] sm:$0xff] }
 0x614   :  { %5222 = vtanh.f32 %v987_v23 }
 0x619   :  { %v984_v32 = vpop.f32.mrf.mxu2 }
 0x61a   :  { %v5223_v33 = vpop.eup %5222  ;;  %v988_v34 = vadd.f32 %v984_v32, %v932_v31 }
 0x61b   :  { %v991_v36 = vmul.f32 %v5223_v33, %v5554_v35  ;;  %v996_v35 = vmul.f32 %v994_v39, %v5492_v19  ;;  %v5060_v19 = vld [vmem:[%s6470_s2 + $0x18] sm:$0xff] }
 0x61c   :  { %5224 = vtanh.f32 %v988_v34  ;;  %1082 = vmatpush.bf16.msra.mxu0 %v5060_v19 }
 0x61d   :  { %v5615_v38 = vadd.f32 %v995_v37, %v991_v36 }
 0x61f   :  { %1246 = vrot.lane.b32.xlu0 %v5615_v38, %s5304_s27  ;;  %4116 = vst.msk [vmem:[%s6473_s5 + $0x10] sm:$0xff] %vm27_vm0, %v5615_v38 }
 0x622   :  { %v5225_v41 = vpop.eup %5224 }
 0x623   :  { %v992_v42 = vmul.f32 %v5225_v41, %v5556_v40  ;;  %v5059_v40 = vld [vmem:[%s6470_s2 + $0x10] sm:$0xff] }
 0x624   :  { %1083 = vmatpush.bf16.msra.mxu0 %v5059_v40 }
 0x625   :  { %v5627_v21 = vadd.f32 %v996_v35, %v992_v42 }
 0x627   :  { %1248 = vrot.lane.b32.xlu1 %v5627_v21, %s5304_s27  ;;  %4117 = vst.msk [vmem:[%s6473_s5 + $0x18] sm:$0xff] %vm27_vm0, %v5627_v21  ;;  %v1007_v43 = vpack.c.bf16 %v5627_v21, %v5615_v38 }
 0x628   :  { %1084 = vmatpush.bf16.msra.mxu0 %v5058_v44 }
 0x629   :  { %1015 = vmatpush.bf16.msra.mxu3 %v1007_v43 }
 0x62c   :  { %4122 = vmatmul.msk.bf16.vlgmr.msra.gmra.mxu3 %vm58_vm1, %v5352_v5  ;;  %1085 = vmatpush.bf16.msra.mxu0 %v5057_v45 }
 0x630   :  { %1194 = vmatpush.bf16.msrb.mxu0 %v5068_v50 }
 0x634   :  { %1195 = vmatpush.bf16.msrb.mxu0 %v5067_v52 }
 0x638   :  { %1196 = vmatpush.bf16.msrb.mxu0 %v5066_v53 }
 0x63c   :  { %4123 = vmatmul.msk.bf16.gmra.mxu3 %vm58_vm1, %v5359_v6  ;;  %1197 = vmatpush.bf16.msrb.mxu0 %v5065_v57 }
 0x64c   :  { %4124 = vmatmul.msk.bf16.gmra.mxu3 %vm58_vm1, %v5366_v7 }
 0x6af   :  { %v1017_v51 = vpop.f32.mrf.mxu3 }
 0x6b0   :  { %v1032_v54 = vpack.c.bf16 %v1017_v51, %v1017_v51 }
 0x6b2   :  { %v1048_v58 = vunpack.c.l.b16 %v1032_v54 }
 0x6b7   :  { %v1019_v55 = vpop.f32.mrf.mxu3 }
 0x6b8   :  { %v1033_v56 = vpack.c.bf16 %v1019_v55, %v1019_v55  ;;  %v1247_v55 = vpop.permute.xlu0 %1246 }
 0x6ba   :  { %v1049_v59 = vunpack.c.l.b16 %v1033_v56  ;;  %v1249_v56 = vpop.permute.xlu1 %1248 }
 0x6bc   :  { %v1050_v60 = vpack.c.b16 %v1049_v59, %v1048_v58 }
 0x6be   :  { %4141 = vmatmul.msk.bf16.vlgmr.msra.gmra.mxu0 %vm27_vm0, %v1050_v60 }
 0x6bf   :  { %v1022_v61 = vpop.f32.mrf.mxu3 }
 0x6c0   :  { %v1034_v62 = vpack.c.bf16 %v1022_v61, %v1022_v61 }
 0x6c2   :  { %v1104_v1 = vunpack.c.l.b16 %v1034_v62  ;;  %v5072_v62 = vld [vmem:[%s6472_s3 + $0x18] sm:$0xff] }
 0x6c3   :  { %1333 = vmatpush.bf16.msrb.mxu2 %v5072_v62  ;;  %v5081_v62 = vld [vmem:[%s6470_s2] sm:$0xff] }
 0x6c7   :  { %v1024_v63 = vpop.f32.mrf.mxu3 }
 0x6c8   :  { %v1035_v0 = vpack.c.bf16 %v1024_v63, %v1024_v63  ;;  %v5071_v63 = vld [vmem:[%s6472_s3 + $0x10] sm:$0xff] }
 0x6c9   :  { %1334 = vmatpush.bf16.msrb.mxu2 %v5071_v63  ;;  %v5088_v63 = vld [vmem:[%s6470_s2 + $0x38] sm:$0xff] }
 0x6ca   :  { %v1105_v4 = vunpack.c.l.b16 %v1035_v0  ;;  %v5075_v0 = vld [vmem:[%s6472_s3 + $0x30] sm:$0xff] }
 0x6cc   :  { %v1106_v8 = vpack.c.b16 %v1105_v4, %v1104_v1  ;;  %v5074_v1 = vld [vmem:[%s6472_s3 + $0x28] sm:$0xff]  ;;  %v5073_v4 = vld [vmem:[%s6472_s3 + $0x20] sm:$0xff] }
 0x6ce   :  { %4166 = vmatmul.msk.bf16.vlgmr.msra.gmra.mxu2 %vm27_vm0, %v1106_v8  ;;  %v5080_v8 = vld [vmem:[%s6472_s3 + $0x58] sm:$0xff] }
 0x6cf   :  { %v1027_v9 = vpop.f32.mrf.mxu3 }
 0x6d0   :  { %v1036_v10 = vpack.c.bf16 %v1027_v9, %v1027_v9 }
 0x6d2   :  { %v1160_v13 = vunpack.c.l.b16 %v1036_v10  ;;  %v5079_v10 = vld [vmem:[%s6472_s3 + $0x50] sm:$0xff] }
 0x6d7   :  { %v1029_v11 = vpop.f32.mrf.mxu3 }
 0x6d8   :  { %v1037_v12 = vpack.c.bf16 %v1029_v11, %v1029_v11  ;;  %v5078_v11 = vld [vmem:[%s6472_s3 + $0x48] sm:$0xff] }
 0x6da   :  { %v1161_v14 = vunpack.c.l.b16 %v1037_v12 }
 0x6dc   :  { %v1162_v15 = vpack.c.b16 %v1161_v14, %v1160_v13 }
 0x6de   :  { %4191 = vmatmul.msk.bf16.vlgmr.msrb.gmra.mxu0 %vm27_vm0, %v1162_v15  ;;  %v5077_v15 = vld [vmem:[%s6472_s3 + $0x40] sm:$0xff] }
 0x73b   :  { %v1087_v16 = vpop.f32.mrf.mxu0 }
 0x73c   :  { %v1092_v22 = vadd.f32 %v4118_v18, %v1087_v16 }
 0x743   :  { %v1089_v17 = vpop.f32.mrf.mxu0 }
 0x744   :  { %v1093_v27 = vadd.f32 %v4120_v26, %v1089_v17 }
 0x751   :  { %v1143_v20 = vpop.f32.mrf.mxu2 }
 0x752   :  { %v1148_v24 = vadd.f32 %v1143_v20, %v1092_v22 }
 0x759   :  { %v1145_v23 = vpop.f32.mrf.mxu2 }
 0x75a   :  { %v1149_v28 = vadd.f32 %v1145_v23, %v1093_v27 }
 0x75b   :  { %v1199_v25 = vpop.f32.mrf.mxu0 }
 0x75c   :  { %v1204_v2 = vadd.f32 %v1199_v25, %v1148_v24 }
 0x75e   :  { %v4192_v3 = vmul.f32 -1.442695, %v1204_v2 }
 0x760   :  { %5226 = vpow2.f32 %v4192_v3 }
 0x763   :  { %v1201_v29 = vpop.f32.mrf.mxu0 }
 0x764   :  { %v1205_v30 = vadd.f32 %v1201_v29, %v1149_v28 }
 0x766   :  { %v5227_v31 = vpop.eup %5226  ;;  %v4193_v32 = vmul.f32 -1.442695, %v1205_v30 }
 0x767   :  { %v1212_v33 = vadd.f32 1.0, %v5227_v31 }
 0x768   :  { %5228 = vpow2.f32 %v4193_v32 }
 0x769   :  { %5230 = vrcp.f32 %v1212_v33  ;;  %v1225_v40 = vand.u32 2147483648, %v1212_v33  ;;  %vm1219_vm5 = vweird.f32 %v1212_v33  ;;  %v1223_v45 = vand.u32 2147483647, %v1212_v33 }
 0x76b   :  { %v1226_v50 = vor.u32 1.1754944e-38, %v1225_v40  ;;  %vm1224_vm8 = vcmp.eq.f32.partialorder %v1223_v45, 8.507059e+37 }
 0x76e   :  { %v5229_v34 = vpop.eup %5228 }
 0x76f   :  { %v5231_v36 = vpop.eup %5230  ;;  %v1213_v37 = vadd.f32 1.0, %v5229_v34 }
 0x770   :  { %v1215_v39 = vmul.f32 %v5231_v36, %v1212_v33  ;;  %vm1220_vm4 = vweird.f32 %v5231_v36 }
 0x771   :  { %5232 = vrcp.f32 %v1213_v37  ;;  %vm1221_vm6 = vmor %vm1219_vm5, %vm1220_vm4  ;;  %v1240_v46 = vand.u32 2147483648, %v1213_v37  ;;  %v1238_v49 = vand.u32 2147483647, %v1213_v37  ;;  %vm1234_vm9 = vweird.f32 %v1213_v37 }
 0x772   :  { %v1216_v41 = vsub.f32 1.0, %v1215_v39 }
 0x773   :  { %v1241_v53 = vor.u32 1.1754944e-38, %v1240_v46  ;;  %vm1239_vm11 = vcmp.eq.f32.partialorder %v1238_v49, 8.507059e+37 }
 0x774   :  { %v1217_v42 = vmul.f32 %v5231_v36, %v1216_v41 }
 0x776   :  { %v1218_v19 = vadd.f32 %v5231_v36, %v1217_v42 }
 0x777   :  { %v5233_v35 = vpop.eup %5232 }
 0x778   :  { %v1230_v43 = vmul.f32 %v5233_v35, %v1213_v37  ;;  %v1222_v47 = vsel %vm1221_vm6, %v5231_v36, %v1218_v19  ;;  %vm1235_vm7 = vweird.f32 %v5233_v35  ;;  %v4119_v36 = vld [vmem:[%s6471_s0 + $0x48] sm:$0xff] }
 0x779   :  { %v5689_v52 = vsel %vm1224_vm8, %v1226_v50, %v1222_v47  ;;  %vm1236_vm10 = vmor %vm1234_vm9, %vm1235_vm7 }
 0x77a   :  { %v1231_v44 = vsub.f32 1.0, %v1230_v43  ;;  %v1252_v58 = vmul.f32 %v1247_v55, %v5689_v52  ;;  %v4121_v43 = vld [vmem:[%s6471_s0 + $0x58] sm:$0xff] }
 0x77c   :  { %v1232_v48 = vmul.f32 %v5233_v35, %v1231_v44  ;;  %v1461_v44 = vsub.f32 1.0, %v5689_v52 }
 0x77e   :  { %v1233_v51 = vadd.f32 %v5233_v35, %v1232_v48  ;;  %v1463_v50 = vmul.f32 %v1461_v44, %v5615_v38 }
 0x780   :  { %v1237_v54 = vsel %vm1236_vm10, %v5233_v35, %v1233_v51 }
 0x781   :  { %v5691_v57 = vsel %vm1239_vm11, %v1241_v53, %v1237_v54 }
 0x782   :  { %v1253_v59 = vmul.f32 %v1249_v56, %v5691_v57  ;;  %v1462_v53 = vsub.f32 1.0, %v5691_v57 }
 0x784   :  { %v1254_v60 = vpack.c.bf16 %v1253_v59, %v1252_v58  ;;  %v5790_v58 = vld [vmem:[%s6469_s1 + $0x10] sm:$0xff]  ;;  %v5084_v59 = vld [vmem:[%s6470_s2 + $0x18] sm:$0xff] }
 0x786   :  { %1256 = vrot.lane.b32.xlu2 %v1254_v60, %s5304_s27  ;;  %v5083_v60 = vld [vmem:[%s6470_s2 + $0x10] sm:$0xff] }
 0x7e0   :  { %v1257_v61 = vpop.permute.xlu2 %1256 }
 0x7e1   :  { %1266 = vmatpush.bf16.msra.mxu1 %v1257_v61  ;;  %v5082_v61 = vld [vmem:[%s6470_s2 + $0x8] sm:$0xff] }
 0x7e4   :  { %4194 = vmatmul.msk.bf16.vlgmr.msra.gmra.mxu1 %vm58_vm1, %v5352_v5  ;;  %v5070_v5 = vld [vmem:[%s6472_s3 + $0x8] sm:$0xff] }
 0x7e5   :  { %1335 = vmatpush.bf16.msrb.mxu2 %v5070_v5  ;;  %v5087_v5 = vld [vmem:[%s6470_s2 + $0x30] sm:$0xff] }
 0x7f4   :  { %4195 = vmatmul.msk.bf16.gmra.mxu1 %vm58_vm1, %v5359_v6  ;;  %v5069_v6 = vld [vmem:[%s6472_s3] sm:$0xff] }
 0x7f5   :  { %1336 = vmatpush.bf16.msrb.mxu2 %v5069_v6  ;;  %v5086_v6 = vld [vmem:[%s6470_s2 + $0x28] sm:$0xff] }
 0x7f9   :  { %1445 = vmatpush.bf16.msra.mxu2 %v5080_v8  ;;  %v5090_v8 = vld [vmem:[%s6470_s2 + $0x48] sm:$0xff] }
 0x7fd   :  { %1446 = vmatpush.bf16.msra.mxu2 %v5079_v10 }
 0x801   :  { %1447 = vmatpush.bf16.msra.mxu2 %v5078_v11 }
 0x804   :  { %4196 = vmatmul.msk.bf16.gmra.mxu1 %vm58_vm1, %v5366_v7  ;;  %v5076_v7 = vld [vmem:[%s6472_s3 + $0x38] sm:$0xff] }
 0x805   :  { %1389 = vmatpush.bf16.msra.mxu0 %v5076_v7  ;;  %1448 = vmatpush.bf16.msra.mxu2 %v5077_v15  ;;  %v5085_v7 = vld [vmem:[%s6470_s2 + $0x20] sm:$0xff] }
 0x809   :  { %1390 = vmatpush.bf16.msra.mxu0 %v5075_v0  ;;  %v5092_v0 = vld [vmem:[%s6470_s2 + $0x58] sm:$0xff] }
 0x80d   :  { %1391 = vmatpush.bf16.msra.mxu0 %v5074_v1 }
 0x811   :  { %1392 = vmatpush.bf16.msra.mxu0 %v5073_v4  ;;  %v5091_v4 = vld [vmem:[%s6470_s2 + $0x50] sm:$0xff] }
 0x815   :  { %1550 = vmatpush.bf16.msrb.mxu0 %v5084_v59 }
 0x819   :  { %1551 = vmatpush.bf16.msrb.mxu0 %v5083_v60 }
 0x81d   :  { %1552 = vmatpush.bf16.msrb.mxu0 %v5082_v61 }
 0x821   :  { %1553 = vmatpush.bf16.msrb.mxu0 %v5081_v62 }
 0x861   :  { %v1268_v9 = vpop.f32.mrf.mxu1 }
 0x862   :  { %v1283_v12 = vpack.c.bf16 %v1268_v9, %v1268_v9 }
 0x864   :  { %v1299_v16 = vunpack.c.l.b16 %v1283_v12  ;;  %v5089_v12 = vld [vmem:[%s6470_s2 + $0x40] sm:$0xff] }
 0x869   :  { %v1270_v13 = vpop.f32.mrf.mxu1 }
 0x86a   :  { %v1284_v14 = vpack.c.bf16 %v1270_v13, %v1270_v13 }
 0x86c   :  { %v1300_v17 = vunpack.c.l.b16 %v1284_v14 }
 0x86e   :  { %v1301_v18 = vpack.c.b16 %v1300_v17, %v1299_v16 }
 0x870   :  { %4213 = vmatmul.msk.bf16.vlgmr.msrb.gmra.mxu2 %vm27_vm0, %v1301_v18 }
 0x871   :  { %v1273_v20 = vpop.f32.mrf.mxu1  ;;  %1606 = vmatpush.bf16.msrb.mxu2 %v5088_v63 }
 0x872   :  { %v1285_v22 = vpack.c.bf16 %v1273_v20, %v1273_v20 }
 0x874   :  { %v1355_v2 = vunpack.c.l.b16 %v1285_v22 }
 0x875   :  { %1607 = vmatpush.bf16.msrb.mxu2 %v5087_v5 }
 0x879   :  { %v1275_v24 = vpop.f32.mrf.mxu1  ;;  %1608 = vmatpush.bf16.msrb.mxu2 %v5086_v6 }
 0x87a   :  { %v1286_v25 = vpack.c.bf16 %v1275_v24, %v1275_v24 }
 0x87c   :  { %v1356_v26 = vunpack.c.l.b16 %v1286_v25 }
 0x87d   :  { %1609 = vmatpush.bf16.msrb.mxu2 %v5085_v7 }
 0x87e   :  { %v1357_v3 = vpack.c.b16 %v1356_v26, %v1355_v2 }
 0x880   :  { %4238 = vmatmul.msk.bf16.vlgmr.msra.gmra.mxu0 %vm27_vm0, %v1357_v3 }
 0x881   :  { %v1278_v23 = vpop.f32.mrf.mxu1  ;;  %1662 = vmatpush.bf16.msra.mxu0 %v5092_v0 }
 0x882   :  { %v1287_v27 = vpack.c.bf16 %v1278_v23, %v1278_v23 }
 0x884   :  { %v1411_v30 = vunpack.c.l.b16 %v1287_v27 }
 0x885   :  { %1663 = vmatpush.bf16.msra.mxu0 %v5091_v4 }
 0x889   :  { %v1280_v28 = vpop.f32.mrf.mxu1  ;;  %1664 = vmatpush.bf16.msra.mxu0 %v5090_v8 }
 0x88a   :  { %v1288_v29 = vpack.c.bf16 %v1280_v28, %v1280_v28 }
 0x88c   :  { %v1412_v31 = vunpack.c.l.b16 %v1288_v29 }
 0x88d   :  { %1665 = vmatpush.bf16.msra.mxu0 %v5089_v12 }
 0x88e   :  { %v1413_v32 = vpack.c.b16 %v1412_v31, %v1411_v30 }
 0x890   :  { %4263 = vmatmul.msk.bf16.vlgmr.msra.gmra.mxu2 %vm27_vm0, %v1413_v32  ;;  %v4266_v32 = vld [vmem:[%s6471_s0 + $0x60] sm:$0xff] }
 0x8f3   :  { %v1338_v33 = vpop.f32.mrf.mxu2 }
 0x8f4   :  { %v1343_v39 = vadd.f32 %v4119_v36, %v1338_v33 }
 0x8fb   :  { %v1340_v34 = vpop.f32.mrf.mxu2 }
 0x8fc   :  { %v1344_v40 = vadd.f32 %v4121_v43, %v1340_v34 }
 0x8fd   :  { %v1394_v37 = vpop.f32.mrf.mxu0 }
 0x8fe   :  { %v1399_v41 = vadd.f32 %v1394_v37, %v1343_v39 }
 0x905   :  { %v1396_v19 = vpop.f32.mrf.mxu0 }
 0x906   :  { %v1400_v45 = vadd.f32 %v1396_v19, %v1344_v40 }
 0x913   :  { %v1450_v42 = vpop.f32.mrf.mxu2 }
 0x914   :  { %v1455_v35 = vadd.f32 %v1450_v42, %v1399_v41  ;;  %v4268_v41 = vld [vmem:[%s6471_s0 + $0x70] sm:$0xff] }
 0x916   :  { %5234 = vtanh.f32 %v1455_v35 }
 0x91b   :  { %v1452_v46 = vpop.f32.mrf.mxu2 }
 0x91c   :  { %v5235_v47 = vpop.eup %5234  ;;  %v1456_v48 = vadd.f32 %v1452_v46, %v1400_v45 }
 0x91d   :  { %v1459_v49 = vmul.f32 %v5235_v47, %v5689_v52  ;;  %v1464_v52 = vmul.f32 %v1462_v53, %v5627_v21  ;;  %v5783_v21 = vld [vmem:[%s6469_s1 + $0x8] sm:$0xff] }
 0x91e   :  { %5236 = vtanh.f32 %v1456_v48 }
 0x91f   :  { %v5750_v51 = vadd.f32 %v1463_v50, %v1459_v49 }
 0x921   :  { %1714 = vrot.lane.b32.xlu0 %v5750_v51, %s5304_s27  ;;  %4264 = vst.msk [vmem:[%s6473_s5 + $0x20] sm:$0xff] %vm27_vm0, %v5750_v51 }
 0x924   :  { %v5237_v54 = vpop.eup %5236 }
 0x925   :  { %v1460_v55 = vmul.f32 %v5237_v54, %v5691_v57  ;;  %v5776_v57 = vld [vmem:[%s6469_s1] sm:$0xff] }
 0x927   :  { %v5762_v38 = vadd.f32 %v1464_v52, %v1460_v55 }
 0x929   :  { %1716 = vrot.lane.b32.xlu1 %v5762_v38, %s5304_s27  ;;  %4265 = vst.msk [vmem:[%s6473_s5 + $0x28] sm:$0xff] %vm27_vm0, %v5762_v38  ;;  %v1475_v56 = vpack.c.bf16 %v5762_v38, %v5750_v51 }
 0x92b   :  { %1483 = vmatpush.bf16.msrb.mxu3 %v1475_v56 }
 0x92e   :  { %4270 = vmatmul.msk.bf16.vlgmr.msrb.gmra.mxu3 %vm58_vm1, %v5776_v57 }
 0x93e   :  { %4271 = vmatmul.msk.bf16.gmra.mxu3 %vm58_vm1, %v5783_v21 }
 0x94e   :  { %4272 = vmatmul.msk.bf16.gmra.mxu3 %vm58_vm1, %v5790_v58 }
 0x9b1   :  { %v1485_v1 = vpop.f32.mrf.mxu3 }
 0x9b2   :  { %v1500_v9 = vpack.c.bf16 %v1485_v1, %v1485_v1 }
 0x9b4   :  { %v1516_v13 = vunpack.c.l.b16 %v1500_v9 }
 0x9b9   :  { %v1487_v10 = vpop.f32.mrf.mxu3 }
 0x9ba   :  { %v1501_v11 = vpack.c.bf16 %v1487_v10, %v1487_v10  ;;  %v1715_v10 = vpop.permute.xlu0 %1714 }
 0x9bc   :  { %v1517_v14 = vunpack.c.l.b16 %v1501_v11  ;;  %v1717_v11 = vpop.permute.xlu1 %1716 }
 0x9be   :  { %v1518_v15 = vpack.c.b16 %v1517_v14, %v1516_v13 }
 0x9c0   :  { %4289 = vmatmul.msk.bf16.vlgmr.msrb.gmra.mxu0 %vm27_vm0, %v1518_v15 }
 0x9c1   :  { %v1490_v16 = vpop.f32.mrf.mxu3 }
 0x9c2   :  { %v1502_v17 = vpack.c.bf16 %v1490_v16, %v1490_v16 }
 0x9c4   :  { %v1572_v22 = vunpack.c.l.b16 %v1502_v17  ;;  %v5096_v17 = vld [vmem:[%s6472_s3 + $0x18] sm:$0xff] }
 0x9c5   :  { %1801 = vmatpush.bf16.msra.mxu2 %v5096_v17  ;;  %v5105_v17 = vld [vmem:[%s6470_s2] sm:$0xff] }
 0x9c9   :  { %v1492_v18 = vpop.f32.mrf.mxu3 }
 0x9ca   :  { %v1503_v20 = vpack.c.bf16 %v1492_v18, %v1492_v18  ;;  %v5095_v18 = vld [vmem:[%s6472_s3 + $0x10] sm:$0xff] }
 0x9cb   :  { %1802 = vmatpush.bf16.msra.mxu2 %v5095_v18  ;;  %v5112_v18 = vld [vmem:[%s6470_s2 + $0x38] sm:$0xff] }
 0x9cc   :  { %v1573_v24 = vunpack.c.l.b16 %v1503_v20  ;;  %v5094_v20 = vld [vmem:[%s6472_s3 + $0x8] sm:$0xff] }
 0x9ce   :  { %v1574_v25 = vpack.c.b16 %v1573_v24, %v1572_v22  ;;  %v5093_v22 = vld [vmem:[%s6472_s3] sm:$0xff]  ;;  %v5100_v24 = vld [vmem:[%s6472_s3 + $0x38] sm:$0xff] }
 0x9cf   :  { %1803 = vmatpush.bf16.msra.mxu2 %v5094_v20  ;;  %1857 = vmatpush.bf16.msrb.mxu0 %v5100_v24  ;;  %v5111_v20 = vld [vmem:[%s6470_s2 + $0x30] sm:$0xff]  ;;  %v5109_v24 = vld [vmem:[%s6470_s2 + $0x20] sm:$0xff] }
 0x9d0   :  { %4314 = vmatmul.msk.bf16.vlgmr.msrb.gmra.mxu2 %vm27_vm0, %v1574_v25  ;;  %v5099_v25 = vld [vmem:[%s6472_s3 + $0x30] sm:$0xff] }
 0x9d1   :  { %v1495_v2 = vpop.f32.mrf.mxu3 }
 0x9d2   :  { %v1504_v26 = vpack.c.bf16 %v1495_v2, %v1495_v2  ;;  %v5098_v2 = vld [vmem:[%s6472_s3 + $0x28] sm:$0xff] }
 0x9d3   :  { %1804 = vmatpush.bf16.msra.mxu2 %v5093_v22  ;;  %1858 = vmatpush.bf16.msrb.mxu0 %v5099_v25  ;;  %v5110_v22 = vld [vmem:[%s6470_s2 + $0x28] sm:$0xff]  ;;  %v5116_v25 = vld [vmem:[%s6470_s2 + $0x58] sm:$0xff] }
 0x9d4   :  { %v1628_v27 = vunpack.c.l.b16 %v1504_v26  ;;  %v5097_v26 = vld [vmem:[%s6472_s3 + $0x20] sm:$0xff] }
 0x9d7   :  { %1859 = vmatpush.bf16.msrb.mxu0 %v5098_v2 }
 0x9d9   :  { %v1497_v3 = vpop.f32.mrf.mxu3 }
 0x9da   :  { %v1505_v23 = vpack.c.bf16 %v1497_v3, %v1497_v3  ;;  %v5104_v3 = vld [vmem:[%s6472_s3 + $0x58] sm:$0xff] }
 0x9db   :  { %1860 = vmatpush.bf16.msrb.mxu0 %v5097_v26  ;;  %1913 = vmatpush.bf16.msrb.mxu2 %v5104_v3  ;;  %v5115_v26 = vld [vmem:[%s6470_s2 + $0x50] sm:$0xff]  ;;  %v5114_v3 = vld [vmem:[%s6470_s2 + $0x48] sm:$0xff] }
 0x9dc   :  { %v1629_v28 = vunpack.c.l.b16 %v1505_v23 }
 0x9de   :  { %v1630_v29 = vpack.c.b16 %v1629_v28, %v1628_v27  ;;  %v5103_v27 = vld [vmem:[%s6472_s3 + $0x50] sm:$0xff]  ;;  %v5102_v28 = vld [vmem:[%s6472_s3 + $0x48] sm:$0xff] }
 0x9df   :  { %1914 = vmatpush.bf16.msrb.mxu2 %v5103_v27 }
 0x9e0   :  { %4339 = vmatmul.msk.bf16.vlgmr.msra.gmra.mxu0 %vm27_vm0, %v1630_v29 }
 0x9e3   :  { %1915 = vmatpush.bf16.msrb.mxu2 %v5102_v28 }
 0xa3d   :  { %v1555_v30 = vpop.f32.mrf.mxu0 }
 0xa3e   :  { %v1560_v34 = vadd.f32 %v4266_v32, %v1555_v30  ;;  %v5101_v32 = vld [vmem:[%s6472_s3 + $0x40] sm:$0xff] }
 0xa3f   :  { %1916 = vmatpush.bf16.msrb.mxu2 %v5101_v32 }
 0xa45   :  { %v1557_v31 = vpop.f32.mrf.mxu0 }
 0xa46   :  { %v1561_v43 = vadd.f32 %v4268_v41, %v1557_v31 }
 0xa53   :  { %v1611_v33 = vpop.f32.mrf.mxu2 }
 0xa54   :  { %v1616_v36 = vadd.f32 %v1611_v33, %v1560_v34 }
 0xa5b   :  { %v1613_v35 = vpop.f32.mrf.mxu2 }
 0xa5c   :  { %v1617_v19 = vadd.f32 %v1613_v35, %v1561_v43 }
 0xa5d   :  { %v1667_v37 = vpop.f32.mrf.mxu0 }
 0xa5e   :  { %v1672_v39 = vadd.f32 %v1667_v37, %v1616_v36 }
 0xa60   :  { %v4340_v42 = vmul.f32 -1.442695, %v1672_v39 }
 0xa62   :  { %5238 = vpow2.f32 %v4340_v42 }
 0xa65   :  { %v1669_v40 = vpop.f32.mrf.mxu0 }
 0xa66   :  { %v1673_v44 = vadd.f32 %v1669_v40, %v1617_v19 }
 0xa68   :  { %v5239_v45 = vpop.eup %5238  ;;  %v4341_v46 = vmul.f32 -1.442695, %v1673_v44 }
 0xa69   :  { %v1680_v47 = vadd.f32 1.0, %v5239_v45 }
 0xa6a   :  { %5240 = vpow2.f32 %v4341_v46 }
 0xa6b   :  { %5242 = vrcp.f32 %v1680_v47  ;;  %v1693_v60 = vand.u32 2147483648, %v1680_v47  ;;  %vm1687_vm13 = vweird.f32 %v1680_v47  ;;  %v1691_v62 = vand.u32 2147483647, %v1680_v47 }
 0xa6d   :  { %v1694_v0 = vor.u32 1.1754944e-38, %v1693_v60  ;;  %vm1692_vm2 = vcmp.eq.f32.partialorder %v1691_v62, 8.507059e+37 }
 0xa70   :  { %v5241_v48 = vpop.eup %5240 }
 0xa71   :  { %v5243_v49 = vpop.eup %5242  ;;  %v1681_v50 = vadd.f32 1.0, %v5241_v48 }
 0xa72   :  { %v1683_v53 = vmul.f32 %v5243_v49, %v1680_v47  ;;  %vm1688_vm12 = vweird.f32 %v5243_v49 }
 0xa73   :  { %5244 = vrcp.f32 %v1681_v50  ;;  %vm1689_vm14 = vmor %vm1687_vm13, %vm1688_vm12  ;;  %v1708_v63 = vand.u32 2147483648, %v1681_v50  ;;  %v1706_v7 = vand.u32 2147483647, %v1681_v50  ;;  %vm1702_vm3 = vweird.f32 %v1681_v50 }
 0xa74   :  { %v1684_v54 = vsub.f32 1.0, %v1683_v53 }
 0xa75   :  { %v1709_v8 = vor.u32 1.1754944e-38, %v1708_v63  ;;  %vm1707_vm5 = vcmp.eq.f32.partialorder %v1706_v7, 8.507059e+37 }
 0xa76   :  { %v1685_v55 = vmul.f32 %v5243_v49, %v1684_v54  ;;  %v4267_v54 = vld [vmem:[%s6471_s0 + $0x68] sm:$0xff] }
 0xa78   :  { %v1686_v59 = vadd.f32 %v5243_v49, %v1685_v55 }
 0xa79   :  { %v5245_v52 = vpop.eup %5244 }
 0xa7a   :  { %v1698_v56 = vmul.f32 %v5245_v52, %v1681_v50  ;;  %v1690_v5 = vsel %vm1689_vm14, %v5243_v49, %v1686_v59  ;;  %vm1703_vm15 = vweird.f32 %v5245_v52 }
 0xa7b   :  { %v5839_v4 = vsel %vm1692_vm2, %v1694_v0, %v1690_v5  ;;  %vm1704_vm4 = vmor %vm1702_vm3, %vm1703_vm15 }
 0xa7c   :  { %v1699_v61 = vsub.f32 1.0, %v1698_v56  ;;  %v1720_v13 = vmul.f32 %v1715_v10, %v5839_v4  ;;  %v1929_v5 = vsub.f32 1.0, %v5839_v4 }
 0xa7e   :  { %v1700_v6 = vmul.f32 %v5245_v52, %v1699_v61  ;;  %v4269_v61 = vld [vmem:[%s6471_s0 + $0x78] sm:$0xff] }
 0xa80   :  { %v1701_v1 = vadd.f32 %v5245_v52, %v1700_v6 }
 0xa82   :  { %v1705_v9 = vsel %vm1704_vm4, %v5245_v52, %v1701_v1 }
 0xa83   :  { %v5841_v12 = vsel %vm1707_vm5, %v1709_v8, %v1705_v9  ;;  %v1931_v9 = vmul.f32 %v1929_v5, %v5750_v51 }
 0xa84   :  { %v1721_v14 = vmul.f32 %v1717_v11, %v5841_v12  ;;  %v1930_v11 = vsub.f32 1.0, %v5841_v12 }
 0xa86   :  { %v1722_v15 = vpack.c.bf16 %v1721_v14, %v1720_v13 }
 0xa88   :  { %1724 = vrot.lane.b32.xlu2 %v1722_v15, %s5304_s27 }
 0xae2   :  { %v1725_v16 = vpop.permute.xlu2 %1724 }
 0xae3   :  { %1734 = vmatpush.bf16.msrb.mxu1 %v1725_v16  ;;  %v5106_v16 = vld [vmem:[%s6470_s2 + $0x8] sm:$0xff] }
 0xae6   :  { %4342 = vmatmul.msk.bf16.vlgmr.msrb.gmra.mxu1 %vm58_vm1, %v5776_v57 }
 0xaf6   :  { %4343 = vmatmul.msk.bf16.gmra.mxu1 %vm58_vm1, %v5783_v21 }
 0xb06   :  { %4344 = vmatmul.msk.bf16.gmra.mxu1 %vm58_vm1, %v5790_v58 }
 0xb63   :  { %v1736_v23 = vpop.f32.mrf.mxu1 }
 0xb64   :  { %v1751_v29 = vpack.c.bf16 %v1736_v23, %v1736_v23 }
 0xb66   :  { %v1767_v33 = vunpack.c.l.b16 %v1751_v29  ;;  %v5113_v29 = vld [vmem:[%s6470_s2 + $0x40] sm:$0xff] }
 0xb6b   :  { %v1738_v30 = vpop.f32.mrf.mxu1 }
 0xb6c   :  { %v1752_v31 = vpack.c.bf16 %v1738_v30, %v1738_v30 }
 0xb6e   :  { %v1768_v34 = vunpack.c.l.b16 %v1752_v31 }
 0xb70   :  { %v1769_v36 = vpack.c.b16 %v1768_v34, %v1767_v33 }
 0xb72   :  { %4361 = vmatmul.msk.bf16.vlgmr.msra.gmra.mxu2 %vm27_vm0, %v1769_v36 }
 0xb73   :  { %v1741_v37 = vpop.f32.mrf.mxu1  ;;  %2074 = vmatpush.bf16.msra.mxu2 %v5112_v18 }
 0xb74   :  { %v1753_v39 = vpack.c.bf16 %v1741_v37, %v1741_v37 }
 0xb76   :  { %v1823_v35 = vunpack.c.l.b16 %v1753_v39 }
 0xb77   :  { %2075 = vmatpush.bf16.msra.mxu2 %v5111_v20 }
 0xb7b   :  { %v1743_v41 = vpop.f32.mrf.mxu1  ;;  %2076 = vmatpush.bf16.msra.mxu2 %v5110_v22 }
 0xb7c   :  { %v1754_v42 = vpack.c.bf16 %v1743_v41, %v1743_v41 }
 0xb7e   :  { %v1824_v43 = vunpack.c.l.b16 %v1754_v42 }
 0xb7f   :  { %2077 = vmatpush.bf16.msra.mxu2 %v5109_v24 }
 0xb80   :  { %v1825_v19 = vpack.c.b16 %v1824_v43, %v1823_v35 }
 0xb82   :  { %4386 = vmatmul.msk.bf16.vlgmr.msrb.gmra.mxu0 %vm27_vm0, %v1825_v19 }
 0xb83   :  { %v1746_v40 = vpop.f32.mrf.mxu1 }
 0xb84   :  { %v1755_v44 = vpack.c.bf16 %v1746_v40, %v1746_v40 }
 0xb86   :  { %v1879_v47 = vunpack.c.l.b16 %v1755_v44 }
 0xb8b   :  { %v1748_v45 = vpop.f32.mrf.mxu1 }
 0xb8c   :  { %v1756_v46 = vpack.c.bf16 %v1748_v45, %v1748_v45 }
 0xb8e   :  { %v1880_v48 = vunpack.c.l.b16 %v1756_v46 }
 0xb90   :  { %v1881_v49 = vpack.c.b16 %v1880_v48, %v1879_v47 }
 0xb92   :  { %4411 = vmatmul.msk.bf16.vlgmr.msrb.gmra.mxu2 %vm27_vm0, %v1881_v49  ;;  %v4414_v49 = vld [vmem:[%s6471_s0 + $0x80] sm:$0xff] }
 0xbf5   :  { %v1806_v50 = vpop.f32.mrf.mxu2 }
 0xbf6   :  { %v1811_v52 = vadd.f32 %v4267_v54, %v1806_v50 }
 0xbfd   :  { %v1808_v53 = vpop.f32.mrf.mxu2 }
 0xbfe   :  { %v1812_v63 = vadd.f32 %v4269_v61, %v1808_v53 }
 0xbff   :  { %v1862_v55 = vpop.f32.mrf.mxu0 }
 0xc00   :  { %v1867_v56 = vadd.f32 %v1862_v55, %v1811_v52 }
 0xc07   :  { %v1864_v62 = vpop.f32.mrf.mxu0 }
 0xc08   :  { %v1868_v6 = vadd.f32 %v1864_v62, %v1812_v63 }
 0xc15   :  { %v1918_v59 = vpop.f32.mrf.mxu2 }
 0xc16   :  { %v1923_v60 = vadd.f32 %v1918_v59, %v1867_v56  ;;  %v4416_v56 = vld [vmem:[%s6471_s0 + $0x90] sm:$0xff] }
 0xc18   :  { %5246 = vtanh.f32 %v1923_v60 }
 0xc1d   :  { %v1920_v7 = vpop.f32.mrf.mxu2 }
 0xc1e   :  { %v5247_v0 = vpop.eup %5246  ;;  %v1924_v1 = vadd.f32 %v1920_v7, %v1868_v6 }
 0xc1f   :  { %v1927_v8 = vmul.f32 %v5247_v0, %v5839_v4  ;;  %v1932_v4 = vmul.f32 %v1930_v11, %v5762_v38  ;;  %v5108_v38 = vld [vmem:[%s6470_s2 + $0x18] sm:$0xff] }
 0xc20   :  { %5248 = vtanh.f32 %v1924_v1  ;;  %2018 = vmatpush.bf16.msra.mxu0 %v5108_v38 }
 0xc21   :  { %v5900_v10 = vadd.f32 %v1931_v9, %v1927_v8 }
 0xc23   :  { %2182 = vrot.lane.b32.xlu0 %v5900_v10, %s5304_s27  ;;  %4412 = vst.msk [vmem:[%s6473_s5 + $0x30] sm:$0xff] %vm27_vm0, %v5900_v10 }
 0xc26   :  { %v5249_v13 = vpop.eup %5248 }
 0xc27   :  { %v1928_v14 = vmul.f32 %v5249_v13, %v5841_v12  ;;  %v5107_v12 = vld [vmem:[%s6470_s2 + $0x10] sm:$0xff] }
 0xc28   :  { %2019 = vmatpush.bf16.msra.mxu0 %v5107_v12 }
 0xc29   :  { %v5912_v51 = vadd.f32 %v1932_v4, %v1928_v14 }
 0xc2b   :  { %2184 = vrot.lane.b32.xlu1 %v5912_v51, %s5304_s27  ;;  %4413 = vst.msk [vmem:[%s6473_s5 + $0x38] sm:$0xff] %vm27_vm0, %v5912_v51  ;;  %v1943_v15 = vpack.c.bf16 %v5912_v51, %v5900_v10 }
 0xc2c   :  { %2020 = vmatpush.bf16.msra.mxu0 %v5106_v16 }
 0xc2d   :  { %1951 = vmatpush.bf16.msra.mxu3 %v1943_v15 }
 0xc30   :  { %4418 = vmatmul.msk.bf16.vlgmr.msra.gmra.mxu3 %vm58_vm1, %v5776_v57  ;;  %2021 = vmatpush.bf16.msra.mxu0 %v5105_v17 }
 0xc34   :  { %2130 = vmatpush.bf16.msrb.mxu0 %v5116_v25 }
 0xc38   :  { %2131 = vmatpush.bf16.msrb.mxu0 %v5115_v26 }
 0xc3c   :  { %2132 = vmatpush.bf16.msrb.mxu0 %v5114_v3 }
 0xc40   :  { %4419 = vmatmul.msk.bf16.gmra.mxu3 %vm58_vm1, %v5783_v21  ;;  %2133 = vmatpush.bf16.msrb.mxu0 %v5113_v29 }
 0xc50   :  { %4420 = vmatmul.msk.bf16.gmra.mxu3 %vm58_vm1, %v5790_v58 }
 0xcb3   :  { %v1953_v2 = vpop.f32.mrf.mxu3 }
 0xcb4   :  { %v1968_v23 = vpack.c.bf16 %v1953_v2, %v1953_v2 }
 0xcb6   :  { %v1984_v30 = vunpack.c.l.b16 %v1968_v23 }
 0xcbb   :  { %v1955_v27 = vpop.f32.mrf.mxu3 }
 0xcbc   :  { %v1969_v28 = vpack.c.bf16 %v1955_v27, %v1955_v27  ;;  %v2183_v27 = vpop.permute.xlu0 %2182 }
 0xcbe   :  { %v1985_v31 = vunpack.c.l.b16 %v1969_v28  ;;  %v2185_v28 = vpop.permute.xlu1 %2184 }
 0xcc0   :  { %v1986_v32 = vpack.c.b16 %v1985_v31, %v1984_v30 }
 0xcc2   :  { %4437 = vmatmul.msk.bf16.vlgmr.msra.gmra.mxu0 %vm27_vm0, %v1986_v32 }
 0xcc3   :  { %v1958_v33 = vpop.f32.mrf.mxu3 }
 0xcc4   :  { %v1970_v34 = vpack.c.bf16 %v1958_v33, %v1958_v33 }
 0xcc6   :  { %v2040_v39 = vunpack.c.l.b16 %v1970_v34  ;;  %v5120_v34 = vld [vmem:[%s6472_s3 + $0x18] sm:$0xff] }
 0xcc7   :  { %2269 = vmatpush.bf16.msrb.mxu2 %v5120_v34  ;;  %v5129_v34 = vld [vmem:[%s6470_s2] sm:$0xff] }
 0xccb   :  { %v1960_v36 = vpop.f32.mrf.mxu3 }
 0xccc   :  { %v1971_v37 = vpack.c.bf16 %v1960_v36, %v1960_v36  ;;  %v5119_v36 = vld [vmem:[%s6472_s3 + $0x10] sm:$0xff] }
 0xccd   :  { %2270 = vmatpush.bf16.msrb.mxu2 %v5119_v36  ;;  %v5136_v36 = vld [vmem:[%s6470_s2 + $0x38] sm:$0xff] }
 0xcce   :  { %v2041_v41 = vunpack.c.l.b16 %v1971_v37  ;;  %v5118_v37 = vld [vmem:[%s6472_s3 + $0x8] sm:$0xff] }
 0xcd0   :  { %v2042_v42 = vpack.c.b16 %v2041_v41, %v2040_v39  ;;  %v5117_v39 = vld [vmem:[%s6472_s3] sm:$0xff]  ;;  %v5124_v41 = vld [vmem:[%s6472_s3 + $0x38] sm:$0xff] }
 0xcd1   :  { %2271 = vmatpush.bf16.msrb.mxu2 %v5118_v37  ;;  %2325 = vmatpush.bf16.msra.mxu0 %v5124_v41  ;;  %v5135_v37 = vld [vmem:[%s6470_s2 + $0x30] sm:$0xff]  ;;  %v5133_v41 = vld [vmem:[%s6470_s2 + $0x20] sm:$0xff] }
 0xcd2   :  { %4462 = vmatmul.msk.bf16.vlgmr.msra.gmra.mxu2 %vm27_vm0, %v2042_v42  ;;  %v5123_v42 = vld [vmem:[%s6472_s3 + $0x30] sm:$0xff] }
 0xcd3   :  { %v1963_v35 = vpop.f32.mrf.mxu3 }
 0xcd4   :  { %v1972_v43 = vpack.c.bf16 %v1963_v35, %v1963_v35  ;;  %v5122_v35 = vld [vmem:[%s6472_s3 + $0x28] sm:$0xff] }
 0xcd5   :  { %2272 = vmatpush.bf16.msrb.mxu2 %v5117_v39  ;;  %2326 = vmatpush.bf16.msra.mxu0 %v5123_v42  ;;  %v5134_v39 = vld [vmem:[%s6470_s2 + $0x28] sm:$0xff]  ;;  %v5140_v42 = vld [vmem:[%s6470_s2 + $0x58] sm:$0xff] }
 0xcd6   :  { %v2096_v44 = vunpack.c.l.b16 %v1972_v43  ;;  %v5121_v43 = vld [vmem:[%s6472_s3 + $0x20] sm:$0xff] }
 0xcd9   :  { %2327 = vmatpush.bf16.msra.mxu0 %v5122_v35 }
 0xcdb   :  { %v1965_v19 = vpop.f32.mrf.mxu3 }
 0xcdc   :  { %v1973_v40 = vpack.c.bf16 %v1965_v19, %v1965_v19  ;;  %v5128_v19 = vld [vmem:[%s6472_s3 + $0x58] sm:$0xff] }
 0xcdd   :  { %2328 = vmatpush.bf16.msra.mxu0 %v5121_v43  ;;  %2381 = vmatpush.bf16.msra.mxu2 %v5128_v19  ;;  %v5139_v43 = vld [vmem:[%s6470_s2 + $0x50] sm:$0xff]  ;;  %v5138_v19 = vld [vmem:[%s6470_s2 + $0x48] sm:$0xff] }
 0xcde   :  { %v2097_v45 = vunpack.c.l.b16 %v1973_v40 }
 0xce0   :  { %v2098_v46 = vpack.c.b16 %v2097_v45, %v2096_v44  ;;  %v5127_v44 = vld [vmem:[%s6472_s3 + $0x50] sm:$0xff]  ;;  %v5126_v45 = vld [vmem:[%s6472_s3 + $0x48] sm:$0xff] }
 0xce1   :  { %2382 = vmatpush.bf16.msra.mxu2 %v5127_v44 }
 0xce2   :  { %4487 = vmatmul.msk.bf16.vlgmr.msrb.gmra.mxu0 %vm27_vm0, %v2098_v46 }
 0xce5   :  { %2383 = vmatpush.bf16.msra.mxu2 %v5126_v45 }
 0xd3f   :  { %v2023_v47 = vpop.f32.mrf.mxu0 }
 0xd40   :  { %v2028_v53 = vadd.f32 %v4414_v49, %v2023_v47  ;;  %v5125_v49 = vld [vmem:[%s6472_s3 + $0x40] sm:$0xff] }
 0xd41   :  { %2384 = vmatpush.bf16.msra.mxu2 %v5125_v49 }
 0xd47   :  { %v2025_v48 = vpop.f32.mrf.mxu0 }
 0xd48   :  { %v2029_v61 = vadd.f32 %v4416_v56, %v2025_v48 }
 0xd55   :  { %v2079_v50 = vpop.f32.mrf.mxu2 }
 0xd56   :  { %v2084_v54 = vadd.f32 %v2079_v50, %v2028_v53 }
 0xd5d   :  { %v2081_v60 = vpop.f32.mrf.mxu2 }
 0xd5e   :  { %v2085_v62 = vadd.f32 %v2081_v60, %v2029_v61 }
 0xd5f   :  { %v2135_v55 = vpop.f32.mrf.mxu0 }
 0xd60   :  { %v2140_v52 = vadd.f32 %v2135_v55, %v2084_v54 }
 0xd62   :  { %v4488_v59 = vmul.f32 -1.442695, %v2140_v52 }
 0xd64   :  { %5250 = vpow2.f32 %v4488_v59 }
 0xd67   :  { %v2137_v63 = vpop.f32.mrf.mxu0 }
 0xd68   :  { %v2141_v5 = vadd.f32 %v2137_v63, %v2085_v62 }
 0xd6a   :  { %v5251_v6 = vpop.eup %5250  ;;  %v4489_v7 = vmul.f32 -1.442695, %v2141_v5 }
 0xd6b   :  { %v2148_v0 = vadd.f32 1.0, %v5251_v6 }
 0xd6c   :  { %5252 = vpow2.f32 %v4489_v7 }
 0xd6d   :  { %5254 = vrcp.f32 %v2148_v0  ;;  %v2161_v12 = vand.u32 2147483648, %v2148_v0  ;;  %vm2155_vm7 = vweird.f32 %v2148_v0  ;;  %v2159_v17 = vand.u32 2147483647, %v2148_v0 }
 0xd6f   :  { %v2162_v25 = vor.u32 1.1754944e-38, %v2161_v12  ;;  %vm2160_vm10 = vcmp.eq.f32.partialorder %v2159_v17, 8.507059e+37 }
 0xd72   :  { %v5253_v1 = vpop.eup %5252 }
 0xd73   :  { %v5255_v8 = vpop.eup %5254  ;;  %v2149_v9 = vadd.f32 1.0, %v5253_v1 }
 0xd74   :  { %v2151_v11 = vmul.f32 %v5255_v8, %v2148_v0  ;;  %vm2156_vm6 = vweird.f32 %v5255_v8 }
 0xd75   :  { %5256 = vrcp.f32 %v2149_v9  ;;  %vm2157_vm8 = vmor %vm2155_vm7, %vm2156_vm6  ;;  %v2176_v18 = vand.u32 2147483648, %v2149_v9  ;;  %v2174_v24 = vand.u32 2147483647, %v2149_v9  ;;  %vm2170_vm11 = vweird.f32 %v2149_v9 }
 0xd76   :  { %v2152_v13 = vsub.f32 1.0, %v2151_v11 }
 0xd77   :  { %v2177_v3 = vor.u32 1.1754944e-38, %v2176_v18  ;;  %vm2175_vm13 = vcmp.eq.f32.partialorder %v2174_v24, 8.507059e+37 }
 0xd78   :  { %v2153_v14 = vmul.f32 %v5255_v8, %v2152_v13  ;;  %v4415_v13 = vld [vmem:[%s6471_s0 + $0x88] sm:$0xff] }
 0xd7a   :  { %v2154_v38 = vadd.f32 %v5255_v8, %v2153_v14 }
 0xd7b   :  { %v5257_v4 = vpop.eup %5256 }
 0xd7c   :  { %v2166_v15 = vmul.f32 %v5257_v4, %v2149_v9  ;;  %v2158_v20 = vsel %vm2157_vm8, %v5255_v8, %v2154_v38  ;;  %vm2171_vm9 = vweird.f32 %v5257_v4 }
 0xd7d   :  { %v5974_v26 = vsel %vm2160_vm10, %v2162_v25, %v2158_v20  ;;  %vm2172_vm12 = vmor %vm2170_vm11, %vm2171_vm9 }
 0xd7e   :  { %v2167_v16 = vsub.f32 1.0, %v2166_v15  ;;  %v2188_v30 = vmul.f32 %v2183_v27, %v5974_v26  ;;  %v2397_v20 = vsub.f32 1.0, %v5974_v26 }
 0xd80   :  { %v2168_v22 = vmul.f32 %v5257_v4, %v2167_v16  ;;  %v4417_v16 = vld [vmem:[%s6471_s0 + $0x98] sm:$0xff] }
 0xd82   :  { %v2169_v2 = vadd.f32 %v5257_v4, %v2168_v22 }
 0xd84   :  { %v2173_v23 = vsel %vm2172_vm12, %v5257_v4, %v2169_v2 }
 0xd85   :  { %v5976_v29 = vsel %vm2175_vm13, %v2177_v3, %v2173_v23  ;;  %v2399_v23 = vmul.f32 %v2397_v20, %v5900_v10 }
 0xd86   :  { %v2189_v31 = vmul.f32 %v2185_v28, %v5976_v29  ;;  %v2398_v28 = vsub.f32 1.0, %v5976_v29 }
 0xd88   :  { %v2190_v32 = vpack.c.bf16 %v2189_v31, %v2188_v30 }
 0xd8a   :  { %2192 = vrot.lane.b32.xlu2 %v2190_v32, %s5304_s27 }
 0xde4   :  { %v2193_v33 = vpop.permute.xlu2 %2192 }
 0xde5   :  { %2202 = vmatpush.bf16.msra.mxu1 %v2193_v33  ;;  %v5130_v33 = vld [vmem:[%s6470_s2 + $0x8] sm:$0xff] }
 0xde8   :  { %4490 = vmatmul.msk.bf16.vlgmr.msra.gmra.mxu1 %vm58_vm1, %v5776_v57 }
 0xdf8   :  { %4491 = vmatmul.msk.bf16.gmra.mxu1 %vm58_vm1, %v5783_v21 }
 0xe08   :  { %4492 = vmatmul.msk.bf16.gmra.mxu1 %vm58_vm1, %v5790_v58 }
 0xe65   :  { %v2204_v40 = vpop.f32.mrf.mxu1 }
 0xe66   :  { %v2219_v46 = vpack.c.bf16 %v2204_v40, %v2204_v40 }
 0xe68   :  { %v2235_v50 = vunpack.c.l.b16 %v2219_v46  ;;  %v5137_v46 = vld [vmem:[%s6470_s2 + $0x40] sm:$0xff] }
 0xe6d   :  { %v2206_v47 = vpop.f32.mrf.mxu1 }
 0xe6e   :  { %v2220_v48 = vpack.c.bf16 %v2206_v47, %v2206_v47 }
 0xe70   :  { %v2236_v53 = vunpack.c.l.b16 %v2220_v48 }
 0xe72   :  { %v2237_v54 = vpack.c.b16 %v2236_v53, %v2235_v50 }
 0xe74   :  { %4509 = vmatmul.msk.bf16.vlgmr.msrb.gmra.mxu2 %vm27_vm0, %v2237_v54 }
 0xe75   :  { %v2209_v55 = vpop.f32.mrf.mxu1  ;;  %2542 = vmatpush.bf16.msrb.mxu2 %v5136_v36 }
 0xe76   :  { %v2221_v52 = vpack.c.bf16 %v2209_v55, %v2209_v55 }
 0xe78   :  { %v2291_v60 = vunpack.c.l.b16 %v2221_v52 }
 0xe79   :  { %2543 = vmatpush.bf16.msrb.mxu2 %v5135_v37 }
 0xe7d   :  { %v2211_v56 = vpop.f32.mrf.mxu1  ;;  %2544 = vmatpush.bf16.msrb.mxu2 %v5134_v39 }
 0xe7e   :  { %v2222_v59 = vpack.c.bf16 %v2211_v56, %v2211_v56 }
 0xe80   :  { %v2292_v61 = vunpack.c.l.b16 %v2222_v59 }
 0xe81   :  { %2545 = vmatpush.bf16.msrb.mxu2 %v5133_v41 }
 0xe82   :  { %v2293_v62 = vpack.c.b16 %v2292_v61, %v2291_v60 }
 0xe84   :  { %4534 = vmatmul.msk.bf16.vlgmr.msra.gmra.mxu0 %vm27_vm0, %v2293_v62 }
 0xe85   :  { %v2214_v63 = vpop.f32.mrf.mxu1 }
 0xe86   :  { %v2223_v5 = vpack.c.bf16 %v2214_v63, %v2214_v63 }
 0xe88   :  { %v2347_v0 = vunpack.c.l.b16 %v2223_v5 }
 0xe8d   :  { %v2216_v6 = vpop.f32.mrf.mxu1 }
 0xe8e   :  { %v2224_v7 = vpack.c.bf16 %v2216_v6, %v2216_v6 }
 0xe90   :  { %v2348_v1 = vunpack.c.l.b16 %v2224_v7 }
 0xe92   :  { %v2349_v8 = vpack.c.b16 %v2348_v1, %v2347_v0 }
 0xe94   :  { %4559 = vmatmul.msk.bf16.vlgmr.msra.gmra.mxu2 %vm27_vm0, %v2349_v8  ;;  %v4562_v8 = vld [vmem:[%s6471_s0 + $0xa0] sm:$0xff] }
 0xef7   :  { %v2274_v9 = vpop.f32.mrf.mxu2 }
 0xef8   :  { %v2279_v4 = vadd.f32 %v4415_v13, %v2274_v9 }
 0xeff   :  { %v2276_v11 = vpop.f32.mrf.mxu2 }
 0xf00   :  { %v2280_v18 = vadd.f32 %v4417_v16, %v2276_v11 }
 0xf01   :  { %v2330_v14 = vpop.f32.mrf.mxu0 }
 0xf02   :  { %v2335_v15 = vadd.f32 %v2330_v14, %v2279_v4 }
 0xf09   :  { %v2332_v17 = vpop.f32.mrf.mxu0 }
 0xf0a   :  { %v2336_v22 = vadd.f32 %v2332_v17, %v2280_v18 }
 0xf17   :  { %v2386_v38 = vpop.f32.mrf.mxu2 }
 0xf18   :  { %v2391_v12 = vadd.f32 %v2386_v38, %v2335_v15  ;;  %v4564_v15 = vld [vmem:[%s6471_s0 + $0xb0] sm:$0xff] }
 0xf1a   :  { %5258 = vtanh.f32 %v2391_v12 }
 0xf1f   :  { %v2388_v24 = vpop.f32.mrf.mxu2 }
 0xf20   :  { %v5259_v25 = vpop.eup %5258  ;;  %v2392_v2 = vadd.f32 %v2388_v24, %v2336_v22 }
 0xf21   :  { %v2395_v3 = vmul.f32 %v5259_v25, %v5974_v26  ;;  %v2400_v26 = vmul.f32 %v2398_v28, %v5912_v51  ;;  %v5132_v51 = vld [vmem:[%s6470_s2 + $0x18] sm:$0xff] }
 0xf22   :  { %5260 = vtanh.f32 %v2392_v2  ;;  %2486 = vmatpush.bf16.msrb.mxu0 %v5132_v51 }
 0xf23   :  { %v6035_v27 = vadd.f32 %v2399_v23, %v2395_v3 }
 0xf25   :  { %2650 = vrot.lane.b32.xlu0 %v6035_v27, %s5304_s27  ;;  %4560 = vst.msk [vmem:[%s6473_s5 + $0x40] sm:$0xff] %vm27_vm0, %v6035_v27 }
 0xf28   :  { %v5261_v30 = vpop.eup %5260 }
 0xf29   :  { %v2396_v31 = vmul.f32 %v5261_v30, %v5976_v29  ;;  %v5131_v29 = vld [vmem:[%s6470_s2 + $0x10] sm:$0xff] }
 0xf2a   :  { %2487 = vmatpush.bf16.msrb.mxu0 %v5131_v29 }
 0xf2b   :  { %v6047_v10 = vadd.f32 %v2400_v26, %v2396_v31 }
 0xf2d   :  { %2652 = vrot.lane.b32.xlu1 %v6047_v10, %s5304_s27  ;;  %4561 = vst.msk [vmem:[%s6473_s5 + $0x48] sm:$0xff] %vm27_vm0, %v6047_v10  ;;  %v2411_v32 = vpack.c.bf16 %v6047_v10, %v6035_v27 }
 0xf2e   :  { %2488 = vmatpush.bf16.msrb.mxu0 %v5130_v33 }
 0xf2f   :  { %2419 = vmatpush.bf16.msrb.mxu3 %v2411_v32 }
 0xf32   :  { %4566 = vmatmul.msk.bf16.vlgmr.msrb.gmra.mxu3 %vm58_vm1, %v5776_v57  ;;  %2489 = vmatpush.bf16.msrb.mxu0 %v5129_v34 }
 0xf36   :  { %2598 = vmatpush.bf16.msra.mxu0 %v5140_v42 }
 0xf3a   :  { %2599 = vmatpush.bf16.msra.mxu0 %v5139_v43 }
 0xf3e   :  { %2600 = vmatpush.bf16.msra.mxu0 %v5138_v19 }
 0xf42   :  { %4567 = vmatmul.msk.bf16.gmra.mxu3 %vm58_vm1, %v5783_v21  ;;  %2601 = vmatpush.bf16.msra.mxu0 %v5137_v46 }
 0xf52   :  { %4568 = vmatmul.msk.bf16.gmra.mxu3 %vm58_vm1, %v5790_v58 }
 0xfb5   :  { %v2421_v35 = vpop.f32.mrf.mxu3 }
 0xfb6   :  { %v2436_v40 = vpack.c.bf16 %v2421_v35, %v2421_v35 }
 0xfb8   :  { %v2452_v47 = vunpack.c.l.b16 %v2436_v40 }
 0xfbd   :  { %v2423_v44 = vpop.f32.mrf.mxu3 }
 0xfbe   :  { %v2437_v45 = vpack.c.bf16 %v2423_v44, %v2423_v44  ;;  %v2651_v44 = vpop.permute.xlu0 %2650 }
 0xfc0   :  { %v2453_v48 = vunpack.c.l.b16 %v2437_v45  ;;  %v2653_v45 = vpop.permute.xlu1 %2652 }
 0xfc2   :  { %v2454_v49 = vpack.c.b16 %v2453_v48, %v2452_v47 }
 0xfc4   :  { %4585 = vmatmul.msk.bf16.vlgmr.msrb.gmra.mxu0 %vm27_vm0, %v2454_v49 }
 0xfc5   :  { %v2426_v50 = vpop.f32.mrf.mxu3 }
 0xfc6   :  { %v2438_v53 = vpack.c.bf16 %v2426_v50, %v2426_v50 }
 0xfc8   :  { %v2508_v52 = vunpack.c.l.b16 %v2438_v53  ;;  %v5144_v53 = vld [vmem:[%s6472_s3 + $0x18] sm:$0xff] }
 0xfc9   :  { %2737 = vmatpush.bf16.msra.mxu2 %v5144_v53  ;;  %v5153_v53 = vld [vmem:[%s6470_s2] sm:$0xff] }
 0xfcd   :  { %v2428_v54 = vpop.f32.mrf.mxu3 }
 0xfce   :  { %v2439_v55 = vpack.c.bf16 %v2428_v54, %v2428_v54  ;;  %v5143_v54 = vld [vmem:[%s6472_s3 + $0x10] sm:$0xff] }
 0xfcf   :  { %2738 = vmatpush.bf16.msra.mxu2 %v5143_v54  ;;  %v5160_v54 = vld [vmem:[%s6470_s2 + $0x38] sm:$0xff] }
 0xfd0   :  { %v2509_v56 = vunpack.c.l.b16 %v2439_v55  ;;  %v5147_v55 = vld [vmem:[%s6472_s3 + $0x30] sm:$0xff] }
 0xfd2   :  { %v2510_v59 = vpack.c.b16 %v2509_v56, %v2508_v52  ;;  %v5146_v52 = vld [vmem:[%s6472_s3 + $0x28] sm:$0xff]  ;;  %v5145_v56 = vld [vmem:[%s6472_s3 + $0x20] sm:$0xff] }
 0xfd4   :  { %4610 = vmatmul.msk.bf16.vlgmr.msrb.gmra.mxu2 %vm27_vm0, %v2510_v59  ;;  %v5152_v59 = vld [vmem:[%s6472_s3 + $0x58] sm:$0xff] }
 0xfd5   :  { %v2431_v60 = vpop.f32.mrf.mxu3 }
 0xfd6   :  { %v2440_v61 = vpack.c.bf16 %v2431_v60, %v2431_v60 }
 0xfd8   :  { %v2564_v5 = vunpack.c.l.b16 %v2440_v61  ;;  %v5151_v61 = vld [vmem:[%s6472_s3 + $0x50] sm:$0xff] }
 0xfdd   :  { %v2433_v62 = vpop.f32.mrf.mxu3 }
 0xfde   :  { %v2441_v63 = vpack.c.bf16 %v2433_v62, %v2433_v62  ;;  %v5150_v62 = vld [vmem:[%s6472_s3 + $0x48] sm:$0xff] }
 0xfe0   :  { %v2565_v6 = vunpack.c.l.b16 %v2441_v63 }
 0xfe2   :  { %v2566_v7 = vpack.c.b16 %v2565_v6, %v2564_v5 }
 0xfe4   :  { %4635 = vmatmul.msk.bf16.vlgmr.msra.gmra.mxu0 %vm27_vm0, %v2566_v7  ;;  %v5149_v7 = vld [vmem:[%s6472_s3 + $0x40] sm:$0xff] }
0x1041   :  { %v2491_v0 = vpop.f32.mrf.mxu0 }
0x1042   :  { %v2496_v11 = vadd.f32 %v4562_v8, %v2491_v0 }
0x1049   :  { %v2493_v1 = vpop.f32.mrf.mxu0 }
0x104a   :  { %v2497_v16 = vadd.f32 %v4564_v15, %v2493_v1 }
0x1057   :  { %v2547_v9 = vpop.f32.mrf.mxu2 }
0x1058   :  { %v2552_v13 = vadd.f32 %v2547_v9, %v2496_v11 }
0x105f   :  { %v2549_v12 = vpop.f32.mrf.mxu2 }
0x1060   :  { %v2553_v17 = vadd.f32 %v2549_v12, %v2497_v16 }
0x1061   :  { %v2603_v14 = vpop.f32.mrf.mxu0 }
0x1062   :  { %v2608_v4 = vadd.f32 %v2603_v14, %v2552_v13 }
0x1064   :  { %v4636_v38 = vmul.f32 -1.442695, %v2608_v4 }
0x1066   :  { %5262 = vpow2.f32 %v4636_v38 }
0x1069   :  { %v2605_v18 = vpop.f32.mrf.mxu0 }
0x106a   :  { %v2609_v20 = vadd.f32 %v2605_v18, %v2553_v17 }
0x106c   :  { %v5263_v22 = vpop.eup %5262  ;;  %v4637_v24 = vmul.f32 -1.442695, %v2609_v20 }
0x106d   :  { %v2616_v25 = vadd.f32 1.0, %v5263_v22 }
0x106e   :  { %5264 = vpow2.f32 %v4637_v24 }
0x106f   :  { %5266 = vrcp.f32 %v2616_v25  ;;  %v2629_v29 = vand.u32 2147483648, %v2616_v25  ;;  %vm2623_vm15 = vweird.f32 %v2616_v25  ;;  %v2627_v34 = vand.u32 2147483647, %v2616_v25 }
0x1071   :  { %v2630_v42 = vor.u32 1.1754944e-38, %v2629_v29  ;;  %vm2628_vm4 = vcmp.eq.f32.partialorder %v2627_v34, 8.507059e+37 }
0x1074   :  { %v5265_v2 = vpop.eup %5264 }
0x1075   :  { %v5267_v3 = vpop.eup %5266  ;;  %v2617_v23 = vadd.f32 1.0, %v5265_v2 }
0x1076   :  { %v2619_v28 = vmul.f32 %v5267_v3, %v2616_v25  ;;  %vm2624_vm14 = vweird.f32 %v5267_v3 }
0x1077   :  { %5268 = vrcp.f32 %v2617_v23  ;;  %vm2625_vm2 = vmor %vm2623_vm15, %vm2624_vm14  ;;  %v2644_v36 = vand.u32 2147483648, %v2617_v23  ;;  %v2642_v41 = vand.u32 2147483647, %v2617_v23  ;;  %vm2638_vm5 = vweird.f32 %v2617_v23 }
0x1078   :  { %v2620_v30 = vsub.f32 1.0, %v2619_v28 }
0x1079   :  { %v2645_v19 = vor.u32 1.1754944e-38, %v2644_v36  ;;  %vm2643_vm7 = vcmp.eq.f32.partialorder %v2642_v41, 8.507059e+37 }
0x107a   :  { %v2621_v31 = vmul.f32 %v5267_v3, %v2620_v30 }
0x107c   :  { %v2622_v51 = vadd.f32 %v5267_v3, %v2621_v31 }
0x107d   :  { %v5269_v26 = vpop.eup %5268 }
0x107e   :  { %v2634_v32 = vmul.f32 %v5269_v26, %v2617_v23  ;;  %v2626_v37 = vsel %vm2625_vm2, %v5267_v3, %v2622_v51  ;;  %vm2639_vm3 = vweird.f32 %v5269_v26  ;;  %v4563_v3 = vld [vmem:[%s6471_s0 + $0xa8] sm:$0xff] }
0x107f   :  { %v6109_v43 = vsel %vm2628_vm4, %v2630_v42, %v2626_v37  ;;  %vm2640_vm6 = vmor %vm2638_vm5, %vm2639_vm3 }
0x1080   :  { %v2635_v33 = vsub.f32 1.0, %v2634_v32  ;;  %v2656_v47 = vmul.f32 %v2651_v44, %v6109_v43  ;;  %v4565_v32 = vld [vmem:[%s6471_s0 + $0xb8] sm:$0xff] }
0x1082   :  { %v2636_v39 = vmul.f32 %v5269_v26, %v2635_v33  ;;  %v2865_v33 = vsub.f32 1.0, %v6109_v43 }
0x1084   :  { %v2637_v35 = vadd.f32 %v5269_v26, %v2636_v39  ;;  %v2867_v42 = vmul.f32 %v2865_v33, %v6035_v27 }
0x1086   :  { %v2641_v40 = vsel %vm2640_vm6, %v5269_v26, %v2637_v35 }
0x1087   :  { %v6111_v46 = vsel %vm2643_vm7, %v2645_v19, %v2641_v40 }
0x1088   :  { %v2657_v48 = vmul.f32 %v2653_v45, %v6111_v46  ;;  %v2866_v19 = vsub.f32 1.0, %v6111_v46 }
0x108a   :  { %v2658_v49 = vpack.c.bf16 %v2657_v48, %v2656_v47  ;;  %v6210_v47 = vld [vmem:[%s6469_s1 + $0x10] sm:$0xff]  ;;  %v5156_v48 = vld [vmem:[%s6470_s2 + $0x18] sm:$0xff] }
0x108c   :  { %2660 = vrot.lane.b32.xlu2 %v2658_v49, %s5304_s27  ;;  %v5155_v49 = vld [vmem:[%s6470_s2 + $0x10] sm:$0xff] }
0x10e6   :  { %v2661_v50 = vpop.permute.xlu2 %2660 }
0x10e7   :  { %2670 = vmatpush.bf16.msrb.mxu1 %v2661_v50  ;;  %v5154_v50 = vld [vmem:[%s6470_s2 + $0x8] sm:$0xff] }
0x10ea   :  { %4638 = vmatmul.msk.bf16.vlgmr.msrb.gmra.mxu1 %vm58_vm1, %v5776_v57  ;;  %v5142_v57 = vld [vmem:[%s6472_s3 + $0x8] sm:$0xff] }
0x10eb   :  { %2739 = vmatpush.bf16.msra.mxu2 %v5142_v57  ;;  %v5159_v57 = vld [vmem:[%s6470_s2 + $0x30] sm:$0xff] }
0x10fa   :  { %4639 = vmatmul.msk.bf16.gmra.mxu1 %vm58_vm1, %v5783_v21  ;;  %v5141_v21 = vld [vmem:[%s6472_s3] sm:$0xff] }
0x10fb   :  { %2740 = vmatpush.bf16.msra.mxu2 %v5141_v21  ;;  %v5158_v21 = vld [vmem:[%s6470_s2 + $0x28] sm:$0xff] }
0x10ff   :  { %2849 = vmatpush.bf16.msrb.mxu2 %v5152_v59  ;;  %v5162_v59 = vld [vmem:[%s6470_s2 + $0x48] sm:$0xff] }
0x1103   :  { %2850 = vmatpush.bf16.msrb.mxu2 %v5151_v61 }
0x1107   :  { %2851 = vmatpush.bf16.msrb.mxu2 %v5150_v62 }
0x110a   :  { %4640 = vmatmul.msk.bf16.gmra.mxu1 %vm58_vm1, %v5790_v58  ;;  %v5148_v58 = vld [vmem:[%s6472_s3 + $0x38] sm:$0xff] }
0x110b   :  { %2793 = vmatpush.bf16.msrb.mxu0 %v5148_v58  ;;  %2852 = vmatpush.bf16.msrb.mxu2 %v5149_v7  ;;  %v5157_v58 = vld [vmem:[%s6470_s2 + $0x20] sm:$0xff] }
0x110f   :  { %2794 = vmatpush.bf16.msrb.mxu0 %v5147_v55  ;;  %v5164_v55 = vld [vmem:[%s6470_s2 + $0x58] sm:$0xff] }
0x1113   :  { %2795 = vmatpush.bf16.msrb.mxu0 %v5146_v52 }
0x1117   :  { %2796 = vmatpush.bf16.msrb.mxu0 %v5145_v56  ;;  %v5163_v56 = vld [vmem:[%s6470_s2 + $0x50] sm:$0xff] }
0x111b   :  { %2954 = vmatpush.bf16.msra.mxu0 %v5156_v48 }
0x111f   :  { %2955 = vmatpush.bf16.msra.mxu0 %v5155_v49 }
0x1123   :  { %2956 = vmatpush.bf16.msra.mxu0 %v5154_v50 }
0x1127   :  { %2957 = vmatpush.bf16.msra.mxu0 %v5153_v53 }
0x1167   :  { %v2672_v60 = vpop.f32.mrf.mxu1 }
0x1168   :  { %v2687_v63 = vpack.c.bf16 %v2672_v60, %v2672_v60 }
0x116a   :  { %v2703_v0 = vunpack.c.l.b16 %v2687_v63  ;;  %v5161_v63 = vld [vmem:[%s6470_s2 + $0x40] sm:$0xff] }
0x116f   :  { %v2674_v5 = vpop.f32.mrf.mxu1 }
0x1170   :  { %v2688_v6 = vpack.c.bf16 %v2674_v5, %v2674_v5 }
0x1172   :  { %v2704_v1 = vunpack.c.l.b16 %v2688_v6 }
0x1174   :  { %v2705_v8 = vpack.c.b16 %v2704_v1, %v2703_v0 }
0x1176   :  { %4657 = vmatmul.msk.bf16.vlgmr.msra.gmra.mxu2 %vm27_vm0, %v2705_v8 }
0x1177   :  { %v2677_v9 = vpop.f32.mrf.mxu1  ;;  %3010 = vmatpush.bf16.msra.mxu2 %v5160_v54 }
0x1178   :  { %v2689_v11 = vpack.c.bf16 %v2677_v9, %v2677_v9 }
0x117a   :  { %v2759_v4 = vunpack.c.l.b16 %v2689_v11 }
0x117b   :  { %3011 = vmatpush.bf16.msra.mxu2 %v5159_v57 }
0x117f   :  { %v2679_v13 = vpop.f32.mrf.mxu1  ;;  %3012 = vmatpush.bf16.msra.mxu2 %v5158_v21 }
0x1180   :  { %v2690_v14 = vpack.c.bf16 %v2679_v13, %v2679_v13 }
0x1182   :  { %v2760_v15 = vunpack.c.l.b16 %v2690_v14 }
0x1183   :  { %3013 = vmatpush.bf16.msra.mxu2 %v5157_v58 }
0x1184   :  { %v2761_v38 = vpack.c.b16 %v2760_v15, %v2759_v4 }
0x1186   :  { %4682 = vmatmul.msk.bf16.vlgmr.msrb.gmra.mxu0 %vm27_vm0, %v2761_v38 }
0x1187   :  { %v2682_v12 = vpop.f32.mrf.mxu1  ;;  %3066 = vmatpush.bf16.msrb.mxu0 %v5164_v55 }
0x1188   :  { %v2691_v16 = vpack.c.bf16 %v2682_v12, %v2682_v12 }
0x118a   :  { %v2815_v20 = vunpack.c.l.b16 %v2691_v16 }
0x118b   :  { %3067 = vmatpush.bf16.msrb.mxu0 %v5163_v56 }
0x118f   :  { %v2684_v17 = vpop.f32.mrf.mxu1  ;;  %3068 = vmatpush.bf16.msrb.mxu0 %v5162_v59 }
0x1190   :  { %v2692_v18 = vpack.c.bf16 %v2684_v17, %v2684_v17 }
0x1192   :  { %v2816_v22 = vunpack.c.l.b16 %v2692_v18 }
0x1193   :  { %3069 = vmatpush.bf16.msrb.mxu0 %v5161_v63 }
0x1194   :  { %v2817_v24 = vpack.c.b16 %v2816_v22, %v2815_v20 }
0x1196   :  { %4707 = vmatmul.msk.bf16.vlgmr.msrb.gmra.mxu2 %vm27_vm0, %v2817_v24  ;;  %v4710_v24 = vld [vmem:[%s6471_s0 + $0xc0] sm:$0xff] }
0x11f9   :  { %v2742_v25 = vpop.f32.mrf.mxu2 }
0x11fa   :  { %v2747_v28 = vadd.f32 %v4563_v3, %v2742_v25 }
0x1201   :  { %v2744_v2 = vpop.f32.mrf.mxu2 }
0x1202   :  { %v2748_v29 = vadd.f32 %v4565_v32, %v2744_v2 }
0x1203   :  { %v2798_v23 = vpop.f32.mrf.mxu0 }
0x1204   :  { %v2803_v30 = vadd.f32 %v2798_v23, %v2747_v28 }
0x120b   :  { %v2800_v51 = vpop.f32.mrf.mxu0 }
0x120c   :  { %v2804_v34 = vadd.f32 %v2800_v51, %v2748_v29 }
0x1219   :  { %v2854_v31 = vpop.f32.mrf.mxu2 }
0x121a   :  { %v2859_v26 = vadd.f32 %v2854_v31, %v2803_v30  ;;  %v4712_v30 = vld [vmem:[%s6471_s0 + $0xd0] sm:$0xff] }
0x121c   :  { %5270 = vtanh.f32 %v2859_v26 }
0x1221   :  { %v2856_v36 = vpop.f32.mrf.mxu2 }
0x1222   :  { %v5271_v37 = vpop.eup %5270  ;;  %v2860_v39 = vadd.f32 %v2856_v36, %v2804_v34 }
0x1223   :  { %v2863_v41 = vmul.f32 %v5271_v37, %v6109_v43  ;;  %v2868_v43 = vmul.f32 %v2866_v19, %v6047_v10  ;;  %v6203_v10 = vld [vmem:[%s6469_s1 + $0x8] sm:$0xff] }
0x1224   :  { %5272 = vtanh.f32 %v2860_v39 }
0x1225   :  { %v6170_v35 = vadd.f32 %v2867_v42, %v2863_v41 }
0x1227   :  { %3118 = vrot.lane.b32.xlu0 %v6170_v35, %s5304_s27  ;;  %4708 = vst.msk [vmem:[%s6473_s5 + $0x50] sm:$0xff] %vm27_vm0, %v6170_v35 }
0x122a   :  { %v5273_v40 = vpop.eup %5272 }
0x122b   :  { %v2864_v44 = vmul.f32 %v5273_v40, %v6111_v46  ;;  %v6196_v46 = vld [vmem:[%s6469_s1] sm:$0xff] }
0x122d   :  { %v6182_v27 = vadd.f32 %v2868_v43, %v2864_v44 }
0x122f   :  { %3120 = vrot.lane.b32.xlu1 %v6182_v27, %s5304_s27  ;;  %4709 = vst.msk [vmem:[%s6473_s5 + $0x58] sm:$0xff] %vm27_vm0, %v6182_v27  ;;  %v2879_v45 = vpack.c.bf16 %v6182_v27, %v6170_v35 }
0x1231   :  { %2887 = vmatpush.bf16.msra.mxu3 %v2879_v45 }
0x1234   :  { %4714 = vmatmul.msk.bf16.vlgmr.msra.gmra.mxu3 %vm58_vm1, %v6196_v46 }
0x1244   :  { %4715 = vmatmul.msk.bf16.gmra.mxu3 %vm58_vm1, %v6203_v10 }
0x1254   :  { %4716 = vmatmul.msk.bf16.gmra.mxu3 %vm58_vm1, %v6210_v47 }
0x12b7   :  { %v2889_v52 = vpop.f32.mrf.mxu3 }
0x12b8   :  { %v2904_v60 = vpack.c.bf16 %v2889_v52, %v2889_v52 }
0x12ba   :  { %v2920_v5 = vunpack.c.l.b16 %v2904_v60 }
0x12bf   :  { %v2891_v61 = vpop.f32.mrf.mxu3 }
0x12c0   :  { %v2905_v62 = vpack.c.bf16 %v2891_v61, %v2891_v61  ;;  %v3119_v61 = vpop.permute.xlu0 %3118 }
0x12c2   :  { %v2921_v6 = vunpack.c.l.b16 %v2905_v62  ;;  %v3121_v62 = vpop.permute.xlu1 %3120 }
0x12c4   :  { %v2922_v7 = vpack.c.b16 %v2921_v6, %v2920_v5 }
0x12c6   :  { %4733 = vmatmul.msk.bf16.vlgmr.msra.gmra.mxu0 %vm27_vm0, %v2922_v7 }
0x12c7   :  { %v2894_v0 = vpop.f32.mrf.mxu3 }
0x12c8   :  { %v2906_v1 = vpack.c.bf16 %v2894_v0, %v2894_v0 }
0x12ca   :  { %v2976_v11 = vunpack.c.l.b16 %v2906_v1  ;;  %v5168_v1 = vld [vmem:[%s6472_s3 + $0x18] sm:$0xff] }
0x12cb   :  { %3205 = vmatpush.bf16.msrb.mxu2 %v5168_v1  ;;  %v5177_v1 = vld [vmem:[%s6470_s2] sm:$0xff] }
0x12cf   :  { %v2896_v8 = vpop.f32.mrf.mxu3 }
0x12d0   :  { %v2907_v9 = vpack.c.bf16 %v2896_v8, %v2896_v8  ;;  %v5167_v8 = vld [vmem:[%s6472_s3 + $0x10] sm:$0xff] }
0x12d1   :  { %3206 = vmatpush.bf16.msrb.mxu2 %v5167_v8  ;;  %v5184_v8 = vld [vmem:[%s6470_s2 + $0x38] sm:$0xff] }
0x12d2   :  { %v2977_v13 = vunpack.c.l.b16 %v2907_v9  ;;  %v5166_v9 = vld [vmem:[%s6472_s3 + $0x8] sm:$0xff] }
0x12d4   :  { %v2978_v14 = vpack.c.b16 %v2977_v13, %v2976_v11  ;;  %v5165_v11 = vld [vmem:[%s6472_s3] sm:$0xff]  ;;  %v5172_v13 = vld [vmem:[%s6472_s3 + $0x38] sm:$0xff] }
0x12d5   :  { %3207 = vmatpush.bf16.msrb.mxu2 %v5166_v9  ;;  %3261 = vmatpush.bf16.msra.mxu0 %v5172_v13  ;;  %v5183_v9 = vld [vmem:[%s6470_s2 + $0x30] sm:$0xff]  ;;  %v5181_v13 = vld [vmem:[%s6470_s2 + $0x20] sm:$0xff] }
0x12d6   :  { %4758 = vmatmul.msk.bf16.vlgmr.msra.gmra.mxu2 %vm27_vm0, %v2978_v14  ;;  %v5171_v14 = vld [vmem:[%s6472_s3 + $0x30] sm:$0xff] }
0x12d7   :  { %v2899_v4 = vpop.f32.mrf.mxu3 }
0x12d8   :  { %v2908_v15 = vpack.c.bf16 %v2899_v4, %v2899_v4  ;;  %v5170_v4 = vld [vmem:[%s6472_s3 + $0x28] sm:$0xff] }
0x12d9   :  { %3208 = vmatpush.bf16.msrb.mxu2 %v5165_v11  ;;  %3262 = vmatpush.bf16.msra.mxu0 %v5171_v14  ;;  %v5182_v11 = vld [vmem:[%s6470_s2 + $0x28] sm:$0xff]  ;;  %v5188_v14 = vld [vmem:[%s6470_s2 + $0x58] sm:$0xff] }
0x12da   :  { %v3032_v16 = vunpack.c.l.b16 %v2908_v15  ;;  %v5169_v15 = vld [vmem:[%s6472_s3 + $0x20] sm:$0xff] }
0x12dd   :  { %3263 = vmatpush.bf16.msra.mxu0 %v5170_v4 }
0x12df   :  { %v2901_v38 = vpop.f32.mrf.mxu3 }
0x12e0   :  { %v2909_v12 = vpack.c.bf16 %v2901_v38, %v2901_v38  ;;  %v5176_v38 = vld [vmem:[%s6472_s3 + $0x58] sm:$0xff] }
0x12e1   :  { %3264 = vmatpush.bf16.msra.mxu0 %v5169_v15  ;;  %3317 = vmatpush.bf16.msra.mxu2 %v5176_v38  ;;  %v5187_v15 = vld [vmem:[%s6470_s2 + $0x50] sm:$0xff]  ;;  %v5186_v38 = vld [vmem:[%s6470_s2 + $0x48] sm:$0xff] }
0x12e2   :  { %v3033_v17 = vunpack.c.l.b16 %v2909_v12 }
0x12e4   :  { %v3034_v18 = vpack.c.b16 %v3033_v17, %v3032_v16  ;;  %v5175_v16 = vld [vmem:[%s6472_s3 + $0x50] sm:$0xff]  ;;  %v5174_v17 = vld [vmem:[%s6472_s3 + $0x48] sm:$0xff] }
0x12e5   :  { %3318 = vmatpush.bf16.msra.mxu2 %v5175_v16 }
0x12e6   :  { %4783 = vmatmul.msk.bf16.vlgmr.msrb.gmra.mxu0 %vm27_vm0, %v3034_v18 }
0x12e9   :  { %3319 = vmatpush.bf16.msra.mxu2 %v5174_v17 }
0x1343   :  { %v2959_v20 = vpop.f32.mrf.mxu0 }
0x1344   :  { %v2964_v2 = vadd.f32 %v4710_v24, %v2959_v20  ;;  %v5173_v24 = vld [vmem:[%s6472_s3 + $0x40] sm:$0xff] }
0x1345   :  { %3320 = vmatpush.bf16.msra.mxu2 %v5173_v24 }
0x134b   :  { %v2961_v22 = vpop.f32.mrf.mxu0 }
0x134c   :  { %v2965_v32 = vadd.f32 %v4712_v30, %v2961_v22 }
0x1359   :  { %v3015_v25 = vpop.f32.mrf.mxu2 }
0x135a   :  { %v3020_v3 = vadd.f32 %v3015_v25, %v2964_v2 }
0x1361   :  { %v3017_v26 = vpop.f32.mrf.mxu2 }
0x1362   :  { %v3021_v51 = vadd.f32 %v3017_v26, %v2965_v32 }
0x1363   :  { %v3071_v23 = vpop.f32.mrf.mxu0 }
0x1364   :  { %v3076_v28 = vadd.f32 %v3071_v23, %v3020_v3 }
0x1366   :  { %v4784_v31 = vmul.f32 -1.442695, %v3076_v28 }
0x1368   :  { %5274 = vpow2.f32 %v4784_v31 }
0x136b   :  { %v3073_v29 = vpop.f32.mrf.mxu0 }
0x136c   :  { %v3077_v33 = vadd.f32 %v3073_v29, %v3021_v51 }
0x136e   :  { %v5275_v34 = vpop.eup %5274  ;;  %v4785_v36 = vmul.f32 -1.442695, %v3077_v33 }
0x136f   :  { %v3084_v37 = vadd.f32 1.0, %v5275_v34 }
0x1370   :  { %5276 = vpow2.f32 %v4785_v36 }
0x1371   :  { %5278 = vrcp.f32 %v3084_v37  ;;  %v3097_v49 = vand.u32 2147483648, %v3084_v37  ;;  %vm3091_vm9 = vweird.f32 %v3084_v37  ;;  %v3095_v53 = vand.u32 2147483647, %v3084_v37 }
0x1373   :  { %v3098_v55 = vor.u32 1.1754944e-38, %v3097_v49  ;;  %vm3096_vm12 = vcmp.eq.f32.partialorder %v3095_v53, 8.507059e+37 }
0x1376   :  { %v5277_v39 = vpop.eup %5276 }
0x1377   :  { %v5279_v41 = vpop.eup %5278  ;;  %v3085_v42 = vadd.f32 1.0, %v5277_v39 }
0x1378   :  { %v3087_v19 = vmul.f32 %v5279_v41, %v3084_v37  ;;  %vm3092_vm8 = vweird.f32 %v5279_v41 }
0x1379   :  { %5280 = vrcp.f32 %v3085_v42  ;;  %vm3093_vm10 = vmor %vm3091_vm9, %vm3092_vm8  ;;  %v3112_v54 = vand.u32 2147483648, %v3085_v42  ;;  %v3110_v58 = vand.u32 2147483647, %v3085_v42  ;;  %vm3106_vm13 = vweird.f32 %v3085_v42 }
0x137a   :  { %v3088_v40 = vsub.f32 1.0, %v3087_v19 }
0x137b   :  { %v3113_v59 = vor.u32 1.1754944e-38, %v3112_v54  ;;  %vm3111_vm15 = vcmp.eq.f32.partialorder %v3110_v58, 8.507059e+37 }
0x137c   :  { %v3089_v44 = vmul.f32 %v5279_v41, %v3088_v40  ;;  %v4711_v40 = vld [vmem:[%s6471_s0 + $0xc8] sm:$0xff] }
0x137e   :  { %v3090_v48 = vadd.f32 %v5279_v41, %v3089_v44 }
0x137f   :  { %v5281_v43 = vpop.eup %5280 }
0x1380   :  { %v3102_v45 = vmul.f32 %v5281_v43, %v3085_v42  ;;  %v3094_v57 = vsel %vm3093_vm10, %v5279_v41, %v3090_v48  ;;  %vm3107_vm11 = vweird.f32 %v5281_v43 }
0x1381   :  { %v6259_v56 = vsel %vm3096_vm12, %v3098_v55, %v3094_v57  ;;  %vm3108_vm14 = vmor %vm3106_vm13, %vm3107_vm11 }
0x1382   :  { %v3103_v50 = vsub.f32 1.0, %v3102_v45  ;;  %v3124_v5 = vmul.f32 %v3119_v61, %v6259_v56  ;;  %v3333_v57 = vsub.f32 1.0, %v6259_v56 }
0x1384   :  { %v3104_v21 = vmul.f32 %v5281_v43, %v3103_v50  ;;  %v4713_v50 = vld [vmem:[%s6471_s0 + $0xd8] sm:$0xff] }
0x1386   :  { %v3105_v52 = vadd.f32 %v5281_v43, %v3104_v21 }
0x1388   :  { %v3109_v60 = vsel %vm3108_vm14, %v5281_v43, %v3105_v52 }
0x1389   :  { %v6261_v63 = vsel %vm3111_vm15, %v3113_v59, %v3109_v60  ;;  %v3335_v60 = vmul.f32 %v3333_v57, %v6170_v35 }
0x138a   :  { %v3125_v6 = vmul.f32 %v3121_v62, %v6261_v63  ;;  %v3334_v62 = vsub.f32 1.0, %v6261_v63 }
0x138c   :  { %v3126_v7 = vpack.c.bf16 %v3125_v6, %v3124_v5 }
0x138e   :  { %3128 = vrot.lane.b32.xlu2 %v3126_v7, %s5304_s27 }
0x13e8   :  { %v3129_v0 = vpop.permute.xlu2 %3128 }
0x13e9   :  { %3138 = vmatpush.bf16.msra.mxu1 %v3129_v0  ;;  %v5178_v0 = vld [vmem:[%s6470_s2 + $0x8] sm:$0xff] }
0x13ec   :  { %4786 = vmatmul.msk.bf16.vlgmr.msra.gmra.mxu1 %vm58_vm1, %v6196_v46 }
0x13fc   :  { %4787 = vmatmul.msk.bf16.gmra.mxu1 %vm58_vm1, %v6203_v10 }
0x140c   :  { %4788 = vmatmul.msk.bf16.gmra.mxu1 %vm58_vm1, %v6210_v47 }
0x1469   :  { %v3140_v12 = vpop.f32.mrf.mxu1 }
0x146a   :  { %v3155_v18 = vpack.c.bf16 %v3140_v12, %v3140_v12 }
0x146c   :  { %v3171_v25 = vunpack.c.l.b16 %v3155_v18  ;;  %v5185_v18 = vld [vmem:[%s6470_s2 + $0x40] sm:$0xff] }
0x1471   :  { %v3142_v20 = vpop.f32.mrf.mxu1 }
0x1472   :  { %v3156_v22 = vpack.c.bf16 %v3142_v20, %v3142_v20 }
0x1474   :  { %v3172_v2 = vunpack.c.l.b16 %v3156_v22 }
0x1476   :  { %v3173_v3 = vpack.c.b16 %v3172_v2, %v3171_v25 }
0x1478   :  { %4805 = vmatmul.msk.bf16.vlgmr.msrb.gmra.mxu2 %vm27_vm0, %v3173_v3 }
0x1479   :  { %v3145_v23 = vpop.f32.mrf.mxu1  ;;  %3478 = vmatpush.bf16.msrb.mxu2 %v5184_v8 }
0x147a   :  { %v3157_v28 = vpack.c.bf16 %v3145_v23, %v3145_v23 }
0x147c   :  { %v3227_v26 = vunpack.c.l.b16 %v3157_v28 }
0x147d   :  { %3479 = vmatpush.bf16.msrb.mxu2 %v5183_v9 }
0x1481   :  { %v3147_v30 = vpop.f32.mrf.mxu1  ;;  %3480 = vmatpush.bf16.msrb.mxu2 %v5182_v11 }
0x1482   :  { %v3158_v31 = vpack.c.bf16 %v3147_v30, %v3147_v30 }
0x1484   :  { %v3228_v32 = vunpack.c.l.b16 %v3158_v31 }
0x1485   :  { %3481 = vmatpush.bf16.msrb.mxu2 %v5181_v13 }
0x1486   :  { %v3229_v51 = vpack.c.b16 %v3228_v32, %v3227_v26 }
0x1488   :  { %4830 = vmatmul.msk.bf16.vlgmr.msra.gmra.mxu0 %vm27_vm0, %v3229_v51 }
0x1489   :  { %v3150_v29 = vpop.f32.mrf.mxu1 }
0x148a   :  { %v3159_v33 = vpack.c.bf16 %v3150_v29, %v3150_v29 }
0x148c   :  { %v3283_v37 = vunpack.c.l.b16 %v3159_v33 }
0x1491   :  { %v3152_v34 = vpop.f32.mrf.mxu1 }
0x1492   :  { %v3160_v36 = vpack.c.bf16 %v3152_v34, %v3152_v34 }
0x1494   :  { %v3284_v39 = vunpack.c.l.b16 %v3160_v36 }
0x1496   :  { %v3285_v41 = vpack.c.b16 %v3284_v39, %v3283_v37 }
0x1498   :  { %4855 = vmatmul.msk.bf16.vlgmr.msra.gmra.mxu2 %vm27_vm0, %v3285_v41  ;;  %v4858_v41 = vld [vmem:[%s6471_s0 + $0xe0] sm:$0xff] }
0x14fb   :  { %v3210_v42 = vpop.f32.mrf.mxu2 }
0x14fc   :  { %v3215_v43 = vadd.f32 %v4711_v40, %v3210_v42 }
0x1503   :  { %v3212_v19 = vpop.f32.mrf.mxu2 }
0x1504   :  { %v3216_v54 = vadd.f32 %v4713_v50, %v3212_v19 }
0x1505   :  { %v3266_v44 = vpop.f32.mrf.mxu0 }
0x1506   :  { %v3271_v45 = vadd.f32 %v3266_v44, %v3215_v43 }
0x150d   :  { %v3268_v53 = vpop.f32.mrf.mxu0 }
0x150e   :  { %v3272_v21 = vadd.f32 %v3268_v53, %v3216_v54 }
0x151b   :  { %v3322_v48 = vpop.f32.mrf.mxu2 }
0x151c   :  { %v3327_v49 = vadd.f32 %v3322_v48, %v3271_v45  ;;  %v4860_v45 = vld [vmem:[%s6471_s0 + $0xf0] sm:$0xff] }
0x151e   :  { %5282 = vtanh.f32 %v3327_v49 }
0x1523   :  { %v3324_v58 = vpop.f32.mrf.mxu2 }
0x1524   :  { %v5283_v55 = vpop.eup %5282  ;;  %v3328_v52 = vadd.f32 %v3324_v58, %v3272_v21 }
0x1525   :  { %v3331_v59 = vmul.f32 %v5283_v55, %v6259_v56  ;;  %v3336_v56 = vmul.f32 %v3334_v62, %v6182_v27  ;;  %v5180_v27 = vld [vmem:[%s6470_s2 + $0x18] sm:$0xff] }
0x1526   :  { %5284 = vtanh.f32 %v3328_v52  ;;  %3422 = vmatpush.bf16.msrb.mxu0 %v5180_v27 }
0x1527   :  { %v6320_v61 = vadd.f32 %v3335_v60, %v3331_v59 }
0x1529   :  { %3586 = vrot.lane.b32.xlu0 %v6320_v61, %s5304_s27  ;;  %4856 = vst.msk [vmem:[%s6473_s5 + $0x60] sm:$0xff] %vm27_vm0, %v6320_v61 }
0x152c   :  { %v5285_v5 = vpop.eup %5284 }
0x152d   :  { %v3332_v6 = vmul.f32 %v5285_v5, %v6261_v63  ;;  %v5179_v63 = vld [vmem:[%s6470_s2 + $0x10] sm:$0xff] }
0x152e   :  { %3423 = vmatpush.bf16.msrb.mxu0 %v5179_v63 }
0x152f   :  { %v6332_v35 = vadd.f32 %v3336_v56, %v3332_v6 }
0x1531   :  { %3588 = vrot.lane.b32.xlu1 %v6332_v35, %s5304_s27  ;;  %4857 = vst.msk [vmem:[%s6473_s5 + $0x68] sm:$0xff] %vm27_vm0, %v6332_v35  ;;  %v3347_v7 = vpack.c.bf16 %v6332_v35, %v6320_v61 }
0x1532   :  { %3424 = vmatpush.bf16.msrb.mxu0 %v5178_v0 }
0x1533   :  { %3355 = vmatpush.bf16.msrb.mxu3 %v3347_v7 }
0x1536   :  { %4862 = vmatmul.msk.bf16.vlgmr.msrb.gmra.mxu3 %vm58_vm1, %v6196_v46  ;;  %3425 = vmatpush.bf16.msrb.mxu0 %v5177_v1 }
0x153a   :  { %3534 = vmatpush.bf16.msra.mxu0 %v5188_v14 }
0x153e   :  { %3535 = vmatpush.bf16.msra.mxu0 %v5187_v15 }
0x1542   :  { %3536 = vmatpush.bf16.msra.mxu0 %v5186_v38 }
0x1546   :  { %4863 = vmatmul.msk.bf16.gmra.mxu3 %vm58_vm1, %v6203_v10  ;;  %3537 = vmatpush.bf16.msra.mxu0 %v5185_v18 }
0x1556   :  { %4864 = vmatmul.msk.bf16.gmra.mxu3 %vm58_vm1, %v6210_v47 }
0x15b9   :  { %v3357_v4 = vpop.f32.mrf.mxu3 }
0x15ba   :  { %v3372_v12 = vpack.c.bf16 %v3357_v4, %v3357_v4 }
0x15bc   :  { %v3388_v20 = vunpack.c.l.b16 %v3372_v12 }
0x15c1   :  { %v3359_v16 = vpop.f32.mrf.mxu3 }
0x15c2   :  { %v3373_v17 = vpack.c.bf16 %v3359_v16, %v3359_v16  ;;  %v3587_v16 = vpop.permute.xlu0 %3586 }
0x15c4   :  { %v3389_v22 = vunpack.c.l.b16 %v3373_v17  ;;  %v3589_v17 = vpop.permute.xlu1 %3588 }
0x15c6   :  { %v3390_v24 = vpack.c.b16 %v3389_v22, %v3388_v20 }
0x15c8   :  { %4881 = vmatmul.msk.bf16.vlgmr.msrb.gmra.mxu0 %vm27_vm0, %v3390_v24 }
0x15c9   :  { %v3362_v25 = vpop.f32.mrf.mxu3 }
0x15ca   :  { %v3374_v2 = vpack.c.bf16 %v3362_v25, %v3362_v25 }
0x15cc   :  { %v3444_v28 = vunpack.c.l.b16 %v3374_v2  ;;  %v5192_v2 = vld [vmem:[%s6472_s3 + $0x18] sm:$0xff] }
0x15cd   :  { %3673 = vmatpush.bf16.msra.mxu2 %v5192_v2 }
0x15d1   :  { %v3364_v3 = vpop.f32.mrf.mxu3 }
0x15d2   :  { %v3375_v23 = vpack.c.bf16 %v3364_v3, %v3364_v3  ;;  %v5191_v3 = vld [vmem:[%s6472_s3 + $0x10] sm:$0xff] }
0x15d3   :  { %3674 = vmatpush.bf16.msra.mxu2 %v5191_v3 }
0x15d4   :  { %v3445_v30 = vunpack.c.l.b16 %v3375_v23  ;;  %v5195_v23 = vld [vmem:[%s6472_s3 + $0x30] sm:$0xff] }
0x15d6   :  { %v3446_v31 = vpack.c.b16 %v3445_v30, %v3444_v28  ;;  %v5194_v28 = vld [vmem:[%s6472_s3 + $0x28] sm:$0xff]  ;;  %v5193_v30 = vld [vmem:[%s6472_s3 + $0x20] sm:$0xff] }
0x15d8   :  { %4906 = vmatmul.msk.bf16.vlgmr.msrb.gmra.mxu2 %vm27_vm0, %v3446_v31  ;;  %v5200_v31 = vld [vmem:[%s6472_s3 + $0x58] sm:$0xff] }
0x15d9   :  { %v3367_v26 = vpop.f32.mrf.mxu3 }
0x15da   :  { %v3376_v32 = vpack.c.bf16 %v3367_v26, %v3367_v26 }
0x15dc   :  { %v3500_v33 = vunpack.c.l.b16 %v3376_v32  ;;  %v5199_v32 = vld [vmem:[%s6472_s3 + $0x50] sm:$0xff] }
0x15e1   :  { %v3369_v51 = vpop.f32.mrf.mxu3 }
0x15e2   :  { %v3377_v29 = vpack.c.bf16 %v3369_v51, %v3369_v51  ;;  %v5198_v51 = vld [vmem:[%s6472_s3 + $0x48] sm:$0xff] }
0x15e4   :  { %v3501_v34 = vunpack.c.l.b16 %v3377_v29 }
0x15e6   :  { %v3502_v36 = vpack.c.b16 %v3501_v34, %v3500_v33 }
0x15e8   :  { %4931 = vmatmul.msk.bf16.vlgmr.msra.gmra.mxu0 %vm27_vm0, %v3502_v36  ;;  %v5197_v36 = vld [vmem:[%s6472_s3 + $0x40] sm:$0xff] }
0x1645   :  { %v3427_v37 = vpop.f32.mrf.mxu0 }
0x1646   :  { %v3432_v19 = vadd.f32 %v4858_v41, %v3427_v37 }
0x164d   :  { %v3429_v39 = vpop.f32.mrf.mxu0 }
0x164e   :  { %v3433_v50 = vadd.f32 %v4860_v45, %v3429_v39 }
0x165b   :  { %v3483_v42 = vpop.f32.mrf.mxu2 }
0x165c   :  { %v3488_v40 = vadd.f32 %v3483_v42, %v3432_v19 }
0x1663   :  { %v3485_v49 = vpop.f32.mrf.mxu2 }
0x1664   :  { %v3489_v53 = vadd.f32 %v3485_v49, %v3433_v50 }
0x1665   :  { %v3539_v44 = vpop.f32.mrf.mxu0 }
0x1666   :  { %v3544_v43 = vadd.f32 %v3539_v44, %v3488_v40 }
0x1668   :  { %v4932_v48 = vmul.f32 -1.442695, %v3544_v43 }
0x166a   :  { %5286 = vpow2.f32 %v4932_v48 }
0x166d   :  { %v3541_v54 = vpop.f32.mrf.mxu0 }
0x166e   :  { %v3545_v57 = vadd.f32 %v3541_v54, %v3489_v53 }
0x1670   :  { %v5287_v21 = vpop.eup %5286  ;;  %v4933_v58 = vmul.f32 -1.442695, %v3545_v57 }
0x1671   :  { %v3552_v55 = vadd.f32 1.0, %v5287_v21 }
0x1672   :  { %5288 = vpow2.f32 %v4933_v58 }
0x1673   :  { %5290 = vrcp.f32 %v3552_v55  ;;  %v3565_v63 = vand.u32 2147483648, %v3552_v55  ;;  %vm3559_vm3 = vweird.f32 %v3552_v55  ;;  %v3563_v1 = vand.u32 2147483647, %v3552_v55 }
0x1675   :  { %v3566_v14 = vor.u32 1.1754944e-38, %v3565_v63  ;;  %vm3564_vm6 = vcmp.eq.f32.partialorder %v3563_v1, 8.507059e+37 }
0x1678   :  { %v5289_v52 = vpop.eup %5288 }
0x1679   :  { %v5291_v59 = vpop.eup %5290  ;;  %v3553_v60 = vadd.f32 1.0, %v5289_v52 }
0x167a   :  { %v3555_v62 = vmul.f32 %v5291_v59, %v3552_v55  ;;  %vm3560_vm2 = vweird.f32 %v5291_v59 }
0x167b   :  { %5292 = vrcp.f32 %v3553_v60  ;;  %vm3561_vm4 = vmor %vm3559_vm3, %vm3560_vm2  ;;  %v3580_v8 = vand.u32 2147483648, %v3553_v60  ;;  %v3578_v13 = vand.u32 2147483647, %v3553_v60  ;;  %vm3574_vm7 = vweird.f32 %v3553_v60 }
0x167c   :  { %v3556_v5 = vsub.f32 1.0, %v3555_v62 }
0x167d   :  { %v3581_v38 = vor.u32 1.1754944e-38, %v3580_v8  ;;  %vm3579_vm9 = vcmp.eq.f32.partialorder %v3578_v13, 8.507059e+37 }
0x167e   :  { %v3557_v6 = vmul.f32 %v5291_v59, %v3556_v5 }
0x1680   :  { %v3558_v27 = vadd.f32 %v5291_v59, %v3557_v6 }
0x1681   :  { %v5293_v56 = vpop.eup %5292 }
0x1682   :  { %v3570_v7 = vmul.f32 %v5293_v56, %v3553_v60  ;;  %v3562_v9 = vsel %vm3561_vm4, %v5291_v59, %v3558_v27  ;;  %vm3575_vm5 = vweird.f32 %v5293_v56  ;;  %v4859_v59 = vld [vmem:[%s6471_s0 + $0xe8] sm:$0xff] }
0x1683   :  { %v6394_v15 = vsel %vm3564_vm6, %v3566_v14, %v3562_v9  ;;  %vm3576_vm8 = vmor %vm3574_vm7, %vm3575_vm5 }
0x1684   :  { %v3571_v0 = vsub.f32 1.0, %v3570_v7  ;;  %v3592_v20 = vmul.f32 %v3587_v16, %v6394_v15  ;;  %v4861_v7 = vld [vmem:[%s6471_s0 + $0xf8] sm:$0xff] }
0x1686   :  { %v3572_v11 = vmul.f32 %v5293_v56, %v3571_v0  ;;  %v3801_v0 = vsub.f32 1.0, %v6394_v15 }
0x1688   :  { %v3573_v4 = vadd.f32 %v5293_v56, %v3572_v11  ;;  %v3803_v14 = vmul.f32 %v3801_v0, %v6320_v61 }
0x168a   :  { %v3577_v12 = vsel %vm3576_vm8, %v5293_v56, %v3573_v4 }
0x168b   :  { %v6396_v18 = vsel %vm3579_vm9, %v3581_v38, %v3577_v12 }
0x168c   :  { %v3593_v22 = vmul.f32 %v3589_v17, %v6396_v18  ;;  %v3802_v38 = vsub.f32 1.0, %v6396_v18 }
0x168e   :  { %v3594_v24 = vpack.c.bf16 %v3593_v22, %v3592_v20  ;;  %v3804_v17 = vmul.f32 %v3802_v38, %v6332_v35 }
0x1690   :  { %3596 = vrot.lane.b32.xlu2 %v3594_v24, %s5304_s27 }
0x16ea   :  { %v3597_v25 = vpop.permute.xlu2 %3596 }
0x16eb   :  { %3606 = vmatpush.bf16.msrb.mxu1 %v3597_v25 }
0x16ee   :  { %4934 = vmatmul.msk.bf16.vlgmr.msrb.gmra.mxu1 %vm58_vm1, %v6196_v46  ;;  %v5190_v46 = vld [vmem:[%s6472_s3 + $0x8] sm:$0xff] }
0x16ef   :  { %3675 = vmatpush.bf16.msra.mxu2 %v5190_v46 }
0x16fe   :  { %4935 = vmatmul.msk.bf16.gmra.mxu1 %vm58_vm1, %v6203_v10  ;;  %v5189_v10 = vld [vmem:[%s6472_s3] sm:$0xff] }
0x16ff   :  { %3676 = vmatpush.bf16.msra.mxu2 %v5189_v10 }
0x1703   :  { %3785 = vmatpush.bf16.msrb.mxu2 %v5200_v31 }
0x1707   :  { %3786 = vmatpush.bf16.msrb.mxu2 %v5199_v32 }
0x170b   :  { %3787 = vmatpush.bf16.msrb.mxu2 %v5198_v51 }
0x170e   :  { %4936 = vmatmul.msk.bf16.gmra.mxu1 %vm58_vm1, %v6210_v47  ;;  %v5196_v47 = vld [vmem:[%s6472_s3 + $0x38] sm:$0xff] }
0x170f   :  { %3729 = vmatpush.bf16.msrb.mxu0 %v5196_v47  ;;  %3788 = vmatpush.bf16.msrb.mxu2 %v5197_v36 }
0x1713   :  { %3730 = vmatpush.bf16.msrb.mxu0 %v5195_v23 }
0x1717   :  { %3731 = vmatpush.bf16.msrb.mxu0 %v5194_v28 }
0x171b   :  { %3732 = vmatpush.bf16.msrb.mxu0 %v5193_v30 }
0x176b   :  { %v3608_v26 = vpop.f32.mrf.mxu1 }
0x176c   :  { %v3623_v29 = vpack.c.bf16 %v3608_v26, %v3608_v26 }
0x176e   :  { %v3639_v37 = vunpack.c.l.b16 %v3623_v29 }
0x1773   :  { %v3610_v33 = vpop.f32.mrf.mxu1 }
0x1774   :  { %v3624_v34 = vpack.c.bf16 %v3610_v33, %v3610_v33 }
0x1776   :  { %v3640_v39 = vunpack.c.l.b16 %v3624_v34 }
0x1778   :  { %v3641_v41 = vpack.c.b16 %v3640_v39, %v3639_v37 }
0x177a   :  { %4953 = vmatmul.msk.bf16.vlgmr.msra.gmra.mxu2 %vm27_vm0, %v3641_v41 }
0x177b   :  { %v3613_v42 = vpop.f32.mrf.mxu1 }
0x177c   :  { %v3625_v19 = vpack.c.bf16 %v3613_v42, %v3613_v42 }
0x177e   :  { %v3695_v43 = vunpack.c.l.b16 %v3625_v19 }
0x1783   :  { %v3615_v40 = vpop.f32.mrf.mxu1 }
0x1784   :  { %v3626_v44 = vpack.c.bf16 %v3615_v40, %v3615_v40 }
0x1786   :  { %v3696_v45 = vunpack.c.l.b16 %v3626_v44 }
0x1788   :  { %v3697_v48 = vpack.c.b16 %v3696_v45, %v3695_v43 }
0x178a   :  { %4978 = vmatmul.msk.bf16.vlgmr.msrb.gmra.mxu0 %vm27_vm0, %v3697_v48 }
0x178b   :  { %v3618_v49 = vpop.f32.mrf.mxu1 }
0x178c   :  { %v3627_v50 = vpack.c.bf16 %v3618_v49, %v3618_v49 }
0x178e   :  { %v3751_v57 = vunpack.c.l.b16 %v3627_v50 }
0x1793   :  { %v3620_v53 = vpop.f32.mrf.mxu1 }
0x1794   :  { %v3628_v54 = vpack.c.bf16 %v3620_v53, %v3620_v53 }
0x1796   :  { %v3752_v21 = vunpack.c.l.b16 %v3628_v54 }
0x1798   :  { %v3753_v58 = vpack.c.b16 %v3752_v21, %v3751_v57 }
0x179a   :  { %5003 = vmatmul.msk.bf16.vlgmr.msrb.gmra.mxu2 %vm27_vm0, %v3753_v58 }
0x17fd   :  { %v3678_v55 = vpop.f32.mrf.mxu2 }
0x17fe   :  { %v3683_v62 = vadd.f32 %v4859_v59, %v3678_v55 }
0x1805   :  { %v3680_v52 = vpop.f32.mrf.mxu2 }
0x1806   :  { %v3684_v63 = vadd.f32 %v4861_v7, %v3680_v52 }
0x1807   :  { %v3734_v60 = vpop.f32.mrf.mxu0 }
0x1808   :  { %v3739_v5 = vadd.f32 %v3734_v60, %v3683_v62 }
0x180f   :  { %v3736_v27 = vpop.f32.mrf.mxu0 }
0x1810   :  { %v3740_v1 = vadd.f32 %v3736_v27, %v3684_v63 }
0x181d   :  { %v3790_v6 = vpop.f32.mrf.mxu2 }
0x181e   :  { %v3795_v56 = vadd.f32 %v3790_v6, %v3739_v5 }
0x1820   :  { %5294 = vtanh.f32 %v3795_v56 }
0x1825   :  { %v3792_v8 = vpop.f32.mrf.mxu2 }
0x1826   :  { %v5295_v9 = vpop.eup %5294  ;;  %v3796_v11 = vadd.f32 %v3792_v8, %v3740_v1 }
0x1827   :  { %v3799_v13 = vmul.f32 %v5295_v9, %v6394_v15 }
0x1828   :  { %5296 = vtanh.f32 %v3796_v11 }
0x1829   :  { %v3805_v4 = vadd.f32 %v3803_v14, %v3799_v13 }
0x182b   :  { %5004 = vst.msk [vmem:[%s6473_s5 + $0x70] sm:$0xff] %vm27_vm0, %v3805_v4 }
0x182c   :  { %3810 = vst.msk [vmem:[#allocation2] sm:$0xff] %vm27_vm0, %v3805_v4 }
0x182e   :  { %v5297_v12 = vpop.eup %5296 }
0x182f   :  { %v3800_v16 = vmul.f32 %v5297_v12, %v6396_v18 }
0x1831   :  { %v3806_v20 = vadd.f32 %v3804_v17, %v3800_v16 }
0x1833   :  { %5005 = vst.msk [vmem:[%s6473_s5 + $0x78] sm:$0xff] %vm27_vm0, %v3806_v20 }
0x1834   :  { %3811 = vst.msk [vmem:[#allocation2 + $0x8] sm:$0xff] %vm27_vm0, %v3806_v20 }

</bundles_post_ra>
